<compile_context>
chip_gen: v6e
topology: v6e:2x2x1
jax: 0.10.0
libtpu: 0.0.40
codegen_flags: <defaults>
</compile_context>

<pallas_src>
import functools

import jax
import jax.numpy as jnp
from jax.experimental import pallas as pl
from jax.experimental.pallas import tpu as pltpu


def _round_up(x, m):
    return (x + m - 1) // m * m


def _conv_tile(x_refs, w_ref, *, rate, H, W):
    """27-tap dilated conv for one output depth slice.

    x_refs: 3 refs (one per depth tap), each a (Hp, Wp, Cinp) bf16 view.
    w_ref:  (27, Cinp, Coutp) bf16 weight ref (resident in VMEM).
    Returns an (H*W, Coutp) float32 accumulator.
    """
    acc = None
    for a in range(3):
        # Upcast the whole halo slab once; all slicing / the (H,W,C)->(H*W,C)
        # reshape then happen on f32 values with (8,128)-aligned tiles, which
        # keeps the reshape a layout no-op.
        xa = x_refs[a][...].astype(jnp.float32)            # (Hp, Wp, Cinp)
        for b in range(3):
            for c in range(3):
                patch = xa[b * rate:b * rate + H, c * rate:c * rate + W, :]
                lhs = patch.reshape(H * W, patch.shape[-1]).astype(jnp.bfloat16)
                rhs = w_ref[a * 9 + b * 3 + c]              # (Cinp, Coutp) bf16
                t = jnp.dot(lhs, rhs, preferred_element_type=jnp.float32)
                acc = t if acc is None else acc + t
    return acc


def _stats_kernel(x0_ref, x1_ref, x2_ref, w_ref, b_ref, stat_ref, *, rate, H, W):
    """Pass 1: conv + bias, accumulate per-channel sum and sum-of-squares."""
    acc = _conv_tile((x0_ref, x1_ref, x2_ref), w_ref, rate=rate, H=H, W=W)
    acc = acc + b_ref[...]                                  # (H*W, Coutp) f32

    s = jnp.sum(acc, axis=0, keepdims=True)                 # (1, Coutp)
    sq = jnp.sum(acc * acc, axis=0, keepdims=True)          # (1, Coutp)

    @pl.when(pl.program_id(1) == 0)
    def _():
        stat_ref[...] = jnp.zeros_like(stat_ref)

    stat_ref[...] = stat_ref[...] + jnp.concatenate([s, sq], axis=0)


def _norm_kernel(x0_ref, x1_ref, x2_ref, w_ref, scale_ref, shift_ref, o_ref,
                 *, rate, H, W):
    """Pass 2: recompute conv tile, apply fused bias + GroupNorm scale/shift."""
    acc = _conv_tile((x0_ref, x1_ref, x2_ref), w_ref, rate=rate, H=H, W=W)
    y = acc * scale_ref[...] + shift_ref[...]               # (H*W, Coutp)
    o_ref[...] = y.astype(o_ref.dtype)


def aspp_module_forward(x_ncdhw, weight_dhwio, bias, gn_gamma, gn_beta, *,
                        rate, num_groups=32, eps=1e-5):
    """ASPP_module forward. x is NCDHW, weight is (kd,kh,kw,Cin,Cout)."""
    N, Cin, D, H, W = x_ncdhw.shape
    Cout = weight_dhwio.shape[-1]
    assert Cout % num_groups == 0
    gs = Cout // num_groups

    Cinp = _round_up(max(Cin, 1), 128)      # lane-aligned contraction dim
    Coutp = _round_up(Cout, 128)            # lane-dense output stores
    Dp, Hp, Wp = D + 2, H + 2 * rate, W + 2 * rate

    # ---- HBM-side glue: NCDHW -> NDHWC, pad, cast bf16 ----
    x = jnp.transpose(x_ncdhw, (0, 2, 3, 4, 1))
    xp = jnp.pad(x, ((0, 0), (1, 1), (rate, rate), (rate, rate),
                     (0, Cinp - Cin))).astype(jnp.bfloat16)

    w = jnp.pad(weight_dhwio,
                ((0, 0), (0, 0), (0, 0), (0, Cinp - Cin), (0, Coutp - Cout)))
    w = w.reshape(27, Cinp, Coutp).astype(jnp.bfloat16)
    bpad = jnp.pad(bias, (0, Coutp - Cout)).reshape(1, Coutp).astype(jnp.float32)

    # Three halo BlockSpecs (depth taps a = 0,1,2); block size 1 along padded
    # depth so the index map can address overlapping element offsets d + a.
    def _tap_spec(a):
        return pl.BlockSpec((None, None, Hp, Wp, Cinp),
                            lambda n, d, _a=a: (n, d + _a, 0, 0, 0))

    x_tap_specs = [_tap_spec(a) for a in range(3)]
    w_spec = pl.BlockSpec((27, Cinp, Coutp), lambda n, d: (0, 0, 0))
    bias_spec = pl.BlockSpec((1, Coutp), lambda n, d: (0, 0))
    per_n_vec_spec = pl.BlockSpec((None, 1, Coutp), lambda n, d: (n, 0, 0))

    flops = 2 * N * D * H * W * 27 * Cinp * Coutp
    x_bytes = 3 * N * D * Hp * Wp * Cinp * 2        # three halo reads, bf16
    w_bytes = 27 * Cinp * Coutp * 2

    cparams = dict(vmem_limit_bytes=48 * 1024 * 1024)

    # ---- pass 1: per-(sample, channel) sum / sum-of-squares ----
    stats = pl.pallas_call(
        functools.partial(_stats_kernel, rate=rate, H=H, W=W),
        out_shape=jax.ShapeDtypeStruct((N, 2, Coutp), jnp.float32),
        grid_spec=pltpu.PrefetchScalarGridSpec(
            num_scalar_prefetch=0,
            grid=(N, D),
            in_specs=x_tap_specs + [w_spec, bias_spec],
            out_specs=pl.BlockSpec((None, 2, Coutp), lambda n, d: (n, 0, 0)),
        ),
        compiler_params=pltpu.CompilerParams(
            dimension_semantics=("parallel", "arbitrary"), **cparams),
        cost_estimate=pl.CostEstimate(
            flops=flops, transcendentals=0,
            bytes_accessed=x_bytes + w_bytes + N * 2 * Coutp * 4),
    )(xp, xp, xp, w, bpad)

    # ---- tiny per-(sample, group) GroupNorm statistics in plain JAX ----
    cnt = float(D * H * W * gs)
    ch_sum = stats[:, 0, :Cout]                              # (N, Cout)
    ch_sq = stats[:, 1, :Cout]
    mean_g = ch_sum.reshape(N, num_groups, gs).sum(-1) / cnt
    ex2_g = ch_sq.reshape(N, num_groups, gs).sum(-1) / cnt
    var_g = jnp.maximum(ex2_g - mean_g * mean_g, 0.0)        # clamp before rsqrt
    inv_g = jax.lax.rsqrt(var_g + eps)
    mean_c = jnp.repeat(mean_g, gs, axis=1)                  # (N, Cout)
    inv_c = jnp.repeat(inv_g, gs, axis=1)
    scale_c = inv_c * gn_gamma[None, :]
    shift_c = (bias[None, :] - mean_c) * scale_c + gn_beta[None, :]
    scale = jnp.pad(scale_c, ((0, 0), (0, Coutp - Cout))) \
        .reshape(N, 1, Coutp).astype(jnp.float32)
    shift = jnp.pad(shift_c, ((0, 0), (0, Coutp - Cout))) \
        .reshape(N, 1, Coutp).astype(jnp.float32)

    # ---- pass 2: recompute conv, normalize, write lane-dense output ----
    out = pl.pallas_call(
        functools.partial(_norm_kernel, rate=rate, H=H, W=W),
        out_shape=jax.ShapeDtypeStruct((N, D, H * W, Coutp), jnp.float32),
        grid_spec=pltpu.PrefetchScalarGridSpec(
            num_scalar_prefetch=0,
            grid=(N, D),
            in_specs=x_tap_specs + [w_spec, per_n_vec_spec, per_n_vec_spec],
            out_specs=pl.BlockSpec((None, None, H * W, Coutp),
                                   lambda n, d: (n, d, 0, 0)),
        ),
        compiler_params=pltpu.CompilerParams(
            dimension_semantics=("parallel", "parallel"), **cparams),
        cost_estimate=pl.CostEstimate(
            flops=flops, transcendentals=0,
            bytes_accessed=x_bytes + w_bytes + N * D * H * W * Coutp * 4),
    )(xp, xp, xp, w, scale, shift)

    out = out[:, :, :, :Cout].reshape(N, D, H, W, Cout)
    return jnp.transpose(out, (0, 4, 1, 2, 3))               # back to NCDHW


def _reference(x_ncdhw, weight_dhwio, bias, gn_gamma, gn_beta, *,
               rate, num_groups=32, eps=1e-5):
    """Pure-JAX reference (conv_general_dilated + manual GroupNorm), f32."""
    x = jnp.transpose(x_ncdhw, (0, 2, 3, 4, 1)).astype(jnp.float32)
    out = jax.lax.conv_general_dilated(
        x, weight_dhwio.astype(jnp.float32),
        window_strides=(1, 1, 1),
        padding=((1, 1), (rate, rate), (rate, rate)),
        rhs_dilation=(1, rate, rate),
        dimension_numbers=('NDHWC', 'DHWIO', 'NDHWC'),
        precision=jax.lax.Precision.HIGHEST)
    out = out + bias
    N, D, H, W, C = out.shape
    gs = C // num_groups
    og = out.reshape(N, D, H, W, num_groups, gs)
    mean = og.mean(axis=(1, 2, 3, 5), keepdims=True)
    var = og.var(axis=(1, 2, 3, 5), keepdims=True)
    og = (og - mean) / jnp.sqrt(var + eps)
    out = og.reshape(N, D, H, W, C) * gn_gamma + gn_beta
    return jnp.transpose(out, (0, 4, 1, 2, 3))


if __name__ == "__main__":
    # ASPP_module(inplanes=4, planes=32, rate=2); planes=32 so GroupNorm(32, planes) is valid.
    N, Cin, Cout, D, H, W, rate = 2, 4, 32, 4, 8, 8, 2

    key = jax.random.PRNGKey(0)
    k_w, k_b, k_x = jax.random.split(key, 3)

    # Conv3d weight: kaiming_normal_ -> std = sqrt(2 / fan_in), fan_in = Cin*27.
    fan_in = Cin * 27
    w_std = (2.0 / fan_in) ** 0.5
    weight = w_std * jax.random.normal(k_w, (3, 3, 3, Cin, Cout), jnp.float32)
    # Conv3d bias: PyTorch default uniform(-1/sqrt(fan_in), 1/sqrt(fan_in)).
    bound = 1.0 / (fan_in ** 0.5)
    bias = jax.random.uniform(k_b, (Cout,), jnp.float32, -bound, bound)
    # GroupNorm affine params (PyTorch defaults): weight=1, bias=0.
    gn_gamma = jnp.ones((Cout,), jnp.float32)
    gn_beta = jnp.zeros((Cout,), jnp.float32)

    x = jax.random.normal(k_x, (N, Cin, D, H, W), jnp.float32)

    fwd = jax.jit(functools.partial(aspp_module_forward, rate=rate))
    out = jax.block_until_ready(fwd(x, weight, bias, gn_gamma, gn_beta))

    ref = jax.block_until_ready(
        _reference(x, weight, bias, gn_gamma, gn_beta, rate=rate))

    assert out.shape == (N, Cout, D, H, W), out.shape
    max_err = float(jnp.max(jnp.abs(out - ref)))
    # bf16 MXU inputs vs an f32 HIGHEST-precision reference -> ~1e-3..1e-2 error.
    assert jnp.allclose(out, ref, atol=2e-2, rtol=2e-2), max_err

    print("KERNEL_OK")
</pallas_src>

<mosaic_0001>
module attributes {stable_mosaic.version = 11 : i64} {
  func.func @_stats_kernel(%arg0: i32, %arg1: i32, %arg2: memref<1x1x12x12x128xbf16, #tpu.memory_space<vmem>>, %arg3: memref<1x1x12x12x128xbf16, #tpu.memory_space<vmem>>, %arg4: memref<1x1x12x12x128xbf16, #tpu.memory_space<vmem>>, %arg5: memref<27x128x128xbf16, #tpu.memory_space<vmem>>, %arg6: memref<1x128xf32, #tpu.memory_space<vmem>>, %arg7: memref<1x2x128xf32, #tpu.memory_space<vmem>>) attributes {dimension_semantics = [#tpu.dimension_semantics<parallel>, #tpu.dimension_semantics<arbitrary>], iteration_bounds = array<i64: 2, 4>, scalar_prefetch = 0 : i64, scratch_operands = 0 : i64, tpu.core_type = #tpu.core_type<tc>, window_params = [{transform_indices = @transform_0, window_bounds = array<i64: 1, 1, 12, 12, 128>}, {transform_indices = @transform_1, window_bounds = array<i64: 1, 1, 12, 12, 128>}, {transform_indices = @transform_2, window_bounds = array<i64: 1, 1, 12, 12, 128>}, {pipeline_mode = #tpu.pipeline_mode<synchronous>, transform_indices = @transform_3, window_bounds = array<i64: 27, 128, 128>}, {pipeline_mode = #tpu.pipeline_mode<synchronous>, transform_indices = @transform_4, window_bounds = array<i64: 1, 128>}, {transform_indices = @transform_5, window_bounds = array<i64: 1, 2, 128>}]} {
    %c0 = arith.constant 0 : index
    %c0_0 = arith.constant 0 : index
    %c0_1 = arith.constant 0 : index
    %c0_2 = arith.constant 0 : index
    %c0_3 = arith.constant 0 : index
    %0 = vector.load %arg2[%c0, %c0_0, %c0_1, %c0_2, %c0_3] : memref<1x1x12x12x128xbf16, #tpu.memory_space<vmem>>, vector<1x1x12x12x128xbf16>
    %1 = vector.shape_cast %0 : vector<1x1x12x12x128xbf16> to vector<12x12x128xbf16>
    %2 = arith.extf %1 : vector<12x12x128xbf16> to vector<12x12x128xf32>
    %3 = vector.extract_strided_slice %2 {offsets = [0, 0, 0], sizes = [8, 8, 128], strides = [1, 1, 1]} : vector<12x12x128xf32> to vector<8x8x128xf32>
    %4 = vector.shape_cast %3 : vector<8x8x128xf32> to vector<64x128xf32>
    %5 = arith.truncf %4 : vector<64x128xf32> to vector<64x128xbf16>
    %c0_4 = arith.constant 0 : index
    %c0_5 = arith.constant 0 : index
    %c0_6 = arith.constant 0 : index
    %6 = vector.load %arg5[%c0_4, %c0_5, %c0_6] : memref<27x128x128xbf16, #tpu.memory_space<vmem>>, vector<1x128x128xbf16>
    %7 = vector.shape_cast %6 : vector<1x128x128xbf16> to vector<128x128xbf16>
    %cst = arith.constant dense<0.000000e+00> : vector<64x128xf32>
    %8 = tpu.matmul %5, %7, %cst {dimension_numbers = #tpu.dot_dimension_numbers<[1], [0], [0], [1], [0, 0, 1, 1], [], []>} : vector<64x128xbf16>, vector<128x128xbf16>, vector<64x128xf32> -> vector<64x128xf32>
    %9 = vector.extract_strided_slice %2 {offsets = [0, 2, 0], sizes = [8, 8, 128], strides = [1, 1, 1]} : vector<12x12x128xf32> to vector<8x8x128xf32>
    %10 = vector.shape_cast %9 : vector<8x8x128xf32> to vector<64x128xf32>
    %11 = arith.truncf %10 : vector<64x128xf32> to vector<64x128xbf16>
    %c1 = arith.constant 1 : index
    %c0_7 = arith.constant 0 : index
    %c0_8 = arith.constant 0 : index
    %12 = vector.load %arg5[%c1, %c0_7, %c0_8] : memref<27x128x128xbf16, #tpu.memory_space<vmem>>, vector<1x128x128xbf16>
    %13 = vector.shape_cast %12 : vector<1x128x128xbf16> to vector<128x128xbf16>
    %cst_9 = arith.constant dense<0.000000e+00> : vector<64x128xf32>
    %14 = tpu.matmul %11, %13, %cst_9 {dimension_numbers = #tpu.dot_dimension_numbers<[1], [0], [0], [1], [0, 0, 1, 1], [], []>} : vector<64x128xbf16>, vector<128x128xbf16>, vector<64x128xf32> -> vector<64x128xf32>
    %15 = arith.addf %8, %14 : vector<64x128xf32>
    %16 = vector.extract_strided_slice %2 {offsets = [0, 4, 0], sizes = [8, 8, 128], strides = [1, 1, 1]} : vector<12x12x128xf32> to vector<8x8x128xf32>
    %17 = vector.shape_cast %16 : vector<8x8x128xf32> to vector<64x128xf32>
    %18 = arith.truncf %17 : vector<64x128xf32> to vector<64x128xbf16>
    %c2 = arith.constant 2 : index
    %c0_10 = arith.constant 0 : index
    %c0_11 = arith.constant 0 : index
    %19 = vector.load %arg5[%c2, %c0_10, %c0_11] : memref<27x128x128xbf16, #tpu.memory_space<vmem>>, vector<1x128x128xbf16>
    %20 = vector.shape_cast %19 : vector<1x128x128xbf16> to vector<128x128xbf16>
    %cst_12 = arith.constant dense<0.000000e+00> : vector<64x128xf32>
    %21 = tpu.matmul %18, %20, %cst_12 {dimension_numbers = #tpu.dot_dimension_numbers<[1], [0], [0], [1], [0, 0, 1, 1], [], []>} : vector<64x128xbf16>, vector<128x128xbf16>, vector<64x128xf32> -> vector<64x128xf32>
    %22 = arith.addf %15, %21 : vector<64x128xf32>
    %23 = vector.extract_strided_slice %2 {offsets = [2, 0, 0], sizes = [8, 8, 128], strides = [1, 1, 1]} : vector<12x12x128xf32> to vector<8x8x128xf32>
    %24 = vector.shape_cast %23 : vector<8x8x128xf32> to vector<64x128xf32>
    %25 = arith.truncf %24 : vector<64x128xf32> to vector<64x128xbf16>
    %c3 = arith.constant 3 : index
    %c0_13 = arith.constant 0 : index
    %c0_14 = arith.constant 0 : index
    %26 = vector.load %arg5[%c3, %c0_13, %c0_14] : memref<27x128x128xbf16, #tpu.memory_space<vmem>>, vector<1x128x128xbf16>
    %27 = vector.shape_cast %26 : vector<1x128x128xbf16> to vector<128x128xbf16>
    %cst_15 = arith.constant dense<0.000000e+00> : vector<64x128xf32>
    %28 = tpu.matmul %25, %27, %cst_15 {dimension_numbers = #tpu.dot_dimension_numbers<[1], [0], [0], [1], [0, 0, 1, 1], [], []>} : vector<64x128xbf16>, vector<128x128xbf16>, vector<64x128xf32> -> vector<64x128xf32>
    %29 = arith.addf %22, %28 : vector<64x128xf32>
    %30 = vector.extract_strided_slice %2 {offsets = [2, 2, 0], sizes = [8, 8, 128], strides = [1, 1, 1]} : vector<12x12x128xf32> to vector<8x8x128xf32>
    %31 = vector.shape_cast %30 : vector<8x8x128xf32> to vector<64x128xf32>
    %32 = arith.truncf %31 : vector<64x128xf32> to vector<64x128xbf16>
    %c4 = arith.constant 4 : index
    %c0_16 = arith.constant 0 : index
    %c0_17 = arith.constant 0 : index
    %33 = vector.load %arg5[%c4, %c0_16, %c0_17] : memref<27x128x128xbf16, #tpu.memory_space<vmem>>, vector<1x128x128xbf16>
    %34 = vector.shape_cast %33 : vector<1x128x128xbf16> to vector<128x128xbf16>
    %cst_18 = arith.constant dense<0.000000e+00> : vector<64x128xf32>
    %35 = tpu.matmul %32, %34, %cst_18 {dimension_numbers = #tpu.dot_dimension_numbers<[1], [0], [0], [1], [0, 0, 1, 1], [], []>} : vector<64x128xbf16>, vector<128x128xbf16>, vector<64x128xf32> -> vector<64x128xf32>
    %36 = arith.addf %29, %35 : vector<64x128xf32>
    %37 = vector.extract_strided_slice %2 {offsets = [2, 4, 0], sizes = [8, 8, 128], strides = [1, 1, 1]} : vector<12x12x128xf32> to vector<8x8x128xf32>
    %38 = vector.shape_cast %37 : vector<8x8x128xf32> to vector<64x128xf32>
    %39 = arith.truncf %38 : vector<64x128xf32> to vector<64x128xbf16>
    %c5 = arith.constant 5 : index
    %c0_19 = arith.constant 0 : index
    %c0_20 = arith.constant 0 : index
    %40 = vector.load %arg5[%c5, %c0_19, %c0_20] : memref<27x128x128xbf16, #tpu.memory_space<vmem>>, vector<1x128x128xbf16>
    %41 = vector.shape_cast %40 : vector<1x128x128xbf16> to vector<128x128xbf16>
    %cst_21 = arith.constant dense<0.000000e+00> : vector<64x128xf32>
    %42 = tpu.matmul %39, %41, %cst_21 {dimension_numbers = #tpu.dot_dimension_numbers<[1], [0], [0], [1], [0, 0, 1, 1], [], []>} : vector<64x128xbf16>, vector<128x128xbf16>, vector<64x128xf32> -> vector<64x128xf32>
    %43 = arith.addf %36, %42 : vector<64x128xf32>
    %44 = vector.extract_strided_slice %2 {offsets = [4, 0, 0], sizes = [8, 8, 128], strides = [1, 1, 1]} : vector<12x12x128xf32> to vector<8x8x128xf32>
    %45 = vector.shape_cast %44 : vector<8x8x128xf32> to vector<64x128xf32>
    %46 = arith.truncf %45 : vector<64x128xf32> to vector<64x128xbf16>
    %c6 = arith.constant 6 : index
    %c0_22 = arith.constant 0 : index
    %c0_23 = arith.constant 0 : index
    %47 = vector.load %arg5[%c6, %c0_22, %c0_23] : memref<27x128x128xbf16, #tpu.memory_space<vmem>>, vector<1x128x128xbf16>
    %48 = vector.shape_cast %47 : vector<1x128x128xbf16> to vector<128x128xbf16>
    %cst_24 = arith.constant dense<0.000000e+00> : vector<64x128xf32>
    %49 = tpu.matmul %46, %48, %cst_24 {dimension_numbers = #tpu.dot_dimension_numbers<[1], [0], [0], [1], [0, 0, 1, 1], [], []>} : vector<64x128xbf16>, vector<128x128xbf16>, vector<64x128xf32> -> vector<64x128xf32>
    %50 = arith.addf %43, %49 : vector<64x128xf32>
    %51 = vector.extract_strided_slice %2 {offsets = [4, 2, 0], sizes = [8, 8, 128], strides = [1, 1, 1]} : vector<12x12x128xf32> to vector<8x8x128xf32>
    %52 = vector.shape_cast %51 : vector<8x8x128xf32> to vector<64x128xf32>
    %53 = arith.truncf %52 : vector<64x128xf32> to vector<64x128xbf16>
    %c7 = arith.constant 7 : index
    %c0_25 = arith.constant 0 : index
    %c0_26 = arith.constant 0 : index
    %54 = vector.load %arg5[%c7, %c0_25, %c0_26] : memref<27x128x128xbf16, #tpu.memory_space<vmem>>, vector<1x128x128xbf16>
    %55 = vector.shape_cast %54 : vector<1x128x128xbf16> to vector<128x128xbf16>
    %cst_27 = arith.constant dense<0.000000e+00> : vector<64x128xf32>
    %56 = tpu.matmul %53, %55, %cst_27 {dimension_numbers = #tpu.dot_dimension_numbers<[1], [0], [0], [1], [0, 0, 1, 1], [], []>} : vector<64x128xbf16>, vector<128x128xbf16>, vector<64x128xf32> -> vector<64x128xf32>
    %57 = arith.addf %50, %56 : vector<64x128xf32>
    %58 = vector.extract_strided_slice %2 {offsets = [4, 4, 0], sizes = [8, 8, 128], strides = [1, 1, 1]} : vector<12x12x128xf32> to vector<8x8x128xf32>
    %59 = vector.shape_cast %58 : vector<8x8x128xf32> to vector<64x128xf32>
    %60 = arith.truncf %59 : vector<64x128xf32> to vector<64x128xbf16>
    %c8 = arith.constant 8 : index
    %c0_28 = arith.constant 0 : index
    %c0_29 = arith.constant 0 : index
    %61 = vector.load %arg5[%c8, %c0_28, %c0_29] : memref<27x128x128xbf16, #tpu.memory_space<vmem>>, vector<1x128x128xbf16>
    %62 = vector.shape_cast %61 : vector<1x128x128xbf16> to vector<128x128xbf16>
    %cst_30 = arith.constant dense<0.000000e+00> : vector<64x128xf32>
    %63 = tpu.matmul %60, %62, %cst_30 {dimension_numbers = #tpu.dot_dimension_numbers<[1], [0], [0], [1], [0, 0, 1, 1], [], []>} : vector<64x128xbf16>, vector<128x128xbf16>, vector<64x128xf32> -> vector<64x128xf32>
    %64 = arith.addf %57, %63 : vector<64x128xf32>
    %c0_31 = arith.constant 0 : index
    %c0_32 = arith.constant 0 : index
    %c0_33 = arith.constant 0 : index
    %c0_34 = arith.constant 0 : index
    %c0_35 = arith.constant 0 : index
    %65 = vector.load %arg3[%c0_31, %c0_32, %c0_33, %c0_34, %c0_35] : memref<1x1x12x12x128xbf16, #tpu.memory_space<vmem>>, vector<1x1x12x12x128xbf16>
    %66 = vector.shape_cast %65 : vector<1x1x12x12x128xbf16> to vector<12x12x128xbf16>
    %67 = arith.extf %66 : vector<12x12x128xbf16> to vector<12x12x128xf32>
    %68 = vector.extract_strided_slice %67 {offsets = [0, 0, 0], sizes = [8, 8, 128], strides = [1, 1, 1]} : vector<12x12x128xf32> to vector<8x8x128xf32>
    %69 = vector.shape_cast %68 : vector<8x8x128xf32> to vector<64x128xf32>
    %70 = arith.truncf %69 : vector<64x128xf32> to vector<64x128xbf16>
    %c9 = arith.constant 9 : index
    %c0_36 = arith.constant 0 : index
    %c0_37 = arith.constant 0 : index
    %71 = vector.load %arg5[%c9, %c0_36, %c0_37] : memref<27x128x128xbf16, #tpu.memory_space<vmem>>, vector<1x128x128xbf16>
    %72 = vector.shape_cast %71 : vector<1x128x128xbf16> to vector<128x128xbf16>
    %cst_38 = arith.constant dense<0.000000e+00> : vector<64x128xf32>
    %73 = tpu.matmul %70, %72, %cst_38 {dimension_numbers = #tpu.dot_dimension_numbers<[1], [0], [0], [1], [0, 0, 1, 1], [], []>} : vector<64x128xbf16>, vector<128x128xbf16>, vector<64x128xf32> -> vector<64x128xf32>
    %74 = arith.addf %64, %73 : vector<64x128xf32>
    %75 = vector.extract_strided_slice %67 {offsets = [0, 2, 0], sizes = [8, 8, 128], strides = [1, 1, 1]} : vector<12x12x128xf32> to vector<8x8x128xf32>
    %76 = vector.shape_cast %75 : vector<8x8x128xf32> to vector<64x128xf32>
    %77 = arith.truncf %76 : vector<64x128xf32> to vector<64x128xbf16>
    %c10 = arith.constant 10 : index
    %c0_39 = arith.constant 0 : index
    %c0_40 = arith.constant 0 : index
    %78 = vector.load %arg5[%c10, %c0_39, %c0_40] : memref<27x128x128xbf16, #tpu.memory_space<vmem>>, vector<1x128x128xbf16>
    %79 = vector.shape_cast %78 : vector<1x128x128xbf16> to vector<128x128xbf16>
    %cst_41 = arith.constant dense<0.000000e+00> : vector<64x128xf32>
    %80 = tpu.matmul %77, %79, %cst_41 {dimension_numbers = #tpu.dot_dimension_numbers<[1], [0], [0], [1], [0, 0, 1, 1], [], []>} : vector<64x128xbf16>, vector<128x128xbf16>, vector<64x128xf32> -> vector<64x128xf32>
    %81 = arith.addf %74, %80 : vector<64x128xf32>
    %82 = vector.extract_strided_slice %67 {offsets = [0, 4, 0], sizes = [8, 8, 128], strides = [1, 1, 1]} : vector<12x12x128xf32> to vector<8x8x128xf32>
    %83 = vector.shape_cast %82 : vector<8x8x128xf32> to vector<64x128xf32>
    %84 = arith.truncf %83 : vector<64x128xf32> to vector<64x128xbf16>
    %c11 = arith.constant 11 : index
    %c0_42 = arith.constant 0 : index
    %c0_43 = arith.constant 0 : index
    %85 = vector.load %arg5[%c11, %c0_42, %c0_43] : memref<27x128x128xbf16, #tpu.memory_space<vmem>>, vector<1x128x128xbf16>
    %86 = vector.shape_cast %85 : vector<1x128x128xbf16> to vector<128x128xbf16>
    %cst_44 = arith.constant dense<0.000000e+00> : vector<64x128xf32>
    %87 = tpu.matmul %84, %86, %cst_44 {dimension_numbers = #tpu.dot_dimension_numbers<[1], [0], [0], [1], [0, 0, 1, 1], [], []>} : vector<64x128xbf16>, vector<128x128xbf16>, vector<64x128xf32> -> vector<64x128xf32>
    %88 = arith.addf %81, %87 : vector<64x128xf32>
    %89 = vector.extract_strided_slice %67 {offsets = [2, 0, 0], sizes = [8, 8, 128], strides = [1, 1, 1]} : vector<12x12x128xf32> to vector<8x8x128xf32>
    %90 = vector.shape_cast %89 : vector<8x8x128xf32> to vector<64x128xf32>
    %91 = arith.truncf %90 : vector<64x128xf32> to vector<64x128xbf16>
    %c12 = arith.constant 12 : index
    %c0_45 = arith.constant 0 : index
    %c0_46 = arith.constant 0 : index
    %92 = vector.load %arg5[%c12, %c0_45, %c0_46] : memref<27x128x128xbf16, #tpu.memory_space<vmem>>, vector<1x128x128xbf16>
    %93 = vector.shape_cast %92 : vector<1x128x128xbf16> to vector<128x128xbf16>
    %cst_47 = arith.constant dense<0.000000e+00> : vector<64x128xf32>
    %94 = tpu.matmul %91, %93, %cst_47 {dimension_numbers = #tpu.dot_dimension_numbers<[1], [0], [0], [1], [0, 0, 1, 1], [], []>} : vector<64x128xbf16>, vector<128x128xbf16>, vector<64x128xf32> -> vector<64x128xf32>
    %95 = arith.addf %88, %94 : vector<64x128xf32>
    %96 = vector.extract_strided_slice %67 {offsets = [2, 2, 0], sizes = [8, 8, 128], strides = [1, 1, 1]} : vector<12x12x128xf32> to vector<8x8x128xf32>
    %97 = vector.shape_cast %96 : vector<8x8x128xf32> to vector<64x128xf32>
    %98 = arith.truncf %97 : vector<64x128xf32> to vector<64x128xbf16>
    %c13 = arith.constant 13 : index
    %c0_48 = arith.constant 0 : index
    %c0_49 = arith.constant 0 : index
    %99 = vector.load %arg5[%c13, %c0_48, %c0_49] : memref<27x128x128xbf16, #tpu.memory_space<vmem>>, vector<1x128x128xbf16>
    %100 = vector.shape_cast %99 : vector<1x128x128xbf16> to vector<128x128xbf16>
    %cst_50 = arith.constant dense<0.000000e+00> : vector<64x128xf32>
    %101 = tpu.matmul %98, %100, %cst_50 {dimension_numbers = #tpu.dot_dimension_numbers<[1], [0], [0], [1], [0, 0, 1, 1], [], []>} : vector<64x128xbf16>, vector<128x128xbf16>, vector<64x128xf32> -> vector<64x128xf32>
    %102 = arith.addf %95, %101 : vector<64x128xf32>
    %103 = vector.extract_strided_slice %67 {offsets = [2, 4, 0], sizes = [8, 8, 128], strides = [1, 1, 1]} : vector<12x12x128xf32> to vector<8x8x128xf32>
    %104 = vector.shape_cast %103 : vector<8x8x128xf32> to vector<64x128xf32>
    %105 = arith.truncf %104 : vector<64x128xf32> to vector<64x128xbf16>
    %c14 = arith.constant 14 : index
    %c0_51 = arith.constant 0 : index
    %c0_52 = arith.constant 0 : index
    %106 = vector.load %arg5[%c14, %c0_51, %c0_52] : memref<27x128x128xbf16, #tpu.memory_space<vmem>>, vector<1x128x128xbf16>
    %107 = vector.shape_cast %106 : vector<1x128x128xbf16> to vector<128x128xbf16>
    %cst_53 = arith.constant dense<0.000000e+00> : vector<64x128xf32>
    %108 = tpu.matmul %105, %107, %cst_53 {dimension_numbers = #tpu.dot_dimension_numbers<[1], [0], [0], [1], [0, 0, 1, 1], [], []>} : vector<64x128xbf16>, vector<128x128xbf16>, vector<64x128xf32> -> vector<64x128xf32>
    %109 = arith.addf %102, %108 : vector<64x128xf32>
    %110 = vector.extract_strided_slice %67 {offsets = [4, 0, 0], sizes = [8, 8, 128], strides = [1, 1, 1]} : vector<12x12x128xf32> to vector<8x8x128xf32>
    %111 = vector.shape_cast %110 : vector<8x8x128xf32> to vector<64x128xf32>
    %112 = arith.truncf %111 : vector<64x128xf32> to vector<64x128xbf16>
    %c15 = arith.constant 15 : index
    %c0_54 = arith.constant 0 : index
    %c0_55 = arith.constant 0 : index
    %113 = vector.load %arg5[%c15, %c0_54, %c0_55] : memref<27x128x128xbf16, #tpu.memory_space<vmem>>, vector<1x128x128xbf16>
    %114 = vector.shape_cast %113 : vector<1x128x128xbf16> to vector<128x128xbf16>
    %cst_56 = arith.constant dense<0.000000e+00> : vector<64x128xf32>
    %115 = tpu.matmul %112, %114, %cst_56 {dimension_numbers = #tpu.dot_dimension_numbers<[1], [0], [0], [1], [0, 0, 1, 1], [], []>} : vector<64x128xbf16>, vector<128x128xbf16>, vector<64x128xf32> -> vector<64x128xf32>
    %116 = arith.addf %109, %115 : vector<64x128xf32>
    %117 = vector.extract_strided_slice %67 {offsets = [4, 2, 0], sizes = [8, 8, 128], strides = [1, 1, 1]} : vector<12x12x128xf32> to vector<8x8x128xf32>
    %118 = vector.shape_cast %117 : vector<8x8x128xf32> to vector<64x128xf32>
    %119 = arith.truncf %118 : vector<64x128xf32> to vector<64x128xbf16>
    %c16 = arith.constant 16 : index
    %c0_57 = arith.constant 0 : index
    %c0_58 = arith.constant 0 : index
    %120 = vector.load %arg5[%c16, %c0_57, %c0_58] : memref<27x128x128xbf16, #tpu.memory_space<vmem>>, vector<1x128x128xbf16>
    %121 = vector.shape_cast %120 : vector<1x128x128xbf16> to vector<128x128xbf16>
    %cst_59 = arith.constant dense<0.000000e+00> : vector<64x128xf32>
    %122 = tpu.matmul %119, %121, %cst_59 {dimension_numbers = #tpu.dot_dimension_numbers<[1], [0], [0], [1], [0, 0, 1, 1], [], []>} : vector<64x128xbf16>, vector<128x128xbf16>, vector<64x128xf32> -> vector<64x128xf32>
    %123 = arith.addf %116, %122 : vector<64x128xf32>
    %124 = vector.extract_strided_slice %67 {offsets = [4, 4, 0], sizes = [8, 8, 128], strides = [1, 1, 1]} : vector<12x12x128xf32> to vector<8x8x128xf32>
    %125 = vector.shape_cast %124 : vector<8x8x128xf32> to vector<64x128xf32>
    %126 = arith.truncf %125 : vector<64x128xf32> to vector<64x128xbf16>
    %c17 = arith.constant 17 : index
    %c0_60 = arith.constant 0 : index
    %c0_61 = arith.constant 0 : index
    %127 = vector.load %arg5[%c17, %c0_60, %c0_61] : memref<27x128x128xbf16, #tpu.memory_space<vmem>>, vector<1x128x128xbf16>
    %128 = vector.shape_cast %127 : vector<1x128x128xbf16> to vector<128x128xbf16>
    %cst_62 = arith.constant dense<0.000000e+00> : vector<64x128xf32>
    %129 = tpu.matmul %126, %128, %cst_62 {dimension_numbers = #tpu.dot_dimension_numbers<[1], [0], [0], [1], [0, 0, 1, 1], [], []>} : vector<64x128xbf16>, vector<128x128xbf16>, vector<64x128xf32> -> vector<64x128xf32>
    %130 = arith.addf %123, %129 : vector<64x128xf32>
    %c0_63 = arith.constant 0 : index
    %c0_64 = arith.constant 0 : index
    %c0_65 = arith.constant 0 : index
    %c0_66 = arith.constant 0 : index
    %c0_67 = arith.constant 0 : index
    %131 = vector.load %arg4[%c0_63, %c0_64, %c0_65, %c0_66, %c0_67] : memref<1x1x12x12x128xbf16, #tpu.memory_space<vmem>>, vector<1x1x12x12x128xbf16>
    %132 = vector.shape_cast %131 : vector<1x1x12x12x128xbf16> to vector<12x12x128xbf16>
    %133 = arith.extf %132 : vector<12x12x128xbf16> to vector<12x12x128xf32>
    %134 = vector.extract_strided_slice %133 {offsets = [0, 0, 0], sizes = [8, 8, 128], strides = [1, 1, 1]} : vector<12x12x128xf32> to vector<8x8x128xf32>
    %135 = vector.shape_cast %134 : vector<8x8x128xf32> to vector<64x128xf32>
    %136 = arith.truncf %135 : vector<64x128xf32> to vector<64x128xbf16>
    %c18 = arith.constant 18 : index
    %c0_68 = arith.constant 0 : index
    %c0_69 = arith.constant 0 : index
    %137 = vector.load %arg5[%c18, %c0_68, %c0_69] : memref<27x128x128xbf16, #tpu.memory_space<vmem>>, vector<1x128x128xbf16>
    %138 = vector.shape_cast %137 : vector<1x128x128xbf16> to vector<128x128xbf16>
    %cst_70 = arith.constant dense<0.000000e+00> : vector<64x128xf32>
    %139 = tpu.matmul %136, %138, %cst_70 {dimension_numbers = #tpu.dot_dimension_numbers<[1], [0], [0], [1], [0, 0, 1, 1], [], []>} : vector<64x128xbf16>, vector<128x128xbf16>, vector<64x128xf32> -> vector<64x128xf32>
    %140 = arith.addf %130, %139 : vector<64x128xf32>
    %141 = vector.extract_strided_slice %133 {offsets = [0, 2, 0], sizes = [8, 8, 128], strides = [1, 1, 1]} : vector<12x12x128xf32> to vector<8x8x128xf32>
    %142 = vector.shape_cast %141 : vector<8x8x128xf32> to vector<64x128xf32>
    %143 = arith.truncf %142 : vector<64x128xf32> to vector<64x128xbf16>
    %c19 = arith.constant 19 : index
    %c0_71 = arith.constant 0 : index
    %c0_72 = arith.constant 0 : index
    %144 = vector.load %arg5[%c19, %c0_71, %c0_72] : memref<27x128x128xbf16, #tpu.memory_space<vmem>>, vector<1x128x128xbf16>
    %145 = vector.shape_cast %144 : vector<1x128x128xbf16> to vector<128x128xbf16>
    %cst_73 = arith.constant dense<0.000000e+00> : vector<64x128xf32>
    %146 = tpu.matmul %143, %145, %cst_73 {dimension_numbers = #tpu.dot_dimension_numbers<[1], [0], [0], [1], [0, 0, 1, 1], [], []>} : vector<64x128xbf16>, vector<128x128xbf16>, vector<64x128xf32> -> vector<64x128xf32>
    %147 = arith.addf %140, %146 : vector<64x128xf32>
    %148 = vector.extract_strided_slice %133 {offsets = [0, 4, 0], sizes = [8, 8, 128], strides = [1, 1, 1]} : vector<12x12x128xf32> to vector<8x8x128xf32>
    %149 = vector.shape_cast %148 : vector<8x8x128xf32> to vector<64x128xf32>
    %150 = arith.truncf %149 : vector<64x128xf32> to vector<64x128xbf16>
    %c20 = arith.constant 20 : index
    %c0_74 = arith.constant 0 : index
    %c0_75 = arith.constant 0 : index
    %151 = vector.load %arg5[%c20, %c0_74, %c0_75] : memref<27x128x128xbf16, #tpu.memory_space<vmem>>, vector<1x128x128xbf16>
    %152 = vector.shape_cast %151 : vector<1x128x128xbf16> to vector<128x128xbf16>
    %cst_76 = arith.constant dense<0.000000e+00> : vector<64x128xf32>
    %153 = tpu.matmul %150, %152, %cst_76 {dimension_numbers = #tpu.dot_dimension_numbers<[1], [0], [0], [1], [0, 0, 1, 1], [], []>} : vector<64x128xbf16>, vector<128x128xbf16>, vector<64x128xf32> -> vector<64x128xf32>
    %154 = arith.addf %147, %153 : vector<64x128xf32>
    %155 = vector.extract_strided_slice %133 {offsets = [2, 0, 0], sizes = [8, 8, 128], strides = [1, 1, 1]} : vector<12x12x128xf32> to vector<8x8x128xf32>
    %156 = vector.shape_cast %155 : vector<8x8x128xf32> to vector<64x128xf32>
    %157 = arith.truncf %156 : vector<64x128xf32> to vector<64x128xbf16>
    %c21 = arith.constant 21 : index
    %c0_77 = arith.constant 0 : index
    %c0_78 = arith.constant 0 : index
    %158 = vector.load %arg5[%c21, %c0_77, %c0_78] : memref<27x128x128xbf16, #tpu.memory_space<vmem>>, vector<1x128x128xbf16>
    %159 = vector.shape_cast %158 : vector<1x128x128xbf16> to vector<128x128xbf16>
    %cst_79 = arith.constant dense<0.000000e+00> : vector<64x128xf32>
    %160 = tpu.matmul %157, %159, %cst_79 {dimension_numbers = #tpu.dot_dimension_numbers<[1], [0], [0], [1], [0, 0, 1, 1], [], []>} : vector<64x128xbf16>, vector<128x128xbf16>, vector<64x128xf32> -> vector<64x128xf32>
    %161 = arith.addf %154, %160 : vector<64x128xf32>
    %162 = vector.extract_strided_slice %133 {offsets = [2, 2, 0], sizes = [8, 8, 128], strides = [1, 1, 1]} : vector<12x12x128xf32> to vector<8x8x128xf32>
    %163 = vector.shape_cast %162 : vector<8x8x128xf32> to vector<64x128xf32>
    %164 = arith.truncf %163 : vector<64x128xf32> to vector<64x128xbf16>
    %c22 = arith.constant 22 : index
    %c0_80 = arith.constant 0 : index
    %c0_81 = arith.constant 0 : index
    %165 = vector.load %arg5[%c22, %c0_80, %c0_81] : memref<27x128x128xbf16, #tpu.memory_space<vmem>>, vector<1x128x128xbf16>
    %166 = vector.shape_cast %165 : vector<1x128x128xbf16> to vector<128x128xbf16>
    %cst_82 = arith.constant dense<0.000000e+00> : vector<64x128xf32>
    %167 = tpu.matmul %164, %166, %cst_82 {dimension_numbers = #tpu.dot_dimension_numbers<[1], [0], [0], [1], [0, 0, 1, 1], [], []>} : vector<64x128xbf16>, vector<128x128xbf16>, vector<64x128xf32> -> vector<64x128xf32>
    %168 = arith.addf %161, %167 : vector<64x128xf32>
    %169 = vector.extract_strided_slice %133 {offsets = [2, 4, 0], sizes = [8, 8, 128], strides = [1, 1, 1]} : vector<12x12x128xf32> to vector<8x8x128xf32>
    %170 = vector.shape_cast %169 : vector<8x8x128xf32> to vector<64x128xf32>
    %171 = arith.truncf %170 : vector<64x128xf32> to vector<64x128xbf16>
    %c23 = arith.constant 23 : index
    %c0_83 = arith.constant 0 : index
    %c0_84 = arith.constant 0 : index
    %172 = vector.load %arg5[%c23, %c0_83, %c0_84] : memref<27x128x128xbf16, #tpu.memory_space<vmem>>, vector<1x128x128xbf16>
    %173 = vector.shape_cast %172 : vector<1x128x128xbf16> to vector<128x128xbf16>
    %cst_85 = arith.constant dense<0.000000e+00> : vector<64x128xf32>
    %174 = tpu.matmul %171, %173, %cst_85 {dimension_numbers = #tpu.dot_dimension_numbers<[1], [0], [0], [1], [0, 0, 1, 1], [], []>} : vector<64x128xbf16>, vector<128x128xbf16>, vector<64x128xf32> -> vector<64x128xf32>
    %175 = arith.addf %168, %174 : vector<64x128xf32>
    %176 = vector.extract_strided_slice %133 {offsets = [4, 0, 0], sizes = [8, 8, 128], strides = [1, 1, 1]} : vector<12x12x128xf32> to vector<8x8x128xf32>
    %177 = vector.shape_cast %176 : vector<8x8x128xf32> to vector<64x128xf32>
    %178 = arith.truncf %177 : vector<64x128xf32> to vector<64x128xbf16>
    %c24 = arith.constant 24 : index
    %c0_86 = arith.constant 0 : index
    %c0_87 = arith.constant 0 : index
    %179 = vector.load %arg5[%c24, %c0_86, %c0_87] : memref<27x128x128xbf16, #tpu.memory_space<vmem>>, vector<1x128x128xbf16>
    %180 = vector.shape_cast %179 : vector<1x128x128xbf16> to vector<128x128xbf16>
    %cst_88 = arith.constant dense<0.000000e+00> : vector<64x128xf32>
    %181 = tpu.matmul %178, %180, %cst_88 {dimension_numbers = #tpu.dot_dimension_numbers<[1], [0], [0], [1], [0, 0, 1, 1], [], []>} : vector<64x128xbf16>, vector<128x128xbf16>, vector<64x128xf32> -> vector<64x128xf32>
    %182 = arith.addf %175, %181 : vector<64x128xf32>
    %183 = vector.extract_strided_slice %133 {offsets = [4, 2, 0], sizes = [8, 8, 128], strides = [1, 1, 1]} : vector<12x12x128xf32> to vector<8x8x128xf32>
    %184 = vector.shape_cast %183 : vector<8x8x128xf32> to vector<64x128xf32>
    %185 = arith.truncf %184 : vector<64x128xf32> to vector<64x128xbf16>
    %c25 = arith.constant 25 : index
    %c0_89 = arith.constant 0 : index
    %c0_90 = arith.constant 0 : index
    %186 = vector.load %arg5[%c25, %c0_89, %c0_90] : memref<27x128x128xbf16, #tpu.memory_space<vmem>>, vector<1x128x128xbf16>
    %187 = vector.shape_cast %186 : vector<1x128x128xbf16> to vector<128x128xbf16>
    %cst_91 = arith.constant dense<0.000000e+00> : vector<64x128xf32>
    %188 = tpu.matmul %185, %187, %cst_91 {dimension_numbers = #tpu.dot_dimension_numbers<[1], [0], [0], [1], [0, 0, 1, 1], [], []>} : vector<64x128xbf16>, vector<128x128xbf16>, vector<64x128xf32> -> vector<64x128xf32>
    %189 = arith.addf %182, %188 : vector<64x128xf32>
    %190 = vector.extract_strided_slice %133 {offsets = [4, 4, 0], sizes = [8, 8, 128], strides = [1, 1, 1]} : vector<12x12x128xf32> to vector<8x8x128xf32>
    %191 = vector.shape_cast %190 : vector<8x8x128xf32> to vector<64x128xf32>
    %192 = arith.truncf %191 : vector<64x128xf32> to vector<64x128xbf16>
    %c26 = arith.constant 26 : index
    %c0_92 = arith.constant 0 : index
    %c0_93 = arith.constant 0 : index
    %193 = vector.load %arg5[%c26, %c0_92, %c0_93] : memref<27x128x128xbf16, #tpu.memory_space<vmem>>, vector<1x128x128xbf16>
    %194 = vector.shape_cast %193 : vector<1x128x128xbf16> to vector<128x128xbf16>
    %cst_94 = arith.constant dense<0.000000e+00> : vector<64x128xf32>
    %195 = tpu.matmul %192, %194, %cst_94 {dimension_numbers = #tpu.dot_dimension_numbers<[1], [0], [0], [1], [0, 0, 1, 1], [], []>} : vector<64x128xbf16>, vector<128x128xbf16>, vector<64x128xf32> -> vector<64x128xf32>
    %196 = arith.addf %189, %195 : vector<64x128xf32>
    %c0_95 = arith.constant 0 : index
    %c0_96 = arith.constant 0 : index
    %197 = vector.load %arg6[%c0_95, %c0_96] : memref<1x128xf32, #tpu.memory_space<vmem>>, vector<1x128xf32>
    %198 = vector.broadcast %197 : vector<1x128xf32> to vector<64x128xf32>
    %199 = arith.addf %196, %198 : vector<64x128xf32>
    %cst_97 = arith.constant dense<0.000000e+00> : vector<128xf32>
    %200 = vector.multi_reduction <add>, %199, %cst_97 [0] : vector<64x128xf32> to vector<128xf32>
    %201 = vector.shape_cast %200 : vector<128xf32> to vector<1x128xf32>
    %202 = arith.mulf %199, %199 : vector<64x128xf32>
    %cst_98 = arith.constant dense<0.000000e+00> : vector<128xf32>
    %203 = vector.multi_reduction <add>, %202, %cst_98 [0] : vector<64x128xf32> to vector<128xf32>
    %204 = vector.shape_cast %203 : vector<128xf32> to vector<1x128xf32>
    %c0_i32 = arith.constant 0 : i32
    %205 = arith.cmpi eq, %arg1, %c0_i32 : i32
    %206 = arith.extui %205 : i1 to i32
    %c0_i32_99 = arith.constant 0 : i32
    %207 = arith.cmpi ne, %206, %c0_i32_99 : i32
    scf.if %207 {
      %cst_106 = arith.constant 0.000000e+00 : f32
      %215 = vector.broadcast %cst_106 : f32 to vector<2x128xf32>
      %c0_107 = arith.constant 0 : index
      %c0_108 = arith.constant 0 : index
      %c0_109 = arith.constant 0 : index
      %216 = vector.load %arg7[%c0_107, %c0_108, %c0_109] : memref<1x2x128xf32, #tpu.memory_space<vmem>>, vector<1x2x128xf32>
      %217 = vector.shape_cast %216 : vector<1x2x128xf32> to vector<2x128xf32>
      %218 = vector.shape_cast %215 : vector<2x128xf32> to vector<1x2x128xf32>
      tpu.vector_store %arg7[%c0_107, %c0_108, %c0_109], %218 {strides = array<i32>} : memref<1x2x128xf32, #tpu.memory_space<vmem>>, vector<1x2x128xf32>,
    } else {
    }
    %c0_100 = arith.constant 0 : index
    %c0_101 = arith.constant 0 : index
    %c0_102 = arith.constant 0 : index
    %208 = vector.load %arg7[%c0_100, %c0_101, %c0_102] : memref<1x2x128xf32, #tpu.memory_space<vmem>>, vector<1x2x128xf32>
    %209 = vector.shape_cast %208 : vector<1x2x128xf32> to vector<2x128xf32>
    %210 = tpu.concatenate %201, %204 in 0 : vector<1x128xf32>, vector<1x128xf32> -> vector<2x128xf32>
    %211 = arith.addf %209, %210 : vector<2x128xf32>
    %c0_103 = arith.constant 0 : index
    %c0_104 = arith.constant 0 : index
    %c0_105 = arith.constant 0 : index
    %212 = vector.load %arg7[%c0_103, %c0_104, %c0_105] : memref<1x2x128xf32, #tpu.memory_space<vmem>>, vector<1x2x128xf32>
    %213 = vector.shape_cast %212 : vector<1x2x128xf32> to vector<2x128xf32>
    %214 = vector.shape_cast %211 : vector<2x128xf32> to vector<1x2x128xf32>
    tpu.vector_store %arg7[%c0_103, %c0_104, %c0_105], %214 {strides = array<i32>} : memref<1x2x128xf32, #tpu.memory_space<vmem>>, vector<1x2x128xf32>,
    return
  }
  func.func @transform_0(%arg0: i32, %arg1: i32) -> (i32, i32, i32, i32, i32) {
    %c0_i32 = arith.constant 0 : i32
    %0 = arith.addi %arg1, %c0_i32 : i32
    %c0_i32_0 = arith.constant 0 : i32
    %c0_i32_1 = arith.constant 0 : i32
    %c0_i32_2 = arith.constant 0 : i32
    %c0_i32_3 = arith.constant 0 : i32
    return %arg0, %0, %c0_i32_0, %c0_i32_1, %c0_i32_2 : i32, i32, i32, i32, i32
  }
  func.func @transform_1(%arg0: i32, %arg1: i32) -> (i32, i32, i32, i32, i32) {
    %c1_i32 = arith.constant 1 : i32
    %0 = arith.addi %arg1, %c1_i32 : i32
    %c0_i32 = arith.constant 0 : i32
    %c0_i32_0 = arith.constant 0 : i32
    %c0_i32_1 = arith.constant 0 : i32
    %c0_i32_2 = arith.constant 0 : i32
    return %arg0, %0, %c0_i32, %c0_i32_0, %c0_i32_1 : i32, i32, i32, i32, i32
  }
  func.func @transform_2(%arg0: i32, %arg1: i32) -> (i32, i32, i32, i32, i32) {
    %c2_i32 = arith.constant 2 : i32
    %0 = arith.addi %arg1, %c2_i32 : i32
    %c0_i32 = arith.constant 0 : i32
    %c0_i32_0 = arith.constant 0 : i32
    %c0_i32_1 = arith.constant 0 : i32
    %c0_i32_2 = arith.constant 0 : i32
    return %arg0, %0, %c0_i32, %c0_i32_0, %c0_i32_1 : i32, i32, i32, i32, i32
  }
  func.func @transform_3(%arg0: i32, %arg1: i32) -> (i32, i32, i32) {
    %c0_i32 = arith.constant 0 : i32
    %c0_i32_0 = arith.constant 0 : i32
    %c0_i32_1 = arith.constant 0 : i32
    %c0_i32_2 = arith.constant 0 : i32
    return %c0_i32, %c0_i32_0, %c0_i32_1 : i32, i32, i32
  }
  func.func @transform_4(%arg0: i32, %arg1: i32) -> (i32, i32) {
    %c0_i32 = arith.constant 0 : i32
    %c0_i32_0 = arith.constant 0 : i32
    %c0_i32_1 = arith.constant 0 : i32
    return %c0_i32, %c0_i32_0 : i32, i32
  }
  func.func @transform_5(%arg0: i32, %arg1: i32) -> (i32, i32, i32) {
    %c0_i32 = arith.constant 0 : i32
    %c0_i32_0 = arith.constant 0 : i32
    %c0_i32_1 = arith.constant 0 : i32
    return %arg0, %c0_i32, %c0_i32_0 : i32, i32, i32
  }
}

module attributes {stable_mosaic.version = 11 : i64} {
  func.func @_norm_kernel(%arg0: i32, %arg1: i32, %arg2: memref<1x1x12x12x128xbf16, #tpu.memory_space<vmem>>, %arg3: memref<1x1x12x12x128xbf16, #tpu.memory_space<vmem>>, %arg4: memref<1x1x12x12x128xbf16, #tpu.memory_space<vmem>>, %arg5: memref<27x128x128xbf16, #tpu.memory_space<vmem>>, %arg6: memref<1x1x128xf32, #tpu.memory_space<vmem>>, %arg7: memref<1x1x128xf32, #tpu.memory_space<vmem>>, %arg8: memref<1x1x64x128xf32, #tpu.memory_space<vmem>>) attributes {dimension_semantics = [#tpu.dimension_semantics<parallel>, #tpu.dimension_semantics<parallel>], iteration_bounds = array<i64: 2, 4>, scalar_prefetch = 0 : i64, scratch_operands = 0 : i64, tpu.core_type = #tpu.core_type<tc>, window_params = [{transform_indices = @transform_0, window_bounds = array<i64: 1, 1, 12, 12, 128>}, {transform_indices = @transform_1, window_bounds = array<i64: 1, 1, 12, 12, 128>}, {transform_indices = @transform_2, window_bounds = array<i64: 1, 1, 12, 12, 128>}, {pipeline_mode = #tpu.pipeline_mode<synchronous>, transform_indices = @transform_3, window_bounds = array<i64: 27, 128, 128>}, {transform_indices = @transform_4, window_bounds = array<i64: 1, 1, 128>}, {transform_indices = @transform_5, window_bounds = array<i64: 1, 1, 128>}, {transform_indices = @transform_6, window_bounds = array<i64: 1, 1, 64, 128>}]} {
    %c0 = arith.constant 0 : index
    %c0_0 = arith.constant 0 : index
    %c0_1 = arith.constant 0 : index
    %c0_2 = arith.constant 0 : index
    %c0_3 = arith.constant 0 : index
    %0 = vector.load %arg2[%c0, %c0_0, %c0_1, %c0_2, %c0_3] : memref<1x1x12x12x128xbf16, #tpu.memory_space<vmem>>, vector<1x1x12x12x128xbf16>
    %1 = vector.shape_cast %0 : vector<1x1x12x12x128xbf16> to vector<12x12x128xbf16>
    %2 = arith.extf %1 : vector<12x12x128xbf16> to vector<12x12x128xf32>
    %3 = vector.extract_strided_slice %2 {offsets = [0, 0, 0], sizes = [8, 8, 128], strides = [1, 1, 1]} : vector<12x12x128xf32> to vector<8x8x128xf32>
    %4 = vector.shape_cast %3 : vector<8x8x128xf32> to vector<64x128xf32>
    %5 = arith.truncf %4 : vector<64x128xf32> to vector<64x128xbf16>
    %c0_4 = arith.constant 0 : index
    %c0_5 = arith.constant 0 : index
    %c0_6 = arith.constant 0 : index
    %6 = vector.load %arg5[%c0_4, %c0_5, %c0_6] : memref<27x128x128xbf16, #tpu.memory_space<vmem>>, vector<1x128x128xbf16>
    %7 = vector.shape_cast %6 : vector<1x128x128xbf16> to vector<128x128xbf16>
    %cst = arith.constant dense<0.000000e+00> : vector<64x128xf32>
    %8 = tpu.matmul %5, %7, %cst {dimension_numbers = #tpu.dot_dimension_numbers<[1], [0], [0], [1], [0, 0, 1, 1], [], []>} : vector<64x128xbf16>, vector<128x128xbf16>, vector<64x128xf32> -> vector<64x128xf32>
    %9 = vector.extract_strided_slice %2 {offsets = [0, 2, 0], sizes = [8, 8, 128], strides = [1, 1, 1]} : vector<12x12x128xf32> to vector<8x8x128xf32>
    %10 = vector.shape_cast %9 : vector<8x8x128xf32> to vector<64x128xf32>
    %11 = arith.truncf %10 : vector<64x128xf32> to vector<64x128xbf16>
    %c1 = arith.constant 1 : index
    %c0_7 = arith.constant 0 : index
    %c0_8 = arith.constant 0 : index
    %12 = vector.load %arg5[%c1, %c0_7, %c0_8] : memref<27x128x128xbf16, #tpu.memory_space<vmem>>, vector<1x128x128xbf16>
    %13 = vector.shape_cast %12 : vector<1x128x128xbf16> to vector<128x128xbf16>
    %cst_9 = arith.constant dense<0.000000e+00> : vector<64x128xf32>
    %14 = tpu.matmul %11, %13, %cst_9 {dimension_numbers = #tpu.dot_dimension_numbers<[1], [0], [0], [1], [0, 0, 1, 1], [], []>} : vector<64x128xbf16>, vector<128x128xbf16>, vector<64x128xf32> -> vector<64x128xf32>
    %15 = arith.addf %8, %14 : vector<64x128xf32>
    %16 = vector.extract_strided_slice %2 {offsets = [0, 4, 0], sizes = [8, 8, 128], strides = [1, 1, 1]} : vector<12x12x128xf32> to vector<8x8x128xf32>
    %17 = vector.shape_cast %16 : vector<8x8x128xf32> to vector<64x128xf32>
    %18 = arith.truncf %17 : vector<64x128xf32> to vector<64x128xbf16>
    %c2 = arith.constant 2 : index
    %c0_10 = arith.constant 0 : index
    %c0_11 = arith.constant 0 : index
    %19 = vector.load %arg5[%c2, %c0_10, %c0_11] : memref<27x128x128xbf16, #tpu.memory_space<vmem>>, vector<1x128x128xbf16>
    %20 = vector.shape_cast %19 : vector<1x128x128xbf16> to vector<128x128xbf16>
    %cst_12 = arith.constant dense<0.000000e+00> : vector<64x128xf32>
    %21 = tpu.matmul %18, %20, %cst_12 {dimension_numbers = #tpu.dot_dimension_numbers<[1], [0], [0], [1], [0, 0, 1, 1], [], []>} : vector<64x128xbf16>, vector<128x128xbf16>, vector<64x128xf32> -> vector<64x128xf32>
    %22 = arith.addf %15, %21 : vector<64x128xf32>
    %23 = vector.extract_strided_slice %2 {offsets = [2, 0, 0], sizes = [8, 8, 128], strides = [1, 1, 1]} : vector<12x12x128xf32> to vector<8x8x128xf32>
    %24 = vector.shape_cast %23 : vector<8x8x128xf32> to vector<64x128xf32>
    %25 = arith.truncf %24 : vector<64x128xf32> to vector<64x128xbf16>
    %c3 = arith.constant 3 : index
    %c0_13 = arith.constant 0 : index
    %c0_14 = arith.constant 0 : index
    %26 = vector.load %arg5[%c3, %c0_13, %c0_14] : memref<27x128x128xbf16, #tpu.memory_space<vmem>>, vector<1x128x128xbf16>
    %27 = vector.shape_cast %26 : vector<1x128x128xbf16> to vector<128x128xbf16>
    %cst_15 = arith.constant dense<0.000000e+00> : vector<64x128xf32>
    %28 = tpu.matmul %25, %27, %cst_15 {dimension_numbers = #tpu.dot_dimension_numbers<[1], [0], [0], [1], [0, 0, 1, 1], [], []>} : vector<64x128xbf16>, vector<128x128xbf16>, vector<64x128xf32> -> vector<64x128xf32>
    %29 = arith.addf %22, %28 : vector<64x128xf32>
    %30 = vector.extract_strided_slice %2 {offsets = [2, 2, 0], sizes = [8, 8, 128], strides = [1, 1, 1]} : vector<12x12x128xf32> to vector<8x8x128xf32>
    %31 = vector.shape_cast %30 : vector<8x8x128xf32> to vector<64x128xf32>
    %32 = arith.truncf %31 : vector<64x128xf32> to vector<64x128xbf16>
    %c4 = arith.constant 4 : index
    %c0_16 = arith.constant 0 : index
    %c0_17 = arith.constant 0 : index
    %33 = vector.load %arg5[%c4, %c0_16, %c0_17] : memref<27x128x128xbf16, #tpu.memory_space<vmem>>, vector<1x128x128xbf16>
    %34 = vector.shape_cast %33 : vector<1x128x128xbf16> to vector<128x128xbf16>
    %cst_18 = arith.constant dense<0.000000e+00> : vector<64x128xf32>
    %35 = tpu.matmul %32, %34, %cst_18 {dimension_numbers = #tpu.dot_dimension_numbers<[1], [0], [0], [1], [0, 0, 1, 1], [], []>} : vector<64x128xbf16>, vector<128x128xbf16>, vector<64x128xf32> -> vector<64x128xf32>
    %36 = arith.addf %29, %35 : vector<64x128xf32>
    %37 = vector.extract_strided_slice %2 {offsets = [2, 4, 0], sizes = [8, 8, 128], strides = [1, 1, 1]} : vector<12x12x128xf32> to vector<8x8x128xf32>
    %38 = vector.shape_cast %37 : vector<8x8x128xf32> to vector<64x128xf32>
    %39 = arith.truncf %38 : vector<64x128xf32> to vector<64x128xbf16>
    %c5 = arith.constant 5 : index
    %c0_19 = arith.constant 0 : index
    %c0_20 = arith.constant 0 : index
    %40 = vector.load %arg5[%c5, %c0_19, %c0_20] : memref<27x128x128xbf16, #tpu.memory_space<vmem>>, vector<1x128x128xbf16>
    %41 = vector.shape_cast %40 : vector<1x128x128xbf16> to vector<128x128xbf16>
    %cst_21 = arith.constant dense<0.000000e+00> : vector<64x128xf32>
    %42 = tpu.matmul %39, %41, %cst_21 {dimension_numbers = #tpu.dot_dimension_numbers<[1], [0], [0], [1], [0, 0, 1, 1], [], []>} : vector<64x128xbf16>, vector<128x128xbf16>, vector<64x128xf32> -> vector<64x128xf32>
    %43 = arith.addf %36, %42 : vector<64x128xf32>
    %44 = vector.extract_strided_slice %2 {offsets = [4, 0, 0], sizes = [8, 8, 128], strides = [1, 1, 1]} : vector<12x12x128xf32> to vector<8x8x128xf32>
    %45 = vector.shape_cast %44 : vector<8x8x128xf32> to vector<64x128xf32>
    %46 = arith.truncf %45 : vector<64x128xf32> to vector<64x128xbf16>
    %c6 = arith.constant 6 : index
    %c0_22 = arith.constant 0 : index
    %c0_23 = arith.constant 0 : index
    %47 = vector.load %arg5[%c6, %c0_22, %c0_23] : memref<27x128x128xbf16, #tpu.memory_space<vmem>>, vector<1x128x128xbf16>
    %48 = vector.shape_cast %47 : vector<1x128x128xbf16> to vector<128x128xbf16>
    %cst_24 = arith.constant dense<0.000000e+00> : vector<64x128xf32>
    %49 = tpu.matmul %46, %48, %cst_24 {dimension_numbers = #tpu.dot_dimension_numbers<[1], [0], [0], [1], [0, 0, 1, 1], [], []>} : vector<64x128xbf16>, vector<128x128xbf16>, vector<64x128xf32> -> vector<64x128xf32>
    %50 = arith.addf %43, %49 : vector<64x128xf32>
    %51 = vector.extract_strided_slice %2 {offsets = [4, 2, 0], sizes = [8, 8, 128], strides = [1, 1, 1]} : vector<12x12x128xf32> to vector<8x8x128xf32>
    %52 = vector.shape_cast %51 : vector<8x8x128xf32> to vector<64x128xf32>
    %53 = arith.truncf %52 : vector<64x128xf32> to vector<64x128xbf16>
    %c7 = arith.constant 7 : index
    %c0_25 = arith.constant 0 : index
    %c0_26 = arith.constant 0 : index
    %54 = vector.load %arg5[%c7, %c0_25, %c0_26] : memref<27x128x128xbf16, #tpu.memory_space<vmem>>, vector<1x128x128xbf16>
    %55 = vector.shape_cast %54 : vector<1x128x128xbf16> to vector<128x128xbf16>
    %cst_27 = arith.constant dense<0.000000e+00> : vector<64x128xf32>
    %56 = tpu.matmul %53, %55, %cst_27 {dimension_numbers = #tpu.dot_dimension_numbers<[1], [0], [0], [1], [0, 0, 1, 1], [], []>} : vector<64x128xbf16>, vector<128x128xbf16>, vector<64x128xf32> -> vector<64x128xf32>
    %57 = arith.addf %50, %56 : vector<64x128xf32>
    %58 = vector.extract_strided_slice %2 {offsets = [4, 4, 0], sizes = [8, 8, 128], strides = [1, 1, 1]} : vector<12x12x128xf32> to vector<8x8x128xf32>
    %59 = vector.shape_cast %58 : vector<8x8x128xf32> to vector<64x128xf32>
    %60 = arith.truncf %59 : vector<64x128xf32> to vector<64x128xbf16>
    %c8 = arith.constant 8 : index
    %c0_28 = arith.constant 0 : index
    %c0_29 = arith.constant 0 : index
    %61 = vector.load %arg5[%c8, %c0_28, %c0_29] : memref<27x128x128xbf16, #tpu.memory_space<vmem>>, vector<1x128x128xbf16>
    %62 = vector.shape_cast %61 : vector<1x128x128xbf16> to vector<128x128xbf16>
    %cst_30 = arith.constant dense<0.000000e+00> : vector<64x128xf32>
    %63 = tpu.matmul %60, %62, %cst_30 {dimension_numbers = #tpu.dot_dimension_numbers<[1], [0], [0], [1], [0, 0, 1, 1], [], []>} : vector<64x128xbf16>, vector<128x128xbf16>, vector<64x128xf32> -> vector<64x128xf32>
    %64 = arith.addf %57, %63 : vector<64x128xf32>
    %c0_31 = arith.constant 0 : index
    %c0_32 = arith.constant 0 : index
    %c0_33 = arith.constant 0 : index
    %c0_34 = arith.constant 0 : index
    %c0_35 = arith.constant 0 : index
    %65 = vector.load %arg3[%c0_31, %c0_32, %c0_33, %c0_34, %c0_35] : memref<1x1x12x12x128xbf16, #tpu.memory_space<vmem>>, vector<1x1x12x12x128xbf16>
    %66 = vector.shape_cast %65 : vector<1x1x12x12x128xbf16> to vector<12x12x128xbf16>
    %67 = arith.extf %66 : vector<12x12x128xbf16> to vector<12x12x128xf32>
    %68 = vector.extract_strided_slice %67 {offsets = [0, 0, 0], sizes = [8, 8, 128], strides = [1, 1, 1]} : vector<12x12x128xf32> to vector<8x8x128xf32>
    %69 = vector.shape_cast %68 : vector<8x8x128xf32> to vector<64x128xf32>
    %70 = arith.truncf %69 : vector<64x128xf32> to vector<64x128xbf16>
    %c9 = arith.constant 9 : index
    %c0_36 = arith.constant 0 : index
    %c0_37 = arith.constant 0 : index
    %71 = vector.load %arg5[%c9, %c0_36, %c0_37] : memref<27x128x128xbf16, #tpu.memory_space<vmem>>, vector<1x128x128xbf16>
    %72 = vector.shape_cast %71 : vector<1x128x128xbf16> to vector<128x128xbf16>
    %cst_38 = arith.constant dense<0.000000e+00> : vector<64x128xf32>
    %73 = tpu.matmul %70, %72, %cst_38 {dimension_numbers = #tpu.dot_dimension_numbers<[1], [0], [0], [1], [0, 0, 1, 1], [], []>} : vector<64x128xbf16>, vector<128x128xbf16>, vector<64x128xf32> -> vector<64x128xf32>
    %74 = arith.addf %64, %73 : vector<64x128xf32>
    %75 = vector.extract_strided_slice %67 {offsets = [0, 2, 0], sizes = [8, 8, 128], strides = [1, 1, 1]} : vector<12x12x128xf32> to vector<8x8x128xf32>
    %76 = vector.shape_cast %75 : vector<8x8x128xf32> to vector<64x128xf32>
    %77 = arith.truncf %76 : vector<64x128xf32> to vector<64x128xbf16>
    %c10 = arith.constant 10 : index
    %c0_39 = arith.constant 0 : index
    %c0_40 = arith.constant 0 : index
    %78 = vector.load %arg5[%c10, %c0_39, %c0_40] : memref<27x128x128xbf16, #tpu.memory_space<vmem>>, vector<1x128x128xbf16>
    %79 = vector.shape_cast %78 : vector<1x128x128xbf16> to vector<128x128xbf16>
    %cst_41 = arith.constant dense<0.000000e+00> : vector<64x128xf32>
    %80 = tpu.matmul %77, %79, %cst_41 {dimension_numbers = #tpu.dot_dimension_numbers<[1], [0], [0], [1], [0, 0, 1, 1], [], []>} : vector<64x128xbf16>, vector<128x128xbf16>, vector<64x128xf32> -> vector<64x128xf32>
    %81 = arith.addf %74, %80 : vector<64x128xf32>
    %82 = vector.extract_strided_slice %67 {offsets = [0, 4, 0], sizes = [8, 8, 128], strides = [1, 1, 1]} : vector<12x12x128xf32> to vector<8x8x128xf32>
    %83 = vector.shape_cast %82 : vector<8x8x128xf32> to vector<64x128xf32>
    %84 = arith.truncf %83 : vector<64x128xf32> to vector<64x128xbf16>
    %c11 = arith.constant 11 : index
    %c0_42 = arith.constant 0 : index
    %c0_43 = arith.constant 0 : index
    %85 = vector.load %arg5[%c11, %c0_42, %c0_43] : memref<27x128x128xbf16, #tpu.memory_space<vmem>>, vector<1x128x128xbf16>
    %86 = vector.shape_cast %85 : vector<1x128x128xbf16> to vector<128x128xbf16>
    %cst_44 = arith.constant dense<0.000000e+00> : vector<64x128xf32>
    %87 = tpu.matmul %84, %86, %cst_44 {dimension_numbers = #tpu.dot_dimension_numbers<[1], [0], [0], [1], [0, 0, 1, 1], [], []>} : vector<64x128xbf16>, vector<128x128xbf16>, vector<64x128xf32> -> vector<64x128xf32>
    %88 = arith.addf %81, %87 : vector<64x128xf32>
    %89 = vector.extract_strided_slice %67 {offsets = [2, 0, 0], sizes = [8, 8, 128], strides = [1, 1, 1]} : vector<12x12x128xf32> to vector<8x8x128xf32>
    %90 = vector.shape_cast %89 : vector<8x8x128xf32> to vector<64x128xf32>
    %91 = arith.truncf %90 : vector<64x128xf32> to vector<64x128xbf16>
    %c12 = arith.constant 12 : index
    %c0_45 = arith.constant 0 : index
    %c0_46 = arith.constant 0 : index
    %92 = vector.load %arg5[%c12, %c0_45, %c0_46] : memref<27x128x128xbf16, #tpu.memory_space<vmem>>, vector<1x128x128xbf16>
    %93 = vector.shape_cast %92 : vector<1x128x128xbf16> to vector<128x128xbf16>
    %cst_47 = arith.constant dense<0.000000e+00> : vector<64x128xf32>
    %94 = tpu.matmul %91, %93, %cst_47 {dimension_numbers = #tpu.dot_dimension_numbers<[1], [0], [0], [1], [0, 0, 1, 1], [], []>} : vector<64x128xbf16>, vector<128x128xbf16>, vector<64x128xf32> -> vector<64x128xf32>
    %95 = arith.addf %88, %94 : vector<64x128xf32>
    %96 = vector.extract_strided_slice %67 {offsets = [2, 2, 0], sizes = [8, 8, 128], strides = [1, 1, 1]} : vector<12x12x128xf32> to vector<8x8x128xf32>
    %97 = vector.shape_cast %96 : vector<8x8x128xf32> to vector<64x128xf32>
    %98 = arith.truncf %97 : vector<64x128xf32> to vector<64x128xbf16>
    %c13 = arith.constant 13 : index
    %c0_48 = arith.constant 0 : index
    %c0_49 = arith.constant 0 : index
    %99 = vector.load %arg5[%c13, %c0_48, %c0_49] : memref<27x128x128xbf16, #tpu.memory_space<vmem>>, vector<1x128x128xbf16>
    %100 = vector.shape_cast %99 : vector<1x128x128xbf16> to vector<128x128xbf16>
    %cst_50 = arith.constant dense<0.000000e+00> : vector<64x128xf32>
    %101 = tpu.matmul %98, %100, %cst_50 {dimension_numbers = #tpu.dot_dimension_numbers<[1], [0], [0], [1], [0, 0, 1, 1], [], []>} : vector<64x128xbf16>, vector<128x128xbf16>, vector<64x128xf32> -> vector<64x128xf32>
    %102 = arith.addf %95, %101 : vector<64x128xf32>
    %103 = vector.extract_strided_slice %67 {offsets = [2, 4, 0], sizes = [8, 8, 128], strides = [1, 1, 1]} : vector<12x12x128xf32> to vector<8x8x128xf32>
    %104 = vector.shape_cast %103 : vector<8x8x128xf32> to vector<64x128xf32>
    %105 = arith.truncf %104 : vector<64x128xf32> to vector<64x128xbf16>
    %c14 = arith.constant 14 : index
    %c0_51 = arith.constant 0 : index
    %c0_52 = arith.constant 0 : index
    %106 = vector.load %arg5[%c14, %c0_51, %c0_52] : memref<27x128x128xbf16, #tpu.memory_space<vmem>>, vector<1x128x128xbf16>
    %107 = vector.shape_cast %106 : vector<1x128x128xbf16> to vector<128x128xbf16>
    %cst_53 = arith.constant dense<0.000000e+00> : vector<64x128xf32>
    %108 = tpu.matmul %105, %107, %cst_53 {dimension_numbers = #tpu.dot_dimension_numbers<[1], [0], [0], [1], [0, 0, 1, 1], [], []>} : vector<64x128xbf16>, vector<128x128xbf16>, vector<64x128xf32> -> vector<64x128xf32>
    %109 = arith.addf %102, %108 : vector<64x128xf32>
    %110 = vector.extract_strided_slice %67 {offsets = [4, 0, 0], sizes = [8, 8, 128], strides = [1, 1, 1]} : vector<12x12x128xf32> to vector<8x8x128xf32>
    %111 = vector.shape_cast %110 : vector<8x8x128xf32> to vector<64x128xf32>
    %112 = arith.truncf %111 : vector<64x128xf32> to vector<64x128xbf16>
    %c15 = arith.constant 15 : index
    %c0_54 = arith.constant 0 : index
    %c0_55 = arith.constant 0 : index
    %113 = vector.load %arg5[%c15, %c0_54, %c0_55] : memref<27x128x128xbf16, #tpu.memory_space<vmem>>, vector<1x128x128xbf16>
    %114 = vector.shape_cast %113 : vector<1x128x128xbf16> to vector<128x128xbf16>
    %cst_56 = arith.constant dense<0.000000e+00> : vector<64x128xf32>
    %115 = tpu.matmul %112, %114, %cst_56 {dimension_numbers = #tpu.dot_dimension_numbers<[1], [0], [0], [1], [0, 0, 1, 1], [], []>} : vector<64x128xbf16>, vector<128x128xbf16>, vector<64x128xf32> -> vector<64x128xf32>
    %116 = arith.addf %109, %115 : vector<64x128xf32>
    %117 = vector.extract_strided_slice %67 {offsets = [4, 2, 0], sizes = [8, 8, 128], strides = [1, 1, 1]} : vector<12x12x128xf32> to vector<8x8x128xf32>
    %118 = vector.shape_cast %117 : vector<8x8x128xf32> to vector<64x128xf32>
    %119 = arith.truncf %118 : vector<64x128xf32> to vector<64x128xbf16>
    %c16 = arith.constant 16 : index
    %c0_57 = arith.constant 0 : index
    %c0_58 = arith.constant 0 : index
    %120 = vector.load %arg5[%c16, %c0_57, %c0_58] : memref<27x128x128xbf16, #tpu.memory_space<vmem>>, vector<1x128x128xbf16>
    %121 = vector.shape_cast %120 : vector<1x128x128xbf16> to vector<128x128xbf16>
    %cst_59 = arith.constant dense<0.000000e+00> : vector<64x128xf32>
    %122 = tpu.matmul %119, %121, %cst_59 {dimension_numbers = #tpu.dot_dimension_numbers<[1], [0], [0], [1], [0, 0, 1, 1], [], []>} : vector<64x128xbf16>, vector<128x128xbf16>, vector<64x128xf32> -> vector<64x128xf32>
    %123 = arith.addf %116, %122 : vector<64x128xf32>
    %124 = vector.extract_strided_slice %67 {offsets = [4, 4, 0], sizes = [8, 8, 128], strides = [1, 1, 1]} : vector<12x12x128xf32> to vector<8x8x128xf32>
    %125 = vector.shape_cast %124 : vector<8x8x128xf32> to vector<64x128xf32>
    %126 = arith.truncf %125 : vector<64x128xf32> to vector<64x128xbf16>
    %c17 = arith.constant 17 : index
    %c0_60 = arith.constant 0 : index
    %c0_61 = arith.constant 0 : index
    %127 = vector.load %arg5[%c17, %c0_60, %c0_61] : memref<27x128x128xbf16, #tpu.memory_space<vmem>>, vector<1x128x128xbf16>
    %128 = vector.shape_cast %127 : vector<1x128x128xbf16> to vector<128x128xbf16>
    %cst_62 = arith.constant dense<0.000000e+00> : vector<64x128xf32>
    %129 = tpu.matmul %126, %128, %cst_62 {dimension_numbers = #tpu.dot_dimension_numbers<[1], [0], [0], [1], [0, 0, 1, 1], [], []>} : vector<64x128xbf16>, vector<128x128xbf16>, vector<64x128xf32> -> vector<64x128xf32>
    %130 = arith.addf %123, %129 : vector<64x128xf32>
    %c0_63 = arith.constant 0 : index
    %c0_64 = arith.constant 0 : index
    %c0_65 = arith.constant 0 : index
    %c0_66 = arith.constant 0 : index
    %c0_67 = arith.constant 0 : index
    %131 = vector.load %arg4[%c0_63, %c0_64, %c0_65, %c0_66, %c0_67] : memref<1x1x12x12x128xbf16, #tpu.memory_space<vmem>>, vector<1x1x12x12x128xbf16>
    %132 = vector.shape_cast %131 : vector<1x1x12x12x128xbf16> to vector<12x12x128xbf16>
    %133 = arith.extf %132 : vector<12x12x128xbf16> to vector<12x12x128xf32>
    %134 = vector.extract_strided_slice %133 {offsets = [0, 0, 0], sizes = [8, 8, 128], strides = [1, 1, 1]} : vector<12x12x128xf32> to vector<8x8x128xf32>
    %135 = vector.shape_cast %134 : vector<8x8x128xf32> to vector<64x128xf32>
    %136 = arith.truncf %135 : vector<64x128xf32> to vector<64x128xbf16>
    %c18 = arith.constant 18 : index
    %c0_68 = arith.constant 0 : index
    %c0_69 = arith.constant 0 : index
    %137 = vector.load %arg5[%c18, %c0_68, %c0_69] : memref<27x128x128xbf16, #tpu.memory_space<vmem>>, vector<1x128x128xbf16>
    %138 = vector.shape_cast %137 : vector<1x128x128xbf16> to vector<128x128xbf16>
    %cst_70 = arith.constant dense<0.000000e+00> : vector<64x128xf32>
    %139 = tpu.matmul %136, %138, %cst_70 {dimension_numbers = #tpu.dot_dimension_numbers<[1], [0], [0], [1], [0, 0, 1, 1], [], []>} : vector<64x128xbf16>, vector<128x128xbf16>, vector<64x128xf32> -> vector<64x128xf32>
    %140 = arith.addf %130, %139 : vector<64x128xf32>
    %141 = vector.extract_strided_slice %133 {offsets = [0, 2, 0], sizes = [8, 8, 128], strides = [1, 1, 1]} : vector<12x12x128xf32> to vector<8x8x128xf32>
    %142 = vector.shape_cast %141 : vector<8x8x128xf32> to vector<64x128xf32>
    %143 = arith.truncf %142 : vector<64x128xf32> to vector<64x128xbf16>
    %c19 = arith.constant 19 : index
    %c0_71 = arith.constant 0 : index
    %c0_72 = arith.constant 0 : index
    %144 = vector.load %arg5[%c19, %c0_71, %c0_72] : memref<27x128x128xbf16, #tpu.memory_space<vmem>>, vector<1x128x128xbf16>
    %145 = vector.shape_cast %144 : vector<1x128x128xbf16> to vector<128x128xbf16>
    %cst_73 = arith.constant dense<0.000000e+00> : vector<64x128xf32>
    %146 = tpu.matmul %143, %145, %cst_73 {dimension_numbers = #tpu.dot_dimension_numbers<[1], [0], [0], [1], [0, 0, 1, 1], [], []>} : vector<64x128xbf16>, vector<128x128xbf16>, vector<64x128xf32> -> vector<64x128xf32>
    %147 = arith.addf %140, %146 : vector<64x128xf32>
    %148 = vector.extract_strided_slice %133 {offsets = [0, 4, 0], sizes = [8, 8, 128], strides = [1, 1, 1]} : vector<12x12x128xf32> to vector<8x8x128xf32>
    %149 = vector.shape_cast %148 : vector<8x8x128xf32> to vector<64x128xf32>
    %150 = arith.truncf %149 : vector<64x128xf32> to vector<64x128xbf16>
    %c20 = arith.constant 20 : index
    %c0_74 = arith.constant 0 : index
    %c0_75 = arith.constant 0 : index
    %151 = vector.load %arg5[%c20, %c0_74, %c0_75] : memref<27x128x128xbf16, #tpu.memory_space<vmem>>, vector<1x128x128xbf16>
    %152 = vector.shape_cast %151 : vector<1x128x128xbf16> to vector<128x128xbf16>
    %cst_76 = arith.constant dense<0.000000e+00> : vector<64x128xf32>
    %153 = tpu.matmul %150, %152, %cst_76 {dimension_numbers = #tpu.dot_dimension_numbers<[1], [0], [0], [1], [0, 0, 1, 1], [], []>} : vector<64x128xbf16>, vector<128x128xbf16>, vector<64x128xf32> -> vector<64x128xf32>
    %154 = arith.addf %147, %153 : vector<64x128xf32>
    %155 = vector.extract_strided_slice %133 {offsets = [2, 0, 0], sizes = [8, 8, 128], strides = [1, 1, 1]} : vector<12x12x128xf32> to vector<8x8x128xf32>
    %156 = vector.shape_cast %155 : vector<8x8x128xf32> to vector<64x128xf32>
    %157 = arith.truncf %156 : vector<64x128xf32> to vector<64x128xbf16>
    %c21 = arith.constant 21 : index
    %c0_77 = arith.constant 0 : index
    %c0_78 = arith.constant 0 : index
    %158 = vector.load %arg5[%c21, %c0_77, %c0_78] : memref<27x128x128xbf16, #tpu.memory_space<vmem>>, vector<1x128x128xbf16>
    %159 = vector.shape_cast %158 : vector<1x128x128xbf16> to vector<128x128xbf16>
    %cst_79 = arith.constant dense<0.000000e+00> : vector<64x128xf32>
    %160 = tpu.matmul %157, %159, %cst_79 {dimension_numbers = #tpu.dot_dimension_numbers<[1], [0], [0], [1], [0, 0, 1, 1], [], []>} : vector<64x128xbf16>, vector<128x128xbf16>, vector<64x128xf32> -> vector<64x128xf32>
    %161 = arith.addf %154, %160 : vector<64x128xf32>
    %162 = vector.extract_strided_slice %133 {offsets = [2, 2, 0], sizes = [8, 8, 128], strides = [1, 1, 1]} : vector<12x12x128xf32> to vector<8x8x128xf32>
    %163 = vector.shape_cast %162 : vector<8x8x128xf32> to vector<64x128xf32>
    %164 = arith.truncf %163 : vector<64x128xf32> to vector<64x128xbf16>
    %c22 = arith.constant 22 : index
    %c0_80 = arith.constant 0 : index
    %c0_81 = arith.constant 0 : index
    %165 = vector.load %arg5[%c22, %c0_80, %c0_81] : memref<27x128x128xbf16, #tpu.memory_space<vmem>>, vector<1x128x128xbf16>
    %166 = vector.shape_cast %165 : vector<1x128x128xbf16> to vector<128x128xbf16>
    %cst_82 = arith.constant dense<0.000000e+00> : vector<64x128xf32>
    %167 = tpu.matmul %164, %166, %cst_82 {dimension_numbers = #tpu.dot_dimension_numbers<[1], [0], [0], [1], [0, 0, 1, 1], [], []>} : vector<64x128xbf16>, vector<128x128xbf16>, vector<64x128xf32> -> vector<64x128xf32>
    %168 = arith.addf %161, %167 : vector<64x128xf32>
    %169 = vector.extract_strided_slice %133 {offsets = [2, 4, 0], sizes = [8, 8, 128], strides = [1, 1, 1]} : vector<12x12x128xf32> to vector<8x8x128xf32>
    %170 = vector.shape_cast %169 : vector<8x8x128xf32> to vector<64x128xf32>
    %171 = arith.truncf %170 : vector<64x128xf32> to vector<64x128xbf16>
    %c23 = arith.constant 23 : index
    %c0_83 = arith.constant 0 : index
    %c0_84 = arith.constant 0 : index
    %172 = vector.load %arg5[%c23, %c0_83, %c0_84] : memref<27x128x128xbf16, #tpu.memory_space<vmem>>, vector<1x128x128xbf16>
    %173 = vector.shape_cast %172 : vector<1x128x128xbf16> to vector<128x128xbf16>
    %cst_85 = arith.constant dense<0.000000e+00> : vector<64x128xf32>
    %174 = tpu.matmul %171, %173, %cst_85 {dimension_numbers = #tpu.dot_dimension_numbers<[1], [0], [0], [1], [0, 0, 1, 1], [], []>} : vector<64x128xbf16>, vector<128x128xbf16>, vector<64x128xf32> -> vector<64x128xf32>
    %175 = arith.addf %168, %174 : vector<64x128xf32>
    %176 = vector.extract_strided_slice %133 {offsets = [4, 0, 0], sizes = [8, 8, 128], strides = [1, 1, 1]} : vector<12x12x128xf32> to vector<8x8x128xf32>
    %177 = vector.shape_cast %176 : vector<8x8x128xf32> to vector<64x128xf32>
    %178 = arith.truncf %177 : vector<64x128xf32> to vector<64x128xbf16>
    %c24 = arith.constant 24 : index
    %c0_86 = arith.constant 0 : index
    %c0_87 = arith.constant 0 : index
    %179 = vector.load %arg5[%c24, %c0_86, %c0_87] : memref<27x128x128xbf16, #tpu.memory_space<vmem>>, vector<1x128x128xbf16>
    %180 = vector.shape_cast %179 : vector<1x128x128xbf16> to vector<128x128xbf16>
    %cst_88 = arith.constant dense<0.000000e+00> : vector<64x128xf32>
    %181 = tpu.matmul %178, %180, %cst_88 {dimension_numbers = #tpu.dot_dimension_numbers<[1], [0], [0], [1], [0, 0, 1, 1], [], []>} : vector<64x128xbf16>, vector<128x128xbf16>, vector<64x128xf32> -> vector<64x128xf32>
    %182 = arith.addf %175, %181 : vector<64x128xf32>
    %183 = vector.extract_strided_slice %133 {offsets = [4, 2, 0], sizes = [8, 8, 128], strides = [1, 1, 1]} : vector<12x12x128xf32> to vector<8x8x128xf32>
    %184 = vector.shape_cast %183 : vector<8x8x128xf32> to vector<64x128xf32>
    %185 = arith.truncf %184 : vector<64x128xf32> to vector<64x128xbf16>
    %c25 = arith.constant 25 : index
    %c0_89 = arith.constant 0 : index
    %c0_90 = arith.constant 0 : index
    %186 = vector.load %arg5[%c25, %c0_89, %c0_90] : memref<27x128x128xbf16, #tpu.memory_space<vmem>>, vector<1x128x128xbf16>
    %187 = vector.shape_cast %186 : vector<1x128x128xbf16> to vector<128x128xbf16>
    %cst_91 = arith.constant dense<0.000000e+00> : vector<64x128xf32>
    %188 = tpu.matmul %185, %187, %cst_91 {dimension_numbers = #tpu.dot_dimension_numbers<[1], [0], [0], [1], [0, 0, 1, 1], [], []>} : vector<64x128xbf16>, vector<128x128xbf16>, vector<64x128xf32> -> vector<64x128xf32>
    %189 = arith.addf %182, %188 : vector<64x128xf32>
    %190 = vector.extract_strided_slice %133 {offsets = [4, 4, 0], sizes = [8, 8, 128], strides = [1, 1, 1]} : vector<12x12x128xf32> to vector<8x8x128xf32>
    %191 = vector.shape_cast %190 : vector<8x8x128xf32> to vector<64x128xf32>
    %192 = arith.truncf %191 : vector<64x128xf32> to vector<64x128xbf16>
    %c26 = arith.constant 26 : index
    %c0_92 = arith.constant 0 : index
    %c0_93 = arith.constant 0 : index
    %193 = vector.load %arg5[%c26, %c0_92, %c0_93] : memref<27x128x128xbf16, #tpu.memory_space<vmem>>, vector<1x128x128xbf16>
    %194 = vector.shape_cast %193 : vector<1x128x128xbf16> to vector<128x128xbf16>
    %cst_94 = arith.constant dense<0.000000e+00> : vector<64x128xf32>
    %195 = tpu.matmul %192, %194, %cst_94 {dimension_numbers = #tpu.dot_dimension_numbers<[1], [0], [0], [1], [0, 0, 1, 1], [], []>} : vector<64x128xbf16>, vector<128x128xbf16>, vector<64x128xf32> -> vector<64x128xf32>
    %196 = arith.addf %189, %195 : vector<64x128xf32>
    %c0_95 = arith.constant 0 : index
    %c0_96 = arith.constant 0 : index
    %c0_97 = arith.constant 0 : index
    %197 = vector.load %arg6[%c0_95, %c0_96, %c0_97] : memref<1x1x128xf32, #tpu.memory_space<vmem>>, vector<1x1x128xf32>
    %198 = vector.shape_cast %197 : vector<1x1x128xf32> to vector<1x128xf32>
    %199 = vector.broadcast %198 : vector<1x128xf32> to vector<64x128xf32>
    %200 = arith.mulf %196, %199 : vector<64x128xf32>
    %c0_98 = arith.constant 0 : index
    %c0_99 = arith.constant 0 : index
    %c0_100 = arith.constant 0 : index
    %201 = vector.load %arg7[%c0_98, %c0_99, %c0_100] : memref<1x1x128xf32, #tpu.memory_space<vmem>>, vector<1x1x128xf32>
    %202 = vector.shape_cast %201 : vector<1x1x128xf32> to vector<1x128xf32>
    %203 = vector.broadcast %202 : vector<1x128xf32> to vector<64x128xf32>
    %204 = arith.addf %200, %203 : vector<64x128xf32>
    %c0_101 = arith.constant 0 : index
    %c0_102 = arith.constant 0 : index
    %c0_103 = arith.constant 0 : index
    %c0_104 = arith.constant 0 : index
    %205 = vector.load %arg8[%c0_101, %c0_102, %c0_103, %c0_104] : memref<1x1x64x128xf32, #tpu.memory_space<vmem>>, vector<1x1x64x128xf32>
    %206 = vector.shape_cast %205 : vector<1x1x64x128xf32> to vector<64x128xf32>
    %207 = vector.shape_cast %204 : vector<64x128xf32> to vector<1x1x64x128xf32>
    tpu.vector_store %arg8[%c0_101, %c0_102, %c0_103, %c0_104], %207 {strides = array<i32>} : memref<1x1x64x128xf32, #tpu.memory_space<vmem>>, vector<1x1x64x128xf32>,
    return
  }
  func.func @transform_0(%arg0: i32, %arg1: i32) -> (i32, i32, i32, i32, i32) {
    %c0_i32 = arith.constant 0 : i32
    %0 = arith.addi %arg1, %c0_i32 : i32
    %c0_i32_0 = arith.constant 0 : i32
    %c0_i32_1 = arith.constant 0 : i32
    %c0_i32_2 = arith.constant 0 : i32
    %c0_i32_3 = arith.constant 0 : i32
    return %arg0, %0, %c0_i32_0, %c0_i32_1, %c0_i32_2 : i32, i32, i32, i32, i32
  }
  func.func @transform_1(%arg0: i32, %arg1: i32) -> (i32, i32, i32, i32, i32) {
    %c1_i32 = arith.constant 1 : i32
    %0 = arith.addi %arg1, %c1_i32 : i32
    %c0_i32 = arith.constant 0 : i32
    %c0_i32_0 = arith.constant 0 : i32
    %c0_i32_1 = arith.constant 0 : i32
    %c0_i32_2 = arith.constant 0 : i32
    return %arg0, %0, %c0_i32, %c0_i32_0, %c0_i32_1 : i32, i32, i32, i32, i32
  }
  func.func @transform_2(%arg0: i32, %arg1: i32) -> (i32, i32, i32, i32, i32) {
    %c2_i32 = arith.constant 2 : i32
    %0 = arith.addi %arg1, %c2_i32 : i32
    %c0_i32 = arith.constant 0 : i32
    %c0_i32_0 = arith.constant 0 : i32
    %c0_i32_1 = arith.constant 0 : i32
    %c0_i32_2 = arith.constant 0 : i32
    return %arg0, %0, %c0_i32, %c0_i32_0, %c0_i32_1 : i32, i32, i32, i32, i32
  }
  func.func @transform_3(%arg0: i32, %arg1: i32) -> (i32, i32, i32) {
    %c0_i32 = arith.constant 0 : i32
    %c0_i32_0 = arith.constant 0 : i32
    %c0_i32_1 = arith.constant 0 : i32
    %c0_i32_2 = arith.constant 0 : i32
    return %c0_i32, %c0_i32_0, %c0_i32_1 : i32, i32, i32
  }
  func.func @transform_4(%arg0: i32, %arg1: i32) -> (i32, i32, i32) {
    %c0_i32 = arith.constant 0 : i32
    %c0_i32_0 = arith.constant 0 : i32
    %c0_i32_1 = arith.constant 0 : i32
    return %arg0, %c0_i32, %c0_i32_0 : i32, i32, i32
  }
  func.func @transform_5(%arg0: i32, %arg1: i32) -> (i32, i32, i32) {
    %c0_i32 = arith.constant 0 : i32
    %c0_i32_0 = arith.constant 0 : i32
    %c0_i32_1 = arith.constant 0 : i32
    return %arg0, %c0_i32, %c0_i32_0 : i32, i32, i32
  }
  func.func @transform_6(%arg0: i32, %arg1: i32) -> (i32, i32, i32, i32) {
    %c0_i32 = arith.constant 0 : i32
    %c0_i32_0 = arith.constant 0 : i32
    %c0_i32_1 = arith.constant 0 : i32
    return %arg0, %arg1, %c0_i32, %c0_i32_0 : i32, i32, i32, i32
  }
}

</mosaic_0001>

<bundles_post_ra>
// kernel: aspp_module_forward.2
= control target key start
LH: loop header
LB: loop body
LE: loop exit
PB: predicated region body
PF: predicated region fallthrough
CT: control target
= control target key end

     0   :  { %s6776_s18 = smov 0   ;;  %s6778_s19 = smov 0   ;;  %s8512_s0 = inlined_call_operand.vmem [shape: bf16[2,6,12,12,128], index: 0, kind: input, shape index: {}, may-alias: {0,1,2}]   ;;  %s8513_s1 = inlined_call_operand.vmem [shape: bf16[2,6,12,12,128], index: 1, kind: input, shape index: {}, may-alias: {0,1,2}]   ;;  %s8514_s2 = inlined_call_operand.vmem [shape: bf16[2,6,12,12,128], index: 2, kind: input, shape index: {}, may-alias: {0,1,2}]   ;;  %s8515_s3 = inlined_call_operand.vmem [shape: bf16[27,128,128], index: 3, kind: input, shape index: {}]   ;;  %s8516_s4 = inlined_call_operand.vmem [shape: f32[1,128], index: 4, kind: input, shape index: {}]   ;;  %s8517_s5 = inlined_call_operand.vmem [shape: f32[2,2,128], index: 5, kind: output, shape index: {}]  }
   0x1   :  { %s6780_s20 = smov 0   ;;  %s6782_s21 = smov 0  }
   0x2   :  { %s6784_s22 = smov 0  }
   0x3 LB: > { %s24_s23 = sadd.s32 1, %s6735_s20  ;;  %s27_s24 = sadd.s32 1, %s6739_s21  ;;  %s6743_s22 = sphi %s6784_s22, %s15_s22   ;;  %s6739_s21 = sphi %s6782_s21, %s8556_s21   ;;  %s6735_s20 = sphi %s6780_s20, %s8555_s20   ;;  %s6731_s19 = sphi %s6778_s19, %s8554_s19   ;;  %s6727_s18 = sphi %s6776_s18, %s8553_s18  }
   0x4   : > { %p25_p0 = scmp.ge.s32.totalorder %s24_s23, 4  ;;  %p4779_p1 = scmp.ge.s32.totalorder %s6743_s22, 1 }
   0x5   : > { %p245_p2 = scmp.lt.s32.totalorder %s6743_s22, 9 }
   0x6   : > { %s8558_s23 = smov (%p25_p0, %s24_s23), 0  ;;  %s8560_s24 = smov (!%p25_p0, %s27_s24), %s6739_s21 }
   0x7   : > { %p246_p3 = pnand %p4779_p1, %p245_p2  ;;  %p29_p4 = scmp.ge.s32.totalorder %s8560_s24, 2 }
   0x9   : > { %s8562_s24 = smov (%p29_p4, %s8560_s24), 0  ;;  %249 = sbr.rel (%p246_p3) target bundleno = 705 (0x2c1), region = 40 }
   0xe   : > { %v6471_v0 = vld [vmem:[%s8515_s3 + $0x78] sm:$0xff]   ;;  %p296_p5 = scmp.lt.s32.totalorder %s6731_s19, 1  ;;  %p298_p6 = scmp.lt.s32.totalorder %s6727_s18, 5  ;;  %v6473_v2 = vld [vmem:[%s8515_s3 + $0x70] sm:$0xff]   ;;  %v6475_v4 = vld [vmem:[%s8515_s3 + $0x68] sm:$0xff]   ;;  %vm416_vm0 = vcmask 1045504  }
   0xf   : > { %v6472_v1 = vld [vmem:[%s8515_s3 + $0x38] sm:$0xff]   ;;  %5762 = vmatprep.subr.bf16.mxu0 %v6471_v0  ;;  %v6474_v3 = vld [vmem:[%s8515_s3 + $0x30] sm:$0xff]   ;;  %v6476_v5 = vld [vmem:[%s8515_s3 + $0x28] sm:$0xff]   ;;  %vm696_vm1 = vcmask 1043456   ;;  %s305_s10 = sadd.s32 1, %s6727_s18  ;;  %p5435_p9 = scmp.ne.s32.totalorder %s6727_s18, 0 }
  0x10   : > { %s8564_s19 = smov (!%p296_p5, %s6731_s19), 1  ;;  %5786 = vmatprep.subr.bf16.mxu1 %v6472_v1  ;;  %5763 = vmatpush3.bf16.msra.mxu0 %v6471_v0  ;;  %v6477_v6 = vld [vmem:[%s8515_s3 + $0x60] sm:$0xff]   ;;  %v6479_v8 = vld [vmem:[%s8515_s3 + $0x58] sm:$0xff]   ;;  %v6481_v10 = vld [vmem:[%s8515_s3 + $0x50] sm:$0xff]   ;;  %p308_p7 = scmp.lt.s32.totalorder %s305_s10, 5 }
  0x11   : > { %s299_s8 = scalar_select %p298_p6, %s6727_s18, 5  ;;  %5787 = vmatpush3.bf16.msra.mxu1 %v6472_v1  ;;  %5764 = vmatprep.subr.bf16.mxu0 %v6473_v2  ;;  %v6478_v7 = vld [vmem:[%s8515_s3 + $0x20] sm:$0xff]   ;;  %v6480_v9 = vld [vmem:[%s8515_s3 + $0x18] sm:$0xff]   ;;  %v6482_v11 = vld [vmem:[%s8515_s3 + $0x10] sm:$0xff]  }
  0x12   : > { %s6825_s11 = smul.u32 144, %s8564_s19  ;;  %5788 = vmatprep.subr.bf16.mxu1 %v6474_v3  ;;  %s4783_s15 = sshll.u32 %s8564_s19, 1  ;;  %v6483_v31 = vld [vmem:[%s8515_s3 + $0x48] sm:$0xff]   ;;  %v6485_v42 = vld [vmem:[%s8515_s3 + $0x40] sm:$0xff]   ;;  %v6489_v44 = vld [vmem:[%s8515_s3 + $0xb8] sm:$0xff]  }
  0x13   : > { %s6426_s14 = smul.u32 24, %s299_s8  ;;  %s6834_s26 = scalar_lea.vmem %s8517_s5, %s4783_s15  ;;  %v6484_v34 = vld [vmem:[%s8515_s3 + $0x8] sm:$0xff]   ;;  %v6486_v43 = vld [vmem:[%s8515_s3] sm:$0xff]   ;;  %v6490_v47 = vld [vmem:[%s8515_s3 + $0xf8] sm:$0xff]  }
  0x14   : > { %5765 = vmatpush3.bf16.msra.mxu0 %v6473_v2  ;;  %v6491_v53 = vld [vmem:[%s8515_s3 + $0xb0] sm:$0xff]   ;;  %s8566_s10 = smov (!%p308_p7, %s305_s10), 5  ;;  %s316_s19 = sadd.s32 2, %s6727_s18 }
  0x15   : > { %s302_s16 = sadd.s32 %s6825_s11, %s6426_s14  ;;  %5789 = vmatpush3.bf16.msra.mxu1 %v6474_v3  ;;  %5766 = vmatprep.subr.bf16.mxu0 %v6475_v4  ;;  %s6428_s9 = smul.u32 24, %s8566_s10 }
  0x16   : > { %5790 = vmatprep.subr.bf16.mxu1 %v6476_v5  ;;  %s4780_s6 = sshll.u32 %s302_s16, 2  ;;  %p7616_p8 = scmp.lt.s32.totalorder %s316_s19, 5 }
  0x17   : > { %s6851_s13 = scalar_lea.vmem %s8512_s0, %s4780_s6  ;;  %s312_s12 = sadd.s32 %s6428_s9, %s6825_s11 }
  0x18   : > { %5767 = vmatpush3.bf16.msra.mxu0 %v6475_v4  ;;  %v332_v12 = vld [vmem:[%s6851_s13] sm:$0xf]  ;;  %v333_v13 = vld [vmem:[%s6851_s13 + $0x4] sm:$0x3]  ;;  %v334_v14 = vld [vmem:[%s6851_s13 + $0x8] sm:$0xf] }
  0x19   : > { %5791 = vmatpush3.bf16.msra.mxu1 %v6476_v5  ;;  %5768 = vmatprep.subr.bf16.mxu0 %v6477_v6  ;;  %v335_v15 = vld [vmem:[%s6851_s13 + $0xc] sm:$0x3]  ;;  %v356_v16 = vunpack.c.l.bf16 %v332_v12  ;;  %v357_v17 = vunpack.c.l.bf16 %v333_v13  ;;  %v358_v18 = vunpack.c.l.bf16 %v334_v14  ;;  %v4784_v19 = vcombine.low %v332_v12, %v334_v14  ;;  %v6864_v20 = vld [vmem:[%s6851_s13 + $0x10] sm:$0xf]  ;;  %v6867_v21 = vld [vmem:[%s6851_s13 + $0x14] sm:$0x3] }
  0x1a   : > { %5792 = vmatprep.subr.bf16.mxu1 %v6478_v7  ;;  %v359_v22 = vunpack.c.l.bf16 %v335_v15  ;;  %v6870_v23 = vld [vmem:[%s6851_s13 + $0x18] sm:$0xf]  ;;  %v6873_v24 = vld [vmem:[%s6851_s13 + $0x1c] sm:$0x3]  ;;  %v360_v25 = vunpack.c.l.bf16 %v6864_v20  ;;  %v361_v26 = vunpack.c.l.bf16 %v6867_v21  ;;  %v6915_v54 = vld [vmem:[%s6851_s13 + $0x20] sm:$0xf] }
  0x1b   : > { %v417_v27 = vrot.slane %v356_v16, 2  ;;  %v418_v28 = vrot.slane %v357_v17, 2  ;;  %v420_v29 = vrot.slane %v358_v18, 2  ;;  %5802 = vmatprep.mubr.bf16.mxu1 %v4784_v19  ;;  %v362_v30 = vunpack.c.l.bf16 %v6870_v23  ;;  %v6918_v55 = vld [vmem:[%s6851_s13 + $0x24] sm:$0x3]  ;;  %v6493_v15 = vld [vmem:[%s8515_s3 + $0xa8] sm:$0xff]  }
  0x1c   : > { %5769 = vmatpush3.bf16.msra.mxu0 %v6477_v6  ;;  %v421_v32 = vrot.slane %v359_v22, 2  ;;  %v363_v33 = vunpack.c.l.bf16 %v6873_v24  ;;  %v423_v37 = vrot.slane %v360_v25, 2  ;;  %v424_v38 = vrot.slane %v361_v26, 2  ;;  %v6921_v56 = vld [vmem:[%s6851_s13 + $0x28] sm:$0xf]  ;;  %v6492_v6 = vld [vmem:[%s8515_s3 + $0xf0] sm:$0xff]  }
  0x1d   : > { %5793 = vmatpush3.bf16.msra.mxu1 %v6478_v7  ;;  %5770 = vmatprep.subr.bf16.mxu0 %v6479_v8  ;;  %v419_v35 = vsel %vm416_vm0, %v417_v27, %v418_v28  ;;  %v426_v40 = vrot.slane %v362_v30, 2  ;;  %v697_v48 = vrot.slane %v356_v16, 4  ;;  %v698_v49 = vrot.slane %v357_v17, 4  ;;  %v6926_v58 = vld [vmem:[%s6851_s13 + $0x2c] sm:$0x3]  ;;  %v6506_v21 = vld [vmem:[%s8515_s3 + $0xc0] sm:$0xff]  }
  0x1e   : > { %5794 = vmatprep.subr.bf16.mxu1 %v6480_v9  ;;  %v422_v36 = vsel %vm416_vm0, %v420_v29, %v421_v32  ;;  %v427_v41 = vrot.slane %v363_v33, 2  ;;  %v425_v45 = vsel %vm416_vm0, %v423_v37, %v424_v38  ;;  %v700_v50 = vrot.slane %v358_v18, 4  ;;  %v6932_v62 = vld [vmem:[%s6851_s13 + $0x30] sm:$0xf]  ;;  %v6935_v63 = vld [vmem:[%s6851_s13 + $0x34] sm:$0x3] }
  0x1f   : > { %v449_v39 = vpack.c.bf16 %v422_v36, %v419_v35  ;;  %v701_v51 = vrot.slane %v359_v22, 4  ;;  %v4785_v57 = vcombine.low %v6864_v20, %v6870_v23  ;;  %v364_v59 = vunpack.c.l.bf16 %v6915_v54  ;;  %v6943_v2 = vld [vmem:[%s6851_s13 + $0x38] sm:$0xf]  ;;  %v6946_v3 = vld [vmem:[%s6851_s13 + $0x3c] sm:$0x3]  ;;  %v6494_v18 = vld [vmem:[%s8515_s3 + $0xe8] sm:$0xff]  }
  0x20   : > { %5771 = vmatpush3.bf16.msra.mxu0 %v6479_v8  ;;  %v428_v46 = vsel %vm416_vm0, %v426_v40, %v427_v41  ;;  %v365_v60 = vunpack.c.l.bf16 %v6918_v55  ;;  %v366_v61 = vunpack.c.l.bf16 %v6921_v56  ;;  %v367_v0 = vunpack.c.l.bf16 %v6926_v58  ;;  %v6495_v36 = vld [vmem:[%s8515_s3 + $0xa0] sm:$0xff]   ;;  %v6498_v40 = vld [vmem:[%s8515_s3 + $0xd8] sm:$0xff]   ;;  %v6501_v41 = vld [vmem:[%s8515_s3 + $0x90] sm:$0xff]   ;;  %s4781_s25 = sshll.u32 %s312_s12, 2  ;;  %s8568_s19 = smov (!%p7616_p8, %s316_s19), 5 }
  0x21   : > { %5795 = vmatpush3.bf16.msra.mxu1 %v6480_v9  ;;  %5772 = vmatprep.subr.bf16.mxu0 %v6481_v10  ;;  %v6909_v52 = vpack.c.bf16 %v428_v46, %v425_v45  ;;  %v6940_v1 = vcombine.low %v6915_v54, %v6921_v56  ;;  %v368_v4 = vunpack.c.l.bf16 %v6932_v62  ;;  %v369_v5 = vunpack.c.l.bf16 %v6935_v63  ;;  %v6496_v37 = vld [vmem:[%s8515_s3 + $0xe0] sm:$0xff]   ;;  %s7227_s6 = scalar_lea.vmem %s8513_s1, %s4781_s25  ;;  %s6429_s29 = smul.u32 24, %s8568_s19 }
  0x22   : > { %5796 = vmatprep.subr.bf16.mxu1 %v6482_v11  ;;  %5778 = vmatprep.mubr.bf16.mxu0 %v449_v39  ;;  %v429_v7 = vrot.slane %v364_v59, 2  ;;  %v430_v8 = vrot.slane %v365_v60, 2  ;;  %v432_v9 = vrot.slane %v366_v61, 2  ;;  %v371_v12 = vunpack.c.l.bf16 %v6946_v3  ;;  %v6497_v39 = vld [vmem:[%s8515_s3 + $0x98] sm:$0xff]   ;;  %v350_v3 = vld [vmem:[%s6851_s13 + $0x48] sm:$0xf] }
  0x23   : > { %v435_v13 = vrot.slane %v368_v4, 2  ;;  %v436_v14 = vrot.slane %v369_v5, 2  ;;  %v702_v32 = vsel %vm696_vm1, %v700_v50, %v701_v51  ;;  %v6992_v35 = vcombine.low %v6932_v62, %v6943_v2  ;;  %v6508_v50 = vld [vmem:[%s8515_s3 + $0x178] sm:$0xff]   ;;  %v6511_v62 = vld [vmem:[%s8515_s3 + $0x128] sm:$0xff]   ;;  %s323_s9 = sadd.s32 %s6429_s29, %s6825_s11 }
  0x24   : > { %5773 = vmatpush3.bf16.msra.mxu0 %v6481_v10  ;;  %v370_v10 = vunpack.c.l.bf16 %v6943_v2  ;;  %v431_v16 = vsel %vm416_vm0, %v429_v7, %v430_v8  ;;  %v439_v27 = vrot.slane %v371_v12, 2  ;;  %v703_v45 = vrot.slane %v360_v25, 4  ;;  %v348_v2 = vld [vmem:[%s6851_s13 + $0x40] sm:$0xf] }
  0x25   : > { %5797 = vmatpush3.bf16.msra.mxu1 %v6482_v11  ;;  %5774 = vmatprep.subr.bf16.mxu0 %v6483_v31  ;;  %v433_v11 = vrot.slane %v367_v0, 2  ;;  %v437_v22 = vsel %vm416_vm0, %v435_v13, %v436_v14  ;;  %v704_v46 = vrot.slane %v361_v26, 4  ;;  %v709_v20 = vrot.slane %v364_v59, 4  ;;  %v6509_v59 = vld [vmem:[%s8515_s3 + $0x130] sm:$0xff]   ;;  %v6514_v7 = vld [vmem:[%s8515_s3 + $0x120] sm:$0xff]   ;;  %v6521_v13 = vld [vmem:[%s8515_s3 + $0x148] sm:$0xff]  }
  0x26   : > { %5798 = vmatprep.subr.bf16.mxu1 %v6484_v34  ;;  %v438_v17 = vrot.slane %v370_v10, 2  ;;  %v710_v23 = vrot.slane %v365_v60, 4  ;;  %v712_v24 = vrot.slane %v366_v61, 4  ;;  %v713_v25 = vrot.slane %v367_v0, 4  ;;  %v6510_v60 = vld [vmem:[%s8515_s3 + $0x170] sm:$0xff]   ;;  %v6515_v8 = vld [vmem:[%s8515_s3 + $0x160] sm:$0xff]  }
  0x27   : > { %v434_v19 = vsel %vm416_vm0, %v432_v9, %v433_v11  ;;  %v705_v26 = vsel %vm696_vm1, %v703_v45, %v704_v46  ;;  %v715_v55 = vrot.slane %v368_v4, 4  ;;  %v716_v56 = vrot.slane %v369_v5, 4  ;;  %v6512_v4 = vld [vmem:[%s8515_s3 + $0x168] sm:$0xff]   ;;  %v6516_v9 = vld [vmem:[%s8515_s3 + $0x118] sm:$0xff]   ;;  %v6518_v11 = vld [vmem:[%s8515_s3 + $0x110] sm:$0xff]  }
  0x28   : > { %5775 = vmatpush3.bf16.msra.mxu0 %v6483_v31  ;;  %v6981_v28 = vpack.c.bf16 %v434_v19, %v431_v16  ;;  %v440_v29 = vsel %vm416_vm0, %v438_v17, %v439_v27  ;;  %v699_v31 = vsel %vm696_vm1, %v697_v48, %v698_v49  ;;  %v707_v48 = vrot.slane %v363_v33, 4  ;;  %v6505_v49 = vld [vmem:[%s8515_s3 + $0x80] sm:$0xff]   ;;  %v6507_v33 = vld [vmem:[%s8515_s3 + $0x138] sm:$0xff]   ;;  %v351_v16 = vld [vmem:[%s6851_s13 + $0x4c] sm:$0x3] }
  0x29   : > { %5799 = vmatpush3.bf16.msra.mxu1 %v6484_v34  ;;  %5776 = vmatprep.subr.bf16.mxu0 %v6485_v42  ;;  %v6988_v34 = vpack.c.bf16 %v440_v29, %v437_v22  ;;  %v729_v38 = vpack.c.bf16 %v702_v32, %v699_v31  ;;  %v714_v54 = vsel %vm696_vm1, %v712_v24, %v713_v25  ;;  %v719_v58 = vrot.slane %v371_v12, 4  ;;  %v6519_v12 = vld [vmem:[%s8515_s3 + $0x150] sm:$0xff]   ;;  %v6522_v14 = vld [vmem:[%s8515_s3 + $0x100] sm:$0xff]   ;;  %v6524_v29 = vld [vmem:[%s8515_s3 + $0x1b8] sm:$0xff]  }
  0x2a   : > { %5800 = vmatprep.subr.bf16.mxu1 %v6486_v43  ;;  %v717_v63 = vsel %vm696_vm1, %v715_v55, %v716_v56  ;;  %v6523_v17 = vld [vmem:[%s8515_s3 + $0x140] sm:$0xff]   ;;  %v374_v19 = vunpack.c.l.bf16 %v350_v3  ;;  %v375_v27 = vunpack.c.l.bf16 %v351_v16  ;;  %v6525_v31 = vld [vmem:[%s8515_s3 + $0x1f8] sm:$0xff]   ;;  %v7192_v56 = vld [vmem:[%s6851_s13 + $0x54] sm:$0x3] }
  0x2b   : > { %v6530_v24 = vld [vmem:[%s8515_s3 + $0x1a0] sm:$0xff]   ;;  %v7189_v55 = vld [vmem:[%s6851_s13 + $0x58] sm:$0xf] }
  0x2c   : > { %5777 = vmatpush3.bf16.msra.mxu0 %v6485_v42  ;;  %v6502_v42 = vld [vmem:[%s8515_s3 + $0xd0] sm:$0xff]   ;;  %v6531_v25 = vld [vmem:[%s8515_s3 + $0x1e0] sm:$0xff]  }
  0x2d   : > { %5801 = vmatpush3.bf16.msra.mxu1 %v6486_v43  ;;  %5810 = vmatprep.subr.bf16.mxu0 %v6489_v44  ;;  %v6503_v43 = vld [vmem:[%s8515_s3 + $0x88] sm:$0xff]  }
  0x2e   : > { %5834 = vmatprep.subr.bf16.mxu1 %v6490_v47 }
  0x2f   : > { %5779 = vmatmul.mubr.bf16.vlgmr.msra.gmra.mxu0 %v6909_v52 }
  0x30   : > { %5803 = vmatmul.mubr.bf16.vlgmr.msra.gmra.mxu1 %v4785_v57  ;;  %5811 = vmatpush3.bf16.msra.mxu0 %v6489_v44  ;;  %v6504_v44 = vld [vmem:[%s8515_s3 + $0xc8] sm:$0xff]  }
  0x31   : > { %5835 = vmatpush3.bf16.msra.mxu1 %v6490_v47  ;;  %5812 = vmatprep.subr.bf16.mxu0 %v6491_v53  ;;  %v706_v47 = vrot.slane %v362_v30, 4 }
  0x32   : > { %5836 = vmatprep.subr.bf16.mxu1 %v6492_v6  ;;  %5806 = vmatprep.mubr.bf16.mxu1 %v6940_v1 }
  0x33   : > { %5782 = vmatprep.mubr.bf16.mxu0 %v6981_v28  ;;  %v708_v30 = vsel %vm696_vm1, %v706_v47, %v707_v48  ;;  %v6528_v47 = vld [vmem:[%s8515_s3 + $0x1a8] sm:$0xff]  }
  0x34   : > { %5813 = vmatpush3.bf16.msra.mxu0 %v6491_v53  ;;  %v730_v51 = vpack.c.bf16 %v708_v30, %v705_v26  ;;  %v711_v53 = vsel %vm696_vm1, %v709_v20, %v710_v23  ;;  %v6529_v20 = vld [vmem:[%s8515_s3 + $0x1e8] sm:$0xff]   ;;  %v6532_v26 = vld [vmem:[%s8515_s3 + $0x198] sm:$0xff]  }
  0x35   : > { %5837 = vmatpush3.bf16.msra.mxu1 %v6492_v6  ;;  %5814 = vmatprep.subr.bf16.mxu0 %v6493_v15  ;;  %v7066_v61 = vpack.c.bf16 %v714_v54, %v711_v53  ;;  %v7083_v6 = vcombine.low %v348_v2, %v350_v3  ;;  %v6533_v30 = vld [vmem:[%s8515_s3 + $0x1d8] sm:$0xff]   ;;  %v6539_v53 = vld [vmem:[%s8515_s3 + $0x1c0] sm:$0xff]   ;;  %v7186_v54 = vld [vmem:[%s6851_s13 + $0x50] sm:$0xf] }
  0x36   : > { %5838 = vmatprep.subr.bf16.mxu1 %v6494_v18 }
  0x37   : > { %5783 = vmatmul.mubr.bf16.gmra.mxu0 %v6988_v34 }
  0x38   : > { %5815 = vmatpush3.bf16.msra.mxu0 %v6493_v15  ;;  %5807 = vmatmul.mubr.bf16.gmra.mxu1 %v6992_v35  ;;  %v349_v15 = vld [vmem:[%s6851_s13 + $0x44] sm:$0x3] }
  0x39   : > { %5839 = vmatpush3.bf16.msra.mxu1 %v6494_v18  ;;  %5816 = vmatprep.subr.bf16.mxu0 %v6495_v36  ;;  %v372_v18 = vunpack.c.l.bf16 %v348_v2  ;;  %v373_v22 = vunpack.c.l.bf16 %v349_v15  ;;  %v6542_v2 = vld [vmem:[%s8515_s3 + $0x230] sm:$0xff]   ;;  %v6548_v15 = vld [vmem:[%s8515_s3 + $0x260] sm:$0xff]  }
  0x3a   : > { %5840 = vmatprep.subr.bf16.mxu1 %v6496_v37  ;;  %5826 = vmatprep.mubr.bf16.mxu0 %v729_v38  ;;  %v1164_v38 = vrot.slane %v374_v19, 4 }
  0x3b   : > { %5850 = vmatprep.mubr.bf16.mxu1 %v4785_v57  ;;  %v718_v57 = vrot.slane %v370_v10, 4  ;;  %v6517_v10 = vld [vmem:[%s8515_s3 + $0x158] sm:$0xff]   ;;  %v1014_v32 = vrot.slane %v372_v18, 2 }
  0x3c   : > { %5817 = vmatpush3.bf16.msra.mxu0 %v6495_v36  ;;  %v1017_v36 = vrot.slane %v374_v19, 2  ;;  %v6551_v19 = vld [vmem:[%s8515_s3 + $0x210] sm:$0xff]  }
  0x3d   : > { %5841 = vmatpush3.bf16.msra.mxu1 %v6496_v37  ;;  %5818 = vmatprep.subr.bf16.mxu0 %v6497_v39  ;;  %v720_v0 = vsel %vm696_vm1, %v718_v57, %v719_v58  ;;  %v1161_v37 = vrot.slane %v372_v18, 4  ;;  %v7195_v57 = vld [vmem:[%s6851_s13 + $0x5c] sm:$0x3]  ;;  %v376_v58 = vunpack.c.l.bf16 %v7186_v54  ;;  %s4782_s13 = sshll.u32 %s323_s9, 2 }
  0x3e   : > { %5842 = vmatprep.subr.bf16.mxu1 %v6498_v40  ;;  %v7080_v5 = vpack.c.bf16 %v720_v0, %v717_v63  ;;  %v379_v63 = vunpack.c.l.bf16 %v7195_v57  ;;  %v6541_v0 = vld [vmem:[%s8515_s3 + $0x278] sm:$0xff]   ;;  %s7686_s27 = scalar_lea.vmem %s8514_s2, %s4782_s13 }
  0x3f   : > { %v1451_v3 = vrot.slane %v376_v58, 2  ;;  %v6550_v18 = vld [vmem:[%s8515_s3 + $0x258] sm:$0xff]  }
  0x40   : > { %5819 = vmatpush3.bf16.msra.mxu0 %v6497_v39  ;;  %v6526_v39 = vld [vmem:[%s8515_s3 + $0x1b0] sm:$0xff]  }
  0x41   : > { %5843 = vmatpush3.bf16.msra.mxu1 %v6498_v40  ;;  %5820 = vmatprep.subr.bf16.mxu0 %v6501_v41  ;;  %v1015_v40 = vrot.slane %v373_v22, 2 }
  0x42   : > { %5844 = vmatprep.subr.bf16.mxu1 %v6502_v42 }
  0x43   : > { %v1016_v45 = vsel %vm416_vm0, %v1014_v32, %v1015_v40  ;;  %v1748_v40 = vld [vmem:[%s7227_s6 + $0xc] sm:$0x3] }
  0x44   : > { %5821 = vmatpush3.bf16.msra.mxu0 %v6501_v41  ;;  %v1018_v41 = vrot.slane %v375_v27, 2 }
  0x45   : > { %5845 = vmatpush3.bf16.msra.mxu1 %v6502_v42  ;;  %5822 = vmatprep.subr.bf16.mxu0 %v6503_v43  ;;  %v1162_v42 = vrot.slane %v373_v22, 4  ;;  %v6552_v22 = vld [vmem:[%s8515_s3 + $0x250] sm:$0xff]  }
  0x46   : > { %5846 = vmatprep.subr.bf16.mxu1 %v6504_v44  ;;  %v1019_v46 = vsel %vm416_vm0, %v1017_v36, %v1018_v41  ;;  %v6556_v36 = vld [vmem:[%s8515_s3 + $0x240] sm:$0xff]   ;;  %v6558_v41 = vld [vmem:[%s8515_s3 + $0x2b8] sm:$0xff]  }
  0x47   : > { %v1163_v48 = vsel %vm696_vm1, %v1161_v37, %v1162_v42  ;;  %v1749_v42 = vld [vmem:[%s7227_s6 + $0x10] sm:$0xf] }
  0x48   : > { %5823 = vmatpush3.bf16.msra.mxu0 %v6503_v43  ;;  %v1165_v43 = vrot.slane %v375_v27, 4  ;;  %v6554_v27 = vld [vmem:[%s8515_s3 + $0x248] sm:$0xff]  }
  0x49   : > { %5847 = vmatpush3.bf16.msra.mxu1 %v6504_v44  ;;  %5824 = vmatprep.subr.bf16.mxu0 %v6505_v49  ;;  %v6527_v44 = vld [vmem:[%s8515_s3 + $0x1f0] sm:$0xff]  }
  0x4a   : > { %5848 = vmatprep.subr.bf16.mxu1 %v6506_v21 }
  0x4c   : > { %5825 = vmatpush3.bf16.msra.mxu0 %v6505_v49  ;;  %v1166_v49 = vsel %vm696_vm1, %v1164_v38, %v1165_v43  ;;  %v7293_v43 = vld [vmem:[%s7227_s6 + $0x18] sm:$0xf] }
  0x4d   : > { %5849 = vmatpush3.bf16.msra.mxu1 %v6506_v21  ;;  %5858 = vmatprep.subr.bf16.mxu0 %v6507_v33  ;;  %v7145_v21 = vpack.c.bf16 %v1019_v46, %v1016_v45  ;;  %v7148_v23 = vpack.c.bf16 %v1166_v49, %v1163_v48  ;;  %v6559_v45 = vld [vmem:[%s8515_s3 + $0x2f8] sm:$0xff]   ;;  %v1602_v46 = vrot.slane %v379_v63, 4 }
  0x4e   : > { %5882 = vmatprep.subr.bf16.mxu1 %v6508_v50 }
  0x4f   : > { %5827 = vmatmul.mubr.bf16.vlgmr.msra.gmra.mxu0 %v730_v51 }
  0x50   : > { %5851 = vmatmul.mubr.bf16.vlgmr.msra.gmra.mxu1 %v6940_v1  ;;  %5859 = vmatpush3.bf16.msra.mxu0 %v6507_v33  ;;  %v6534_v33 = vld [vmem:[%s8515_s3 + $0x190] sm:$0xff]  }
  0x51   : > { %5883 = vmatpush3.bf16.msra.mxu1 %v6508_v50  ;;  %5860 = vmatprep.subr.bf16.mxu0 %v6509_v59  ;;  %v6535_v50 = vld [vmem:[%s8515_s3 + $0x1d0] sm:$0xff]  }
  0x52   : > { %5884 = vmatprep.subr.bf16.mxu1 %v6510_v60  ;;  %5830 = vmatprep.mubr.bf16.mxu0 %v7066_v61 }
  0x53   : > { %5854 = vmatprep.mubr.bf16.mxu1 %v6992_v35 }
  0x54   : > { %5861 = vmatpush3.bf16.msra.mxu0 %v6509_v59  ;;  %v378_v59 = vunpack.c.l.bf16 %v7189_v55 }
  0x55   : > { %5885 = vmatpush3.bf16.msra.mxu1 %v6510_v60  ;;  %5862 = vmatprep.subr.bf16.mxu0 %v6511_v62  ;;  %v6540_v60 = vld [vmem:[%s8515_s3 + $0x238] sm:$0xff]  }
  0x56   : > { %5886 = vmatprep.subr.bf16.mxu1 %v6512_v4  ;;  %v1601_v32 = vrot.slane %v378_v59, 4 }
  0x57   : > { %5831 = vmatmul.mubr.bf16.gmra.mxu0 %v7080_v5 }
  0x58   : > { %5863 = vmatpush3.bf16.msra.mxu0 %v6511_v62  ;;  %5855 = vmatmul.mubr.bf16.gmra.mxu1 %v7083_v6  ;;  %v377_v62 = vunpack.c.l.bf16 %v7192_v56  ;;  %v1603_v56 = vsel %vm696_vm1, %v1601_v32, %v1602_v46  ;;  %v6576_v46 = vld [vmem:[%s8515_s3 + $0x2c0] sm:$0xff]  }
  0x59   : > { %5887 = vmatpush3.bf16.msra.mxu1 %v6512_v4  ;;  %5864 = vmatprep.subr.bf16.mxu0 %v6514_v7  ;;  %v1454_v4 = vrot.slane %v378_v59, 2  ;;  %v6564_v59 = vld [vmem:[%s8515_s3 + $0x2e8] sm:$0xff]  }
  0x5a   : > { %5888 = vmatprep.subr.bf16.mxu1 %v6515_v8  ;;  %5874 = vmatprep.mubr.bf16.mxu0 %v6909_v52  ;;  %v6520_v52 = vld [vmem:[%s8515_s3 + $0x108] sm:$0xff]  }
  0x5b   : > { %5898 = vmatprep.mubr.bf16.mxu1 %v730_v51  ;;  %v6538_v51 = vld [vmem:[%s8515_s3 + $0x180] sm:$0xff]  }
  0x5c   : > { %5865 = vmatpush3.bf16.msra.mxu0 %v6514_v7  ;;  %v1452_v7 = vrot.slane %v377_v62, 2 }
  0x5d   : > { %5889 = vmatpush3.bf16.msra.mxu1 %v6515_v8  ;;  %5866 = vmatprep.subr.bf16.mxu0 %v6516_v9  ;;  %v1455_v8 = vrot.slane %v379_v63, 2 }
  0x5e   : > { %5890 = vmatprep.subr.bf16.mxu1 %v6517_v10 }
  0x60   : > { %5867 = vmatpush3.bf16.msra.mxu0 %v6516_v9  ;;  %v6543_v9 = vld [vmem:[%s8515_s3 + $0x270] sm:$0xff]  }
  0x61   : > { %5891 = vmatpush3.bf16.msra.mxu1 %v6517_v10  ;;  %5868 = vmatprep.subr.bf16.mxu0 %v6518_v11  ;;  %v6545_v10 = vld [vmem:[%s8515_s3 + $0x228] sm:$0xff]  }
  0x62   : > { %5892 = vmatprep.subr.bf16.mxu1 %v6519_v12 }
  0x64   : > { %5869 = vmatpush3.bf16.msra.mxu0 %v6518_v11  ;;  %v1453_v11 = vsel %vm416_vm0, %v1451_v3, %v1452_v7  ;;  %v1775_v7 = vunpack.c.l.bf16 %v7293_v43 }
  0x65   : > { %5893 = vmatpush3.bf16.msra.mxu1 %v6519_v12  ;;  %5870 = vmatprep.subr.bf16.mxu0 %v6520_v52  ;;  %v4917_v12 = vcombine.low %v7186_v54, %v7189_v55 }
  0x66   : > { %5894 = vmatprep.subr.bf16.mxu1 %v6521_v13 }
  0x68   : > { %5871 = vmatpush3.bf16.msra.mxu0 %v6520_v52  ;;  %v7242_v52 = vld [vmem:[%s7227_s6] sm:$0xf] }
  0x69   : > { %5895 = vmatpush3.bf16.msra.mxu1 %v6521_v13  ;;  %5872 = vmatprep.subr.bf16.mxu0 %v6522_v14  ;;  %v1769_v37 = vunpack.c.l.bf16 %v7242_v52 }
  0x6a   : > { %5896 = vmatprep.subr.bf16.mxu1 %v6523_v17 }
  0x6c   : > { %5873 = vmatpush3.bf16.msra.mxu0 %v6522_v14  ;;  %v7245_v14 = vld [vmem:[%s7227_s6 + $0x8] sm:$0xf] }
  0x6d   : > { %5897 = vmatpush3.bf16.msra.mxu1 %v6523_v17  ;;  %5906 = vmatprep.subr.bf16.mxu0 %v6524_v29  ;;  %v4990_v16 = vcombine.low %v7242_v52, %v7245_v14  ;;  %v6549_v17 = vld [vmem:[%s8515_s3 + $0x218] sm:$0xff]   ;;  %v1771_v38 = vunpack.c.l.bf16 %v7245_v14  ;;  %v1960_v14 = vrot.slane %v1775_v7, 2 }
  0x6e   : > { %5930 = vmatprep.subr.bf16.mxu1 %v6525_v31 }
  0x6f   : > { %5875 = vmatmul.mubr.bf16.vlgmr.msra.gmra.mxu0 %v6981_v28  ;;  %v1954_v48 = vrot.slane %v1771_v38, 2 }
  0x70   : > { %5899 = vmatmul.mubr.bf16.vlgmr.msra.gmra.mxu1 %v7066_v61  ;;  %5907 = vmatpush3.bf16.msra.mxu0 %v6524_v29  ;;  %v1598_v29 = vrot.slane %v376_v58, 4  ;;  %v7332_v58 = vld [vmem:[%s7227_s6 + $0x38] sm:$0xf] }
  0x71   : > { %5931 = vmatpush3.bf16.msra.mxu1 %v6525_v31  ;;  %5908 = vmatprep.subr.bf16.mxu0 %v6526_v39  ;;  %v6555_v31 = vld [vmem:[%s8515_s3 + $0x200] sm:$0xff]  }
  0x72   : > { %5932 = vmatprep.subr.bf16.mxu1 %v6527_v44  ;;  %5878 = vmatprep.mubr.bf16.mxu0 %v6988_v34 }
  0x73   : > { %5902 = vmatprep.mubr.bf16.mxu1 %v7080_v5 }
  0x74   : > { %5909 = vmatpush3.bf16.msra.mxu0 %v6526_v39  ;;  %v1746_v39 = vld [vmem:[%s7227_s6 + $0x4] sm:$0x3] }
  0x75   : > { %5933 = vmatpush3.bf16.msra.mxu1 %v6527_v44  ;;  %5910 = vmatprep.subr.bf16.mxu0 %v6528_v47  ;;  %v1599_v44 = vrot.slane %v377_v62, 4  ;;  %v1770_v49 = vunpack.c.l.bf16 %v1746_v39  ;;  %v6574_v39 = vld [vmem:[%s8515_s3 + $0x2c8] sm:$0xff]  }
  0x76   : > { %5934 = vmatprep.subr.bf16.mxu1 %v6529_v20 }
  0x77   : > { %5879 = vmatmul.mubr.bf16.gmra.mxu0 %v7145_v21  ;;  %v1600_v55 = vsel %vm696_vm1, %v1598_v29, %v1599_v44  ;;  %v6572_v29 = vld [vmem:[%s8515_s3 + $0x2d0] sm:$0xff]   ;;  %v6575_v44 = vld [vmem:[%s8515_s3 + $0x280] sm:$0xff]  }
  0x78   : > { %5911 = vmatpush3.bf16.msra.mxu0 %v6528_v47  ;;  %5903 = vmatmul.mubr.bf16.gmra.mxu1 %v7148_v23  ;;  %v1951_v47 = vrot.slane %v1769_v37, 2 }
  0x79   : > { %5935 = vmatpush3.bf16.msra.mxu1 %v6529_v20  ;;  %5912 = vmatprep.subr.bf16.mxu0 %v6530_v24  ;;  %v1772_v20 = vunpack.c.l.bf16 %v1748_v40 }
  0x7a   : > { %5936 = vmatprep.subr.bf16.mxu1 %v6531_v25  ;;  %5922 = vmatprep.mubr.bf16.mxu0 %v6940_v1  ;;  %v6536_v1 = vld [vmem:[%s8515_s3 + $0x188] sm:$0xff]  }
  0x7b   : > { %5946 = vmatprep.mubr.bf16.mxu1 %v6981_v28  ;;  %v6537_v28 = vld [vmem:[%s8515_s3 + $0x1c8] sm:$0xff]   ;;  %v1955_v54 = vrot.slane %v1772_v20, 2  ;;  %v2129_v57 = vrot.slane %v1772_v20, 4 }
  0x7c   : > { %5913 = vmatpush3.bf16.msra.mxu0 %v6530_v24  ;;  %v7306_v24 = vld [vmem:[%s7227_s6 + $0x20] sm:$0xf] }
  0x7d   : > { %5937 = vmatpush3.bf16.msra.mxu1 %v6531_v25  ;;  %5914 = vmatprep.subr.bf16.mxu0 %v6532_v26  ;;  %v7309_v25 = vld [vmem:[%s7227_s6 + $0x28] sm:$0xf]  ;;  %v1956_v63 = vsel %vm416_vm0, %v1954_v48, %v1955_v54 }
  0x7e   : > { %5938 = vmatprep.subr.bf16.mxu1 %v6533_v30 }
  0x80   : > { %5915 = vmatpush3.bf16.msra.mxu0 %v6532_v26  ;;  %v2125_v26 = vrot.slane %v1769_v37, 4  ;;  %v6573_v37 = vld [vmem:[%s8515_s3 + $0x288] sm:$0xff]  }
  0x81   : > { %5939 = vmatpush3.bf16.msra.mxu1 %v6533_v30  ;;  %5916 = vmatprep.subr.bf16.mxu0 %v6534_v33  ;;  %v6561_v30 = vld [vmem:[%s8515_s3 + $0x2b0] sm:$0xff]  }
  0x82   : > { %5940 = vmatprep.subr.bf16.mxu1 %v6535_v50 }
  0x84   : > { %5917 = vmatpush3.bf16.msra.mxu0 %v6534_v33  ;;  %v2128_v33 = vrot.slane %v1771_v38, 4  ;;  %v1756_v38 = vld [vmem:[%s7227_s6 + $0x2c] sm:$0x3] }
  0x85   : > { %5941 = vmatpush3.bf16.msra.mxu1 %v6535_v50  ;;  %5918 = vmatprep.subr.bf16.mxu0 %v6536_v1  ;;  %v6562_v50 = vld [vmem:[%s8515_s3 + $0x2f0] sm:$0xff]  }
  0x86   : > { %5942 = vmatprep.subr.bf16.mxu1 %v6537_v28 }
  0x88   : > { %5919 = vmatpush3.bf16.msra.mxu0 %v6536_v1  ;;  %v6563_v1 = vld [vmem:[%s8515_s3 + $0x2a8] sm:$0xff]  }
  0x89   : > { %5943 = vmatpush3.bf16.msra.mxu1 %v6537_v28  ;;  %5920 = vmatprep.subr.bf16.mxu0 %v6538_v51  ;;  %v7323_v28 = vcombine.low %v7306_v24, %v7309_v25 }
  0x8a   : > { %5944 = vmatprep.subr.bf16.mxu1 %v6539_v53 }
  0x8c   : > { %5921 = vmatpush3.bf16.msra.mxu0 %v6538_v51  ;;  %v7326_v51 = vld [vmem:[%s7227_s6 + $0x30] sm:$0xf] }
  0x8d   : > { %5945 = vmatpush3.bf16.msra.mxu1 %v6539_v53  ;;  %5954 = vmatprep.subr.bf16.mxu0 %v6540_v60  ;;  %v1952_v53 = vrot.slane %v1770_v49, 2 }
  0x8e   : > { %5978 = vmatprep.subr.bf16.mxu1 %v6541_v0 }
  0x8f   : > { %5923 = vmatmul.mubr.bf16.vlgmr.msra.gmra.mxu0 %v6992_v35  ;;  %v1456_v35 = vsel %vm416_vm0, %v1454_v4, %v1455_v8  ;;  %v1953_v62 = vsel %vm416_vm0, %v1951_v47, %v1952_v53  ;;  %v2130_v4 = vsel %vm696_vm1, %v2128_v33, %v2129_v57  ;;  %v6568_v8 = vld [vmem:[%s8515_s3 + $0x2e0] sm:$0xff]   ;;  %v1758_v47 = vld [vmem:[%s7227_s6 + $0x34] sm:$0x3] }
  0x90   : > { %5947 = vmatmul.mubr.bf16.vlgmr.msra.gmra.mxu1 %v6988_v34  ;;  %5955 = vmatpush3.bf16.msra.mxu0 %v6540_v60  ;;  %v6546_v34 = vld [vmem:[%s8515_s3 + $0x268] sm:$0xff]   ;;  %v1459_v13 = vpack.c.bf16 %v1456_v35, %v1453_v11  ;;  %v1606_v60 = vpack.c.bf16 %v1603_v56, %v1600_v55  ;;  %v1777_v11 = vunpack.c.l.bf16 %v7306_v24  ;;  %v1779_v35 = vunpack.c.l.bf16 %v7309_v25 }
  0x91   : > { %5979 = vmatpush3.bf16.msra.mxu1 %v6541_v0  ;;  %5956 = vmatprep.subr.bf16.mxu0 %v6542_v2  ;;  %v1773_v0 = vunpack.c.l.bf16 %v1749_v42  ;;  %v1781_v24 = vunpack.c.l.bf16 %v7326_v51  ;;  %v1783_v25 = vunpack.c.l.bf16 %v7332_v58  ;;  %v1782_v54 = vunpack.c.l.bf16 %v1758_v47 }
  0x92   : > { %5980 = vmatprep.subr.bf16.mxu1 %v6543_v9  ;;  %5926 = vmatprep.mubr.bf16.mxu0 %v7083_v6  ;;  %v6547_v6 = vld [vmem:[%s8515_s3 + $0x220] sm:$0xff]  }
  0x93   : > { %5950 = vmatprep.mubr.bf16.mxu1 %v7145_v21  ;;  %v7303_v21 = vcombine.low %v1749_v42, %v7293_v43  ;;  %v2131_v52 = vrot.slane %v1773_v0, 4  ;;  %v1969_v56 = vrot.slane %v1781_v24, 2  ;;  %v2143_v57 = vrot.slane %v1781_v24, 4 }
  0x94   : > { %5957 = vmatpush3.bf16.msra.mxu0 %v6542_v2  ;;  %v7343_v2 = vcombine.low %v7326_v51, %v7332_v58  ;;  %v6577_v51 = vld [vmem:[%s8515_s3 + $0x338] sm:$0xff]  }
  0x95   : > { %5981 = vmatpush3.bf16.msra.mxu1 %v6543_v9  ;;  %5958 = vmatprep.subr.bf16.mxu0 %v6545_v10  ;;  %v1983_v9 = vpack.c.bf16 %v1956_v63, %v1953_v62  ;;  %v6578_v58 = vld [vmem:[%s8515_s3 + $0x378] sm:$0xff]  }
  0x96   : > { %5982 = vmatprep.subr.bf16.mxu1 %v6546_v34 }
  0x97   : > { %5927 = vmatmul.mubr.bf16.gmra.mxu0 %v4917_v12  ;;  %v1957_v12 = vrot.slane %v1773_v0, 2  ;;  %v1970_v0 = vrot.slane %v1782_v54, 2 }
  0x98   : > { %5959 = vmatpush3.bf16.msra.mxu0 %v6545_v10  ;;  %5951 = vmatmul.mubr.bf16.gmra.mxu1 %v1459_v13  ;;  %v1750_v10 = vld [vmem:[%s7227_s6 + $0x14] sm:$0x3]  ;;  %v6569_v13 = vld [vmem:[%s8515_s3 + $0x298] sm:$0xff]  }
  0x99   : > { %5983 = vmatpush3.bf16.msra.mxu1 %v6546_v34  ;;  %5960 = vmatprep.subr.bf16.mxu0 %v6547_v6 }
  0x9a   : > { %5984 = vmatprep.subr.bf16.mxu1 %v6548_v15  ;;  %5970 = vmatprep.mubr.bf16.mxu0 %v7066_v61  ;;  %v6553_v61 = vld [vmem:[%s8515_s3 + $0x208] sm:$0xff]  }
  0x9b   : > { %5994 = vmatprep.mubr.bf16.mxu1 %v4990_v16  ;;  %v1752_v16 = vld [vmem:[%s7227_s6 + $0x1c] sm:$0x3] }
  0x9c   : > { %5961 = vmatpush3.bf16.msra.mxu0 %v6547_v6  ;;  %v6570_v6 = vld [vmem:[%s8515_s3 + $0x2d8] sm:$0xff]  }
  0x9d   : > { %5985 = vmatpush3.bf16.msra.mxu1 %v6548_v15  ;;  %5962 = vmatprep.subr.bf16.mxu0 %v6549_v17  ;;  %v1774_v15 = vunpack.c.l.bf16 %v1750_v10 }
  0x9e   : > { %5986 = vmatprep.subr.bf16.mxu1 %v6550_v18 }
  0x9f   : > { %v1958_v32 = vrot.slane %v1774_v15, 2 }
  0xa0   : > { %5963 = vmatpush3.bf16.msra.mxu0 %v6549_v17  ;;  %v2134_v17 = vrot.slane %v1775_v7, 4  ;;  %v2146_v7 = vrot.slane %v1783_v25, 4 }
  0xa1   : > { %5987 = vmatpush3.bf16.msra.mxu1 %v6550_v18  ;;  %5964 = vmatprep.subr.bf16.mxu0 %v6551_v19  ;;  %v1963_v18 = vrot.slane %v1777_v11, 2 }
  0xa2   : > { %5988 = vmatprep.subr.bf16.mxu1 %v6552_v22 }
  0xa4   : > { %5965 = vmatpush3.bf16.msra.mxu0 %v6551_v19  ;;  %v1966_v19 = vrot.slane %v1779_v35, 2 }
  0xa5   : > { %5989 = vmatpush3.bf16.msra.mxu1 %v6552_v22  ;;  %5966 = vmatprep.subr.bf16.mxu0 %v6553_v61  ;;  %v2137_v22 = vrot.slane %v1777_v11, 4  ;;  %v6580_v11 = vld [vmem:[%s8515_s3 + $0x370] sm:$0xff]  }
  0xa6   : > { %5990 = vmatprep.subr.bf16.mxu1 %v6554_v27 }
  0xa8   : > { %5967 = vmatpush3.bf16.msra.mxu0 %v6553_v61  ;;  %v2140_v61 = vrot.slane %v1779_v35, 4 }
  0xa9   : > { %5991 = vmatpush3.bf16.msra.mxu1 %v6554_v27  ;;  %5968 = vmatprep.subr.bf16.mxu0 %v6555_v31  ;;  %v6571_v27 = vld [vmem:[%s8515_s3 + $0x290] sm:$0xff]  }
  0xaa   : > { %5992 = vmatprep.subr.bf16.mxu1 %v6556_v36 }
  0xac   : > { %5969 = vmatpush3.bf16.msra.mxu0 %v6555_v31  ;;  %v1776_v31 = vunpack.c.l.bf16 %v1752_v16 }
  0xad   : > { %5993 = vmatpush3.bf16.msra.mxu1 %v6556_v36  ;;  %6002 = vmatprep.subr.bf16.mxu0 %v6558_v41  ;;  %v1754_v36 = vld [vmem:[%s7227_s6 + $0x24] sm:$0x3] }
  0xae   : > { %6026 = vmatprep.subr.bf16.mxu1 %v6559_v45  ;;  %v1961_v40 = vrot.slane %v1776_v31, 2  ;;  %v2135_v42 = vrot.slane %v1776_v31, 4  ;;  %v1778_v43 = vunpack.c.l.bf16 %v1754_v36  ;;  %v6589_v31 = vld [vmem:[%s8515_s3 + $0x308] sm:$0xff]  }
  0xaf   : > { %5971 = vmatmul.mubr.bf16.vlgmr.msra.gmra.mxu0 %v7080_v5  ;;  %v2126_v5 = vrot.slane %v1770_v49, 4  ;;  %v1760_v49 = vld [vmem:[%s7227_s6 + $0x3c] sm:$0x3]  ;;  %v7463_v36 = vld [vmem:[%s7227_s6 + $0x48] sm:$0xf] }
  0xb0   : > { %5995 = vmatmul.mubr.bf16.vlgmr.msra.gmra.mxu1 %v7303_v21  ;;  %6003 = vmatpush3.bf16.msra.mxu0 %v6558_v41  ;;  %v2132_v41 = vrot.slane %v1774_v15, 4  ;;  %v1964_v48 = vrot.slane %v1778_v43, 2  ;;  %v2138_v20 = vrot.slane %v1778_v43, 4  ;;  %v2136_v53 = vsel %vm696_vm1, %v2134_v17, %v2135_v42  ;;  %v6582_v15 = vld [vmem:[%s8515_s3 + $0x368] sm:$0xff]  }
  0xb1   : > { %6027 = vmatpush3.bf16.msra.mxu1 %v6559_v45  ;;  %6004 = vmatprep.subr.bf16.mxu0 %v6561_v30  ;;  %v2127_v3 = vsel %vm696_vm1, %v2125_v26, %v2126_v5  ;;  %v1780_v45 = vunpack.c.l.bf16 %v1756_v38  ;;  %v1959_v26 = vsel %vm416_vm0, %v1957_v12, %v1958_v32  ;;  %v1784_v55 = vunpack.c.l.bf16 %v1760_v49  ;;  %v7460_v32 = vld [vmem:[%s7227_s6 + $0x40] sm:$0xf]  ;;  %v7469_v38 = vld [vmem:[%s7227_s6 + $0x4c] sm:$0x3]  ;;  %v6595_v49 = vld [vmem:[%s8515_s3 + $0x3b0] sm:$0xff]  }
  0xb2   : > { %6028 = vmatprep.subr.bf16.mxu1 %v6562_v50  ;;  %5974 = vmatprep.mubr.bf16.mxu0 %v7148_v23  ;;  %v6567_v23 = vld [vmem:[%s8515_s3 + $0x2a0] sm:$0xff]   ;;  %v2157_v34 = vpack.c.bf16 %v2130_v4, %v2127_v3  ;;  %v1972_v5 = vrot.slane %v1783_v25, 2  ;;  %v1965_v62 = vsel %vm416_vm0, %v1963_v18, %v1964_v48  ;;  %v2139_v3 = vsel %vm696_vm1, %v2137_v22, %v2138_v20  ;;  %v6585_v22 = vld [vmem:[%s8515_s3 + $0x318] sm:$0xff]   ;;  %v6596_v25 = vld [vmem:[%s8515_s3 + $0x3f0] sm:$0xff]  }
  0xb3   : > { %5998 = vmatprep.mubr.bf16.mxu1 %v7323_v28  ;;  %v1967_v33 = vrot.slane %v1780_v45, 2  ;;  %v2147_v10 = vrot.slane %v1784_v55, 4  ;;  %v1971_v12 = vsel %vm416_vm0, %v1969_v56, %v1970_v0  ;;  %v6583_v18 = vld [vmem:[%s8515_s3 + $0x320] sm:$0xff]   ;;  %v1787_v42 = vunpack.c.l.bf16 %v7463_v36 }
  0xb4   : > { %6005 = vmatpush3.bf16.msra.mxu0 %v6561_v30  ;;  %v1962_v30 = vsel %vm416_vm0, %v1960_v14, %v1961_v40  ;;  %v6592_v40 = vld [vmem:[%s8515_s3 + $0x340] sm:$0xff]  }
  0xb5   : > { %6029 = vmatpush3.bf16.msra.mxu1 %v6562_v50  ;;  %6006 = vmatprep.subr.bf16.mxu0 %v6563_v1  ;;  %v2141_v50 = vrot.slane %v1780_v45, 4  ;;  %v1968_v63 = vsel %vm416_vm0, %v1966_v19, %v1967_v33  ;;  %v6584_v19 = vld [vmem:[%s8515_s3 + $0x360] sm:$0xff]   ;;  %v6593_v45 = vld [vmem:[%s8515_s3 + $0x3b8] sm:$0xff]   ;;  %v2445_v48 = vrot.slane %v1787_v42, 2 }
  0xb6   : > { %6030 = vmatprep.subr.bf16.mxu1 %v6564_v59  ;;  %v7411_v35 = vpack.c.bf16 %v1968_v63, %v1965_v62 }
  0xb7   : > { %5975 = vmatmul.mubr.bf16.gmra.mxu0 %v1606_v60  ;;  %v2142_v4 = vsel %vm696_vm1, %v2140_v61, %v2141_v50  ;;  %v6586_v61 = vld [vmem:[%s8515_s3 + $0x358] sm:$0xff]  }
  0xb8   : > { %6007 = vmatpush3.bf16.msra.mxu0 %v6563_v1  ;;  %5999 = vmatmul.mubr.bf16.gmra.mxu1 %v7343_v2  ;;  %v2133_v1 = vsel %vm696_vm1, %v2131_v52, %v2132_v41  ;;  %v1785_v41 = vunpack.c.l.bf16 %v7460_v32 }
  0xb9   : > { %6031 = vmatpush3.bf16.msra.mxu1 %v6564_v59  ;;  %6008 = vmatprep.subr.bf16.mxu0 %v6567_v23  ;;  %v1984_v59 = vpack.c.bf16 %v1962_v30, %v1959_v26  ;;  %v7399_v60 = vpack.c.bf16 %v2136_v53, %v2133_v1  ;;  %v6598_v30 = vld [vmem:[%s8515_s3 + $0x3a8] sm:$0xff]  }
  0xba   : > { %6032 = vmatprep.subr.bf16.mxu1 %v6568_v8  ;;  %6018 = vmatprep.mubr.bf16.mxu0 %v1983_v9  ;;  %v2144_v9 = vrot.slane %v1782_v54, 4  ;;  %v2442_v47 = vrot.slane %v1785_v41, 2 }
  0xbb   : > { %6042 = vmatprep.mubr.bf16.mxu1 %v2157_v34  ;;  %v7413_v34 = vpack.c.bf16 %v2142_v4, %v2139_v3  ;;  %v6601_v3 = vld [vmem:[%s8515_s3 + $0x3e0] sm:$0xff]  }
  0xbc   : > { %6009 = vmatpush3.bf16.msra.mxu0 %v6567_v23  ;;  %v1973_v23 = vrot.slane %v1784_v55, 2  ;;  %v2145_v14 = vsel %vm696_vm1, %v2143_v57, %v2144_v9  ;;  %v7518_v57 = vcombine.low %v7460_v32, %v7463_v36  ;;  %v6613_v32 = vld [vmem:[%s8515_s3 + $0x470] sm:$0xff]  }
  0xbd   : > { %6033 = vmatpush3.bf16.msra.mxu1 %v6568_v8  ;;  %6010 = vmatprep.subr.bf16.mxu0 %v6569_v13  ;;  %v6579_v8 = vld [vmem:[%s8515_s3 + $0x330] sm:$0xff]  }
  0xbe   : > { %6034 = vmatprep.subr.bf16.mxu1 %v6570_v6  ;;  %v1974_v52 = vsel %vm416_vm0, %v1972_v5, %v1973_v23 }
  0xbf   : > { %v7427_v16 = vpack.c.bf16 %v1974_v52, %v1971_v12  ;;  %v6603_v12 = vld [vmem:[%s8515_s3 + $0x3d8] sm:$0xff]  }
  0xc0   : > { %6011 = vmatpush3.bf16.msra.mxu0 %v6569_v13  ;;  %v6581_v13 = vld [vmem:[%s8515_s3 + $0x328] sm:$0xff]  }
  0xc1   : > { %6035 = vmatpush3.bf16.msra.mxu1 %v6570_v6  ;;  %6012 = vmatprep.subr.bf16.mxu0 %v6571_v27  ;;  %v2148_v6 = vsel %vm696_vm1, %v2146_v7, %v2147_v10  ;;  %v6602_v7 = vld [vmem:[%s8515_s3 + $0x398] sm:$0xff]  }
  0xc2   : > { %6036 = vmatprep.subr.bf16.mxu1 %v6572_v29  ;;  %v7430_v17 = vpack.c.bf16 %v2148_v6, %v2145_v14  ;;  %v6604_v6 = vld [vmem:[%s8515_s3 + $0x390] sm:$0xff]  }
  0xc4   : > { %6013 = vmatpush3.bf16.msra.mxu0 %v6571_v27  ;;  %v6587_v27 = vld [vmem:[%s8515_s3 + $0x310] sm:$0xff]  }
  0xc5   : > { %6037 = vmatpush3.bf16.msra.mxu1 %v6572_v29  ;;  %6014 = vmatprep.subr.bf16.mxu0 %v6573_v37  ;;  %v6588_v29 = vld [vmem:[%s8515_s3 + $0x350] sm:$0xff]  }
  0xc6   : > { %6038 = vmatprep.subr.bf16.mxu1 %v6574_v39 }
  0xc8   : > { %6015 = vmatpush3.bf16.msra.mxu0 %v6573_v37  ;;  %v7466_v37 = vld [vmem:[%s7227_s6 + $0x44] sm:$0x3] }
  0xc9   : > { %6039 = vmatpush3.bf16.msra.mxu1 %v6574_v39  ;;  %6016 = vmatprep.subr.bf16.mxu0 %v6575_v44  ;;  %v6591_v39 = vld [vmem:[%s8515_s3 + $0x300] sm:$0xff]   ;;  %v1786_v43 = vunpack.c.l.bf16 %v7466_v37 }
  0xca   : > { %6040 = vmatprep.subr.bf16.mxu1 %v6576_v46 }
  0xcb   : > { %v2443_v20 = vrot.slane %v1786_v43, 2 }
  0xcc   : > { %6017 = vmatpush3.bf16.msra.mxu0 %v6575_v44  ;;  %v1788_v44 = vunpack.c.l.bf16 %v7469_v38 }
  0xcd   : > { %6041 = vmatpush3.bf16.msra.mxu1 %v6576_v46  ;;  %6050 = vmatprep.subr.bf16.mxu0 %v6577_v51  ;;  %v6594_v46 = vld [vmem:[%s8515_s3 + $0x3f8] sm:$0xff]   ;;  %v2444_v53 = vsel %vm416_vm0, %v2442_v47, %v2443_v20 }
  0xce   : > { %6074 = vmatprep.subr.bf16.mxu1 %v6578_v58  ;;  %v2446_v24 = vrot.slane %v1788_v44, 2  ;;  %v2593_v47 = vrot.slane %v1788_v44, 4  ;;  %v6614_v44 = vld [vmem:[%s8515_s3 + $0x428] sm:$0xff]   ;;  %v7602_v20 = vld [vmem:[%s7227_s6 + $0x58] sm:$0xf] }
  0xcf   : > { %6019 = vmatmul.mubr.bf16.vlgmr.msra.gmra.mxu0 %v1984_v59 }
  0xd0   : > { %6043 = vmatmul.mubr.bf16.vlgmr.msra.gmra.mxu1 %v7399_v60  ;;  %6051 = vmatpush3.bf16.msra.mxu0 %v6577_v51  ;;  %v2447_v54 = vsel %vm416_vm0, %v2445_v48, %v2446_v24  ;;  %v6599_v51 = vld [vmem:[%s8515_s3 + $0x3e8] sm:$0xff]   ;;  %v6612_v48 = vld [vmem:[%s8515_s3 + $0x430] sm:$0xff]  }
  0xd1   : > { %6075 = vmatpush3.bf16.msra.mxu1 %v6578_v58  ;;  %6052 = vmatprep.subr.bf16.mxu0 %v6579_v8  ;;  %v6600_v58 = vld [vmem:[%s8515_s3 + $0x3a0] sm:$0xff]   ;;  %v7524_v62 = vpack.c.bf16 %v2447_v54, %v2444_v53 }
  0xd2   : > { %6076 = vmatprep.subr.bf16.mxu1 %v6580_v11  ;;  %6022 = vmatprep.mubr.bf16.mxu0 %v7411_v35 }
  0xd3   : > { %6046 = vmatprep.mubr.bf16.mxu1 %v7413_v34 }
  0xd4   : > { %6053 = vmatpush3.bf16.msra.mxu0 %v6579_v8 }
  0xd5   : > { %6077 = vmatpush3.bf16.msra.mxu1 %v6580_v11  ;;  %6054 = vmatprep.subr.bf16.mxu0 %v6581_v13 }
  0xd6   : > { %6078 = vmatprep.subr.bf16.mxu1 %v6582_v15 }
  0xd7   : > { %6023 = vmatmul.mubr.bf16.gmra.mxu0 %v7427_v16 }
  0xd8   : > { %6055 = vmatpush3.bf16.msra.mxu0 %v6581_v13  ;;  %6047 = vmatmul.mubr.bf16.gmra.mxu1 %v7430_v17 }
  0xd9   : > { %6079 = vmatpush3.bf16.msra.mxu1 %v6582_v15  ;;  %6056 = vmatprep.subr.bf16.mxu0 %v6583_v18 }
  0xda   : > { %6080 = vmatprep.subr.bf16.mxu1 %v6584_v19  ;;  %6066 = vmatprep.mubr.bf16.mxu0 %v7303_v21  ;;  %v6590_v21 = vld [vmem:[%s8515_s3 + $0x348] sm:$0xff]  }
  0xdb   : > { %6090 = vmatprep.mubr.bf16.mxu1 %v1984_v59 }
  0xdc   : > { %6057 = vmatpush3.bf16.msra.mxu0 %v6583_v18 }
  0xdd   : > { %6081 = vmatpush3.bf16.msra.mxu1 %v6584_v19  ;;  %6058 = vmatprep.subr.bf16.mxu0 %v6585_v22 }
  0xde   : > { %6082 = vmatprep.subr.bf16.mxu1 %v6586_v61 }
  0xe0   : > { %6059 = vmatpush3.bf16.msra.mxu0 %v6585_v22 }
  0xe1   : > { %6083 = vmatpush3.bf16.msra.mxu1 %v6586_v61  ;;  %6060 = vmatprep.subr.bf16.mxu0 %v6587_v27 }
  0xe2   : > { %6084 = vmatprep.subr.bf16.mxu1 %v6588_v29 }
  0xe4   : > { %6061 = vmatpush3.bf16.msra.mxu0 %v6587_v27  ;;  %v6607_v27 = vld [vmem:[%s8515_s3 + $0x3c8] sm:$0xff]  }
  0xe5   : > { %6085 = vmatpush3.bf16.msra.mxu1 %v6588_v29  ;;  %6062 = vmatprep.subr.bf16.mxu0 %v6589_v31  ;;  %v6608_v29 = vld [vmem:[%s8515_s3 + $0x380] sm:$0xff]  }
  0xe6   : > { %6086 = vmatprep.subr.bf16.mxu1 %v6590_v21 }
  0xe8   : > { %6063 = vmatpush3.bf16.msra.mxu0 %v6589_v31  ;;  %v6609_v31 = vld [vmem:[%s8515_s3 + $0x3c0] sm:$0xff]  }
  0xe9   : > { %6087 = vmatpush3.bf16.msra.mxu1 %v6590_v21  ;;  %6064 = vmatprep.subr.bf16.mxu0 %v6591_v39  ;;  %v6610_v21 = vld [vmem:[%s8515_s3 + $0x438] sm:$0xff]  }
  0xea   : > { %6088 = vmatprep.subr.bf16.mxu1 %v6592_v40 }
  0xec   : > { %6065 = vmatpush3.bf16.msra.mxu0 %v6591_v39  ;;  %v6611_v39 = vld [vmem:[%s8515_s3 + $0x478] sm:$0xff]  }
  0xed   : > { %6089 = vmatpush3.bf16.msra.mxu1 %v6592_v40  ;;  %6098 = vmatprep.subr.bf16.mxu0 %v6593_v45  ;;  %v2589_v40 = vrot.slane %v1785_v41, 4 }
  0xee   : > { %6122 = vmatprep.subr.bf16.mxu1 %v6594_v46 }
  0xef   : > { %v5780_v26 = vpop.f32.mrf.mxu0  ;;  %6067 = vmatmul.mubr.bf16.vlgmr.msra.gmra.mxu0 %v7323_v28 }
  0xf0   : > { %v5804_v33 = vpop.f32.mrf.mxu1  ;;  %6091 = vmatmul.mubr.bf16.vlgmr.msra.gmra.mxu1 %v7411_v35  ;;  %6099 = vmatpush3.bf16.msra.mxu0 %v6593_v45  ;;  %v2592_v45 = vrot.slane %v1787_v42, 4 }
  0xf1   : > { %v7506_v50 = vadd.f32 %v5804_v33, %v5780_v26  ;;  %6123 = vmatpush3.bf16.msra.mxu1 %v6594_v46  ;;  %v552_v1 = vpop.f32.mrf.mxu0  ;;  %6100 = vmatprep.subr.bf16.mxu0 %v6595_v49  ;;  %v2590_v46 = vrot.slane %v1786_v43, 4  ;;  %v6615_v26 = vld [vmem:[%s8515_s3 + $0x468] sm:$0xff]  }
  0xf2   : > { %v665_v55 = vpop.f32.mrf.mxu1  ;;  %6124 = vmatprep.subr.bf16.mxu1 %v6596_v25  ;;  %6070 = vmatprep.mubr.bf16.mxu0 %v7343_v2  ;;  %v2594_v42 = vsel %vm696_vm1, %v2592_v45, %v2593_v47  ;;  %v7696_v47 = vld [vmem:[%s7686_s27] sm:$0xf] }
  0xf3   : > { %v7514_v56 = vadd.f32 %v665_v55, %v552_v1  ;;  %v5781_v5 = vpop.f32.mrf.mxu0  ;;  %6094 = vmatprep.mubr.bf16.mxu1 %v7427_v16  ;;  %v2591_v41 = vsel %vm696_vm1, %v2589_v40, %v2590_v46  ;;  %v6627_v46 = vld [vmem:[%s8515_s3 + $0x4b8] sm:$0xff]  }
  0xf4   : > { %v5805_v59 = vpop.f32.mrf.mxu1  ;;  %6101 = vmatpush3.bf16.msra.mxu0 %v6595_v49  ;;  %v7599_v49 = vld [vmem:[%s7227_s6 + $0x50] sm:$0xf]  ;;  %v7611_v33 = vpack.c.bf16 %v2594_v42, %v2591_v41  ;;  %v6628_v42 = vld [vmem:[%s8515_s3 + $0x4f8] sm:$0xff]  }
  0xf5   : > { %v7526_v63 = vadd.f32 %v5805_v59, %v5781_v5  ;;  %6125 = vmatpush3.bf16.msra.mxu1 %v6596_v25  ;;  %v555_v0 = vpop.f32.mrf.mxu0  ;;  %6102 = vmatprep.subr.bf16.mxu0 %v6598_v30  ;;  %v5139_v54 = vcombine.low %v7599_v49, %v7602_v20 }
  0xf6   : > { %v668_v23 = vpop.f32.mrf.mxu1  ;;  %6126 = vmatprep.subr.bf16.mxu1 %v6599_v51 }
  0xf7   : > { %v7531_v4 = vadd.f32 %v668_v23, %v555_v0  ;;  %6071 = vmatmul.mubr.bf16.gmra.mxu0 %v7518_v57  ;;  %v5784_v8 = vpop.f32.mrf.mxu0 }
  0xf8   : > { %6103 = vmatpush3.bf16.msra.mxu0 %v6598_v30  ;;  %6095 = vmatmul.mubr.bf16.gmra.mxu1 %v7524_v62  ;;  %v5808_v9 = vpop.f32.mrf.mxu1 }
  0xf9   : > { %6127 = vmatpush3.bf16.msra.mxu1 %v6599_v51  ;;  %6104 = vmatprep.subr.bf16.mxu0 %v6600_v58  ;;  %v7538_v10 = vadd.f32 %v5808_v9, %v5784_v8  ;;  %v568_v11 = vpop.f32.mrf.mxu0  ;;  %v6617_v51 = vld [vmem:[%s8515_s3 + $0x420] sm:$0xff]  }
  0xfa   : > { %6128 = vmatprep.subr.bf16.mxu1 %v6601_v3  ;;  %v681_v52 = vpop.f32.mrf.mxu1  ;;  %6114 = vmatprep.mubr.bf16.mxu0 %v7399_v60  ;;  %v6605_v60 = vld [vmem:[%s8515_s3 + $0x3d0] sm:$0xff]  }
  0xfb   : > { %v7544_v13 = vadd.f32 %v681_v52, %v568_v11  ;;  %v5785_v14 = vpop.f32.mrf.mxu0  ;;  %6138 = vmatprep.mubr.bf16.mxu1 %v7323_v28  ;;  %v6606_v28 = vld [vmem:[%s8515_s3 + $0x388] sm:$0xff]  }
  0xfc   : > { %6105 = vmatpush3.bf16.msra.mxu0 %v6600_v58  ;;  %v5809_v15 = vpop.f32.mrf.mxu1  ;;  %v6618_v58 = vld [vmem:[%s8515_s3 + $0x460] sm:$0xff]  }
  0xfd   : > { %6129 = vmatpush3.bf16.msra.mxu1 %v6601_v3  ;;  %6106 = vmatprep.subr.bf16.mxu0 %v6602_v7  ;;  %v7550_v18 = vadd.f32 %v5809_v15, %v5785_v14  ;;  %v571_v19 = vpop.f32.mrf.mxu0 }
  0xfe   : > { %6130 = vmatprep.subr.bf16.mxu1 %v6603_v12  ;;  %v684_v22 = vpop.f32.mrf.mxu1 }
  0xff   : > { %v7555_v61 = vadd.f32 %v684_v22, %v571_v19  ;;  %v6624_v22 = vld [vmem:[%s8515_s3 + $0x448] sm:$0xff]  }
 0x100   : > { %6107 = vmatpush3.bf16.msra.mxu0 %v6602_v7 }
 0x101   : > { %6131 = vmatpush3.bf16.msra.mxu1 %v6603_v12  ;;  %6108 = vmatprep.subr.bf16.mxu0 %v6604_v6 }
 0x102   : > { %6132 = vmatprep.subr.bf16.mxu1 %v6605_v60 }
 0x104   : > { %6109 = vmatpush3.bf16.msra.mxu0 %v6604_v6  ;;  %v6621_v6 = vld [vmem:[%s8515_s3 + $0x410] sm:$0xff]  }
 0x105   : > { %6133 = vmatpush3.bf16.msra.mxu1 %v6605_v60  ;;  %6110 = vmatprep.subr.bf16.mxu0 %v6606_v28  ;;  %v6623_v60 = vld [vmem:[%s8515_s3 + $0x408] sm:$0xff]  }
 0x106   : > { %6134 = vmatprep.subr.bf16.mxu1 %v6607_v27 }
 0x108   : > { %6111 = vmatpush3.bf16.msra.mxu0 %v6606_v28  ;;  %v1789_v28 = vunpack.c.l.bf16 %v7599_v49 }
 0x109   : > { %6135 = vmatpush3.bf16.msra.mxu1 %v6607_v27  ;;  %6112 = vmatprep.subr.bf16.mxu0 %v6608_v29  ;;  %v1768_v27 = vld [vmem:[%s7227_s6 + $0x5c] sm:$0x3] }
 0x10a   : > { %6136 = vmatprep.subr.bf16.mxu1 %v6609_v31  ;;  %v1792_v40 = vunpack.c.l.bf16 %v1768_v27  ;;  %v2879_v45 = vrot.slane %v1789_v28, 2 }
 0x10c   : > { %6113 = vmatpush3.bf16.msra.mxu0 %v6608_v29  ;;  %v6625_v29 = vld [vmem:[%s8515_s3 + $0x400] sm:$0xff]  }
 0x10d   : > { %6137 = vmatpush3.bf16.msra.mxu1 %v6609_v31  ;;  %6146 = vmatprep.subr.bf16.mxu0 %v6610_v21  ;;  %v1791_v31 = vunpack.c.l.bf16 %v7602_v20  ;;  %v3030_v20 = vrot.slane %v1792_v40, 4 }
 0x10e   : > { %6170 = vmatprep.subr.bf16.mxu1 %v6611_v39 }
 0x10f   : > { %v5828_v36 = vpop.f32.mrf.mxu0  ;;  %6115 = vmatmul.mubr.bf16.vlgmr.msra.gmra.mxu0 %v7413_v34  ;;  %v3029_v41 = vrot.slane %v1791_v31, 4 }
 0x110   : > { %v865_v37 = vadd.f32 %v5828_v36, %v7506_v50  ;;  %6139 = vmatmul.mubr.bf16.vlgmr.msra.gmra.mxu1 %v7343_v2  ;;  %6147 = vmatpush3.bf16.msra.mxu0 %v6610_v21  ;;  %v5852_v38 = vpop.f32.mrf.mxu1  ;;  %v6626_v21 = vld [vmem:[%s8515_s3 + $0x440] sm:$0xff]   ;;  %v7705_v36 = vld [vmem:[%s7686_s27 + $0xc] sm:$0x3] }
 0x111   : > { %6171 = vmatpush3.bf16.msra.mxu1 %v6611_v39  ;;  %v832_v43 = vpop.f32.mrf.mxu0  ;;  %6148 = vmatprep.subr.bf16.mxu0 %v6612_v48 }
 0x112   : > { %v863_v2 = vadd.f32 %v832_v43, %v7514_v56  ;;  %v7605_v24 = vadd.f32 %v5852_v38, %v865_v37  ;;  %v971_v25 = vpop.f32.mrf.mxu1  ;;  %6172 = vmatprep.subr.bf16.mxu1 %v6613_v32  ;;  %6118 = vmatprep.mubr.bf16.mxu0 %v7430_v17  ;;  %v2882_v37 = vrot.slane %v1791_v31, 2  ;;  %v3026_v38 = vrot.slane %v1789_v28, 4 }
 0x113   : > { %v5829_v30 = vpop.f32.mrf.mxu0  ;;  %6142 = vmatprep.mubr.bf16.mxu1 %v7518_v57 }
 0x114   : > { %v866_v50 = vadd.f32 %v5829_v30, %v7526_v63  ;;  %v7621_v1 = vadd.f32 %v971_v25, %v863_v2  ;;  %6149 = vmatpush3.bf16.msra.mxu0 %v6612_v48  ;;  %v5853_v53 = vpop.f32.mrf.mxu1  ;;  %v7699_v48 = vld [vmem:[%s7686_s27 + $0x8] sm:$0xf]  ;;  %v3197_v2 = vunpack.c.l.bf16 %v7696_v47  ;;  %v3200_v30 = vunpack.c.l.bf16 %v7705_v36 }
 0x115   : > { %6173 = vmatpush3.bf16.msra.mxu1 %v6613_v32  ;;  %v835_v55 = vpop.f32.mrf.mxu0  ;;  %6150 = vmatprep.subr.bf16.mxu0 %v6614_v44  ;;  %v7702_v32 = vld [vmem:[%s7686_s27 + $0x4] sm:$0x3]  ;;  %v3199_v25 = vunpack.c.l.bf16 %v7699_v48 }
 0x116   : > { %v864_v56 = vadd.f32 %v835_v55, %v7531_v4  ;;  %v7629_v5 = vadd.f32 %v5853_v53, %v866_v50  ;;  %v974_v57 = vpop.f32.mrf.mxu1  ;;  %6174 = vmatprep.subr.bf16.mxu1 %v6615_v26  ;;  %v6619_v4 = vld [vmem:[%s8515_s3 + $0x418] sm:$0xff]   ;;  %v6629_v50 = vld [vmem:[%s8515_s3 + $0x4b0] sm:$0xff]  }
 0x117   : > { %v5832_v59 = vpop.f32.mrf.mxu0  ;;  %6119 = vmatmul.mubr.bf16.gmra.mxu0 %v7611_v33  ;;  %v6630_v53 = vld [vmem:[%s8515_s3 + $0x4f0] sm:$0xff]  }
 0x118   : > { %v869_v63 = vadd.f32 %v5832_v59, %v7538_v10  ;;  %v7642_v0 = vadd.f32 %v974_v57, %v864_v56  ;;  %6151 = vmatpush3.bf16.msra.mxu0 %v6614_v44  ;;  %v5856_v23 = vpop.f32.mrf.mxu1  ;;  %6143 = vmatmul.mubr.bf16.gmra.mxu1 %v5139_v54  ;;  %v6620_v10 = vld [vmem:[%s8515_s3 + $0x458] sm:$0xff]   ;;  %v2883_v44 = vrot.slane %v1792_v40, 2  ;;  %v3031_v57 = vsel %vm696_vm1, %v3029_v41, %v3030_v20 }
 0x119   : > { %6175 = vmatpush3.bf16.msra.mxu1 %v6615_v26  ;;  %v848_v3 = vpop.f32.mrf.mxu0  ;;  %6152 = vmatprep.subr.bf16.mxu0 %v6617_v51  ;;  %v3198_v26 = vunpack.c.l.bf16 %v7702_v32 }
 0x11a   : > { %v867_v7 = vadd.f32 %v848_v3, %v7544_v13  ;;  %v7648_v8 = vadd.f32 %v5856_v23, %v869_v63  ;;  %v987_v9 = vpop.f32.mrf.mxu1  ;;  %6176 = vmatprep.subr.bf16.mxu1 %v6618_v58  ;;  %6162 = vmatprep.mubr.bf16.mxu0 %v7411_v35  ;;  %v3382_v23 = vrot.slane %v3199_v25, 2  ;;  %v3383_v3 = vrot.slane %v3200_v30, 2 }
 0x11b   : > { %v5833_v11 = vpop.f32.mrf.mxu0  ;;  %6186 = vmatprep.mubr.bf16.mxu1 %v7413_v34 }
 0x11c   : > { %v870_v12 = vadd.f32 %v5833_v11, %v7550_v18  ;;  %v7657_v52 = vadd.f32 %v987_v9, %v867_v7  ;;  %6153 = vmatpush3.bf16.msra.mxu0 %v6617_v51  ;;  %v5857_v13 = vpop.f32.mrf.mxu1  ;;  %v6622_v18 = vld [vmem:[%s8515_s3 + $0x450] sm:$0xff]   ;;  %v2884_v51 = vsel %vm416_vm0, %v2882_v37, %v2883_v44 }
 0x11d   : > { %6177 = vmatpush3.bf16.msra.mxu1 %v6618_v58  ;;  %v851_v14 = vpop.f32.mrf.mxu0  ;;  %6154 = vmatprep.subr.bf16.mxu0 %v6619_v4  ;;  %v3379_v58 = vrot.slane %v3197_v2, 2  ;;  %v7784_v44 = vld [vmem:[%s7686_s27 + $0x14] sm:$0x3] }
 0x11e   : > { %v868_v35 = vadd.f32 %v851_v14, %v7555_v61  ;;  %v7663_v15 = vadd.f32 %v5857_v13, %v870_v12  ;;  %v990_v34 = vpop.f32.mrf.mxu1  ;;  %6178 = vmatprep.subr.bf16.mxu1 %v6620_v10  ;;  %v1766_v61 = vld [vmem:[%s7227_s6 + $0x54] sm:$0x3] }
 0x11f   : > { %v1790_v39 = vunpack.c.l.bf16 %v1766_v61  ;;  %v5212_v61 = vcombine.low %v7696_v47, %v7699_v48  ;;  %v3554_v47 = vrot.slane %v3198_v26, 4 }
 0x120   : > { %v7669_v19 = vadd.f32 %v990_v34, %v868_v35  ;;  %6155 = vmatpush3.bf16.msra.mxu0 %v6619_v4  ;;  %v3384_v34 = vsel %vm416_vm0, %v3382_v23, %v3383_v3  ;;  %v7811_v23 = vld [vmem:[%s7686_s27 + $0x28] sm:$0xf]  ;;  %v7817_v3 = vld [vmem:[%s7686_s27 + $0x2c] sm:$0x3] }
 0x121   : > { %6179 = vmatpush3.bf16.msra.mxu1 %v6620_v10  ;;  %6156 = vmatprep.subr.bf16.mxu0 %v6621_v6  ;;  %v2880_v43 = vrot.slane %v1790_v39, 2  ;;  %v3027_v49 = vrot.slane %v1790_v39, 4  ;;  %v6632_v10 = vld [vmem:[%s8515_s3 + $0x4e8] sm:$0xff]   ;;  %v6635_v39 = vld [vmem:[%s8515_s3 + $0x498] sm:$0xff]  }
 0x122   : > { %6180 = vmatprep.subr.bf16.mxu1 %v6622_v18 }
 0x123   : > { %v2881_v54 = vsel %vm416_vm0, %v2879_v45, %v2880_v43  ;;  %v3028_v56 = vsel %vm696_vm1, %v3026_v38, %v3027_v49  ;;  %v7775_v38 = vld [vmem:[%s7686_s27 + $0x10] sm:$0xf]  ;;  %v7787_v49 = vld [vmem:[%s7686_s27 + $0x1c] sm:$0x3] }
 0x124   : > { %6157 = vmatpush3.bf16.msra.mxu0 %v6621_v6  ;;  %v2887_v12 = vpack.c.bf16 %v2884_v51, %v2881_v54  ;;  %v3034_v13 = vpack.c.bf16 %v3031_v57, %v3028_v56  ;;  %v3201_v51 = vunpack.c.l.bf16 %v7775_v38  ;;  %v3202_v57 = vunpack.c.l.bf16 %v7784_v44 }
 0x125   : > { %6181 = vmatpush3.bf16.msra.mxu1 %v6622_v18  ;;  %6158 = vmatprep.subr.bf16.mxu0 %v6623_v60  ;;  %v6633_v18 = vld [vmem:[%s8515_s3 + $0x4a0] sm:$0xff]  }
 0x126   : > { %6182 = vmatprep.subr.bf16.mxu1 %v6624_v22 }
 0x128   : > { %6159 = vmatpush3.bf16.msra.mxu0 %v6623_v60 }
 0x129   : > { %6183 = vmatpush3.bf16.msra.mxu1 %v6624_v22  ;;  %6160 = vmatprep.subr.bf16.mxu0 %v6625_v29  ;;  %v6634_v22 = vld [vmem:[%s8515_s3 + $0x4e0] sm:$0xff]  }
 0x12a   : > { %6184 = vmatprep.subr.bf16.mxu1 %v6626_v21 }
 0x12c   : > { %6161 = vmatpush3.bf16.msra.mxu0 %v6625_v29 }
 0x12d   : > { %6185 = vmatpush3.bf16.msra.mxu1 %v6626_v21  ;;  %6194 = vmatprep.subr.bf16.mxu0 %v6627_v46 }
 0x12e   : > { %6218 = vmatprep.subr.bf16.mxu1 %v6628_v42 }
 0x12f   : > { %v5876_v55 = vpop.f32.mrf.mxu0  ;;  %6163 = vmatmul.mubr.bf16.vlgmr.msra.gmra.mxu0 %v7427_v16  ;;  %v3380_v16 = vrot.slane %v3198_v26, 2 }
 0x130   : > { %v1155_v59 = vadd.f32 %v5876_v55, %v7605_v24  ;;  %6187 = vmatmul.mubr.bf16.vlgmr.msra.gmra.mxu1 %v7430_v17  ;;  %6195 = vmatpush3.bf16.msra.mxu0 %v6627_v46  ;;  %v5900_v63 = vpop.f32.mrf.mxu1  ;;  %v6631_v24 = vld [vmem:[%s8515_s3 + $0x4a8] sm:$0xff]   ;;  %v6636_v46 = vld [vmem:[%s8515_s3 + $0x4d8] sm:$0xff]   ;;  %v6638_v55 = vld [vmem:[%s8515_s3 + $0x4d0] sm:$0xff]  }
 0x131   : > { %6219 = vmatpush3.bf16.msra.mxu1 %v6628_v42  ;;  %v1122_v4 = vpop.f32.mrf.mxu0  ;;  %6196 = vmatprep.subr.bf16.mxu0 %v6629_v50  ;;  %v3381_v35 = vsel %vm416_vm0, %v3379_v58, %v3380_v16  ;;  %v3204_v58 = vunpack.c.l.bf16 %v7787_v49  ;;  %v7814_v16 = vld [vmem:[%s7686_s27 + $0x24] sm:$0x3] }
 0x132   : > { %v1153_v17 = vadd.f32 %v1122_v4, %v7621_v1  ;;  %v7739_v7 = vadd.f32 %v5900_v63, %v1155_v59  ;;  %v1269_v9 = vpop.f32.mrf.mxu1  ;;  %6220 = vmatprep.subr.bf16.mxu1 %v6630_v53  ;;  %6166 = vmatprep.mubr.bf16.mxu0 %v7524_v62  ;;  %v3411_v27 = vpack.c.bf16 %v3384_v34, %v3381_v35  ;;  %v7808_v63 = vld [vmem:[%s7686_s27 + $0x20] sm:$0xf]  ;;  %v6640_v4 = vld [vmem:[%s8515_s3 + $0x4c8] sm:$0xff]   ;;  %v7841_v34 = vld [vmem:[%s7686_s27 + $0x30] sm:$0xf] }
 0x133   : > { %v5877_v11 = vpop.f32.mrf.mxu0  ;;  %6190 = vmatprep.mubr.bf16.mxu1 %v7611_v33  ;;  %v6642_v35 = vld [vmem:[%s8515_s3 + $0x4c0] sm:$0xff]  }
 0x134   : > { %v1156_v14 = vadd.f32 %v5877_v11, %v7629_v5  ;;  %v7747_v6 = vadd.f32 %v1269_v9, %v1153_v17  ;;  %6197 = vmatpush3.bf16.msra.mxu0 %v6629_v50  ;;  %v5901_v1 = vpop.f32.mrf.mxu1  ;;  %v6637_v50 = vld [vmem:[%s8515_s3 + $0x490] sm:$0xff]   ;;  %v3386_v9 = vrot.slane %v3202_v57, 2  ;;  %v3205_v11 = vunpack.c.l.bf16 %v7808_v63 }
 0x135   : > { %6221 = vmatpush3.bf16.msra.mxu1 %v6630_v53  ;;  %v1125_v62 = vpop.f32.mrf.mxu0  ;;  %6198 = vmatprep.subr.bf16.mxu0 %v6631_v24 }
 0x136   : > { %v1154_v33 = vadd.f32 %v1125_v62, %v7642_v0  ;;  %v7755_v60 = vadd.f32 %v5901_v1, %v1156_v14  ;;  %v1272_v5 = vpop.f32.mrf.mxu1  ;;  %6222 = vmatprep.subr.bf16.mxu1 %v6632_v10  ;;  %v3208_v14 = vunpack.c.l.bf16 %v7817_v3  ;;  %v6641_v1 = vld [vmem:[%s8515_s3 + $0x480] sm:$0xff]   ;;  %v7844_v62 = vld [vmem:[%s7686_s27 + $0x38] sm:$0xf] }
 0x137   : > { %v5880_v28 = vpop.f32.mrf.mxu0  ;;  %6167 = vmatmul.mubr.bf16.gmra.mxu0 %v2887_v12  ;;  %v3207_v12 = vunpack.c.l.bf16 %v7811_v23 }
 0x138   : > { %v1159_v29 = vadd.f32 %v5880_v28, %v7648_v8  ;;  %v7763_v31 = vadd.f32 %v1272_v5, %v1154_v33  ;;  %6199 = vmatpush3.bf16.msra.mxu0 %v6631_v24  ;;  %v5904_v0 = vpop.f32.mrf.mxu1  ;;  %6191 = vmatmul.mubr.bf16.gmra.mxu1 %v3034_v13  ;;  %v3385_v24 = vrot.slane %v3201_v51, 2  ;;  %v3206_v13 = vunpack.c.l.bf16 %v7814_v16  ;;  %v7850_v33 = vld [vmem:[%s7686_s27 + $0x3c] sm:$0x3] }
 0x139   : > { %6223 = vmatpush3.bf16.msra.mxu1 %v6632_v10  ;;  %v1138_v21 = vpop.f32.mrf.mxu0  ;;  %6200 = vmatprep.subr.bf16.mxu0 %v6633_v18  ;;  %v3389_v10 = vrot.slane %v3204_v58, 2  ;;  %v3394_v28 = vrot.slane %v3207_v12, 2  ;;  %v3568_v44 = vrot.slane %v3207_v12, 4 }
 0x13a   : > { %v1157_v40 = vadd.f32 %v1138_v21, %v7657_v52  ;;  %v7769_v45 = vadd.f32 %v5904_v0, %v1159_v29  ;;  %v1285_v8 = vpop.f32.mrf.mxu1  ;;  %6224 = vmatprep.subr.bf16.mxu1 %v6634_v22  ;;  %6210 = vmatprep.mubr.bf16.mxu0 %v5212_v61  ;;  %v7781_v52 = vld [vmem:[%s7686_s27 + $0x18] sm:$0xf]  ;;  %v3387_v5 = vsel %vm416_vm0, %v3385_v24, %v3386_v9  ;;  %v3391_v61 = vrot.slane %v3205_v11, 2  ;;  %v6648_v24 = vld [vmem:[%s8515_s3 + $0x570] sm:$0xff]  }
 0x13b   : > { %v5881_v37 = vpop.f32.mrf.mxu0  ;;  %6234 = vmatprep.mubr.bf16.mxu1 %v3411_v27  ;;  %v3203_v56 = vunpack.c.l.bf16 %v7781_v52  ;;  %v3392_v27 = vrot.slane %v3206_v13, 2  ;;  %v3395_v29 = vrot.slane %v3208_v14, 2  ;;  %v6645_v0 = vld [vmem:[%s8515_s3 + $0x538] sm:$0xff]   ;;  %v3209_v21 = vunpack.c.l.bf16 %v7841_v34 }
 0x13c   : > { %v1160_v41 = vadd.f32 %v5881_v37, %v7663_v15  ;;  %v7778_v42 = vadd.f32 %v1285_v8, %v1157_v40  ;;  %6201 = vmatpush3.bf16.msra.mxu0 %v6633_v18  ;;  %v5905_v43 = vpop.f32.mrf.mxu1  ;;  %v7847_v18 = vld [vmem:[%s7686_s27 + $0x34] sm:$0x3]  ;;  %v3212_v8 = vunpack.c.l.bf16 %v7850_v33  ;;  %v7874_v37 = vcombine.low %v7775_v38, %v7781_v52  ;;  %v6662_v38 = vld [vmem:[%s8515_s3 + $0x540] sm:$0xff]  }
 0x13d   : > { %6225 = vmatpush3.bf16.msra.mxu1 %v6634_v22  ;;  %v1141_v20 = vpop.f32.mrf.mxu0  ;;  %6202 = vmatprep.subr.bf16.mxu0 %v6635_v39  ;;  %v3388_v17 = vrot.slane %v3203_v56, 2  ;;  %v3210_v40 = vunpack.c.l.bf16 %v7847_v18  ;;  %v3556_v9 = vrot.slane %v3199_v25, 4  ;;  %v6651_v25 = vld [vmem:[%s8515_s3 + $0x528] sm:$0xff]   ;;  %v3565_v52 = vrot.slane %v3205_v11, 4 }
 0x13e   : > { %v1158_v15 = vadd.f32 %v1141_v20, %v7669_v19  ;;  %v7793_v53 = vadd.f32 %v5905_v43, %v1160_v41  ;;  %v1288_v54 = vpop.f32.mrf.mxu1  ;;  %6226 = vmatprep.subr.bf16.mxu1 %v6636_v46  ;;  %v6639_v19 = vld [vmem:[%s8515_s3 + $0x488] sm:$0xff]   ;;  %v3393_v43 = vsel %vm416_vm0, %v3391_v61, %v3392_v27  ;;  %v3396_v20 = vsel %vm416_vm0, %v3394_v28, %v3395_v29 }
 0x13f   : > { %v3390_v22 = vsel %vm416_vm0, %v3388_v17, %v3389_v10  ;;  %v7898_v17 = vcombine.low %v7808_v63, %v7811_v23  ;;  %v7925_v28 = vcombine.low %v7841_v34, %v7844_v62  ;;  %v3566_v49 = vrot.slane %v3206_v13, 4  ;;  %v6664_v63 = vld [vmem:[%s8515_s3 + $0x5f8] sm:$0xff]   ;;  %v6666_v34 = vld [vmem:[%s8515_s3 + $0x5f0] sm:$0xff]  }
 0x140   : > { %v7802_v59 = vadd.f32 %v1288_v54, %v1158_v15  ;;  %6203 = vmatpush3.bf16.msra.mxu0 %v6635_v39  ;;  %v3211_v39 = vunpack.c.l.bf16 %v7844_v62  ;;  %v7876_v41 = vpack.c.bf16 %v3390_v22, %v3387_v5  ;;  %v3397_v15 = vrot.slane %v3209_v21, 2 }
 0x141   : > { %6227 = vmatpush3.bf16.msra.mxu1 %v6636_v46  ;;  %6204 = vmatprep.subr.bf16.mxu0 %v6637_v50  ;;  %v6646_v46 = vld [vmem:[%s8515_s3 + $0x578] sm:$0xff]   ;;  %v3567_v16 = vsel %vm696_vm1, %v3565_v52, %v3566_v49  ;;  %v3571_v11 = vrot.slane %v3209_v21, 4  ;;  %v3572_v13 = vrot.slane %v3210_v40, 4 }
 0x142   : > { %6228 = vmatprep.subr.bf16.mxu1 %v6638_v55  ;;  %v3400_v54 = vrot.slane %v3211_v39, 2  ;;  %v3574_v12 = vrot.slane %v3211_v39, 4 }
 0x143   : > { %v3573_v39 = vsel %vm696_vm1, %v3571_v11, %v3572_v13 }
 0x144   : > { %6205 = vmatpush3.bf16.msra.mxu0 %v6637_v50  ;;  %v6647_v50 = vld [vmem:[%s8515_s3 + $0x530] sm:$0xff]  }
 0x145   : > { %6229 = vmatpush3.bf16.msra.mxu1 %v6638_v55  ;;  %6206 = vmatprep.subr.bf16.mxu0 %v6639_v19  ;;  %v3398_v55 = vrot.slane %v3210_v40, 2 }
 0x146   : > { %6230 = vmatprep.subr.bf16.mxu1 %v6640_v4 }
 0x147   : > { %v3399_v22 = vsel %vm416_vm0, %v3397_v15, %v3398_v55  ;;  %v6653_v15 = vld [vmem:[%s8515_s3 + $0x520] sm:$0xff]  }
 0x148   : > { %6207 = vmatpush3.bf16.msra.mxu0 %v6639_v19  ;;  %v3401_v19 = vrot.slane %v3212_v8, 2 }
 0x149   : > { %6231 = vmatpush3.bf16.msra.mxu1 %v6640_v4  ;;  %6208 = vmatprep.subr.bf16.mxu0 %v6641_v1  ;;  %v3553_v4 = vrot.slane %v3197_v2, 4  ;;  %v3557_v2 = vrot.slane %v3200_v30, 4 }
 0x14a   : > { %6232 = vmatprep.subr.bf16.mxu1 %v6642_v35  ;;  %v3402_v32 = vsel %vm416_vm0, %v3400_v54, %v3401_v19 }
 0x14b   : > { %v3555_v27 = vsel %vm696_vm1, %v3553_v4, %v3554_v47  ;;  %v6655_v47 = vld [vmem:[%s8515_s3 + $0x518] sm:$0xff]  }
 0x14c   : > { %6209 = vmatpush3.bf16.msra.mxu0 %v6641_v1  ;;  %v7903_v1 = vpack.c.bf16 %v3396_v20, %v3393_v43  ;;  %v7933_v43 = vpack.c.bf16 %v3402_v32, %v3399_v22 }
 0x14d   : > { %6233 = vmatpush3.bf16.msra.mxu1 %v6642_v35  ;;  %6242 = vmatprep.subr.bf16.mxu0 %v6645_v0 }
 0x14e   : > { %6266 = vmatprep.subr.bf16.mxu1 %v6646_v46 }
 0x14f   : > { %v5924_v10 = vpop.f32.mrf.mxu0  ;;  %6211 = vmatmul.mubr.bf16.vlgmr.msra.gmra.mxu0 %v7874_v37 }
 0x150   : > { %v1441_v35 = vadd.f32 %v5924_v10, %v7739_v7  ;;  %6235 = vmatmul.mubr.bf16.vlgmr.msra.gmra.mxu1 %v7876_v41  ;;  %6243 = vmatpush3.bf16.msra.mxu0 %v6645_v0  ;;  %v5948_v5 = vpop.f32.mrf.mxu1  ;;  %v6652_v7 = vld [vmem:[%s8515_s3 + $0x568] sm:$0xff]  }
 0x151   : > { %6267 = vmatpush3.bf16.msra.mxu1 %v6646_v46  ;;  %v1408_v48 = vpop.f32.mrf.mxu0  ;;  %6244 = vmatprep.subr.bf16.mxu0 %v6647_v50 }
 0x152   : > { %v1439_v36 = vadd.f32 %v1408_v48, %v7747_v6  ;;  %v7917_v26 = vadd.f32 %v5948_v5, %v1441_v35  ;;  %v1559_v30 = vpop.f32.mrf.mxu1  ;;  %6268 = vmatprep.subr.bf16.mxu1 %v6648_v24  ;;  %6214 = vmatprep.mubr.bf16.mxu0 %v7898_v17  ;;  %v3558_v6 = vsel %vm696_vm1, %v3556_v9, %v3557_v2 }
 0x153   : > { %v5925_v61 = vpop.f32.mrf.mxu0  ;;  %6238 = vmatprep.mubr.bf16.mxu1 %v7903_v1 }
 0x154   : > { %v1442_v29 = vadd.f32 %v5925_v61, %v7755_v60  ;;  %v7931_v0 = vadd.f32 %v1559_v30, %v1439_v36  ;;  %6245 = vmatpush3.bf16.msra.mxu0 %v6647_v50  ;;  %v5949_v46 = vpop.f32.mrf.mxu1  ;;  %v6654_v60 = vld [vmem:[%s8515_s3 + $0x560] sm:$0xff]   ;;  %v3585_v50 = vpack.c.bf16 %v3558_v6, %v3555_v27  ;;  %v6657_v36 = vld [vmem:[%s8515_s3 + $0x510] sm:$0xff]   ;;  %v6659_v27 = vld [vmem:[%s8515_s3 + $0x508] sm:$0xff]   ;;  %v3559_v6 = vrot.slane %v3201_v51, 4 }
 0x155   : > { %6269 = vmatpush3.bf16.msra.mxu1 %v6648_v24  ;;  %v1411_v20 = vpop.f32.mrf.mxu0  ;;  %6246 = vmatprep.subr.bf16.mxu0 %v6651_v25  ;;  %v3569_v51 = vrot.slane %v3208_v14, 4  ;;  %v3575_v14 = vrot.slane %v3212_v8, 4 }
 0x156   : > { %v1440_v54 = vadd.f32 %v1411_v20, %v7763_v31  ;;  %v7939_v55 = vadd.f32 %v5949_v46, %v1442_v29  ;;  %v1562_v19 = vpop.f32.mrf.mxu1  ;;  %6270 = vmatprep.subr.bf16.mxu1 %v6652_v7  ;;  %v3562_v29 = vrot.slane %v3203_v56, 4  ;;  %v3560_v46 = vrot.slane %v3202_v57, 4 }
 0x157   : > { %v5928_v4 = vpop.f32.mrf.mxu0  ;;  %6215 = vmatmul.mubr.bf16.gmra.mxu0 %v7925_v28  ;;  %v3563_v20 = vrot.slane %v3204_v58, 4  ;;  %v6663_v58 = vld [vmem:[%s8515_s3 + $0x5b8] sm:$0xff]   ;;  %v3570_v3 = vsel %vm696_vm1, %v3568_v44, %v3569_v51  ;;  %v3576_v40 = vsel %vm696_vm1, %v3574_v12, %v3575_v14  ;;  %v6674_v44 = vld [vmem:[%s8515_s3 + $0x590] sm:$0xff]  }
 0x158   : > { %v1445_v24 = vadd.f32 %v5928_v4, %v7769_v45  ;;  %v7946_v9 = vadd.f32 %v1562_v19, %v1440_v54  ;;  %6247 = vmatpush3.bf16.msra.mxu0 %v6651_v25  ;;  %v5952_v10 = vpop.f32.mrf.mxu1  ;;  %6239 = vmatmul.mubr.bf16.gmra.mxu1 %v7933_v43  ;;  %v6656_v45 = vld [vmem:[%s8515_s3 + $0x558] sm:$0xff]   ;;  %v3561_v56 = vsel %vm696_vm1, %v3559_v6, %v3560_v46  ;;  %v6665_v54 = vld [vmem:[%s8515_s3 + $0x5b0] sm:$0xff]   ;;  %v6667_v19 = vld [vmem:[%s8515_s3 + $0x5a8] sm:$0xff]  }
 0x159   : > { %6271 = vmatpush3.bf16.msra.mxu1 %v6652_v7  ;;  %v1424_v31 = vpop.f32.mrf.mxu0  ;;  %6248 = vmatprep.subr.bf16.mxu0 %v6653_v15  ;;  %v3564_v57 = vsel %vm696_vm1, %v3562_v29, %v3563_v20  ;;  %v8027_v62 = vpack.c.bf16 %v3570_v3, %v3567_v16  ;;  %v6679_v16 = vld [vmem:[%s8515_s3 + $0x5c0] sm:$0xff]   ;;  %v6680_v14 = vld [vmem:[%s8515_s3 + $0x638] sm:$0xff]  }
 0x15a   : > { %v1443_v2 = vadd.f32 %v1424_v31, %v7778_v42  ;;  %v7953_v35 = vadd.f32 %v5952_v10, %v1445_v24  ;;  %v1575_v5 = vpop.f32.mrf.mxu1  ;;  %6272 = vmatprep.subr.bf16.mxu1 %v6654_v60  ;;  %6258 = vmatprep.mubr.bf16.mxu0 %v3585_v50  ;;  %v8009_v23 = vpack.c.bf16 %v3564_v57, %v3561_v56  ;;  %v8041_v50 = vld [vmem:[%s7686_s27 + $0x48] sm:$0xf] }
 0x15b   : > { %v5929_v48 = vpop.f32.mrf.mxu0  ;;  %6282 = vmatprep.mubr.bf16.mxu1 %v7874_v37  ;;  %v6668_v10 = vld [vmem:[%s8515_s3 + $0x5e8] sm:$0xff]   ;;  %v3215_v11 = vunpack.c.l.bf16 %v8041_v50 }
 0x15c   : > { %v1446_v25 = vadd.f32 %v5929_v48, %v7793_v53  ;;  %v7960_v22 = vadd.f32 %v1575_v5, %v1443_v2  ;;  %6249 = vmatpush3.bf16.msra.mxu0 %v6653_v15  ;;  %v5953_v32 = vpop.f32.mrf.mxu1  ;;  %v6658_v53 = vld [vmem:[%s8515_s3 + $0x550] sm:$0xff]   ;;  %v6661_v15 = vld [vmem:[%s8515_s3 + $0x500] sm:$0xff]   ;;  %v6676_v57 = vld [vmem:[%s8515_s3 + $0x588] sm:$0xff]  }
 0x15d   : > { %6273 = vmatpush3.bf16.msra.mxu1 %v6654_v60  ;;  %v1427_v42 = vpop.f32.mrf.mxu0  ;;  %6250 = vmatprep.subr.bf16.mxu0 %v6655_v47  ;;  %v8038_v60 = vld [vmem:[%s7686_s27 + $0x40] sm:$0xf] }
 0x15e   : > { %v1444_v30 = vadd.f32 %v1427_v42, %v7802_v59  ;;  %v7966_v7 = vadd.f32 %v5953_v32, %v1446_v25  ;;  %v1578_v61 = vpop.f32.mrf.mxu1  ;;  %6274 = vmatprep.subr.bf16.mxu1 %v6656_v45  ;;  %v6660_v59 = vld [vmem:[%s8515_s3 + $0x548] sm:$0xff]   ;;  %v6670_v25 = vld [vmem:[%s8515_s3 + $0x5a0] sm:$0xff]   ;;  %v3213_v3 = vunpack.c.l.bf16 %v8038_v60 }
 0x160   : > { %v7971_v37 = vadd.f32 %v1578_v61, %v1444_v30  ;;  %6251 = vmatpush3.bf16.msra.mxu0 %v6655_v47  ;;  %v8050_v47 = vpack.c.bf16 %v3576_v40, %v3573_v39  ;;  %v4017_v39 = vrot.slane %v3213_v3, 4  ;;  %v4020_v40 = vrot.slane %v3215_v11, 4 }
 0x161   : > { %6275 = vmatpush3.bf16.msra.mxu1 %v6656_v45  ;;  %6252 = vmatprep.subr.bf16.mxu0 %v6657_v36  ;;  %v8058_v45 = vcombine.low %v8038_v60, %v8041_v50  ;;  %v6683_v50 = vld [vmem:[%s8515_s3 + $0x670] sm:$0xff]  }
 0x162   : > { %6276 = vmatprep.subr.bf16.mxu1 %v6658_v53 }
 0x164   : > { %6253 = vmatpush3.bf16.msra.mxu0 %v6657_v36  ;;  %v6671_v36 = vld [vmem:[%s8515_s3 + $0x5e0] sm:$0xff]  }
 0x165   : > { %6277 = vmatpush3.bf16.msra.mxu1 %v6658_v53  ;;  %6254 = vmatprep.subr.bf16.mxu0 %v6659_v27 }
 0x166   : > { %6278 = vmatprep.subr.bf16.mxu1 %v6660_v59 }
 0x168   : > { %6255 = vmatpush3.bf16.msra.mxu0 %v6659_v27 }
 0x169   : > { %6279 = vmatpush3.bf16.msra.mxu1 %v6660_v59  ;;  %6256 = vmatprep.subr.bf16.mxu0 %v6661_v15  ;;  %v6672_v59 = vld [vmem:[%s8515_s3 + $0x598] sm:$0xff]  }
 0x16a   : > { %6280 = vmatprep.subr.bf16.mxu1 %v6662_v38 }
 0x16c   : > { %6257 = vmatpush3.bf16.msra.mxu0 %v6661_v15 }
 0x16d   : > { %6281 = vmatpush3.bf16.msra.mxu1 %v6662_v38  ;;  %6290 = vmatprep.subr.bf16.mxu0 %v6663_v58 }
 0x16e   : > { %6314 = vmatprep.subr.bf16.mxu1 %v6664_v63 }
 0x16f   : > { %v5972_v18 = vpop.f32.mrf.mxu0  ;;  %6259 = vmatmul.mubr.bf16.vlgmr.msra.gmra.mxu0 %v8009_v23 }
 0x170   : > { %v1739_v33 = vadd.f32 %v5972_v18, %v7917_v26  ;;  %6283 = vmatmul.mubr.bf16.vlgmr.msra.gmra.mxu1 %v7898_v17  ;;  %6291 = vmatpush3.bf16.msra.mxu0 %v6663_v58  ;;  %v5996_v21 = vpop.f32.mrf.mxu1  ;;  %v6678_v58 = vld [vmem:[%s8515_s3 + $0x580] sm:$0xff]   ;;  %v3873_v18 = vrot.slane %v3215_v11, 2  ;;  %v6690_v11 = vld [vmem:[%s8515_s3 + $0x610] sm:$0xff]  }
 0x171   : > { %6315 = vmatpush3.bf16.msra.mxu1 %v6664_v63  ;;  %v1706_v8 = vpop.f32.mrf.mxu0  ;;  %6292 = vmatprep.subr.bf16.mxu0 %v6665_v54  ;;  %v3190_v63 = vld [vmem:[%s7686_s27 + $0x44] sm:$0x3] }
 0x172   : > { %v1737_v26 = vadd.f32 %v1706_v8, %v7931_v0  ;;  %v8044_v4 = vadd.f32 %v5996_v21, %v1739_v33  ;;  %v1896_v24 = vpop.f32.mrf.mxu1  ;;  %6316 = vmatprep.subr.bf16.mxu1 %v6666_v34  ;;  %6262 = vmatprep.mubr.bf16.mxu0 %v8027_v62  ;;  %v3214_v12 = vunpack.c.l.bf16 %v3190_v63  ;;  %v6682_v8 = vld [vmem:[%s8515_s3 + $0x630] sm:$0xff]  }
 0x173   : > { %v5973_v31 = vpop.f32.mrf.mxu0  ;;  %6286 = vmatprep.mubr.bf16.mxu1 %v7925_v28 }
 0x174   : > { %v1740_v2 = vadd.f32 %v5973_v31, %v7939_v55  ;;  %v8054_v5 = vadd.f32 %v1896_v24, %v1737_v26  ;;  %6293 = vmatpush3.bf16.msra.mxu0 %v6665_v54  ;;  %v5997_v0 = vpop.f32.mrf.mxu1  ;;  %v6681_v54 = vld [vmem:[%s8515_s3 + $0x678] sm:$0xff]   ;;  %v3871_v33 = vrot.slane %v3214_v12, 2 }
 0x175   : > { %6317 = vmatpush3.bf16.msra.mxu1 %v6666_v34  ;;  %v1709_v48 = vpop.f32.mrf.mxu0  ;;  %6294 = vmatprep.subr.bf16.mxu0 %v6667_v19  ;;  %v3870_v34 = vrot.slane %v3213_v3, 2 }
 0x176   : > { %v1738_v32 = vadd.f32 %v1709_v48, %v7946_v9  ;;  %v8064_v42 = vadd.f32 %v5997_v0, %v1740_v2  ;;  %v1899_v55 = vpop.f32.mrf.mxu1  ;;  %6318 = vmatprep.subr.bf16.mxu1 %v6668_v10  ;;  %v6684_v48 = vld [vmem:[%s8515_s3 + $0x628] sm:$0xff]  }
 0x177   : > { %v5976_v30 = vpop.f32.mrf.mxu0  ;;  %6263 = vmatmul.mubr.bf16.gmra.mxu0 %v8050_v47  ;;  %v3872_v31 = vsel %vm416_vm0, %v3870_v34, %v3871_v33  ;;  %v6695_v34 = vld [vmem:[%s8515_s3 + $0x640] sm:$0xff]   ;;  %v8207_v33 = vld [vmem:[%s7686_s27 + $0x58] sm:$0xf] }
 0x178   : > { %v1743_v61 = vadd.f32 %v5976_v30, %v7953_v35  ;;  %v8071_v53 = vadd.f32 %v1899_v55, %v1738_v32  ;;  %6295 = vmatpush3.bf16.msra.mxu0 %v6667_v19  ;;  %v6000_v27 = vpop.f32.mrf.mxu1  ;;  %6287 = vmatmul.mubr.bf16.gmra.mxu1 %v8058_v45  ;;  %v6673_v35 = vld [vmem:[%s8515_s3 + $0x5d8] sm:$0xff]   ;;  %v4018_v19 = vrot.slane %v3214_v12, 4  ;;  %v6685_v30 = vld [vmem:[%s8515_s3 + $0x668] sm:$0xff]  }
 0x179   : > { %6319 = vmatpush3.bf16.msra.mxu1 %v6668_v10  ;;  %v1722_v9 = vpop.f32.mrf.mxu0  ;;  %6296 = vmatprep.subr.bf16.mxu0 %v6670_v25 }
 0x17a   : > { %v1741_v6 = vadd.f32 %v1722_v9, %v7960_v22  ;;  %v8078_v29 = vadd.f32 %v6000_v27, %v1743_v61  ;;  %v1912_v46 = vpop.f32.mrf.mxu1  ;;  %6320 = vmatprep.subr.bf16.mxu1 %v6671_v36  ;;  %6306 = vmatprep.mubr.bf16.mxu0 %v7876_v41 }
 0x17b   : > { %v5977_v20 = vpop.f32.mrf.mxu0  ;;  %6330 = vmatprep.mubr.bf16.mxu1 %v8009_v23  ;;  %v3192_v23 = vld [vmem:[%s7686_s27 + $0x4c] sm:$0x3] }
 0x17c   : > { %v1744_v15 = vadd.f32 %v5977_v20, %v7966_v7  ;;  %v8086_v38 = vadd.f32 %v1912_v46, %v1741_v6  ;;  %6297 = vmatpush3.bf16.msra.mxu0 %v6670_v25  ;;  %v6001_v52 = vpop.f32.mrf.mxu1  ;;  %v6675_v7 = vld [vmem:[%s8515_s3 + $0x5d0] sm:$0xff]   ;;  %v3216_v13 = vunpack.c.l.bf16 %v3192_v23  ;;  %v4019_v25 = vsel %vm696_vm1, %v4017_v39, %v4018_v19  ;;  %v8213_v39 = vld [vmem:[%s7686_s27 + $0x5c] sm:$0x3] }
 0x17d   : > { %6321 = vmatpush3.bf16.msra.mxu1 %v6671_v36  ;;  %v1725_v22 = vpop.f32.mrf.mxu0  ;;  %6298 = vmatprep.subr.bf16.mxu0 %v6672_v59  ;;  %v3219_v19 = vunpack.c.l.bf16 %v8207_v33 }
 0x17e   : > { %v1742_v49 = vadd.f32 %v1725_v22, %v7971_v37  ;;  %v8092_v41 = vadd.f32 %v6001_v52, %v1744_v15  ;;  %v1915_v51 = vpop.f32.mrf.mxu1  ;;  %6322 = vmatprep.subr.bf16.mxu1 %v6673_v35  ;;  %v6677_v37 = vld [vmem:[%s8515_s3 + $0x5c8] sm:$0xff]   ;;  %v3874_v21 = vrot.slane %v3216_v13, 2  ;;  %v4021_v60 = vrot.slane %v3216_v13, 4 }
 0x180   : > { %v8097_v56 = vadd.f32 %v1915_v51, %v1742_v49  ;;  %6299 = vmatpush3.bf16.msra.mxu0 %v6672_v59  ;;  %v3875_v2 = vsel %vm416_vm0, %v3873_v18, %v3874_v21  ;;  %v4022_v32 = vsel %vm696_vm1, %v4020_v40, %v4021_v60  ;;  %v8204_v18 = vld [vmem:[%s7686_s27 + $0x50] sm:$0xf]  ;;  %v8210_v21 = vld [vmem:[%s7686_s27 + $0x54] sm:$0x3]  ;;  %v6696_v40 = vld [vmem:[%s8515_s3 + $0x6b8] sm:$0xff]  }
 0x181   : > { %6323 = vmatpush3.bf16.msra.mxu1 %v6673_v35  ;;  %6300 = vmatprep.subr.bf16.mxu0 %v6674_v44  ;;  %v8144_v27 = vpack.c.bf16 %v3875_v2, %v3872_v31  ;;  %v8150_v6 = vpack.c.bf16 %v4022_v32, %v4019_v25  ;;  %v6686_v35 = vld [vmem:[%s8515_s3 + $0x620] sm:$0xff]   ;;  %v3218_v60 = vunpack.c.l.bf16 %v8210_v21 }
 0x182   : > { %6324 = vmatprep.subr.bf16.mxu1 %v6675_v7 }
 0x183   : > { %v4308_v31 = vrot.slane %v3218_v60, 2 }
 0x184   : > { %6301 = vmatpush3.bf16.msra.mxu0 %v6674_v44 }
 0x185   : > { %6325 = vmatpush3.bf16.msra.mxu1 %v6675_v7  ;;  %6302 = vmatprep.subr.bf16.mxu0 %v6676_v57  ;;  %v6688_v7 = vld [vmem:[%s8515_s3 + $0x618] sm:$0xff]  }
 0x186   : > { %6326 = vmatprep.subr.bf16.mxu1 %v6677_v37 }
 0x188   : > { %6303 = vmatpush3.bf16.msra.mxu0 %v6676_v57 }
 0x189   : > { %6327 = vmatpush3.bf16.msra.mxu1 %v6677_v37  ;;  %6304 = vmatprep.subr.bf16.mxu0 %v6678_v58 }
 0x18a   : > { %6328 = vmatprep.subr.bf16.mxu1 %v6679_v16 }
 0x18c   : > { %6305 = vmatpush3.bf16.msra.mxu0 %v6678_v58 }
 0x18d   : > { %6329 = vmatpush3.bf16.msra.mxu1 %v6679_v16  ;;  %6338 = vmatprep.subr.bf16.mxu0 %v6680_v14 }
 0x18e   : > { %6362 = vmatprep.subr.bf16.mxu1 %v6681_v54 }
 0x18f   : > { %v6020_v26 = vpop.f32.mrf.mxu0  ;;  %6307 = vmatmul.mubr.bf16.vlgmr.msra.gmra.mxu0 %v7903_v1 }
 0x190   : > { %v2119_v24 = vadd.f32 %v6020_v26, %v8044_v4  ;;  %6331 = vmatmul.mubr.bf16.vlgmr.msra.gmra.mxu1 %v8027_v62  ;;  %6339 = vmatpush3.bf16.msra.mxu0 %v6680_v14  ;;  %v6044_v10 = vpop.f32.mrf.mxu1  ;;  %v6693_v14 = vld [vmem:[%s8515_s3 + $0x648] sm:$0xff]   ;;  %v6697_v26 = vld [vmem:[%s8515_s3 + $0x6b0] sm:$0xff]  }
 0x191   : > { %6363 = vmatpush3.bf16.msra.mxu1 %v6681_v54  ;;  %v2086_v0 = vpop.f32.mrf.mxu0  ;;  %6340 = vmatprep.subr.bf16.mxu0 %v6682_v8  ;;  %v6694_v54 = vld [vmem:[%s8515_s3 + $0x600] sm:$0xff]  }
 0x192   : > { %v2117_v4 = vadd.f32 %v2086_v0, %v8054_v5  ;;  %v8138_v55 = vadd.f32 %v6044_v10, %v2119_v24  ;;  %v2260_v36 = vpop.f32.mrf.mxu1  ;;  %6364 = vmatprep.subr.bf16.mxu1 %v6683_v50  ;;  %6310 = vmatprep.mubr.bf16.mxu0 %v7933_v43  ;;  %v4310_v10 = vrot.slane %v3219_v19, 2 }
 0x193   : > { %v6021_v61 = vpop.f32.mrf.mxu0  ;;  %6334 = vmatprep.mubr.bf16.mxu1 %v8050_v47 }
 0x194   : > { %v2120_v9 = vadd.f32 %v6021_v61, %v8064_v42  ;;  %v8148_v59 = vadd.f32 %v2260_v36, %v2117_v4  ;;  %6341 = vmatpush3.bf16.msra.mxu0 %v6682_v8  ;;  %v6045_v5 = vpop.f32.mrf.mxu1  ;;  %v6687_v42 = vld [vmem:[%s8515_s3 + $0x660] sm:$0xff]   ;;  %v3217_v8 = vunpack.c.l.bf16 %v8204_v18  ;;  %v6699_v4 = vld [vmem:[%s8515_s3 + $0x6a8] sm:$0xff]  }
 0x195   : > { %6365 = vmatpush3.bf16.msra.mxu1 %v6683_v50  ;;  %v2089_v46 = vpop.f32.mrf.mxu0  ;;  %6342 = vmatprep.subr.bf16.mxu0 %v6684_v48  ;;  %v3220_v50 = vunpack.c.l.bf16 %v8213_v39 }
 0x196   : > { %v2118_v20 = vadd.f32 %v2089_v46, %v8071_v53  ;;  %v8156_v15 = vadd.f32 %v6045_v5, %v2120_v9  ;;  %v2263_v52 = vpop.f32.mrf.mxu1  ;;  %6366 = vmatprep.subr.bf16.mxu1 %v6685_v30  ;;  %v4307_v24 = vrot.slane %v3217_v8, 2  ;;  %v5361_v9 = vcombine.low %v8204_v18, %v8207_v33 }
 0x197   : > { %v6024_v22 = vpop.f32.mrf.mxu0  ;;  %6311 = vmatmul.mubr.bf16.gmra.mxu0 %v8144_v27  ;;  %v4311_v2 = vrot.slane %v3220_v50, 2 }
 0x198   : > { %v2123_v44 = vadd.f32 %v6024_v22, %v8078_v29  ;;  %v8163_v49 = vadd.f32 %v2263_v52, %v2118_v20  ;;  %6343 = vmatpush3.bf16.msra.mxu0 %v6684_v48  ;;  %v6048_v51 = vpop.f32.mrf.mxu1  ;;  %6335 = vmatmul.mubr.bf16.gmra.mxu1 %v8150_v6  ;;  %v6689_v29 = vld [vmem:[%s8515_s3 + $0x658] sm:$0xff]   ;;  %v4309_v36 = vsel %vm416_vm0, %v4307_v24, %v4308_v31 }
 0x199   : > { %6367 = vmatpush3.bf16.msra.mxu1 %v6685_v30  ;;  %v2102_v53 = vpop.f32.mrf.mxu0  ;;  %6344 = vmatprep.subr.bf16.mxu0 %v6686_v35  ;;  %v4312_v30 = vsel %vm416_vm0, %v4310_v10, %v4311_v2 }
 0x19a   : > { %v2121_v57 = vadd.f32 %v2102_v53, %v8086_v38  ;;  %v8170_v37 = vadd.f32 %v6048_v51, %v2123_v44  ;;  %v2276_v58 = vpop.f32.mrf.mxu1  ;;  %6368 = vmatprep.subr.bf16.mxu1 %v6687_v42  ;;  %6354 = vmatprep.mubr.bf16.mxu0 %v7898_v17  ;;  %v4315_v20 = vpack.c.bf16 %v4312_v30, %v4309_v36 }
 0x19b   : > { %v6025_v63 = vpop.f32.mrf.mxu0  ;;  %6378 = vmatprep.mubr.bf16.mxu1 %v7903_v1  ;;  %v6691_v1 = vld [vmem:[%s8515_s3 + $0x650] sm:$0xff]  }
 0x19c   : > { %v2124_v23 = vadd.f32 %v6025_v63, %v8092_v41  ;;  %v8178_v16 = vadd.f32 %v2276_v58, %v2121_v57  ;;  %6345 = vmatpush3.bf16.msra.mxu0 %v6686_v35  ;;  %v6049_v3 = vpop.f32.mrf.mxu1 }
 0x19d   : > { %6369 = vmatpush3.bf16.msra.mxu1 %v6687_v42  ;;  %v2105_v38 = vpop.f32.mrf.mxu0  ;;  %6346 = vmatprep.subr.bf16.mxu0 %v6688_v7 }
 0x19e   : > { %v2122_v12 = vadd.f32 %v2105_v38, %v8097_v56  ;;  %v8184_v13 = vadd.f32 %v6049_v3, %v2124_v23  ;;  %v2279_v17 = vpop.f32.mrf.mxu1  ;;  %6370 = vmatprep.subr.bf16.mxu1 %v6689_v29  ;;  %v6692_v56 = vld [vmem:[%s8515_s3 + $0x608] sm:$0xff]  }
 0x1a0   : > { %v8189_v41 = vadd.f32 %v2279_v17, %v2122_v12  ;;  %6347 = vmatpush3.bf16.msra.mxu0 %v6688_v7  ;;  %v4457_v17 = vrot.slane %v3219_v19, 4 }
 0x1a1   : > { %6371 = vmatpush3.bf16.msra.mxu1 %v6689_v29  ;;  %6348 = vmatprep.subr.bf16.mxu0 %v6690_v11 }
 0x1a2   : > { %6372 = vmatprep.subr.bf16.mxu1 %v6691_v1 }
 0x1a4   : > { %6349 = vmatpush3.bf16.msra.mxu0 %v6690_v11 }
 0x1a5   : > { %6373 = vmatpush3.bf16.msra.mxu1 %v6691_v1  ;;  %6350 = vmatprep.subr.bf16.mxu0 %v6692_v56  ;;  %v4455_v1 = vrot.slane %v3218_v60, 4 }
 0x1a6   : > { %6374 = vmatprep.subr.bf16.mxu1 %v6693_v14 }
 0x1a8   : > { %6351 = vmatpush3.bf16.msra.mxu0 %v6692_v56  ;;  %v6704_v56 = vld [vmem:[%s8515_s3 + $0x680] sm:$0xff]  }
 0x1a9   : > { %6375 = vmatpush3.bf16.msra.mxu1 %v6693_v14  ;;  %6352 = vmatprep.subr.bf16.mxu0 %v6694_v54 }
 0x1aa   : > { %6376 = vmatprep.subr.bf16.mxu1 %v6695_v34 }
 0x1ac   : > { %6353 = vmatpush3.bf16.msra.mxu0 %v6694_v54 }
 0x1ad   : > { %6377 = vmatpush3.bf16.msra.mxu1 %v6695_v34  ;;  %6386 = vmatprep.subr.bf16.mxu0 %v6696_v40 }
 0x1ae   : > { %6410 = vmatprep.subr.bf16.mxu1 %v6696_v40 }
 0x1af   : > { %v6068_v0 = vpop.f32.mrf.mxu0  ;;  %6355 = vmatmul.mubr.bf16.vlgmr.msra.gmra.mxu0 %v7925_v28 }
 0x1b0   : > { %v2432_v48 = vadd.f32 %v6068_v0, %v8138_v55  ;;  %6379 = vmatmul.mubr.bf16.vlgmr.msra.gmra.mxu1 %v7933_v43  ;;  %6387 = vmatpush3.bf16.msra.mxu0 %v6696_v40  ;;  %v6092_v25 = vpop.f32.mrf.mxu1 }
 0x1b1   : > { %6418 = vmatpush3.bf16.msra.mxu1 %v6696_v40  ;;  %v2399_v32 = vpop.f32.mrf.mxu0  ;;  %6388 = vmatprep.subr.bf16.mxu0 %v6697_v26 }
 0x1b2   : > { %v2430_v61 = vadd.f32 %v2399_v32, %v8148_v59  ;;  %v8242_v28 = vadd.f32 %v6092_v25, %v2432_v48  ;;  %v2550_v55 = vpop.f32.mrf.mxu1  ;;  %6411 = vmatprep.subr.bf16.mxu1 %v6697_v26  ;;  %6358 = vmatprep.mubr.bf16.mxu0 %v8058_v45  ;;  %v6700_v45 = vld [vmem:[%s8515_s3 + $0x6a0] sm:$0xff]  }
 0x1b3   : > { %v6069_v43 = vpop.f32.mrf.mxu0  ;;  %6382 = vmatprep.mubr.bf16.mxu1 %v8144_v27 }
 0x1b4   : > { %v2433_v5 = vadd.f32 %v6069_v43, %v8156_v15  ;;  %v8249_v46 = vadd.f32 %v2550_v55, %v2430_v61  ;;  %6389 = vmatpush3.bf16.msra.mxu0 %v6697_v26  ;;  %v6093_v35 = vpop.f32.mrf.mxu1 }
 0x1b5   : > { %6419 = vmatpush3.bf16.msra.mxu1 %v6697_v26  ;;  %v2402_v59 = vpop.f32.mrf.mxu0  ;;  %6390 = vmatprep.subr.bf16.mxu0 %v6699_v4 }
 0x1b6   : > { %v2431_v52 = vadd.f32 %v2402_v59, %v8163_v49  ;;  %v8255_v42 = vadd.f32 %v6093_v35, %v2433_v5  ;;  %v2553_v22 = vpop.f32.mrf.mxu1  ;;  %6412 = vmatprep.subr.bf16.mxu1 %v6699_v4  ;;  %v6701_v49 = vld [vmem:[%s8515_s3 + $0x698] sm:$0xff]  }
 0x1b7   : > { %v6072_v27 = vpop.f32.mrf.mxu0  ;;  %6359 = vmatmul.mubr.bf16.gmra.mxu0 %v5361_v9 }
 0x1b8   : > { %v2436_v15 = vadd.f32 %v6072_v27, %v8170_v37  ;;  %v8258_v44 = vadd.f32 %v2553_v22, %v2431_v52  ;;  %6391 = vmatpush3.bf16.msra.mxu0 %v6699_v4  ;;  %v6096_v51 = vpop.f32.mrf.mxu1  ;;  %6383 = vmatmul.mubr.bf16.gmra.mxu1 %v4315_v20 }
 0x1b9   : > { %6420 = vmatpush3.bf16.msra.mxu1 %v6699_v4  ;;  %v2415_v53 = vpop.f32.mrf.mxu0  ;;  %6392 = vmatprep.subr.bf16.mxu0 %v6700_v45 }
 0x1ba   : > { %v2434_v7 = vadd.f32 %v2415_v53, %v8178_v16  ;;  %v2587_v57 = vadd.f32 %v6096_v51, %v2436_v15  ;;  %v2566_v58 = vpop.f32.mrf.mxu1  ;;  %6413 = vmatprep.subr.bf16.mxu1 %v6700_v45  ;;  %6402 = vmatprep.mubr.bf16.mxu0 %v8027_v62  ;;  %v6702_v16 = vld [vmem:[%s8515_s3 + $0x690] sm:$0xff]  }
 0x1bb   : > { %v6073_v37 = vpop.f32.mrf.mxu0  ;;  %6406 = vmatprep.mubr.bf16.mxu1 %v8150_v6  ;;  %v6703_v6 = vld [vmem:[%s8515_s3 + $0x688] sm:$0xff]  }
 0x1bc   : > { %v2437_v29 = vadd.f32 %v6073_v37, %v8184_v13  ;;  %v2585_v63 = vadd.f32 %v2566_v58, %v2434_v7  ;;  %6393 = vmatpush3.bf16.msra.mxu0 %v6700_v45  ;;  %v6097_v23 = vpop.f32.mrf.mxu1  ;;  %v4454_v13 = vrot.slane %v3217_v8, 4 }
 0x1bd   : > { %6421 = vmatpush3.bf16.msra.mxu1 %v6700_v45  ;;  %v2418_v3 = vpop.f32.mrf.mxu0  ;;  %6394 = vmatprep.subr.bf16.mxu0 %v6701_v49 }
 0x1be   : > { %v2435_v38 = vadd.f32 %v2418_v3, %v8189_v41  ;;  %v2588_v11 = vadd.f32 %v6097_v23, %v2437_v29  ;;  %v2569_v12 = vpop.f32.mrf.mxu1  ;;  %6414 = vmatprep.subr.bf16.mxu1 %v6701_v49  ;;  %v4458_v41 = vrot.slane %v3220_v50, 4  ;;  %v4456_v14 = vsel %vm696_vm1, %v4454_v13, %v4455_v1 }
 0x1c0   : > { %v2586_v62 = vadd.f32 %v2569_v12, %v2435_v38  ;;  %6395 = vmatpush3.bf16.msra.mxu0 %v6701_v49  ;;  %v4459_v54 = vsel %vm696_vm1, %v4457_v17, %v4458_v41 }
 0x1c1   : > { %6422 = vmatpush3.bf16.msra.mxu1 %v6701_v49  ;;  %6396 = vmatprep.subr.bf16.mxu0 %v6702_v16  ;;  %v4462_v34 = vpack.c.bf16 %v4459_v54, %v4456_v14 }
 0x1c2   : > { %6415 = vmatprep.subr.bf16.mxu1 %v6702_v16 }
 0x1c4   : > { %6397 = vmatpush3.bf16.msra.mxu0 %v6702_v16 }
 0x1c5   : > { %6423 = vmatpush3.bf16.msra.mxu1 %v6702_v16  ;;  %6398 = vmatprep.subr.bf16.mxu0 %v6703_v6 }
 0x1c6   : > { %6416 = vmatprep.subr.bf16.mxu1 %v6703_v6 }
 0x1c8   : > { %6399 = vmatpush3.bf16.msra.mxu0 %v6703_v6 }
 0x1c9   : > { %6424 = vmatpush3.bf16.msra.mxu1 %v6703_v6  ;;  %6400 = vmatprep.subr.bf16.mxu0 %v6704_v56 }
 0x1ca   : > { %6417 = vmatprep.subr.bf16.mxu1 %v6704_v56 }
 0x1cc   : > { %6401 = vmatpush3.bf16.msra.mxu0 %v6704_v56 }
 0x1cd   : > { %6425 = vmatpush3.bf16.msra.mxu1 %v6704_v56 }
 0x1cf   : > { %v6116_v18 = vpop.f32.mrf.mxu0  ;;  %6403 = vmatmul.mubr.bf16.vlgmr.msra.gmra.mxu0 %v8050_v47 }
 0x1d0   : > { %v2730_v33 = vadd.f32 %v6116_v18, %v8242_v28  ;;  %6407 = vmatmul.mubr.bf16.vlgmr.msra.gmra.mxu1 %v4462_v34  ;;  %v6140_v21 = vpop.f32.mrf.mxu1 }
 0x1d1   : > { %v2697_v39 = vpop.f32.mrf.mxu0 }
 0x1d2   : > { %v2728_v40 = vadd.f32 %v2697_v39, %v8249_v46  ;;  %v2869_v8 = vadd.f32 %v6140_v21, %v2730_v33  ;;  %v2836_v19 = vpop.f32.mrf.mxu1 }
 0x1d3   : > { %v6117_v60 = vpop.f32.mrf.mxu0 }
 0x1d4   : > { %v2731_v50 = vadd.f32 %v6117_v60, %v8255_v42  ;;  %v2867_v26 = vadd.f32 %v2836_v19, %v2728_v40  ;;  %v6141_v24 = vpop.f32.mrf.mxu1 }
 0x1d5   : > { %v2700_v10 = vpop.f32.mrf.mxu0 }
 0x1d6   : > { %v2729_v31 = vadd.f32 %v2700_v10, %v8258_v44  ;;  %v2870_v2 = vadd.f32 %v6141_v24, %v2731_v50  ;;  %v2839_v0 = vpop.f32.mrf.mxu1 }
 0x1d7   : > { %v6120_v47 = vpop.f32.mrf.mxu0 }
 0x1d8   : > { %v2734_v48 = vadd.f32 %v6120_v47, %v2587_v57  ;;  %v8292_v25 = vadd.f32 %v2839_v0, %v2729_v31  ;;  %v6144_v32 = vpop.f32.mrf.mxu1 }
 0x1d9   : > { %v2713_v4 = vpop.f32.mrf.mxu0 }
 0x1da   : > { %v2732_v36 = vadd.f32 %v2713_v4, %v2585_v63  ;;  %v2873_v30 = vadd.f32 %v6144_v32, %v2734_v48  ;;  %v2852_v61 = vpop.f32.mrf.mxu1 }
 0x1db   : > { %v6121_v28 = vpop.f32.mrf.mxu0 }
 0x1dc   : > { %v2735_v55 = vadd.f32 %v6121_v28, %v2588_v11  ;;  %v8294_v43 = vadd.f32 %v2852_v61, %v2732_v36  ;;  %v6145_v9 = vpop.f32.mrf.mxu1 }
 0x1dd   : > { %v2716_v5 = vpop.f32.mrf.mxu0 }
 0x1de   : > { %v2733_v46 = vadd.f32 %v2716_v5, %v2586_v62  ;;  %v2874_v35 = vadd.f32 %v6145_v9, %v2735_v55  ;;  %v2855_v20 = vpop.f32.mrf.mxu1 }
 0x1e0   : > { %v8296_v59 = vadd.f32 %v2855_v20, %v2733_v46 }
 0x1ef   : > { %v6164_v45 = vpop.f32.mrf.mxu0 }
 0x1f0   : > { %v8298_v52 = vadd.f32 %v6164_v45, %v2869_v8  ;;  %v8310_v7 = vpop.f32.mrf.mxu1 }
 0x1f1   : > { %v2987_v42 = vpop.f32.mrf.mxu0 }
 0x1f2   : > { %v8300_v22 = vadd.f32 %v2987_v42, %v2867_v26  ;;  %v3134_v37 = vpop.f32.mrf.mxu1 }
 0x1f3   : > { %v6165_v27 = vpop.f32.mrf.mxu0 }
 0x1f4   : > { %v8302_v15 = vadd.f32 %v6165_v27, %v2870_v2  ;;  %v8314_v29 = vpop.f32.mrf.mxu1 }
 0x1f5   : > { %v8304_v44 = vpop.f32.mrf.mxu0 }
 0x1f6   : > { %v8316_v63 = vpop.f32.mrf.mxu1 }
 0x1f7   : > { %v6168_v51 = vpop.f32.mrf.mxu0 }
 0x1f8   : > { %v8306_v53 = vadd.f32 %v6168_v51, %v2873_v30  ;;  %v8318_v23 = vpop.f32.mrf.mxu1 }
 0x1f9   : > { %v8308_v49 = vpop.f32.mrf.mxu0 }
 0x1fa   : > { %v8320_v3 = vpop.f32.mrf.mxu1 }
 0x1fb   : > { %v6169_v57 = vpop.f32.mrf.mxu0 }
 0x1fc   : > { %v8312_v58 = vadd.f32 %v6169_v57, %v2874_v35  ;;  %v8322_v16 = vpop.f32.mrf.mxu1 }
 0x1fd   : > { %v8324_v38 = vpop.f32.mrf.mxu0 }
 0x1fe   : > { %v8326_v11 = vpop.f32.mrf.mxu1 }
 0x20f   : > { %v6212_v12 = vpop.f32.mrf.mxu0 }
 0x210   : > { %v8328_v62 = vpop.f32.mrf.mxu1 }
 0x211   : > { %v3324_v6 = vpop.f32.mrf.mxu0 }
 0x212   : > { %v8330_v13 = vpop.f32.mrf.mxu1 }
 0x213   : > { %v6213_v17 = vpop.f32.mrf.mxu0 }
 0x214   : > { %v8332_v1 = vpop.f32.mrf.mxu1 }
 0x215   : > { %v3327_v41 = vpop.f32.mrf.mxu0 }
 0x216   : > { %v8334_v56 = vpop.f32.mrf.mxu1 }
 0x217   : > { %v8336_v14 = vpop.f32.mrf.mxu0 }
 0x218   : > { %v8338_v54 = vpop.f32.mrf.mxu1 }
 0x219   : > { %v3340_v34 = vpop.f32.mrf.mxu0 }
 0x21a   : > { %v8340_v18 = vpop.f32.mrf.mxu1 }
 0x21b   : > { %v8342_v33 = vpop.f32.mrf.mxu0 }
 0x21c   : > { %v8344_v21 = vpop.f32.mrf.mxu1 }
 0x21d   : > { %v8346_v39 = vpop.f32.mrf.mxu0 }
 0x21e   : > { %v8348_v40 = vpop.f32.mrf.mxu1 }
 0x22f   : > { %v6260_v8 = vpop.f32.mrf.mxu0 }
 0x230   : > { %v8350_v19 = vpop.f32.mrf.mxu1 }
 0x231   : > { %v3688_v60 = vpop.f32.mrf.mxu0 }
 0x232   : > { %v8352_v50 = vpop.f32.mrf.mxu1 }
 0x233   : > { %v8354_v26 = vpop.f32.mrf.mxu0 }
 0x234   : > { %v8356_v24 = vpop.f32.mrf.mxu1 }
 0x235   : > { %v8358_v10 = vpop.f32.mrf.mxu0 }
 0x236   : > { %v8360_v31 = vpop.f32.mrf.mxu1 }
 0x237   : > { %v8362_v2 = vpop.f32.mrf.mxu0 }
 0x238   : > { %v8364_v0 = vpop.f32.mrf.mxu1 }
 0x239   : > { %8519 = vst [vmem:[#allocation2_spill] sm:$0xff] %v8364_v0  ;;  %v8366_v47 = vpop.f32.mrf.mxu0 }
 0x23a   : > { %v8368_v48 = vpop.f32.mrf.mxu1 }
 0x23b   : > { %v8370_v32 = vpop.f32.mrf.mxu0 }
 0x23c   : > { %v8372_v4 = vpop.f32.mrf.mxu1 }
 0x23d   : > { %8520 = vst [vmem:[#allocation3_spill] sm:$0xff] %v8372_v4  ;;  %v8374_v36 = vpop.f32.mrf.mxu0 }
 0x23e   : > { %v8376_v30 = vpop.f32.mrf.mxu1 }
 0x23f   : > { %8521 = vst [vmem:[#allocation4_spill] sm:$0xff] %v8376_v30 }
 0x24f   : > { %v8378_v61 = vpop.f32.mrf.mxu0 }
 0x250   : > { %v8380_v28 = vpop.f32.mrf.mxu1 }
 0x251   : > { %8522 = vst [vmem:[#allocation5_spill] sm:$0xff] %v8380_v28  ;;  %v3978_v55 = vpop.f32.mrf.mxu0 }
 0x252   : > { %v8382_v9 = vpop.f32.mrf.mxu1 }
 0x253   : > { %v8384_v5 = vpop.f32.mrf.mxu0 }
 0x254   : > { %v8386_v46 = vpop.f32.mrf.mxu1 }
 0x255   : > { %8523 = vst [vmem:[#allocation6_spill] sm:$0xff] %v8386_v46  ;;  %v8388_v35 = vpop.f32.mrf.mxu0 }
 0x256   : > { %v8390_v20 = vpop.f32.mrf.mxu1 }
 0x257   : > { %8524 = vst [vmem:[#allocation7_spill] sm:$0xff] %v8390_v20  ;;  %v8392_v45 = vpop.f32.mrf.mxu0 }
 0x258   : > { %8525 = vst [vmem:[#allocation8_spill] sm:$0xff] %v8392_v45  ;;  %v8394_v42 = vpop.f32.mrf.mxu1 }
 0x259   : > { %8526 = vst [vmem:[#allocation9_spill] sm:$0xff] %v8394_v42  ;;  %v8396_v27 = vpop.f32.mrf.mxu0  ;;  %v3165_v42 = vadd.f32 %v3134_v37, %v8300_v22  ;;  %v3023_v22 = vadd.f32 %v8324_v38, %v8296_v59 }
 0x25a   : > { %8527 = vst [vmem:[#allocation10_spill] sm:$0xff] %v8396_v27  ;;  %v8398_v51 = vpop.f32.mrf.mxu1 }
 0x25b   : > { %8528 = vst [vmem:[#allocation11_spill] sm:$0xff] %v8398_v51  ;;  %v8400_v57 = vpop.f32.mrf.mxu0  ;;  %v3019_v51 = vadd.f32 %v8304_v44, %v8292_v25 }
 0x25c   : > { %8529 = vst [vmem:[#allocation12_spill] sm:$0xff] %v8400_v57  ;;  %v8402_v4 = vpop.f32.mrf.mxu1  ;;  %v3355_v57 = vadd.f32 %v3324_v6, %v3165_v42 }
 0x25d   : > { %8530 = vst [vmem:[#allocation13_spill] sm:$0xff] %v8402_v4  ;;  %v8404_v0 = vpop.f32.mrf.mxu0  ;;  %v3167_v4 = vadd.f32 %v8310_v7, %v8298_v52 }
 0x25e   : > { %v8406_v28 = vpop.f32.mrf.mxu1  ;;  %v3545_v52 = vadd.f32 %v8330_v13, %v3355_v57 }
 0x25f   : > { %8531 = vst [vmem:[#allocation14_spill] sm:$0xff] %v8406_v28  ;;  %v3022_v28 = vadd.f32 %v8308_v49, %v8294_v43  ;;  %v3357_v25 = vadd.f32 %v6212_v12, %v3167_v4  ;;  %v3170_v49 = vadd.f32 %v8326_v11, %v3023_v22  ;;  %v3172_v11 = vadd.f32 %v8322_v16, %v8312_v58 }
 0x261   : > { %v3169_v37 = vadd.f32 %v8320_v3, %v3022_v28  ;;  %v3547_v6 = vadd.f32 %v8328_v62, %v3357_v25  ;;  %v3360_v12 = vadd.f32 %v8346_v39, %v3170_v49  ;;  %v8536_v28 = vld [vmem:[#allocation4_spill] sm:$0xff] }
 0x263   : > { %v3721_v13 = vadd.f32 %v6260_v8, %v3547_v6  ;;  %v3550_v39 = vadd.f32 %v8348_v40, %v3360_v12 }
 0x265   : > { %v3860_v8 = vadd.f32 %v8350_v19, %v3721_v13 }
 0x26f   : > { %v8408_v46 = vpop.f32.mrf.mxu0 }
 0x270   : > { %8532 = vst [vmem:[#allocation15_spill] sm:$0xff] %v8408_v46  ;;  %v8410_v30 = vpop.f32.mrf.mxu1 }
 0x271   : > { %8533 = vst [vmem:[#allocation16_spill] sm:$0xff] %v8410_v30  ;;  %v4264_v20 = vpop.f32.mrf.mxu0  ;;  %v3168_v30 = vadd.f32 %v8314_v29, %v8302_v15  ;;  %v3359_v15 = vadd.f32 %v3340_v34, %v3169_v37  ;;  %v3719_v29 = vadd.f32 %v3688_v60, %v3545_v52 }
 0x272   : > { %v8412_v45 = vpop.f32.mrf.mxu1 }
 0x273   : > { %8534 = vst [vmem:[#allocation17_spill] sm:$0xff] %v8412_v45  ;;  %v8417_v27 = vpop.f32.mrf.mxu0  ;;  %v3166_v45 = vadd.f32 %v8316_v63, %v3019_v51  ;;  %v3171_v63 = vadd.f32 %v8318_v23, %v8306_v53  ;;  %v3858_v23 = vadd.f32 %v8352_v50, %v3719_v29  ;;  %v3724_v50 = vadd.f32 %v8374_v36, %v3550_v39 }
 0x274   : > { %8535 = vst [vmem:[#allocation18_spill] sm:$0xff] %v8417_v27  ;;  %v8423_v46 = vpop.f32.mrf.mxu1  ;;  %v3358_v27 = vadd.f32 %v6213_v17, %v3168_v30 }
 0x275   : > { %v4267_v44 = vpop.f32.mrf.mxu0  ;;  %v3356_v7 = vadd.f32 %v3327_v41, %v3166_v45  ;;  %v3361_v62 = vadd.f32 %v8336_v14, %v3171_v63  ;;  %v3549_v41 = vadd.f32 %v8340_v18, %v3359_v15  ;;  %v4009_v58 = vadd.f32 %v3978_v55, %v3858_v23  ;;  %v8537_v55 = vld [vmem:[#allocation5_spill] sm:$0xff]  ;;  %v8538_v45 = vld [vmem:[#allocation10_spill] sm:$0xff]  ;;  %v8545_v15 = vld [vmem:[#allocation11_spill] sm:$0xff] }
 0x276   : > { %v8432_v43 = vpop.f32.mrf.mxu1  ;;  %v3548_v38 = vadd.f32 %v8332_v1, %v3358_v27  ;;  %v3863_v36 = vadd.f32 %v8536_v28, %v3724_v50 }
 0x277   : > { %v8438_v59 = vpop.f32.mrf.mxu0  ;;  %v3546_v3 = vadd.f32 %v8334_v56, %v3356_v7  ;;  %v3362_v56 = vadd.f32 %v8342_v33, %v3172_v11  ;;  %v3723_v60 = vadd.f32 %v8366_v47, %v3549_v41  ;;  %v3551_v14 = vadd.f32 %v8338_v54, %v3361_v62  ;;  %v8544_v7 = vld [vmem:[#allocation8_spill] sm:$0xff] }
 0x278   : > { %v8443_v17 = vpop.f32.mrf.mxu1  ;;  %v3722_v53 = vadd.f32 %v8354_v26, %v3548_v38  ;;  %v4156_v30 = vadd.f32 %v8382_v9, %v4009_v58  ;;  %v4014_v9 = vadd.f32 %v8404_v0, %v3863_v36  ;;  %v8548_v11 = vld [vmem:[#allocation12_spill] sm:$0xff]  ;;  %v8549_v0 = vld [vmem:[#allocation14_spill] sm:$0xff] }
 0x279   : > { %v3720_v1 = vadd.f32 %v8358_v10, %v3546_v3  ;;  %v4280_v34 = vpop.f32.mrf.mxu0  ;;  %v4011_v10 = vadd.f32 %v8378_v61, %v3860_v8  ;;  %v3552_v33 = vadd.f32 %v8344_v21, %v3362_v56  ;;  %v3725_v40 = vadd.f32 %v8362_v2, %v3551_v14  ;;  %v8539_v2 = vld [vmem:[#allocation2_spill] sm:$0xff]  ;;  %v8550_v23 = vld [vmem:[#allocation16_spill] sm:$0xff] }
 0x27a   : > { %v4431_v16 = vpop.f32.mrf.mxu1  ;;  %v3861_v18 = vadd.f32 %v8356_v24, %v3722_v53  ;;  %v3862_v19 = vadd.f32 %v8368_v48, %v3723_v60  ;;  %v4295_v42 = vadd.f32 %v4264_v20, %v4156_v30  ;;  %v8540_v48 = vld [vmem:[#allocation6_spill] sm:$0xff]  ;;  %v8547_v38 = vld [vmem:[#allocation17_spill] sm:$0xff]  ;;  %v4161_v53 = vadd.f32 %v8549_v0, %v4014_v9 }
 0x27b   : > { %v3859_v26 = vadd.f32 %v8360_v31, %v3720_v1  ;;  %v6361_v4 = vpop.f32.mrf.mxu0  ;;  %v3726_v31 = vadd.f32 %v8370_v32, %v3552_v33  ;;  %v4158_v61 = vadd.f32 %v8537_v55, %v4011_v10  ;;  %v3864_v27 = vadd.f32 %v8539_v2, %v3725_v40  ;;  %v8543_v32 = vld [vmem:[#allocation3_spill] sm:$0xff]  ;;  %v8546_v20 = vld [vmem:[#allocation18_spill] sm:$0xff]  ;;  %v8551_v60 = vld [vmem:[#allocation9_spill] sm:$0xff] }
 0x27c   : > { %v4012_v47 = vadd.f32 %v8384_v5, %v3861_v18  ;;  %v6385_v24 = vpop.f32.mrf.mxu1  ;;  %v4013_v21 = vadd.f32 %v8538_v45, %v3862_v19  ;;  %v8541_v5 = vld [vmem:[#allocation7_spill] sm:$0xff]  ;;  %v4446_v3 = vadd.f32 %v8547_v38, %v4295_v42  ;;  %v5434_v10 = vld [vmem:[%s8516_s4] ss:$0 sm:$0xff]  ;;  %v8552_v40 = vld [vmem:[#allocation13_spill] sm:$0xff] }
 0x27d   : > { %v4010_v54 = vadd.f32 %v8388_v35, %v3859_v26  ;;  %v4283_v51 = vpop.f32.mrf.mxu0  ;;  %v8542_v35 = vld [vmem:[#allocation15_spill] sm:$0xff]  ;;  %v3865_v52 = vadd.f32 %v8543_v32, %v3726_v31  ;;  %v4015_v49 = vadd.f32 %v8544_v7, %v3864_v27 }
 0x27e   : > { %v4159_v57 = vadd.f32 %v8540_v48, %v4012_v47  ;;  %v4297_v25 = vadd.f32 %v8542_v35, %v4158_v61  ;;  %v4434_v37 = vpop.f32.mrf.mxu1  ;;  %v4160_v29 = vadd.f32 %v8545_v15, %v4013_v21  ;;  %v4300_v50 = vadd.f32 %v4283_v51, %v4161_v53 }
 0x27f   : > { %v4157_v22 = vadd.f32 %v8541_v5, %v4010_v54  ;;  %v4016_v62 = vadd.f32 %v8548_v11, %v3865_v52  ;;  %v4162_v58 = vadd.f32 %v8551_v60, %v4015_v49 }
 0x280   : > { %v4298_v63 = vadd.f32 %v8546_v20, %v4159_v57  ;;  %v4448_v1 = vadd.f32 %v8550_v23, %v4297_v25  ;;  %v4299_v56 = vadd.f32 %v4280_v34, %v4160_v29  ;;  %v4451_v55 = vadd.f32 %v4434_v37, %v4300_v50 }
 0x281   : > { %v4296_v12 = vadd.f32 %v4267_v44, %v4157_v22  ;;  %v4163_v19 = vadd.f32 %v8552_v40, %v4016_v62  ;;  %v4301_v34 = vadd.f32 %v8438_v59, %v4162_v58 }
 0x282   : > { %v4449_v18 = vadd.f32 %v8423_v46, %v4298_v63  ;;  %v4450_v54 = vadd.f32 %v4431_v16, %v4299_v56 }
 0x283   : > { %v4447_v26 = vadd.f32 %v8432_v43, %v4296_v12  ;;  %v4302_v36 = vadd.f32 %v6361_v4, %v4163_v19  ;;  %v4452_v21 = vadd.f32 %v8443_v17, %v4301_v34 }
 0x285   : > { %v4453_v57 = vadd.f32 %v6385_v24, %v4302_v36 }
 0x28f   : > { %v6404_v6 = vpop.f32.mrf.mxu0 }
 0x290   : > { %v6408_v13 = vpop.f32.mrf.mxu1  ;;  %v4595_v44 = vadd.f32 %v6404_v6, %v4448_v1 }
 0x291   : > { %v4562_v41 = vpop.f32.mrf.mxu0  ;;  %v4599_v59 = vadd.f32 %v6408_v13, %v4452_v21 }
 0x292   : > { %v4593_v39 = vadd.f32 %v4562_v41, %v4446_v3  ;;  %v4578_v8 = vpop.f32.mrf.mxu1  ;;  %v4610_v43 = vadd.f32 %v5434_v10, %v4595_v44 }
 0x293   : > { %v6405_v14 = vpop.f32.mrf.mxu0  ;;  %v4597_v61 = vadd.f32 %v4578_v8, %v4450_v54  ;;  %v4614_v52 = vadd.f32 %v5434_v10, %v4599_v59 }
 0x294   : > { %v6409_v33 = vpop.f32.mrf.mxu1  ;;  %v4608_v47 = vadd.f32 %v5434_v10, %v4593_v39  ;;  %v4596_v31 = vadd.f32 %v6405_v14, %v4449_v18  ;;  %v4631_v5 = vmul.f32 %v4610_v43, %v4610_v43 }
 0x295   : > { %v4565_v30 = vpop.f32.mrf.mxu0  ;;  %v4612_v22 = vadd.f32 %v5434_v10, %v4597_v61  ;;  %v4600_v35 = vadd.f32 %v6409_v33, %v4453_v57  ;;  %v4635_v63 = vmul.f32 %v4614_v52, %v4614_v52 }
 0x296   : > { %v4594_v28 = vadd.f32 %v4565_v30, %v4447_v26  ;;  %v4581_v46 = vpop.f32.mrf.mxu1  ;;  %v4629_v42 = vmul.f32 %v4608_v47, %v4608_v47  ;;  %v4611_v2 = vadd.f32 %v5434_v10, %v4596_v31 }
 0x297   : > { %v4598_v48 = vadd.f32 %v4581_v46, %v4451_v55  ;;  %v4633_v7 = vmul.f32 %v4612_v22, %v4612_v22  ;;  %v4615_v6 = vadd.f32 %v5434_v10, %v4600_v35 }
 0x298   : > { %v4609_v45 = vadd.f32 %v5434_v10, %v4594_v28  ;;  %v4632_v4 = vmul.f32 %v4611_v2, %v4611_v2 }
 0x299   : > { %v4613_v37 = vadd.f32 %v5434_v10, %v4598_v48  ;;  %v4636_v3 = vmul.f32 %v4615_v6, %v4615_v6 }
 0x29a   : > { %v4616_v27 = vadd.f32 %v4609_v45, %v4608_v47  ;;  %v4630_v51 = vmul.f32 %v4609_v45, %v4609_v45 }
 0x29b   : > { %v4634_v29 = vmul.f32 %v4613_v37, %v4613_v37 }
 0x29c   : > { %v4617_v16 = vadd.f32 %v4616_v27, %v4610_v43  ;;  %v4637_v9 = vadd.f32 %v4630_v51, %v4629_v42 }
 0x29e   : > { %v4638_v25 = vadd.f32 %v4637_v9, %v4631_v5  ;;  %v4618_v32 = vadd.f32 %v4617_v16, %v4611_v2 }
 0x2a0   : > { %v4619_v49 = vadd.f32 %v4618_v32, %v4612_v22  ;;  %v4639_v17 = vadd.f32 %v4638_v25, %v4632_v4 }
 0x2a2   : > { %v4620_v15 = vadd.f32 %v4619_v49, %v4613_v37  ;;  %v4640_v20 = vadd.f32 %v4639_v17, %v4633_v7 }
 0x2a4   : > { %v4621_v24 = vadd.f32 %v4620_v15, %v4614_v52  ;;  %v4641_v38 = vadd.f32 %v4640_v20, %v4634_v29 }
 0x2a6   : > { %v4622_v12 = vadd.f32 %v4621_v24, %v4615_v6  ;;  %v4642_v13 = vadd.f32 %v4641_v38, %v4635_v63 }
 0x2a8   : > { %v4623_v11 = vrot.slane %v4622_v12, 4  ;;  %v4643_v62 = vadd.f32 %v4642_v13, %v4636_v3 }
 0x2aa   : > { %v4624_v41 = vadd.f32 %v4623_v11, %v4622_v12  ;;  %v4644_v0 = vrot.slane %v4643_v62, 4 }
 0x2ac   : > { %v4625_v53 = vrot.slane %v4624_v41, 2  ;;  %v4645_v23 = vadd.f32 %v4644_v0, %v4643_v62 }
 0x2ae   : > { %v4626_v1 = vadd.f32 %v4625_v53, %v4624_v41  ;;  %v4646_v56 = vrot.slane %v4645_v23, 2 }
 0x2b0   : > { %v4627_v39 = vrot.slane %v4626_v1, 1  ;;  %v4647_v8 = vadd.f32 %v4646_v56, %v4645_v23  ;;  %4653 = sbr.rel (%p5435_p9) target bundleno = 695 (0x2b7), region = 44 }
 0x2b2   : > { %v4628_v60 = vadd.f32 %v4627_v39, %v4626_v1  ;;  %v4648_v58 = vrot.slane %v4647_v8, 1 }
 0x2b4   : > { %v4649_v14 = vadd.f32 %v4648_v58, %v4647_v8 }
 0x2b5   : > { %v6745_v18 = vmov 0.0  }
 0x2b6   : > { %4654 = vst [vmem:[%s6834_s26] sm:$0x3] %v6745_v18 }
 0x2b7 PF: > { %vm4656_vm2 = vcmask 1040384  }
 0x2b8   : > { %v4657_v50 = vsel %vm4656_vm2, %v4628_v60, %v4649_v14 }
 0x2bd   : > { %v4655_v26 = vld [vmem:[%s6834_s26] sm:$0x3] }
 0x2be   : > { %v4658_v44 = vadd.f32 %v4657_v50, %v4655_v26 }
 0x2c0   : > { %4659 = vst [vmem:[%s6834_s26] sm:$0x3] %v4658_v44 }
 0x2c1 PF: > { %s15_s22 = sadd.s32 1, %s6743_s22   ;;  %s8553_s18 = smov %s6735_s20 }
 0x2c2   : > { %p12_p10 = scmp.ge.s32.totalorder %s15_s22, 10   ;;  %s8554_s19 = smov %s6739_s21 }
 0x2c3   : > { %s8555_s20 = smov %s8558_s23  ;;  %s8556_s21 = smov %s8562_s24 }
 0x2c4   :  { %14 = sbr.rel (!%p12_p10) target bundleno = 3 (0x3), region = 106 }

// kernel: aspp_module_forward.3
= control target key start
LH: loop header
LB: loop body
LE: loop exit
PB: predicated region body
PF: predicated region fallthrough
CT: control target
= control target key end

     0   :  { %s6867_s21 = smov 0   ;;  %s6869_s22 = smov 0   ;;  %s8648_s0 = inlined_call_operand.vmem [shape: bf16[2,6,12,12,128], index: 0, kind: input, shape index: {}, may-alias: {0,1,2}]   ;;  %s8649_s1 = inlined_call_operand.vmem [shape: bf16[2,6,12,12,128], index: 1, kind: input, shape index: {}, may-alias: {0,1,2}]   ;;  %s8650_s2 = inlined_call_operand.vmem [shape: bf16[2,6,12,12,128], index: 2, kind: input, shape index: {}, may-alias: {0,1,2}]   ;;  %s8651_s3 = inlined_call_operand.vmem [shape: bf16[27,128,128], index: 3, kind: input, shape index: {}]   ;;  %s8652_s4 = inlined_call_operand.vmem [shape: f32[2,1,128], index: 4, kind: input, shape index: {}]   ;;  %s8653_s5 = inlined_call_operand.vmem [shape: f32[2,1,128], index: 5, kind: input, shape index: {}]   ;;  %s8654_s6 = inlined_call_operand.vmem [shape: f32[2,4,64,128], index: 6, kind: output, shape index: {}]  }
   0x1   :  { %s6871_s23 = smov 0   ;;  %s6873_s24 = smov 0  }
   0x2   :  { %s6875_s25 = smov 0  }
   0x3 LB: > { %s25_s26 = sadd.s32 1, %s6822_s23  ;;  %s28_s27 = sadd.s32 1, %s6826_s24  ;;  %s6830_s25 = sphi %s6875_s25, %s16_s25   ;;  %s6826_s24 = sphi %s6873_s24, %s8695_s24   ;;  %s6822_s23 = sphi %s6871_s23, %s8694_s23   ;;  %s6818_s22 = sphi %s6869_s22, %s8693_s22   ;;  %s6814_s21 = sphi %s6867_s21, %s8692_s21  }
   0x4   : > { %p26_p0 = scmp.ge.s32.totalorder %s25_s26, 4  ;;  %p4865_p1 = scmp.ge.s32.totalorder %s6830_s25, 1 }
   0x5   : > { %p288_p2 = scmp.lt.s32.totalorder %s6830_s25, 9 }
   0x6   : > { %s8697_s26 = smov (%p26_p0, %s25_s26), 0  ;;  %s8699_s27 = smov (!%p26_p0, %s28_s27), %s6826_s24 }
   0x7   : > { %p289_p3 = pnand %p4865_p1, %p288_p2  ;;  %p30_p4 = scmp.ge.s32.totalorder %s8699_s27, 2 }
   0x9   : > { %s8701_s27 = smov (%p30_p4, %s8699_s27), 0  ;;  %292 = sbr.rel (%p289_p3) target bundleno = 670 (0x29e), region = 44 }
   0xe   : > { %v6558_v0 = vld [vmem:[%s8651_s3 + $0x78] sm:$0xff]   ;;  %p352_p5 = scmp.lt.s32.totalorder %s6818_s22, 1  ;;  %p354_p6 = scmp.lt.s32.totalorder %s6814_s21, 5  ;;  %v6560_v2 = vld [vmem:[%s8651_s3 + $0x70] sm:$0xff]   ;;  %v6562_v4 = vld [vmem:[%s8651_s3 + $0x68] sm:$0xff]   ;;  %vm483_vm0 = vcmask 1045504  }
   0xf   : > { %v6559_v1 = vld [vmem:[%s8651_s3 + $0x38] sm:$0xff]   ;;  %5850 = vmatprep.subr.bf16.mxu0 %v6558_v0  ;;  %v6561_v3 = vld [vmem:[%s8651_s3 + $0x30] sm:$0xff]   ;;  %v6563_v5 = vld [vmem:[%s8651_s3 + $0x28] sm:$0xff]   ;;  %vm763_vm1 = vcmask 1043456   ;;  %s361_s20 = sadd.s32 1, %s6814_s21  ;;  %s372_s8 = sadd.s32 2, %s6814_s21 }
  0x10   : > { %s8703_s22 = smov (!%p352_p5, %s6818_s22), 1  ;;  %5874 = vmatprep.subr.bf16.mxu1 %v6559_v1  ;;  %5851 = vmatpush3.bf16.msra.mxu0 %v6558_v0  ;;  %v6564_v6 = vld [vmem:[%s8651_s3 + $0x60] sm:$0xff]   ;;  %v6566_v8 = vld [vmem:[%s8651_s3 + $0x58] sm:$0xff]   ;;  %v6568_v10 = vld [vmem:[%s8651_s3 + $0x50] sm:$0xff]   ;;  %p364_p7 = scmp.lt.s32.totalorder %s361_s20, 5 }
  0x11   : > { %s355_s12 = scalar_select %p354_p6, %s6814_s21, 5  ;;  %5875 = vmatpush3.bf16.msra.mxu1 %v6559_v1  ;;  %5852 = vmatprep.subr.bf16.mxu0 %v6560_v2  ;;  %v6565_v7 = vld [vmem:[%s8651_s3 + $0x20] sm:$0xff]   ;;  %v6567_v9 = vld [vmem:[%s8651_s3 + $0x18] sm:$0xff]   ;;  %v6569_v11 = vld [vmem:[%s8651_s3 + $0x10] sm:$0xff]  }
  0x12   : > { %s6919_s15 = smul.u32 144, %s8703_s22  ;;  %5876 = vmatprep.subr.bf16.mxu1 %v6561_v3  ;;  %v6570_v31 = vld [vmem:[%s8651_s3 + $0x48] sm:$0xff]   ;;  %v6572_v42 = vld [vmem:[%s8651_s3 + $0x40] sm:$0xff]   ;;  %v6576_v44 = vld [vmem:[%s8651_s3 + $0xb8] sm:$0xff]   ;;  %s8705_s20 = smov (!%p364_p7, %s361_s20), 5 }
  0x13   : > { %s6514_s18 = smul.u32 24, %s355_s12  ;;  %v6571_v34 = vld [vmem:[%s8651_s3 + $0x8] sm:$0xff]   ;;  %v6573_v43 = vld [vmem:[%s8651_s3] sm:$0xff]   ;;  %v6577_v47 = vld [vmem:[%s8651_s3 + $0xf8] sm:$0xff]   ;;  %p7709_p8 = scmp.lt.s32.totalorder %s372_s8, 5 }
  0x14   : > { %5853 = vmatpush3.bf16.msra.mxu0 %v6560_v2  ;;  %v6578_v53 = vld [vmem:[%s8651_s3 + $0xb0] sm:$0xff]   ;;  %s6516_s28 = smul.u32 24, %s8705_s20  ;;  %p391_p9 = scmp.lt.s32.totalorder %s6814_s21, 3 }
  0x15   : > { %s358_s19 = sadd.s32 %s6919_s15, %s6514_s18  ;;  %5877 = vmatpush3.bf16.msra.mxu1 %v6561_v3  ;;  %5854 = vmatprep.subr.bf16.mxu0 %v6562_v4  ;;  %s8707_s8 = smov (!%p7709_p8, %s372_s8), 5 }
  0x16   : > { %5878 = vmatprep.subr.bf16.mxu1 %v6563_v5  ;;  %s4866_s7 = sshll.u32 %s358_s19, 2  ;;  %s368_s29 = sadd.s32 %s6516_s28, %s6919_s15 }
  0x17   : > { %s6940_s14 = scalar_lea.vmem %s8648_s0, %s4866_s7  ;;  %s4867_s10 = sshll.u32 %s368_s29, 2 }
  0x18   : > { %5855 = vmatpush3.bf16.msra.mxu0 %v6562_v4  ;;  %v399_v12 = vld [vmem:[%s6940_s14] sm:$0xf]  ;;  %v400_v13 = vld [vmem:[%s6940_s14 + $0x4] sm:$0x3]  ;;  %v401_v14 = vld [vmem:[%s6940_s14 + $0x8] sm:$0xf]  ;;  %s7316_s17 = scalar_lea.vmem %s8649_s1, %s4867_s10  ;;  %s388_s13 = scalar_lea.vmem %s8653_s5, %s8703_s22 }
  0x19   : > { %5879 = vmatpush3.bf16.msra.mxu1 %v6563_v5  ;;  %5856 = vmatprep.subr.bf16.mxu0 %v6564_v6  ;;  %v402_v15 = vld [vmem:[%s6940_s14 + $0xc] sm:$0x3]  ;;  %v423_v16 = vunpack.c.l.bf16 %v399_v12  ;;  %v424_v17 = vunpack.c.l.bf16 %v400_v13  ;;  %v425_v18 = vunpack.c.l.bf16 %v401_v14  ;;  %v4872_v19 = vcombine.low %v399_v12, %v401_v14  ;;  %v6953_v20 = vld [vmem:[%s6940_s14 + $0x10] sm:$0xf]  ;;  %v6956_v21 = vld [vmem:[%s6940_s14 + $0x14] sm:$0x3] }
  0x1a   : > { %5880 = vmatprep.subr.bf16.mxu1 %v6565_v7  ;;  %v426_v22 = vunpack.c.l.bf16 %v402_v15  ;;  %v6959_v23 = vld [vmem:[%s6940_s14 + $0x18] sm:$0xf]  ;;  %v6962_v24 = vld [vmem:[%s6940_s14 + $0x1c] sm:$0x3]  ;;  %v427_v25 = vunpack.c.l.bf16 %v6953_v20  ;;  %v428_v26 = vunpack.c.l.bf16 %v6956_v21  ;;  %v7004_v54 = vld [vmem:[%s6940_s14 + $0x20] sm:$0xf] }
  0x1b   : > { %v484_v27 = vrot.slane %v423_v16, 2  ;;  %v485_v28 = vrot.slane %v424_v17, 2  ;;  %v487_v29 = vrot.slane %v425_v18, 2  ;;  %5890 = vmatprep.mubr.bf16.mxu1 %v4872_v19  ;;  %v429_v30 = vunpack.c.l.bf16 %v6959_v23  ;;  %v7007_v55 = vld [vmem:[%s6940_s14 + $0x24] sm:$0x3]  ;;  %v6580_v15 = vld [vmem:[%s8651_s3 + $0xa8] sm:$0xff]  }
  0x1c   : > { %5857 = vmatpush3.bf16.msra.mxu0 %v6564_v6  ;;  %v488_v32 = vrot.slane %v426_v22, 2  ;;  %v430_v33 = vunpack.c.l.bf16 %v6962_v24  ;;  %v490_v37 = vrot.slane %v427_v25, 2  ;;  %v491_v38 = vrot.slane %v428_v26, 2  ;;  %v7010_v56 = vld [vmem:[%s6940_s14 + $0x28] sm:$0xf]  ;;  %v6579_v6 = vld [vmem:[%s8651_s3 + $0xf0] sm:$0xff]  }
  0x1d   : > { %5881 = vmatpush3.bf16.msra.mxu1 %v6565_v7  ;;  %5858 = vmatprep.subr.bf16.mxu0 %v6566_v8  ;;  %v486_v35 = vsel %vm483_vm0, %v484_v27, %v485_v28  ;;  %v493_v40 = vrot.slane %v429_v30, 2  ;;  %v764_v48 = vrot.slane %v423_v16, 4  ;;  %v765_v49 = vrot.slane %v424_v17, 4  ;;  %v7015_v58 = vld [vmem:[%s6940_s14 + $0x2c] sm:$0x3]  ;;  %v6593_v21 = vld [vmem:[%s8651_s3 + $0xc0] sm:$0xff]  }
  0x1e   : > { %5882 = vmatprep.subr.bf16.mxu1 %v6567_v9  ;;  %v489_v36 = vsel %vm483_vm0, %v487_v29, %v488_v32  ;;  %v494_v41 = vrot.slane %v430_v33, 2  ;;  %v492_v45 = vsel %vm483_vm0, %v490_v37, %v491_v38  ;;  %v767_v50 = vrot.slane %v425_v18, 4  ;;  %v7021_v62 = vld [vmem:[%s6940_s14 + $0x30] sm:$0xf]  ;;  %v7024_v63 = vld [vmem:[%s6940_s14 + $0x34] sm:$0x3] }
  0x1f   : > { %v516_v39 = vpack.c.bf16 %v489_v36, %v486_v35  ;;  %v768_v51 = vrot.slane %v426_v22, 4  ;;  %v4873_v57 = vcombine.low %v6953_v20, %v6959_v23  ;;  %v431_v59 = vunpack.c.l.bf16 %v7004_v54  ;;  %v7032_v2 = vld [vmem:[%s6940_s14 + $0x38] sm:$0xf]  ;;  %v7035_v3 = vld [vmem:[%s6940_s14 + $0x3c] sm:$0x3]  ;;  %v6581_v18 = vld [vmem:[%s8651_s3 + $0xe8] sm:$0xff]  }
  0x20   : > { %5859 = vmatpush3.bf16.msra.mxu0 %v6566_v8  ;;  %v495_v46 = vsel %vm483_vm0, %v493_v40, %v494_v41  ;;  %v432_v60 = vunpack.c.l.bf16 %v7007_v55  ;;  %v433_v61 = vunpack.c.l.bf16 %v7010_v56  ;;  %v434_v0 = vunpack.c.l.bf16 %v7015_v58  ;;  %v6582_v36 = vld [vmem:[%s8651_s3 + $0xa0] sm:$0xff]   ;;  %v6585_v40 = vld [vmem:[%s8651_s3 + $0xd8] sm:$0xff]   ;;  %v6588_v41 = vld [vmem:[%s8651_s3 + $0x90] sm:$0xff]   ;;  %s8709_s21 = smov (!%p391_p9, %s6814_s21), 3  ;;  %s4870_s9 = sshll.u32 %s8703_s22, 5 }
  0x21   : > { %5883 = vmatpush3.bf16.msra.mxu1 %v6567_v9  ;;  %5860 = vmatprep.subr.bf16.mxu0 %v6568_v10  ;;  %v6998_v52 = vpack.c.bf16 %v495_v46, %v492_v45  ;;  %v7029_v1 = vcombine.low %v7004_v54, %v7010_v56  ;;  %v435_v4 = vunpack.c.l.bf16 %v7021_v62  ;;  %v436_v5 = vunpack.c.l.bf16 %v7024_v63  ;;  %v6583_v37 = vld [vmem:[%s8651_s3 + $0xe0] sm:$0xff]  }
  0x22   : > { %5884 = vmatprep.subr.bf16.mxu1 %v6569_v11  ;;  %5866 = vmatprep.mubr.bf16.mxu0 %v516_v39  ;;  %v496_v7 = vrot.slane %v431_v59, 2  ;;  %v497_v8 = vrot.slane %v432_v60, 2  ;;  %v499_v9 = vrot.slane %v433_v61, 2  ;;  %v438_v12 = vunpack.c.l.bf16 %v7035_v3  ;;  %v6584_v39 = vld [vmem:[%s8651_s3 + $0x98] sm:$0xff]   ;;  %v417_v3 = vld [vmem:[%s6940_s14 + $0x48] sm:$0xf] }
  0x23   : > { %v502_v13 = vrot.slane %v435_v4, 2  ;;  %v503_v14 = vrot.slane %v436_v5, 2  ;;  %v769_v32 = vsel %vm763_vm1, %v767_v50, %v768_v51  ;;  %v7081_v35 = vcombine.low %v7021_v62, %v7032_v2  ;;  %v6595_v50 = vld [vmem:[%s8651_s3 + $0x178] sm:$0xff]   ;;  %v6598_v62 = vld [vmem:[%s8651_s3 + $0x128] sm:$0xff]  }
  0x24   : > { %5861 = vmatpush3.bf16.msra.mxu0 %v6568_v10  ;;  %v437_v10 = vunpack.c.l.bf16 %v7032_v2  ;;  %v498_v16 = vsel %vm483_vm0, %v496_v7, %v497_v8  ;;  %v506_v27 = vrot.slane %v438_v12, 2  ;;  %v770_v45 = vrot.slane %v427_v25, 4  ;;  %v415_v2 = vld [vmem:[%s6940_s14 + $0x40] sm:$0xf] }
  0x25   : > { %5885 = vmatpush3.bf16.msra.mxu1 %v6569_v11  ;;  %5862 = vmatprep.subr.bf16.mxu0 %v6570_v31  ;;  %v500_v11 = vrot.slane %v434_v0, 2  ;;  %v504_v22 = vsel %vm483_vm0, %v502_v13, %v503_v14  ;;  %v771_v46 = vrot.slane %v428_v26, 4  ;;  %v776_v20 = vrot.slane %v431_v59, 4  ;;  %v6596_v59 = vld [vmem:[%s8651_s3 + $0x130] sm:$0xff]   ;;  %v6601_v7 = vld [vmem:[%s8651_s3 + $0x120] sm:$0xff]   ;;  %v6608_v13 = vld [vmem:[%s8651_s3 + $0x148] sm:$0xff]  }
  0x26   : > { %5886 = vmatprep.subr.bf16.mxu1 %v6571_v34  ;;  %v505_v17 = vrot.slane %v437_v10, 2  ;;  %v777_v23 = vrot.slane %v432_v60, 4  ;;  %v779_v24 = vrot.slane %v433_v61, 4  ;;  %v780_v25 = vrot.slane %v434_v0, 4  ;;  %v6597_v60 = vld [vmem:[%s8651_s3 + $0x170] sm:$0xff]   ;;  %v6602_v8 = vld [vmem:[%s8651_s3 + $0x160] sm:$0xff]  }
  0x27   : > { %v501_v19 = vsel %vm483_vm0, %v499_v9, %v500_v11  ;;  %v772_v26 = vsel %vm763_vm1, %v770_v45, %v771_v46  ;;  %v782_v55 = vrot.slane %v435_v4, 4  ;;  %v783_v56 = vrot.slane %v436_v5, 4  ;;  %v6599_v4 = vld [vmem:[%s8651_s3 + $0x168] sm:$0xff]   ;;  %v6603_v9 = vld [vmem:[%s8651_s3 + $0x118] sm:$0xff]   ;;  %v6605_v11 = vld [vmem:[%s8651_s3 + $0x110] sm:$0xff]  }
  0x28   : > { %5863 = vmatpush3.bf16.msra.mxu0 %v6570_v31  ;;  %v7070_v28 = vpack.c.bf16 %v501_v19, %v498_v16  ;;  %v507_v29 = vsel %vm483_vm0, %v505_v17, %v506_v27  ;;  %v766_v31 = vsel %vm763_vm1, %v764_v48, %v765_v49  ;;  %v774_v48 = vrot.slane %v430_v33, 4  ;;  %v6592_v49 = vld [vmem:[%s8651_s3 + $0x80] sm:$0xff]   ;;  %v6594_v33 = vld [vmem:[%s8651_s3 + $0x138] sm:$0xff]   ;;  %v418_v16 = vld [vmem:[%s6940_s14 + $0x4c] sm:$0x3] }
  0x29   : > { %5887 = vmatpush3.bf16.msra.mxu1 %v6571_v34  ;;  %5864 = vmatprep.subr.bf16.mxu0 %v6572_v42  ;;  %v7077_v34 = vpack.c.bf16 %v507_v29, %v504_v22  ;;  %v796_v38 = vpack.c.bf16 %v769_v32, %v766_v31  ;;  %v781_v54 = vsel %vm763_vm1, %v779_v24, %v780_v25  ;;  %v786_v58 = vrot.slane %v438_v12, 4  ;;  %v6606_v12 = vld [vmem:[%s8651_s3 + $0x150] sm:$0xff]   ;;  %v6609_v14 = vld [vmem:[%s8651_s3 + $0x100] sm:$0xff]   ;;  %v6611_v29 = vld [vmem:[%s8651_s3 + $0x1b8] sm:$0xff]  }
  0x2a   : > { %5888 = vmatprep.subr.bf16.mxu1 %v6573_v43  ;;  %v784_v63 = vsel %vm763_vm1, %v782_v55, %v783_v56  ;;  %v6610_v17 = vld [vmem:[%s8651_s3 + $0x140] sm:$0xff]   ;;  %v441_v19 = vunpack.c.l.bf16 %v417_v3  ;;  %v442_v27 = vunpack.c.l.bf16 %v418_v16  ;;  %v6612_v31 = vld [vmem:[%s8651_s3 + $0x1f8] sm:$0xff]   ;;  %v7281_v56 = vld [vmem:[%s6940_s14 + $0x54] sm:$0x3] }
  0x2b   : > { %v6617_v24 = vld [vmem:[%s8651_s3 + $0x1a0] sm:$0xff]   ;;  %v7278_v55 = vld [vmem:[%s6940_s14 + $0x58] sm:$0xf] }
  0x2c   : > { %5865 = vmatpush3.bf16.msra.mxu0 %v6572_v42  ;;  %v6589_v42 = vld [vmem:[%s8651_s3 + $0xd0] sm:$0xff]   ;;  %v6618_v25 = vld [vmem:[%s8651_s3 + $0x1e0] sm:$0xff]  }
  0x2d   : > { %5889 = vmatpush3.bf16.msra.mxu1 %v6573_v43  ;;  %5898 = vmatprep.subr.bf16.mxu0 %v6576_v44  ;;  %v6590_v43 = vld [vmem:[%s8651_s3 + $0x88] sm:$0xff]  }
  0x2e   : > { %5922 = vmatprep.subr.bf16.mxu1 %v6577_v47 }
  0x2f   : > { %5867 = vmatmul.mubr.bf16.vlgmr.msra.gmra.mxu0 %v6998_v52 }
  0x30   : > { %5891 = vmatmul.mubr.bf16.vlgmr.msra.gmra.mxu1 %v4873_v57  ;;  %5899 = vmatpush3.bf16.msra.mxu0 %v6576_v44  ;;  %v6591_v44 = vld [vmem:[%s8651_s3 + $0xc8] sm:$0xff]  }
  0x31   : > { %5923 = vmatpush3.bf16.msra.mxu1 %v6577_v47  ;;  %5900 = vmatprep.subr.bf16.mxu0 %v6578_v53  ;;  %v773_v47 = vrot.slane %v429_v30, 4 }
  0x32   : > { %5924 = vmatprep.subr.bf16.mxu1 %v6579_v6  ;;  %5894 = vmatprep.mubr.bf16.mxu1 %v7029_v1 }
  0x33   : > { %5870 = vmatprep.mubr.bf16.mxu0 %v7070_v28  ;;  %v775_v30 = vsel %vm763_vm1, %v773_v47, %v774_v48  ;;  %v6615_v47 = vld [vmem:[%s8651_s3 + $0x1a8] sm:$0xff]  }
  0x34   : > { %5901 = vmatpush3.bf16.msra.mxu0 %v6578_v53  ;;  %v797_v51 = vpack.c.bf16 %v775_v30, %v772_v26  ;;  %v778_v53 = vsel %vm763_vm1, %v776_v20, %v777_v23  ;;  %v6616_v20 = vld [vmem:[%s8651_s3 + $0x1e8] sm:$0xff]   ;;  %v6619_v26 = vld [vmem:[%s8651_s3 + $0x198] sm:$0xff]  }
  0x35   : > { %5925 = vmatpush3.bf16.msra.mxu1 %v6579_v6  ;;  %5902 = vmatprep.subr.bf16.mxu0 %v6580_v15  ;;  %v7155_v61 = vpack.c.bf16 %v781_v54, %v778_v53  ;;  %v7172_v6 = vcombine.low %v415_v2, %v417_v3  ;;  %v6620_v30 = vld [vmem:[%s8651_s3 + $0x1d8] sm:$0xff]   ;;  %v6626_v53 = vld [vmem:[%s8651_s3 + $0x1c0] sm:$0xff]   ;;  %v7275_v54 = vld [vmem:[%s6940_s14 + $0x50] sm:$0xf] }
  0x36   : > { %5926 = vmatprep.subr.bf16.mxu1 %v6581_v18 }
  0x37   : > { %5871 = vmatmul.mubr.bf16.gmra.mxu0 %v7077_v34 }
  0x38   : > { %5903 = vmatpush3.bf16.msra.mxu0 %v6580_v15  ;;  %5895 = vmatmul.mubr.bf16.gmra.mxu1 %v7081_v35  ;;  %v416_v15 = vld [vmem:[%s6940_s14 + $0x44] sm:$0x3] }
  0x39   : > { %5927 = vmatpush3.bf16.msra.mxu1 %v6581_v18  ;;  %5904 = vmatprep.subr.bf16.mxu0 %v6582_v36  ;;  %v439_v18 = vunpack.c.l.bf16 %v415_v2  ;;  %v440_v22 = vunpack.c.l.bf16 %v416_v15  ;;  %v6629_v2 = vld [vmem:[%s8651_s3 + $0x230] sm:$0xff]   ;;  %v6635_v15 = vld [vmem:[%s8651_s3 + $0x260] sm:$0xff]  }
  0x3a   : > { %5928 = vmatprep.subr.bf16.mxu1 %v6583_v37  ;;  %5914 = vmatprep.mubr.bf16.mxu0 %v796_v38  ;;  %v1231_v38 = vrot.slane %v441_v19, 4 }
  0x3b   : > { %5938 = vmatprep.mubr.bf16.mxu1 %v4873_v57  ;;  %v785_v57 = vrot.slane %v437_v10, 4  ;;  %v6604_v10 = vld [vmem:[%s8651_s3 + $0x158] sm:$0xff]   ;;  %v1081_v32 = vrot.slane %v439_v18, 2 }
  0x3c   : > { %5905 = vmatpush3.bf16.msra.mxu0 %v6582_v36  ;;  %v1084_v36 = vrot.slane %v441_v19, 2  ;;  %v6638_v19 = vld [vmem:[%s8651_s3 + $0x210] sm:$0xff]  }
  0x3d   : > { %5929 = vmatpush3.bf16.msra.mxu1 %v6583_v37  ;;  %5906 = vmatprep.subr.bf16.mxu0 %v6584_v39  ;;  %v787_v0 = vsel %vm763_vm1, %v785_v57, %v786_v58  ;;  %v1228_v37 = vrot.slane %v439_v18, 4  ;;  %v7284_v57 = vld [vmem:[%s6940_s14 + $0x5c] sm:$0x3]  ;;  %v443_v58 = vunpack.c.l.bf16 %v7275_v54  ;;  %s6517_s14 = smul.u32 24, %s8707_s8  ;;  %s385_s8 = scalar_lea.vmem %s8652_s4, %s8703_s22 }
  0x3e   : > { %5930 = vmatprep.subr.bf16.mxu1 %v6585_v40  ;;  %v7169_v5 = vpack.c.bf16 %v787_v0, %v784_v63  ;;  %v446_v63 = vunpack.c.l.bf16 %v7284_v57  ;;  %v6628_v0 = vld [vmem:[%s8651_s3 + $0x278] sm:$0xff]  }
  0x3f   : > { %v1518_v3 = vrot.slane %v443_v58, 2  ;;  %v6637_v18 = vld [vmem:[%s8651_s3 + $0x258] sm:$0xff]   ;;  %s379_s12 = sadd.s32 %s6517_s14, %s6919_s15 }
  0x40   : > { %5907 = vmatpush3.bf16.msra.mxu0 %v6584_v39  ;;  %v6613_v39 = vld [vmem:[%s8651_s3 + $0x1b0] sm:$0xff]   ;;  %s4868_s28 = sshll.u32 %s379_s12, 2 }
  0x41   : > { %5931 = vmatpush3.bf16.msra.mxu1 %v6585_v40  ;;  %5908 = vmatprep.subr.bf16.mxu0 %v6588_v41  ;;  %v1082_v40 = vrot.slane %v440_v22, 2  ;;  %s7779_s20 = scalar_lea.vmem %s8650_s2, %s4868_s28 }
  0x42   : > { %5932 = vmatprep.subr.bf16.mxu1 %v6589_v42 }
  0x43   : > { %v1083_v45 = vsel %vm483_vm0, %v1081_v32, %v1082_v40  ;;  %v1815_v40 = vld [vmem:[%s7316_s17 + $0xc] sm:$0x3] }
  0x44   : > { %5909 = vmatpush3.bf16.msra.mxu0 %v6588_v41  ;;  %v1085_v41 = vrot.slane %v442_v27, 2 }
  0x45   : > { %5933 = vmatpush3.bf16.msra.mxu1 %v6589_v42  ;;  %5910 = vmatprep.subr.bf16.mxu0 %v6590_v43  ;;  %v1229_v42 = vrot.slane %v440_v22, 4  ;;  %v6639_v22 = vld [vmem:[%s8651_s3 + $0x250] sm:$0xff]  }
  0x46   : > { %5934 = vmatprep.subr.bf16.mxu1 %v6591_v44  ;;  %v1086_v46 = vsel %vm483_vm0, %v1084_v36, %v1085_v41  ;;  %v6643_v36 = vld [vmem:[%s8651_s3 + $0x240] sm:$0xff]   ;;  %v7378_v41 = vld [vmem:[%s7316_s17 + $0x10] sm:$0xf] }
  0x47   : > { %v1230_v48 = vsel %vm763_vm1, %v1228_v37, %v1229_v42  ;;  %v7381_v42 = vld [vmem:[%s7316_s17 + $0x18] sm:$0xf] }
  0x48   : > { %5911 = vmatpush3.bf16.msra.mxu0 %v6590_v43  ;;  %v1232_v43 = vrot.slane %v442_v27, 4  ;;  %v6641_v27 = vld [vmem:[%s8651_s3 + $0x248] sm:$0xff]  }
  0x49   : > { %5935 = vmatpush3.bf16.msra.mxu1 %v6591_v44  ;;  %5912 = vmatprep.subr.bf16.mxu0 %v6592_v49  ;;  %v6614_v44 = vld [vmem:[%s8651_s3 + $0x1f0] sm:$0xff]  }
  0x4a   : > { %5936 = vmatprep.subr.bf16.mxu1 %v6593_v21 }
  0x4c   : > { %5913 = vmatpush3.bf16.msra.mxu0 %v6592_v49  ;;  %v1233_v49 = vsel %vm763_vm1, %v1231_v38, %v1232_v43  ;;  %v6646_v43 = vld [vmem:[%s8651_s3 + $0x2b8] sm:$0xff]  }
  0x4d   : > { %5937 = vmatpush3.bf16.msra.mxu1 %v6593_v21  ;;  %5946 = vmatprep.subr.bf16.mxu0 %v6594_v33  ;;  %v7234_v21 = vpack.c.bf16 %v1086_v46, %v1083_v45  ;;  %v7237_v23 = vpack.c.bf16 %v1233_v49, %v1230_v48  ;;  %v6647_v45 = vld [vmem:[%s8651_s3 + $0x2f8] sm:$0xff]   ;;  %v1669_v46 = vrot.slane %v446_v63, 4 }
  0x4e   : > { %5970 = vmatprep.subr.bf16.mxu1 %v6595_v50 }
  0x4f   : > { %5915 = vmatmul.mubr.bf16.vlgmr.msra.gmra.mxu0 %v797_v51 }
  0x50   : > { %5939 = vmatmul.mubr.bf16.vlgmr.msra.gmra.mxu1 %v7029_v1  ;;  %5947 = vmatpush3.bf16.msra.mxu0 %v6594_v33  ;;  %v6621_v33 = vld [vmem:[%s8651_s3 + $0x190] sm:$0xff]  }
  0x51   : > { %5971 = vmatpush3.bf16.msra.mxu1 %v6595_v50  ;;  %5948 = vmatprep.subr.bf16.mxu0 %v6596_v59  ;;  %v6622_v50 = vld [vmem:[%s8651_s3 + $0x1d0] sm:$0xff]  }
  0x52   : > { %5972 = vmatprep.subr.bf16.mxu1 %v6597_v60  ;;  %5918 = vmatprep.mubr.bf16.mxu0 %v7155_v61 }
  0x53   : > { %5942 = vmatprep.mubr.bf16.mxu1 %v7081_v35 }
  0x54   : > { %5949 = vmatpush3.bf16.msra.mxu0 %v6596_v59  ;;  %v445_v59 = vunpack.c.l.bf16 %v7278_v55 }
  0x55   : > { %5973 = vmatpush3.bf16.msra.mxu1 %v6597_v60  ;;  %5950 = vmatprep.subr.bf16.mxu0 %v6598_v62  ;;  %v6627_v60 = vld [vmem:[%s8651_s3 + $0x238] sm:$0xff]  }
  0x56   : > { %5974 = vmatprep.subr.bf16.mxu1 %v6599_v4  ;;  %v1668_v32 = vrot.slane %v445_v59, 4 }
  0x57   : > { %5919 = vmatmul.mubr.bf16.gmra.mxu0 %v7169_v5 }
  0x58   : > { %5951 = vmatpush3.bf16.msra.mxu0 %v6598_v62  ;;  %5943 = vmatmul.mubr.bf16.gmra.mxu1 %v7172_v6  ;;  %v444_v62 = vunpack.c.l.bf16 %v7281_v56  ;;  %v1670_v56 = vsel %vm763_vm1, %v1668_v32, %v1669_v46  ;;  %v6663_v46 = vld [vmem:[%s8651_s3 + $0x2c0] sm:$0xff]  }
  0x59   : > { %5975 = vmatpush3.bf16.msra.mxu1 %v6599_v4  ;;  %5952 = vmatprep.subr.bf16.mxu0 %v6601_v7  ;;  %v1521_v4 = vrot.slane %v445_v59, 2  ;;  %v6651_v59 = vld [vmem:[%s8651_s3 + $0x2e8] sm:$0xff]  }
  0x5a   : > { %5976 = vmatprep.subr.bf16.mxu1 %v6602_v8  ;;  %5962 = vmatprep.mubr.bf16.mxu0 %v6998_v52  ;;  %v6607_v52 = vld [vmem:[%s8651_s3 + $0x108] sm:$0xff]  }
  0x5b   : > { %5986 = vmatprep.mubr.bf16.mxu1 %v797_v51  ;;  %v6625_v51 = vld [vmem:[%s8651_s3 + $0x180] sm:$0xff]  }
  0x5c   : > { %5953 = vmatpush3.bf16.msra.mxu0 %v6601_v7  ;;  %v1519_v7 = vrot.slane %v444_v62, 2 }
  0x5d   : > { %5977 = vmatpush3.bf16.msra.mxu1 %v6602_v8  ;;  %5954 = vmatprep.subr.bf16.mxu0 %v6603_v9  ;;  %v1522_v8 = vrot.slane %v446_v63, 2 }
  0x5e   : > { %5978 = vmatprep.subr.bf16.mxu1 %v6604_v10 }
  0x60   : > { %5955 = vmatpush3.bf16.msra.mxu0 %v6603_v9  ;;  %v6630_v9 = vld [vmem:[%s8651_s3 + $0x270] sm:$0xff]  }
  0x61   : > { %5979 = vmatpush3.bf16.msra.mxu1 %v6604_v10  ;;  %5956 = vmatprep.subr.bf16.mxu0 %v6605_v11  ;;  %v6632_v10 = vld [vmem:[%s8651_s3 + $0x228] sm:$0xff]  }
  0x62   : > { %5980 = vmatprep.subr.bf16.mxu1 %v6606_v12 }
  0x64   : > { %5957 = vmatpush3.bf16.msra.mxu0 %v6605_v11  ;;  %v1520_v11 = vsel %vm483_vm0, %v1518_v3, %v1519_v7  ;;  %v6654_v3 = vld [vmem:[%s8651_s3 + $0x2a0] sm:$0xff]  }
  0x65   : > { %5981 = vmatpush3.bf16.msra.mxu1 %v6606_v12  ;;  %5958 = vmatprep.subr.bf16.mxu0 %v6607_v52  ;;  %v5005_v12 = vcombine.low %v7275_v54, %v7278_v55 }
  0x66   : > { %5982 = vmatprep.subr.bf16.mxu1 %v6608_v13 }
  0x68   : > { %5959 = vmatpush3.bf16.msra.mxu0 %v6607_v52  ;;  %v7331_v52 = vld [vmem:[%s7316_s17] sm:$0xf] }
  0x69   : > { %5983 = vmatpush3.bf16.msra.mxu1 %v6608_v13  ;;  %5960 = vmatprep.subr.bf16.mxu0 %v6609_v14  ;;  %v1836_v37 = vunpack.c.l.bf16 %v7331_v52 }
  0x6a   : > { %5984 = vmatprep.subr.bf16.mxu1 %v6610_v17 }
  0x6c   : > { %5961 = vmatpush3.bf16.msra.mxu0 %v6609_v14  ;;  %v7334_v14 = vld [vmem:[%s7316_s17 + $0x8] sm:$0xf] }
  0x6d   : > { %5985 = vmatpush3.bf16.msra.mxu1 %v6610_v17  ;;  %5994 = vmatprep.subr.bf16.mxu0 %v6611_v29  ;;  %v5078_v16 = vcombine.low %v7331_v52, %v7334_v14  ;;  %v6636_v17 = vld [vmem:[%s8651_s3 + $0x218] sm:$0xff]   ;;  %v1838_v38 = vunpack.c.l.bf16 %v7334_v14 }
  0x6e   : > { %6018 = vmatprep.subr.bf16.mxu1 %v6612_v31 }
  0x6f   : > { %5963 = vmatmul.mubr.bf16.vlgmr.msra.gmra.mxu0 %v7070_v28  ;;  %v2021_v48 = vrot.slane %v1838_v38, 2 }
  0x70   : > { %5987 = vmatmul.mubr.bf16.vlgmr.msra.gmra.mxu1 %v7155_v61  ;;  %5995 = vmatpush3.bf16.msra.mxu0 %v6611_v29  ;;  %v1665_v29 = vrot.slane %v443_v58, 4  ;;  %v7424_v58 = vld [vmem:[%s7316_s17 + $0x38] sm:$0xf] }
  0x71   : > { %6019 = vmatpush3.bf16.msra.mxu1 %v6612_v31  ;;  %5996 = vmatprep.subr.bf16.mxu0 %v6613_v39  ;;  %v6642_v31 = vld [vmem:[%s8651_s3 + $0x200] sm:$0xff]  }
  0x72   : > { %6020 = vmatprep.subr.bf16.mxu1 %v6614_v44  ;;  %5966 = vmatprep.mubr.bf16.mxu0 %v7077_v34 }
  0x73   : > { %5990 = vmatprep.mubr.bf16.mxu1 %v7169_v5 }
  0x74   : > { %5997 = vmatpush3.bf16.msra.mxu0 %v6613_v39  ;;  %v1813_v39 = vld [vmem:[%s7316_s17 + $0x4] sm:$0x3] }
  0x75   : > { %6021 = vmatpush3.bf16.msra.mxu1 %v6614_v44  ;;  %5998 = vmatprep.subr.bf16.mxu0 %v6615_v47  ;;  %v1666_v44 = vrot.slane %v444_v62, 4  ;;  %v1837_v49 = vunpack.c.l.bf16 %v1813_v39  ;;  %v6661_v39 = vld [vmem:[%s8651_s3 + $0x2c8] sm:$0xff]  }
  0x76   : > { %6022 = vmatprep.subr.bf16.mxu1 %v6616_v20 }
  0x77   : > { %5967 = vmatmul.mubr.bf16.gmra.mxu0 %v7234_v21  ;;  %v1667_v55 = vsel %vm763_vm1, %v1665_v29, %v1666_v44  ;;  %v6659_v29 = vld [vmem:[%s8651_s3 + $0x2d0] sm:$0xff]   ;;  %v6662_v44 = vld [vmem:[%s8651_s3 + $0x280] sm:$0xff]  }
  0x78   : > { %5999 = vmatpush3.bf16.msra.mxu0 %v6615_v47  ;;  %5991 = vmatmul.mubr.bf16.gmra.mxu1 %v7237_v23  ;;  %v2018_v47 = vrot.slane %v1836_v37, 2  ;;  %v1673_v62 = vpack.c.bf16 %v1670_v56, %v1667_v55 }
  0x79   : > { %6023 = vmatpush3.bf16.msra.mxu1 %v6616_v20  ;;  %6000 = vmatprep.subr.bf16.mxu0 %v6617_v24  ;;  %v1839_v20 = vunpack.c.l.bf16 %v1815_v40 }
  0x7a   : > { %6024 = vmatprep.subr.bf16.mxu1 %v6618_v25  ;;  %6010 = vmatprep.mubr.bf16.mxu0 %v7029_v1  ;;  %v6623_v1 = vld [vmem:[%s8651_s3 + $0x188] sm:$0xff]  }
  0x7b   : > { %6034 = vmatprep.mubr.bf16.mxu1 %v7070_v28  ;;  %v6624_v28 = vld [vmem:[%s8651_s3 + $0x1c8] sm:$0xff]   ;;  %v2022_v54 = vrot.slane %v1839_v20, 2  ;;  %v2196_v57 = vrot.slane %v1839_v20, 4 }
  0x7c   : > { %6001 = vmatpush3.bf16.msra.mxu0 %v6617_v24  ;;  %v7398_v24 = vld [vmem:[%s7316_s17 + $0x20] sm:$0xf] }
  0x7d   : > { %6025 = vmatpush3.bf16.msra.mxu1 %v6618_v25  ;;  %6002 = vmatprep.subr.bf16.mxu0 %v6619_v26  ;;  %v7401_v25 = vld [vmem:[%s7316_s17 + $0x28] sm:$0xf] }
  0x7e   : > { %6026 = vmatprep.subr.bf16.mxu1 %v6620_v30 }
  0x80   : > { %6003 = vmatpush3.bf16.msra.mxu0 %v6619_v26  ;;  %v2192_v26 = vrot.slane %v1836_v37, 4  ;;  %v6660_v37 = vld [vmem:[%s8651_s3 + $0x288] sm:$0xff]  }
  0x81   : > { %6027 = vmatpush3.bf16.msra.mxu1 %v6620_v30  ;;  %6004 = vmatprep.subr.bf16.mxu0 %v6621_v33  ;;  %v6648_v30 = vld [vmem:[%s8651_s3 + $0x2b0] sm:$0xff]  }
  0x82   : > { %6028 = vmatprep.subr.bf16.mxu1 %v6622_v50 }
  0x84   : > { %6005 = vmatpush3.bf16.msra.mxu0 %v6621_v33  ;;  %v2195_v33 = vrot.slane %v1838_v38, 4  ;;  %v1823_v38 = vld [vmem:[%s7316_s17 + $0x2c] sm:$0x3] }
  0x85   : > { %6029 = vmatpush3.bf16.msra.mxu1 %v6622_v50  ;;  %6006 = vmatprep.subr.bf16.mxu0 %v6623_v1  ;;  %v6649_v50 = vld [vmem:[%s8651_s3 + $0x2f0] sm:$0xff]  }
  0x86   : > { %6030 = vmatprep.subr.bf16.mxu1 %v6624_v28  ;;  %v2197_v7 = vsel %vm763_vm1, %v2195_v33, %v2196_v57 }
  0x88   : > { %6007 = vmatpush3.bf16.msra.mxu0 %v6623_v1  ;;  %v6650_v1 = vld [vmem:[%s8651_s3 + $0x2a8] sm:$0xff]  }
  0x89   : > { %6031 = vmatpush3.bf16.msra.mxu1 %v6624_v28  ;;  %6008 = vmatprep.subr.bf16.mxu0 %v6625_v51  ;;  %v7415_v28 = vcombine.low %v7398_v24, %v7401_v25 }
  0x8a   : > { %6032 = vmatprep.subr.bf16.mxu1 %v6626_v53 }
  0x8c   : > { %6009 = vmatpush3.bf16.msra.mxu0 %v6625_v51  ;;  %v7418_v51 = vld [vmem:[%s7316_s17 + $0x30] sm:$0xf] }
  0x8d   : > { %6033 = vmatpush3.bf16.msra.mxu1 %v6626_v53  ;;  %6042 = vmatprep.subr.bf16.mxu0 %v6627_v60  ;;  %v2019_v53 = vrot.slane %v1837_v49, 2 }
  0x8e   : > { %6066 = vmatprep.subr.bf16.mxu1 %v6628_v0 }
  0x8f   : > { %6011 = vmatmul.mubr.bf16.vlgmr.msra.gmra.mxu0 %v7081_v35  ;;  %v1523_v35 = vsel %vm483_vm0, %v1521_v4, %v1522_v8  ;;  %v2020_v63 = vsel %vm483_vm0, %v2018_v47, %v2019_v53  ;;  %v6655_v8 = vld [vmem:[%s8651_s3 + $0x2e0] sm:$0xff]   ;;  %v1825_v47 = vld [vmem:[%s7316_s17 + $0x34] sm:$0x3] }
  0x90   : > { %6035 = vmatmul.mubr.bf16.vlgmr.msra.gmra.mxu1 %v7077_v34  ;;  %6043 = vmatpush3.bf16.msra.mxu0 %v6627_v60  ;;  %v6633_v34 = vld [vmem:[%s8651_s3 + $0x268] sm:$0xff]   ;;  %v1526_v13 = vpack.c.bf16 %v1523_v35, %v1520_v11  ;;  %v1840_v60 = vunpack.c.l.bf16 %v7378_v41  ;;  %v1844_v11 = vunpack.c.l.bf16 %v7398_v24  ;;  %v1846_v35 = vunpack.c.l.bf16 %v7401_v25 }
  0x91   : > { %6067 = vmatpush3.bf16.msra.mxu1 %v6628_v0  ;;  %6044 = vmatprep.subr.bf16.mxu0 %v6629_v2  ;;  %v2023_v0 = vsel %vm483_vm0, %v2021_v48, %v2022_v54  ;;  %v1848_v24 = vunpack.c.l.bf16 %v7418_v51  ;;  %v1850_v25 = vunpack.c.l.bf16 %v7424_v58  ;;  %v1849_v54 = vunpack.c.l.bf16 %v1825_v47 }
  0x92   : > { %6068 = vmatprep.subr.bf16.mxu1 %v6630_v9  ;;  %6014 = vmatprep.mubr.bf16.mxu0 %v7172_v6  ;;  %v6634_v6 = vld [vmem:[%s8651_s3 + $0x220] sm:$0xff]   ;;  %v2198_v14 = vrot.slane %v1840_v60, 4 }
  0x93   : > { %6038 = vmatprep.mubr.bf16.mxu1 %v7234_v21  ;;  %v7395_v21 = vcombine.low %v7378_v41, %v7381_v42  ;;  %v2036_v56 = vrot.slane %v1848_v24, 2  ;;  %v2210_v57 = vrot.slane %v1848_v24, 4 }
  0x94   : > { %6045 = vmatpush3.bf16.msra.mxu0 %v6629_v2  ;;  %v1842_v2 = vunpack.c.l.bf16 %v7381_v42 }
  0x95   : > { %6069 = vmatpush3.bf16.msra.mxu1 %v6630_v9  ;;  %6046 = vmatprep.subr.bf16.mxu0 %v6632_v10  ;;  %v2050_v9 = vpack.c.bf16 %v2023_v0, %v2020_v63  ;;  %v2037_v0 = vrot.slane %v1849_v54, 2 }
  0x96   : > { %6070 = vmatprep.subr.bf16.mxu1 %v6633_v34  ;;  %v2027_v52 = vrot.slane %v1842_v2, 2 }
  0x97   : > { %6015 = vmatmul.mubr.bf16.gmra.mxu0 %v5005_v12  ;;  %v2024_v12 = vrot.slane %v1840_v60, 2 }
  0x98   : > { %6047 = vmatpush3.bf16.msra.mxu0 %v6632_v10  ;;  %6039 = vmatmul.mubr.bf16.gmra.mxu1 %v1526_v13  ;;  %v1817_v10 = vld [vmem:[%s7316_s17 + $0x14] sm:$0x3]  ;;  %v6656_v13 = vld [vmem:[%s8651_s3 + $0x298] sm:$0xff]  }
  0x99   : > { %6071 = vmatpush3.bf16.msra.mxu1 %v6633_v34  ;;  %6048 = vmatprep.subr.bf16.mxu0 %v6634_v6 }
  0x9a   : > { %6072 = vmatprep.subr.bf16.mxu1 %v6635_v15  ;;  %6058 = vmatprep.mubr.bf16.mxu0 %v7155_v61  ;;  %v6640_v61 = vld [vmem:[%s8651_s3 + $0x208] sm:$0xff]  }
  0x9b   : > { %6082 = vmatprep.mubr.bf16.mxu1 %v5078_v16  ;;  %v1819_v16 = vld [vmem:[%s7316_s17 + $0x1c] sm:$0x3] }
  0x9c   : > { %6049 = vmatpush3.bf16.msra.mxu0 %v6634_v6  ;;  %v6657_v6 = vld [vmem:[%s8651_s3 + $0x2d8] sm:$0xff]  }
  0x9d   : > { %6073 = vmatpush3.bf16.msra.mxu1 %v6635_v15  ;;  %6050 = vmatprep.subr.bf16.mxu0 %v6636_v17  ;;  %v1841_v15 = vunpack.c.l.bf16 %v1817_v10 }
  0x9e   : > { %6074 = vmatprep.subr.bf16.mxu1 %v6637_v18 }
  0x9f   : > { %v2025_v32 = vrot.slane %v1841_v15, 2  ;;  %v2199_v41 = vrot.slane %v1841_v15, 4  ;;  %v6669_v15 = vld [vmem:[%s8651_s3 + $0x368] sm:$0xff]  }
  0xa0   : > { %6051 = vmatpush3.bf16.msra.mxu0 %v6636_v17  ;;  %v2201_v17 = vrot.slane %v1842_v2, 4 }
  0xa1   : > { %6075 = vmatpush3.bf16.msra.mxu1 %v6637_v18  ;;  %6052 = vmatprep.subr.bf16.mxu0 %v6638_v19  ;;  %v2030_v18 = vrot.slane %v1844_v11, 2 }
  0xa2   : > { %6076 = vmatprep.subr.bf16.mxu1 %v6639_v22 }
  0xa4   : > { %6053 = vmatpush3.bf16.msra.mxu0 %v6638_v19  ;;  %v2033_v19 = vrot.slane %v1846_v35, 2 }
  0xa5   : > { %6077 = vmatpush3.bf16.msra.mxu1 %v6639_v22  ;;  %6054 = vmatprep.subr.bf16.mxu0 %v6640_v61  ;;  %v2204_v22 = vrot.slane %v1844_v11, 4  ;;  %v6667_v11 = vld [vmem:[%s8651_s3 + $0x370] sm:$0xff]  }
  0xa6   : > { %6078 = vmatprep.subr.bf16.mxu1 %v6641_v27 }
  0xa8   : > { %6055 = vmatpush3.bf16.msra.mxu0 %v6640_v61  ;;  %v2207_v61 = vrot.slane %v1846_v35, 4 }
  0xa9   : > { %6079 = vmatpush3.bf16.msra.mxu1 %v6641_v27  ;;  %6056 = vmatprep.subr.bf16.mxu0 %v6642_v31  ;;  %v6658_v27 = vld [vmem:[%s8651_s3 + $0x290] sm:$0xff]  }
  0xaa   : > { %6080 = vmatprep.subr.bf16.mxu1 %v6643_v36 }
  0xac   : > { %6057 = vmatpush3.bf16.msra.mxu0 %v6642_v31  ;;  %v1843_v31 = vunpack.c.l.bf16 %v1819_v16 }
  0xad   : > { %6081 = vmatpush3.bf16.msra.mxu1 %v6643_v36  ;;  %6090 = vmatprep.subr.bf16.mxu0 %v6646_v43  ;;  %v1821_v36 = vld [vmem:[%s7316_s17 + $0x24] sm:$0x3] }
  0xae   : > { %6114 = vmatprep.subr.bf16.mxu1 %v6647_v45  ;;  %v2028_v40 = vrot.slane %v1843_v31, 2  ;;  %v2202_v42 = vrot.slane %v1843_v31, 4  ;;  %v6676_v31 = vld [vmem:[%s8651_s3 + $0x308] sm:$0xff]  }
  0xaf   : > { %6059 = vmatmul.mubr.bf16.vlgmr.msra.gmra.mxu0 %v7169_v5  ;;  %v2193_v5 = vrot.slane %v1837_v49, 4  ;;  %v1827_v49 = vld [vmem:[%s7316_s17 + $0x3c] sm:$0x3] }
  0xb0   : > { %6083 = vmatmul.mubr.bf16.vlgmr.msra.gmra.mxu1 %v7395_v21  ;;  %6091 = vmatpush3.bf16.msra.mxu0 %v6646_v43  ;;  %v1845_v43 = vunpack.c.l.bf16 %v1821_v36  ;;  %v2203_v53 = vsel %vm763_vm1, %v2201_v17, %v2202_v42  ;;  %v1851_v55 = vunpack.c.l.bf16 %v1827_v49  ;;  %v7556_v36 = vld [vmem:[%s7316_s17 + $0x48] sm:$0xf]  ;;  %v6682_v49 = vld [vmem:[%s8651_s3 + $0x3b0] sm:$0xff]  }
  0xb1   : > { %6115 = vmatpush3.bf16.msra.mxu1 %v6647_v45  ;;  %6092 = vmatprep.subr.bf16.mxu0 %v6648_v30  ;;  %v2194_v4 = vsel %vm763_vm1, %v2192_v26, %v2193_v5  ;;  %v1847_v45 = vunpack.c.l.bf16 %v1823_v38  ;;  %v2026_v26 = vsel %vm483_vm0, %v2024_v12, %v2025_v32  ;;  %v2039_v5 = vrot.slane %v1850_v25, 2  ;;  %v7553_v32 = vld [vmem:[%s7316_s17 + $0x40] sm:$0xf]  ;;  %v7562_v38 = vld [vmem:[%s7316_s17 + $0x4c] sm:$0x3] }
  0xb2   : > { %6116 = vmatprep.subr.bf16.mxu1 %v6649_v50  ;;  %6062 = vmatprep.mubr.bf16.mxu0 %v7237_v23  ;;  %v7437_v23 = vcombine.low %v7418_v51, %v7424_v58  ;;  %v2224_v34 = vpack.c.bf16 %v2197_v7, %v2194_v4  ;;  %v2031_v48 = vrot.slane %v1845_v43, 2  ;;  %v2205_v20 = vrot.slane %v1845_v43, 4  ;;  %v6664_v51 = vld [vmem:[%s8651_s3 + $0x338] sm:$0xff]  }
  0xb3   : > { %6086 = vmatprep.mubr.bf16.mxu1 %v7415_v28  ;;  %v2034_v33 = vrot.slane %v1847_v45, 2  ;;  %v6665_v58 = vld [vmem:[%s8651_s3 + $0x378] sm:$0xff]   ;;  %v2040_v2 = vrot.slane %v1851_v55, 2  ;;  %v2213_v7 = vrot.slane %v1850_v25, 4  ;;  %v2214_v10 = vrot.slane %v1851_v55, 4  ;;  %v6683_v25 = vld [vmem:[%s8651_s3 + $0x3f0] sm:$0xff]  }
  0xb4   : > { %6093 = vmatpush3.bf16.msra.mxu0 %v6648_v30  ;;  %v2029_v30 = vsel %vm483_vm0, %v2027_v52, %v2028_v40  ;;  %v2038_v12 = vsel %vm483_vm0, %v2036_v56, %v2037_v0  ;;  %v6679_v40 = vld [vmem:[%s8651_s3 + $0x340] sm:$0xff]   ;;  %v1854_v42 = vunpack.c.l.bf16 %v7556_v36 }
  0xb5   : > { %6117 = vmatpush3.bf16.msra.mxu1 %v6649_v50  ;;  %6094 = vmatprep.subr.bf16.mxu0 %v6650_v1  ;;  %v2208_v50 = vrot.slane %v1847_v45, 4  ;;  %v2035_v63 = vsel %vm483_vm0, %v2033_v19, %v2034_v33  ;;  %v2041_v52 = vsel %vm483_vm0, %v2039_v5, %v2040_v2  ;;  %v6671_v19 = vld [vmem:[%s8651_s3 + $0x360] sm:$0xff]   ;;  %v6680_v45 = vld [vmem:[%s8651_s3 + $0x3b8] sm:$0xff]  }
  0xb6   : > { %6118 = vmatprep.subr.bf16.mxu1 %v6651_v59  ;;  %v7520_v16 = vpack.c.bf16 %v2041_v52, %v2038_v12  ;;  %v6690_v12 = vld [vmem:[%s8651_s3 + $0x3d8] sm:$0xff]  }
  0xb7   : > { %6063 = vmatmul.mubr.bf16.gmra.mxu0 %v1673_v62  ;;  %v2032_v62 = vsel %vm483_vm0, %v2030_v18, %v2031_v48  ;;  %v2209_v4 = vsel %vm763_vm1, %v2207_v61, %v2208_v50  ;;  %v6670_v18 = vld [vmem:[%s8651_s3 + $0x320] sm:$0xff]   ;;  %v6673_v61 = vld [vmem:[%s8651_s3 + $0x358] sm:$0xff]   ;;  %v2512_v48 = vrot.slane %v1854_v42, 2 }
  0xb8   : > { %6095 = vmatpush3.bf16.msra.mxu0 %v6650_v1  ;;  %6087 = vmatmul.mubr.bf16.gmra.mxu1 %v7437_v23  ;;  %v2200_v1 = vsel %vm763_vm1, %v2198_v14, %v2199_v41  ;;  %v7504_v35 = vpack.c.bf16 %v2035_v63, %v2032_v62  ;;  %v1852_v41 = vunpack.c.l.bf16 %v7553_v32 }
  0xb9   : > { %6119 = vmatpush3.bf16.msra.mxu1 %v6651_v59  ;;  %6096 = vmatprep.subr.bf16.mxu0 %v6654_v3  ;;  %v2051_v59 = vpack.c.bf16 %v2029_v30, %v2026_v26  ;;  %v7492_v60 = vpack.c.bf16 %v2203_v53, %v2200_v1  ;;  %v6685_v30 = vld [vmem:[%s8651_s3 + $0x3a8] sm:$0xff]  }
  0xba   : > { %6120 = vmatprep.subr.bf16.mxu1 %v6655_v8  ;;  %6106 = vmatprep.mubr.bf16.mxu0 %v2050_v9  ;;  %v2211_v9 = vrot.slane %v1849_v54, 4  ;;  %v2509_v47 = vrot.slane %v1852_v41, 2 }
  0xbb   : > { %6130 = vmatprep.mubr.bf16.mxu1 %v2224_v34 }
  0xbc   : > { %6097 = vmatpush3.bf16.msra.mxu0 %v6654_v3  ;;  %v2206_v3 = vsel %vm763_vm1, %v2204_v22, %v2205_v20  ;;  %v2212_v14 = vsel %vm763_vm1, %v2210_v57, %v2211_v9  ;;  %v6672_v22 = vld [vmem:[%s8651_s3 + $0x318] sm:$0xff]   ;;  %v7611_v57 = vcombine.low %v7553_v32, %v7556_v36  ;;  %v6700_v32 = vld [vmem:[%s8651_s3 + $0x470] sm:$0xff]  }
  0xbd   : > { %6121 = vmatpush3.bf16.msra.mxu1 %v6655_v8  ;;  %6098 = vmatprep.subr.bf16.mxu0 %v6656_v13  ;;  %v6666_v8 = vld [vmem:[%s8651_s3 + $0x330] sm:$0xff]   ;;  %v7506_v34 = vpack.c.bf16 %v2209_v4, %v2206_v3  ;;  %v6688_v3 = vld [vmem:[%s8651_s3 + $0x3e0] sm:$0xff]  }
  0xbe   : > { %6122 = vmatprep.subr.bf16.mxu1 %v6657_v6 }
  0xc0   : > { %6099 = vmatpush3.bf16.msra.mxu0 %v6656_v13  ;;  %v6668_v13 = vld [vmem:[%s8651_s3 + $0x328] sm:$0xff]  }
  0xc1   : > { %6123 = vmatpush3.bf16.msra.mxu1 %v6657_v6  ;;  %6100 = vmatprep.subr.bf16.mxu0 %v6658_v27  ;;  %v2215_v6 = vsel %vm763_vm1, %v2213_v7, %v2214_v10  ;;  %v6689_v7 = vld [vmem:[%s8651_s3 + $0x398] sm:$0xff]  }
  0xc2   : > { %6124 = vmatprep.subr.bf16.mxu1 %v6659_v29  ;;  %v7523_v17 = vpack.c.bf16 %v2215_v6, %v2212_v14  ;;  %v6691_v6 = vld [vmem:[%s8651_s3 + $0x390] sm:$0xff]  }
  0xc4   : > { %6101 = vmatpush3.bf16.msra.mxu0 %v6658_v27  ;;  %v6674_v27 = vld [vmem:[%s8651_s3 + $0x310] sm:$0xff]  }
  0xc5   : > { %6125 = vmatpush3.bf16.msra.mxu1 %v6659_v29  ;;  %6102 = vmatprep.subr.bf16.mxu0 %v6660_v37  ;;  %v6675_v29 = vld [vmem:[%s8651_s3 + $0x350] sm:$0xff]  }
  0xc6   : > { %6126 = vmatprep.subr.bf16.mxu1 %v6661_v39 }
  0xc8   : > { %6103 = vmatpush3.bf16.msra.mxu0 %v6660_v37  ;;  %v7559_v37 = vld [vmem:[%s7316_s17 + $0x44] sm:$0x3] }
  0xc9   : > { %6127 = vmatpush3.bf16.msra.mxu1 %v6661_v39  ;;  %6104 = vmatprep.subr.bf16.mxu0 %v6662_v44  ;;  %v6678_v39 = vld [vmem:[%s8651_s3 + $0x300] sm:$0xff]   ;;  %v1853_v43 = vunpack.c.l.bf16 %v7559_v37 }
  0xca   : > { %6128 = vmatprep.subr.bf16.mxu1 %v6663_v46 }
  0xcb   : > { %v2510_v20 = vrot.slane %v1853_v43, 2 }
  0xcc   : > { %6105 = vmatpush3.bf16.msra.mxu0 %v6662_v44  ;;  %v1855_v44 = vunpack.c.l.bf16 %v7562_v38 }
  0xcd   : > { %6129 = vmatpush3.bf16.msra.mxu1 %v6663_v46  ;;  %6138 = vmatprep.subr.bf16.mxu0 %v6664_v51  ;;  %v6681_v46 = vld [vmem:[%s8651_s3 + $0x3f8] sm:$0xff]   ;;  %v2511_v53 = vsel %vm483_vm0, %v2509_v47, %v2510_v20 }
  0xce   : > { %6162 = vmatprep.subr.bf16.mxu1 %v6665_v58  ;;  %v2513_v24 = vrot.slane %v1855_v44, 2  ;;  %v2660_v47 = vrot.slane %v1855_v44, 4  ;;  %v6701_v44 = vld [vmem:[%s8651_s3 + $0x428] sm:$0xff]   ;;  %v7695_v20 = vld [vmem:[%s7316_s17 + $0x58] sm:$0xf] }
  0xcf   : > { %6107 = vmatmul.mubr.bf16.vlgmr.msra.gmra.mxu0 %v2051_v59 }
  0xd0   : > { %6131 = vmatmul.mubr.bf16.vlgmr.msra.gmra.mxu1 %v7492_v60  ;;  %6139 = vmatpush3.bf16.msra.mxu0 %v6664_v51  ;;  %v2514_v54 = vsel %vm483_vm0, %v2512_v48, %v2513_v24  ;;  %v6686_v51 = vld [vmem:[%s8651_s3 + $0x3e8] sm:$0xff]   ;;  %v6699_v48 = vld [vmem:[%s8651_s3 + $0x430] sm:$0xff]  }
  0xd1   : > { %6163 = vmatpush3.bf16.msra.mxu1 %v6665_v58  ;;  %6140 = vmatprep.subr.bf16.mxu0 %v6666_v8  ;;  %v6687_v58 = vld [vmem:[%s8651_s3 + $0x3a0] sm:$0xff]   ;;  %v7617_v62 = vpack.c.bf16 %v2514_v54, %v2511_v53 }
  0xd2   : > { %6164 = vmatprep.subr.bf16.mxu1 %v6667_v11  ;;  %6110 = vmatprep.mubr.bf16.mxu0 %v7504_v35 }
  0xd3   : > { %6134 = vmatprep.mubr.bf16.mxu1 %v7506_v34 }
  0xd4   : > { %6141 = vmatpush3.bf16.msra.mxu0 %v6666_v8 }
  0xd5   : > { %6165 = vmatpush3.bf16.msra.mxu1 %v6667_v11  ;;  %6142 = vmatprep.subr.bf16.mxu0 %v6668_v13 }
  0xd6   : > { %6166 = vmatprep.subr.bf16.mxu1 %v6669_v15 }
  0xd7   : > { %6111 = vmatmul.mubr.bf16.gmra.mxu0 %v7520_v16 }
  0xd8   : > { %6143 = vmatpush3.bf16.msra.mxu0 %v6668_v13  ;;  %6135 = vmatmul.mubr.bf16.gmra.mxu1 %v7523_v17 }
  0xd9   : > { %6167 = vmatpush3.bf16.msra.mxu1 %v6669_v15  ;;  %6144 = vmatprep.subr.bf16.mxu0 %v6670_v18 }
  0xda   : > { %6168 = vmatprep.subr.bf16.mxu1 %v6671_v19  ;;  %6154 = vmatprep.mubr.bf16.mxu0 %v7395_v21  ;;  %v6677_v21 = vld [vmem:[%s8651_s3 + $0x348] sm:$0xff]  }
  0xdb   : > { %6178 = vmatprep.mubr.bf16.mxu1 %v2051_v59 }
  0xdc   : > { %6145 = vmatpush3.bf16.msra.mxu0 %v6670_v18 }
  0xdd   : > { %6169 = vmatpush3.bf16.msra.mxu1 %v6671_v19  ;;  %6146 = vmatprep.subr.bf16.mxu0 %v6672_v22 }
  0xde   : > { %6170 = vmatprep.subr.bf16.mxu1 %v6673_v61 }
  0xe0   : > { %6147 = vmatpush3.bf16.msra.mxu0 %v6672_v22 }
  0xe1   : > { %6171 = vmatpush3.bf16.msra.mxu1 %v6673_v61  ;;  %6148 = vmatprep.subr.bf16.mxu0 %v6674_v27 }
  0xe2   : > { %6172 = vmatprep.subr.bf16.mxu1 %v6675_v29 }
  0xe4   : > { %6149 = vmatpush3.bf16.msra.mxu0 %v6674_v27  ;;  %v6694_v27 = vld [vmem:[%s8651_s3 + $0x3c8] sm:$0xff]  }
  0xe5   : > { %6173 = vmatpush3.bf16.msra.mxu1 %v6675_v29  ;;  %6150 = vmatprep.subr.bf16.mxu0 %v6676_v31  ;;  %v6695_v29 = vld [vmem:[%s8651_s3 + $0x380] sm:$0xff]  }
  0xe6   : > { %6174 = vmatprep.subr.bf16.mxu1 %v6677_v21 }
  0xe8   : > { %6151 = vmatpush3.bf16.msra.mxu0 %v6676_v31  ;;  %v6696_v31 = vld [vmem:[%s8651_s3 + $0x3c0] sm:$0xff]  }
  0xe9   : > { %6175 = vmatpush3.bf16.msra.mxu1 %v6677_v21  ;;  %6152 = vmatprep.subr.bf16.mxu0 %v6678_v39  ;;  %v6697_v21 = vld [vmem:[%s8651_s3 + $0x438] sm:$0xff]  }
  0xea   : > { %6176 = vmatprep.subr.bf16.mxu1 %v6679_v40 }
  0xec   : > { %6153 = vmatpush3.bf16.msra.mxu0 %v6678_v39  ;;  %v6698_v39 = vld [vmem:[%s8651_s3 + $0x478] sm:$0xff]  }
  0xed   : > { %6177 = vmatpush3.bf16.msra.mxu1 %v6679_v40  ;;  %6186 = vmatprep.subr.bf16.mxu0 %v6680_v45  ;;  %v2656_v40 = vrot.slane %v1852_v41, 4 }
  0xee   : > { %6210 = vmatprep.subr.bf16.mxu1 %v6681_v46 }
  0xef   : > { %v5868_v26 = vpop.f32.mrf.mxu0  ;;  %6155 = vmatmul.mubr.bf16.vlgmr.msra.gmra.mxu0 %v7415_v28 }
  0xf0   : > { %v5892_v33 = vpop.f32.mrf.mxu1  ;;  %6179 = vmatmul.mubr.bf16.vlgmr.msra.gmra.mxu1 %v7504_v35  ;;  %6187 = vmatpush3.bf16.msra.mxu0 %v6680_v45  ;;  %v2659_v45 = vrot.slane %v1854_v42, 4 }
  0xf1   : > { %v7599_v50 = vadd.f32 %v5892_v33, %v5868_v26  ;;  %6211 = vmatpush3.bf16.msra.mxu1 %v6681_v46  ;;  %v619_v1 = vpop.f32.mrf.mxu0  ;;  %6188 = vmatprep.subr.bf16.mxu0 %v6682_v49  ;;  %v2657_v46 = vrot.slane %v1853_v43, 4  ;;  %v6702_v26 = vld [vmem:[%s8651_s3 + $0x468] sm:$0xff]  }
  0xf2   : > { %v732_v55 = vpop.f32.mrf.mxu1  ;;  %6212 = vmatprep.subr.bf16.mxu1 %v6683_v25  ;;  %6158 = vmatprep.mubr.bf16.mxu0 %v7437_v23  ;;  %v2661_v42 = vsel %vm763_vm1, %v2659_v45, %v2660_v47  ;;  %v7789_v47 = vld [vmem:[%s7779_s20] sm:$0xf] }
  0xf3   : > { %v7607_v56 = vadd.f32 %v732_v55, %v619_v1  ;;  %v5869_v5 = vpop.f32.mrf.mxu0  ;;  %6182 = vmatprep.mubr.bf16.mxu1 %v7520_v16  ;;  %v2658_v41 = vsel %vm763_vm1, %v2656_v40, %v2657_v46  ;;  %v6714_v46 = vld [vmem:[%s8651_s3 + $0x4b8] sm:$0xff]  }
  0xf4   : > { %v5893_v59 = vpop.f32.mrf.mxu1  ;;  %6189 = vmatpush3.bf16.msra.mxu0 %v6682_v49  ;;  %v7692_v49 = vld [vmem:[%s7316_s17 + $0x50] sm:$0xf]  ;;  %v7704_v33 = vpack.c.bf16 %v2661_v42, %v2658_v41  ;;  %v6715_v42 = vld [vmem:[%s8651_s3 + $0x4f8] sm:$0xff]  }
  0xf5   : > { %v7619_v63 = vadd.f32 %v5893_v59, %v5869_v5  ;;  %6213 = vmatpush3.bf16.msra.mxu1 %v6683_v25  ;;  %v622_v0 = vpop.f32.mrf.mxu0  ;;  %6190 = vmatprep.subr.bf16.mxu0 %v6685_v30  ;;  %v5227_v54 = vcombine.low %v7692_v49, %v7695_v20 }
  0xf6   : > { %v735_v2 = vpop.f32.mrf.mxu1  ;;  %6214 = vmatprep.subr.bf16.mxu1 %v6686_v51 }
  0xf7   : > { %v7624_v4 = vadd.f32 %v735_v2, %v622_v0  ;;  %6159 = vmatmul.mubr.bf16.gmra.mxu0 %v7611_v57  ;;  %v5872_v8 = vpop.f32.mrf.mxu0 }
  0xf8   : > { %6191 = vmatpush3.bf16.msra.mxu0 %v6685_v30  ;;  %6183 = vmatmul.mubr.bf16.gmra.mxu1 %v7617_v62  ;;  %v5896_v9 = vpop.f32.mrf.mxu1 }
  0xf9   : > { %6215 = vmatpush3.bf16.msra.mxu1 %v6686_v51  ;;  %6192 = vmatprep.subr.bf16.mxu0 %v6687_v58  ;;  %v7631_v10 = vadd.f32 %v5896_v9, %v5872_v8  ;;  %v635_v11 = vpop.f32.mrf.mxu0  ;;  %v6704_v51 = vld [vmem:[%s8651_s3 + $0x420] sm:$0xff]  }
  0xfa   : > { %6216 = vmatprep.subr.bf16.mxu1 %v6688_v3  ;;  %v748_v52 = vpop.f32.mrf.mxu1  ;;  %6202 = vmatprep.mubr.bf16.mxu0 %v7492_v60  ;;  %v6692_v60 = vld [vmem:[%s8651_s3 + $0x3d0] sm:$0xff]  }
  0xfb   : > { %v7637_v13 = vadd.f32 %v748_v52, %v635_v11  ;;  %v5873_v14 = vpop.f32.mrf.mxu0  ;;  %6226 = vmatprep.mubr.bf16.mxu1 %v7415_v28  ;;  %v6693_v28 = vld [vmem:[%s8651_s3 + $0x388] sm:$0xff]  }
  0xfc   : > { %6193 = vmatpush3.bf16.msra.mxu0 %v6687_v58  ;;  %v5897_v15 = vpop.f32.mrf.mxu1  ;;  %v6705_v58 = vld [vmem:[%s8651_s3 + $0x460] sm:$0xff]  }
  0xfd   : > { %6217 = vmatpush3.bf16.msra.mxu1 %v6688_v3  ;;  %6194 = vmatprep.subr.bf16.mxu0 %v6689_v7  ;;  %v7643_v18 = vadd.f32 %v5897_v15, %v5873_v14  ;;  %v638_v19 = vpop.f32.mrf.mxu0 }
  0xfe   : > { %6218 = vmatprep.subr.bf16.mxu1 %v6690_v12  ;;  %v751_v22 = vpop.f32.mrf.mxu1 }
  0xff   : > { %v7648_v61 = vadd.f32 %v751_v22, %v638_v19  ;;  %v6711_v22 = vld [vmem:[%s8651_s3 + $0x448] sm:$0xff]  }
 0x100   : > { %6195 = vmatpush3.bf16.msra.mxu0 %v6689_v7 }
 0x101   : > { %6219 = vmatpush3.bf16.msra.mxu1 %v6690_v12  ;;  %6196 = vmatprep.subr.bf16.mxu0 %v6691_v6 }
 0x102   : > { %6220 = vmatprep.subr.bf16.mxu1 %v6692_v60 }
 0x104   : > { %6197 = vmatpush3.bf16.msra.mxu0 %v6691_v6  ;;  %v6708_v6 = vld [vmem:[%s8651_s3 + $0x410] sm:$0xff]  }
 0x105   : > { %6221 = vmatpush3.bf16.msra.mxu1 %v6692_v60  ;;  %6198 = vmatprep.subr.bf16.mxu0 %v6693_v28  ;;  %v6710_v60 = vld [vmem:[%s8651_s3 + $0x408] sm:$0xff]  }
 0x106   : > { %6222 = vmatprep.subr.bf16.mxu1 %v6694_v27 }
 0x108   : > { %6199 = vmatpush3.bf16.msra.mxu0 %v6693_v28  ;;  %v1856_v28 = vunpack.c.l.bf16 %v7692_v49 }
 0x109   : > { %6223 = vmatpush3.bf16.msra.mxu1 %v6694_v27  ;;  %6200 = vmatprep.subr.bf16.mxu0 %v6695_v29  ;;  %v1835_v27 = vld [vmem:[%s7316_s17 + $0x5c] sm:$0x3] }
 0x10a   : > { %6224 = vmatprep.subr.bf16.mxu1 %v6696_v31  ;;  %v1859_v40 = vunpack.c.l.bf16 %v1835_v27  ;;  %v2946_v45 = vrot.slane %v1856_v28, 2 }
 0x10c   : > { %6201 = vmatpush3.bf16.msra.mxu0 %v6695_v29  ;;  %v6712_v29 = vld [vmem:[%s8651_s3 + $0x400] sm:$0xff]  }
 0x10d   : > { %6225 = vmatpush3.bf16.msra.mxu1 %v6696_v31  ;;  %6234 = vmatprep.subr.bf16.mxu0 %v6697_v21  ;;  %v1858_v31 = vunpack.c.l.bf16 %v7695_v20  ;;  %v3097_v20 = vrot.slane %v1859_v40, 4 }
 0x10e   : > { %6258 = vmatprep.subr.bf16.mxu1 %v6698_v39 }
 0x10f   : > { %v5916_v36 = vpop.f32.mrf.mxu0  ;;  %6203 = vmatmul.mubr.bf16.vlgmr.msra.gmra.mxu0 %v7506_v34  ;;  %v3096_v41 = vrot.slane %v1858_v31, 4 }
 0x110   : > { %v932_v37 = vadd.f32 %v5916_v36, %v7599_v50  ;;  %v5940_v38 = vpop.f32.mrf.mxu1  ;;  %6227 = vmatmul.mubr.bf16.vlgmr.msra.gmra.mxu1 %v7437_v23  ;;  %6235 = vmatpush3.bf16.msra.mxu0 %v6697_v21  ;;  %v6713_v21 = vld [vmem:[%s8651_s3 + $0x440] sm:$0xff]   ;;  %v7798_v36 = vld [vmem:[%s7779_s20 + $0xc] sm:$0x3] }
 0x111   : > { %6259 = vmatpush3.bf16.msra.mxu1 %v6698_v39  ;;  %v899_v43 = vpop.f32.mrf.mxu0  ;;  %6236 = vmatprep.subr.bf16.mxu0 %v6699_v48 }
 0x112   : > { %v7697_v24 = vadd.f32 %v5940_v38, %v932_v37  ;;  %v930_v23 = vadd.f32 %v899_v43, %v7607_v56  ;;  %v1038_v25 = vpop.f32.mrf.mxu1  ;;  %6260 = vmatprep.subr.bf16.mxu1 %v6700_v32  ;;  %6206 = vmatprep.mubr.bf16.mxu0 %v7523_v17  ;;  %v2949_v37 = vrot.slane %v1858_v31, 2  ;;  %v3093_v38 = vrot.slane %v1856_v28, 4 }
 0x113   : > { %v5917_v30 = vpop.f32.mrf.mxu0  ;;  %6230 = vmatprep.mubr.bf16.mxu1 %v7611_v57 }
 0x114   : > { %v7713_v50 = vadd.f32 %v1038_v25, %v930_v23  ;;  %v933_v1 = vadd.f32 %v5917_v30, %v7619_v63  ;;  %v5941_v53 = vpop.f32.mrf.mxu1  ;;  %6237 = vmatpush3.bf16.msra.mxu0 %v6699_v48  ;;  %v7792_v48 = vld [vmem:[%s7779_s20 + $0x8] sm:$0xf]  ;;  %v3264_v23 = vunpack.c.l.bf16 %v7789_v47  ;;  %v3267_v30 = vunpack.c.l.bf16 %v7798_v36 }
 0x115   : > { %6261 = vmatpush3.bf16.msra.mxu1 %v6700_v32  ;;  %v902_v55 = vpop.f32.mrf.mxu0  ;;  %6238 = vmatprep.subr.bf16.mxu0 %v6701_v44  ;;  %v7795_v32 = vld [vmem:[%s7779_s20 + $0x4] sm:$0x3]  ;;  %v3266_v25 = vunpack.c.l.bf16 %v7792_v48 }
 0x116   : > { %v7721_v56 = vadd.f32 %v5941_v53, %v933_v1  ;;  %v931_v5 = vadd.f32 %v902_v55, %v7624_v4  ;;  %v1041_v57 = vpop.f32.mrf.mxu1  ;;  %6262 = vmatprep.subr.bf16.mxu1 %v6702_v26  ;;  %v6706_v4 = vld [vmem:[%s8651_s3 + $0x418] sm:$0xff]   ;;  %v6716_v1 = vld [vmem:[%s8651_s3 + $0x4b0] sm:$0xff]  }
 0x117   : > { %v5920_v59 = vpop.f32.mrf.mxu0  ;;  %6207 = vmatmul.mubr.bf16.gmra.mxu0 %v7704_v33  ;;  %v6717_v53 = vld [vmem:[%s8651_s3 + $0x4f0] sm:$0xff]  }
 0x118   : > { %v7734_v63 = vadd.f32 %v1041_v57, %v931_v5  ;;  %v936_v0 = vadd.f32 %v5920_v59, %v7631_v10  ;;  %6239 = vmatpush3.bf16.msra.mxu0 %v6701_v44  ;;  %v5944_v2 = vpop.f32.mrf.mxu1  ;;  %6231 = vmatmul.mubr.bf16.gmra.mxu1 %v5227_v54  ;;  %v6707_v10 = vld [vmem:[%s8651_s3 + $0x458] sm:$0xff]   ;;  %v2950_v44 = vrot.slane %v1859_v40, 2  ;;  %v3098_v57 = vsel %vm763_vm1, %v3096_v41, %v3097_v20 }
 0x119   : > { %6263 = vmatpush3.bf16.msra.mxu1 %v6702_v26  ;;  %v915_v3 = vpop.f32.mrf.mxu0  ;;  %6240 = vmatprep.subr.bf16.mxu0 %v6704_v51  ;;  %v3265_v26 = vunpack.c.l.bf16 %v7795_v32 }
 0x11a   : > { %v934_v7 = vadd.f32 %v915_v3, %v7637_v13  ;;  %v7741_v8 = vadd.f32 %v5944_v2, %v936_v0  ;;  %v1054_v9 = vpop.f32.mrf.mxu1  ;;  %6264 = vmatprep.subr.bf16.mxu1 %v6705_v58  ;;  %6250 = vmatprep.mubr.bf16.mxu0 %v7504_v35  ;;  %v3449_v2 = vrot.slane %v3266_v25, 2  ;;  %v3450_v3 = vrot.slane %v3267_v30, 2 }
 0x11b   : > { %v5921_v11 = vpop.f32.mrf.mxu0  ;;  %6274 = vmatprep.mubr.bf16.mxu1 %v7506_v34 }
 0x11c   : > { %v937_v12 = vadd.f32 %v5921_v11, %v7643_v18  ;;  %v7750_v52 = vadd.f32 %v1054_v9, %v934_v7  ;;  %6241 = vmatpush3.bf16.msra.mxu0 %v6704_v51  ;;  %v5945_v13 = vpop.f32.mrf.mxu1  ;;  %v6709_v18 = vld [vmem:[%s8651_s3 + $0x450] sm:$0xff]   ;;  %v2951_v51 = vsel %vm483_vm0, %v2949_v37, %v2950_v44 }
 0x11d   : > { %6265 = vmatpush3.bf16.msra.mxu1 %v6705_v58  ;;  %v918_v14 = vpop.f32.mrf.mxu0  ;;  %6242 = vmatprep.subr.bf16.mxu0 %v6706_v4  ;;  %v3446_v58 = vrot.slane %v3264_v23, 2  ;;  %v7877_v44 = vld [vmem:[%s7779_s20 + $0x14] sm:$0x3] }
 0x11e   : > { %v935_v35 = vadd.f32 %v918_v14, %v7648_v61  ;;  %v7756_v15 = vadd.f32 %v5945_v13, %v937_v12  ;;  %v1057_v34 = vpop.f32.mrf.mxu1  ;;  %6266 = vmatprep.subr.bf16.mxu1 %v6707_v10  ;;  %v1833_v61 = vld [vmem:[%s7316_s17 + $0x54] sm:$0x3]  ;;  %s4869_s17 = sshll.u32 %s8709_s21, 3 }
 0x11f   : > { %v1857_v39 = vunpack.c.l.bf16 %v1833_v61  ;;  %v5300_v61 = vcombine.low %v7789_v47, %v7792_v48  ;;  %v3621_v47 = vrot.slane %v3265_v26, 4  ;;  %s395_s21 = sadd.s32 %s4870_s9, %s4869_s17 }
 0x120   : > { %v7762_v19 = vadd.f32 %v1057_v34, %v935_v35  ;;  %6243 = vmatpush3.bf16.msra.mxu0 %v6706_v4  ;;  %v3451_v34 = vsel %vm483_vm0, %v3449_v2, %v3450_v3  ;;  %v7904_v2 = vld [vmem:[%s7779_s20 + $0x28] sm:$0xf]  ;;  %v7910_v3 = vld [vmem:[%s7779_s20 + $0x2c] sm:$0x3]  ;;  %s4871_s16 = sshll.u32 %s395_s21, 3 }
 0x121   : > { %6267 = vmatpush3.bf16.msra.mxu1 %v6707_v10  ;;  %6244 = vmatprep.subr.bf16.mxu0 %v6708_v6  ;;  %v2947_v43 = vrot.slane %v1857_v39, 2  ;;  %v3094_v49 = vrot.slane %v1857_v39, 4  ;;  %v6719_v10 = vld [vmem:[%s8651_s3 + $0x4e8] sm:$0xff]   ;;  %v6722_v39 = vld [vmem:[%s8651_s3 + $0x498] sm:$0xff]   ;;  %s8622_s19 = scalar_lea.vmem %s8654_s6, %s4871_s16 }
 0x122   : > { %6268 = vmatprep.subr.bf16.mxu1 %v6709_v18 }
 0x123   : > { %v2948_v54 = vsel %vm483_vm0, %v2946_v45, %v2947_v43  ;;  %v3095_v5 = vsel %vm763_vm1, %v3093_v38, %v3094_v49  ;;  %v7868_v38 = vld [vmem:[%s7779_s20 + $0x10] sm:$0xf]  ;;  %v7880_v49 = vld [vmem:[%s7779_s20 + $0x1c] sm:$0x3] }
 0x124   : > { %6245 = vmatpush3.bf16.msra.mxu0 %v6708_v6  ;;  %v2954_v12 = vpack.c.bf16 %v2951_v51, %v2948_v54  ;;  %v3101_v13 = vpack.c.bf16 %v3098_v57, %v3095_v5  ;;  %v3268_v51 = vunpack.c.l.bf16 %v7868_v38  ;;  %v3269_v57 = vunpack.c.l.bf16 %v7877_v44 }
 0x125   : > { %6269 = vmatpush3.bf16.msra.mxu1 %v6709_v18  ;;  %6246 = vmatprep.subr.bf16.mxu0 %v6710_v60  ;;  %v6720_v18 = vld [vmem:[%s8651_s3 + $0x4a0] sm:$0xff]  }
 0x126   : > { %6270 = vmatprep.subr.bf16.mxu1 %v6711_v22 }
 0x128   : > { %6247 = vmatpush3.bf16.msra.mxu0 %v6710_v60 }
 0x129   : > { %6271 = vmatpush3.bf16.msra.mxu1 %v6711_v22  ;;  %6248 = vmatprep.subr.bf16.mxu0 %v6712_v29 }
 0x12a   : > { %6272 = vmatprep.subr.bf16.mxu1 %v6713_v21 }
 0x12c   : > { %6249 = vmatpush3.bf16.msra.mxu0 %v6712_v29 }
 0x12d   : > { %6273 = vmatpush3.bf16.msra.mxu1 %v6713_v21  ;;  %6282 = vmatprep.subr.bf16.mxu0 %v6714_v46 }
 0x12e   : > { %6306 = vmatprep.subr.bf16.mxu1 %v6715_v42 }
 0x12f   : > { %v5964_v55 = vpop.f32.mrf.mxu0  ;;  %6251 = vmatmul.mubr.bf16.vlgmr.msra.gmra.mxu0 %v7520_v16  ;;  %v3447_v16 = vrot.slane %v3265_v26, 2 }
 0x130   : > { %v1222_v59 = vadd.f32 %v5964_v55, %v7697_v24  ;;  %v5988_v0 = vpop.f32.mrf.mxu1  ;;  %6275 = vmatmul.mubr.bf16.vlgmr.msra.gmra.mxu1 %v7523_v17  ;;  %6283 = vmatpush3.bf16.msra.mxu0 %v6714_v46  ;;  %v6718_v24 = vld [vmem:[%s8651_s3 + $0x4a8] sm:$0xff]   ;;  %v6725_v55 = vld [vmem:[%s8651_s3 + $0x4d0] sm:$0xff]  }
 0x131   : > { %6307 = vmatpush3.bf16.msra.mxu1 %v6715_v42  ;;  %v1189_v4 = vpop.f32.mrf.mxu0  ;;  %6284 = vmatprep.subr.bf16.mxu0 %v6716_v1 }
 0x132   : > { %v7831_v7 = vadd.f32 %v5988_v0, %v1222_v59  ;;  %v1220_v17 = vadd.f32 %v1189_v4, %v7713_v50  ;;  %v1336_v9 = vpop.f32.mrf.mxu1  ;;  %6308 = vmatprep.subr.bf16.mxu1 %v6717_v53  ;;  %6254 = vmatprep.mubr.bf16.mxu0 %v7617_v62  ;;  %v3448_v50 = vsel %vm483_vm0, %v3446_v58, %v3447_v16  ;;  %v3271_v58 = vunpack.c.l.bf16 %v7880_v49  ;;  %v7901_v0 = vld [vmem:[%s7779_s20 + $0x20] sm:$0xf]  ;;  %v7907_v16 = vld [vmem:[%s7779_s20 + $0x24] sm:$0x3]  ;;  %v6727_v4 = vld [vmem:[%s8651_s3 + $0x4c8] sm:$0xff]  }
 0x133   : > { %v5965_v11 = vpop.f32.mrf.mxu0  ;;  %6278 = vmatprep.mubr.bf16.mxu1 %v7704_v33  ;;  %v3478_v27 = vpack.c.bf16 %v3451_v34, %v3448_v50  ;;  %v6729_v50 = vld [vmem:[%s8651_s3 + $0x4c0] sm:$0xff]   ;;  %v7934_v34 = vld [vmem:[%s7779_s20 + $0x30] sm:$0xf] }
 0x134   : > { %v7839_v14 = vadd.f32 %v1336_v9, %v1220_v17  ;;  %v1223_v6 = vadd.f32 %v5965_v11, %v7721_v56  ;;  %v5989_v35 = vpop.f32.mrf.mxu1  ;;  %6285 = vmatpush3.bf16.msra.mxu0 %v6716_v1  ;;  %v6721_v56 = vld [vmem:[%s8651_s3 + $0x4e0] sm:$0xff]   ;;  %v6724_v1 = vld [vmem:[%s8651_s3 + $0x490] sm:$0xff]   ;;  %v3453_v9 = vrot.slane %v3269_v57, 2  ;;  %v3272_v11 = vunpack.c.l.bf16 %v7901_v0 }
 0x135   : > { %6309 = vmatpush3.bf16.msra.mxu1 %v6717_v53  ;;  %v1192_v62 = vpop.f32.mrf.mxu0  ;;  %6286 = vmatprep.subr.bf16.mxu0 %v6718_v24 }
 0x136   : > { %v7847_v60 = vadd.f32 %v5989_v35, %v1223_v6  ;;  %v1221_v33 = vadd.f32 %v1192_v62, %v7734_v63  ;;  %v1339_v22 = vpop.f32.mrf.mxu1  ;;  %6310 = vmatprep.subr.bf16.mxu1 %v6719_v10  ;;  %v3275_v6 = vunpack.c.l.bf16 %v7910_v3  ;;  %v6728_v35 = vld [vmem:[%s8651_s3 + $0x480] sm:$0xff]   ;;  %v7937_v62 = vld [vmem:[%s7779_s20 + $0x38] sm:$0xf] }
 0x137   : > { %v5968_v28 = vpop.f32.mrf.mxu0  ;;  %6255 = vmatmul.mubr.bf16.gmra.mxu0 %v2954_v12  ;;  %v3274_v12 = vunpack.c.l.bf16 %v7904_v2 }
 0x138   : > { %v7855_v29 = vadd.f32 %v1339_v22, %v1221_v33  ;;  %v1226_v31 = vadd.f32 %v5968_v28, %v7741_v8  ;;  %6287 = vmatpush3.bf16.msra.mxu0 %v6718_v24  ;;  %v5992_v21 = vpop.f32.mrf.mxu1  ;;  %6279 = vmatmul.mubr.bf16.gmra.mxu1 %v3101_v13  ;;  %v6723_v8 = vld [vmem:[%s8651_s3 + $0x4d8] sm:$0xff]   ;;  %v3452_v24 = vrot.slane %v3268_v51, 2  ;;  %v3273_v13 = vunpack.c.l.bf16 %v7907_v16 }
 0x139   : > { %6311 = vmatpush3.bf16.msra.mxu1 %v6719_v10  ;;  %v1205_v63 = vpop.f32.mrf.mxu0  ;;  %6288 = vmatprep.subr.bf16.mxu0 %v6720_v18  ;;  %v3456_v10 = vrot.slane %v3271_v58, 2  ;;  %v7943_v33 = vld [vmem:[%s7779_s20 + $0x3c] sm:$0x3]  ;;  %v3461_v28 = vrot.slane %v3274_v12, 2  ;;  %v3635_v44 = vrot.slane %v3274_v12, 4 }
 0x13a   : > { %v1224_v40 = vadd.f32 %v1205_v63, %v7750_v52  ;;  %v7862_v45 = vadd.f32 %v5992_v21, %v1226_v31  ;;  %v1352_v46 = vpop.f32.mrf.mxu1  ;;  %6312 = vmatprep.subr.bf16.mxu1 %v6721_v56  ;;  %6298 = vmatprep.mubr.bf16.mxu0 %v5300_v61  ;;  %v7874_v52 = vld [vmem:[%s7779_s20 + $0x18] sm:$0xf]  ;;  %v3454_v22 = vsel %vm483_vm0, %v3452_v24, %v3453_v9  ;;  %v3458_v61 = vrot.slane %v3272_v11, 2  ;;  %v6735_v24 = vld [vmem:[%s8651_s3 + $0x570] sm:$0xff]  }
 0x13b   : > { %v5969_v37 = vpop.f32.mrf.mxu0  ;;  %6322 = vmatprep.mubr.bf16.mxu1 %v3478_v27  ;;  %v3270_v5 = vunpack.c.l.bf16 %v7874_v52  ;;  %v3459_v27 = vrot.slane %v3273_v13, 2  ;;  %v3462_v31 = vrot.slane %v3275_v6, 2  ;;  %v6732_v21 = vld [vmem:[%s8651_s3 + $0x538] sm:$0xff]   ;;  %v3276_v63 = vunpack.c.l.bf16 %v7934_v34 }
 0x13c   : > { %v1227_v41 = vadd.f32 %v5969_v37, %v7756_v15  ;;  %v7871_v42 = vadd.f32 %v1352_v46, %v1224_v40  ;;  %6289 = vmatpush3.bf16.msra.mxu0 %v6720_v18  ;;  %v5993_v43 = vpop.f32.mrf.mxu1  ;;  %v7940_v18 = vld [vmem:[%s7779_s20 + $0x34] sm:$0x3]  ;;  %v3279_v46 = vunpack.c.l.bf16 %v7943_v33  ;;  %v7967_v37 = vcombine.low %v7868_v38, %v7874_v52  ;;  %v6749_v38 = vld [vmem:[%s8651_s3 + $0x540] sm:$0xff]  }
 0x13d   : > { %6313 = vmatpush3.bf16.msra.mxu1 %v6721_v56  ;;  %v1208_v20 = vpop.f32.mrf.mxu0  ;;  %6290 = vmatprep.subr.bf16.mxu0 %v6722_v39  ;;  %v3455_v17 = vrot.slane %v3270_v5, 2  ;;  %v3277_v40 = vunpack.c.l.bf16 %v7940_v18  ;;  %v3623_v9 = vrot.slane %v3266_v25, 4  ;;  %v6738_v25 = vld [vmem:[%s8651_s3 + $0x528] sm:$0xff]   ;;  %v3632_v52 = vrot.slane %v3272_v11, 4 }
 0x13e   : > { %v1225_v15 = vadd.f32 %v1208_v20, %v7762_v19  ;;  %v7886_v53 = vadd.f32 %v5993_v43, %v1227_v41  ;;  %v1355_v54 = vpop.f32.mrf.mxu1  ;;  %6314 = vmatprep.subr.bf16.mxu1 %v6723_v8  ;;  %v6726_v19 = vld [vmem:[%s8651_s3 + $0x488] sm:$0xff]   ;;  %v3460_v43 = vsel %vm483_vm0, %v3458_v61, %v3459_v27  ;;  %v3463_v20 = vsel %vm483_vm0, %v3461_v28, %v3462_v31 }
 0x13f   : > { %v3457_v56 = vsel %vm483_vm0, %v3455_v17, %v3456_v10  ;;  %v7991_v17 = vcombine.low %v7901_v0, %v7904_v2  ;;  %v8018_v28 = vcombine.low %v7934_v34, %v7937_v62  ;;  %v3633_v49 = vrot.slane %v3273_v13, 4  ;;  %v6751_v0 = vld [vmem:[%s8651_s3 + $0x5f8] sm:$0xff]   ;;  %v6753_v34 = vld [vmem:[%s8651_s3 + $0x5f0] sm:$0xff]  }
 0x140   : > { %v7895_v59 = vadd.f32 %v1355_v54, %v1225_v15  ;;  %6291 = vmatpush3.bf16.msra.mxu0 %v6722_v39  ;;  %v3278_v39 = vunpack.c.l.bf16 %v7937_v62  ;;  %v7969_v41 = vpack.c.bf16 %v3457_v56, %v3454_v22  ;;  %v3464_v15 = vrot.slane %v3276_v63, 2 }
 0x141   : > { %6315 = vmatpush3.bf16.msra.mxu1 %v6723_v8  ;;  %6292 = vmatprep.subr.bf16.mxu0 %v6724_v1  ;;  %v6733_v8 = vld [vmem:[%s8651_s3 + $0x578] sm:$0xff]   ;;  %v3634_v16 = vsel %vm763_vm1, %v3632_v52, %v3633_v49  ;;  %v3638_v11 = vrot.slane %v3276_v63, 4  ;;  %v3639_v13 = vrot.slane %v3277_v40, 4 }
 0x142   : > { %6316 = vmatprep.subr.bf16.mxu1 %v6725_v55  ;;  %v3467_v54 = vrot.slane %v3278_v39, 2  ;;  %v3641_v12 = vrot.slane %v3278_v39, 4 }
 0x143   : > { %v3640_v39 = vsel %vm763_vm1, %v3638_v11, %v3639_v13 }
 0x144   : > { %6293 = vmatpush3.bf16.msra.mxu0 %v6724_v1  ;;  %v6734_v1 = vld [vmem:[%s8651_s3 + $0x530] sm:$0xff]  }
 0x145   : > { %6317 = vmatpush3.bf16.msra.mxu1 %v6725_v55  ;;  %6294 = vmatprep.subr.bf16.mxu0 %v6726_v19  ;;  %v3465_v55 = vrot.slane %v3277_v40, 2 }
 0x146   : > { %6318 = vmatprep.subr.bf16.mxu1 %v6727_v4 }
 0x147   : > { %v3466_v56 = vsel %vm483_vm0, %v3464_v15, %v3465_v55  ;;  %v6740_v15 = vld [vmem:[%s8651_s3 + $0x520] sm:$0xff]  }
 0x148   : > { %6295 = vmatpush3.bf16.msra.mxu0 %v6726_v19  ;;  %v3468_v19 = vrot.slane %v3279_v46, 2 }
 0x149   : > { %6319 = vmatpush3.bf16.msra.mxu1 %v6727_v4  ;;  %6296 = vmatprep.subr.bf16.mxu0 %v6728_v35  ;;  %v3620_v4 = vrot.slane %v3264_v23, 4  ;;  %v3624_v23 = vrot.slane %v3267_v30, 4 }
 0x14a   : > { %6320 = vmatprep.subr.bf16.mxu1 %v6729_v50  ;;  %v3469_v32 = vsel %vm483_vm0, %v3467_v54, %v3468_v19 }
 0x14b   : > { %v3622_v27 = vsel %vm763_vm1, %v3620_v4, %v3621_v47  ;;  %v3625_v31 = vsel %vm763_vm1, %v3623_v9, %v3624_v23  ;;  %v6742_v47 = vld [vmem:[%s8651_s3 + $0x518] sm:$0xff]  }
 0x14c   : > { %6297 = vmatpush3.bf16.msra.mxu0 %v6728_v35  ;;  %v7996_v35 = vpack.c.bf16 %v3463_v20, %v3460_v43  ;;  %v8026_v43 = vpack.c.bf16 %v3469_v32, %v3466_v56 }
 0x14d   : > { %6321 = vmatpush3.bf16.msra.mxu1 %v6729_v50  ;;  %6330 = vmatprep.subr.bf16.mxu0 %v6732_v21 }
 0x14e   : > { %6354 = vmatprep.subr.bf16.mxu1 %v6733_v8 }
 0x14f   : > { %v6012_v10 = vpop.f32.mrf.mxu0  ;;  %6299 = vmatmul.mubr.bf16.vlgmr.msra.gmra.mxu0 %v7967_v37 }
 0x150   : > { %v1508_v50 = vadd.f32 %v6012_v10, %v7831_v7  ;;  %v6036_v22 = vpop.f32.mrf.mxu1  ;;  %6323 = vmatmul.mubr.bf16.vlgmr.msra.gmra.mxu1 %v7969_v41  ;;  %6331 = vmatpush3.bf16.msra.mxu0 %v6732_v21  ;;  %v6739_v7 = vld [vmem:[%s8651_s3 + $0x568] sm:$0xff]  }
 0x151   : > { %6355 = vmatpush3.bf16.msra.mxu1 %v6733_v8  ;;  %v1475_v48 = vpop.f32.mrf.mxu0  ;;  %6332 = vmatprep.subr.bf16.mxu0 %v6734_v1 }
 0x152   : > { %v8009_v26 = vadd.f32 %v6036_v22, %v1508_v50  ;;  %v1506_v36 = vadd.f32 %v1475_v48, %v7839_v14  ;;  %v1626_v30 = vpop.f32.mrf.mxu1  ;;  %6356 = vmatprep.subr.bf16.mxu1 %v6735_v24  ;;  %6302 = vmatprep.mubr.bf16.mxu0 %v7991_v17 }
 0x153   : > { %v6013_v61 = vpop.f32.mrf.mxu0  ;;  %6326 = vmatprep.mubr.bf16.mxu1 %v7996_v35 }
 0x154   : > { %v8023_v14 = vadd.f32 %v1626_v30, %v1506_v36  ;;  %v1509_v21 = vadd.f32 %v6013_v61, %v7847_v60  ;;  %v6037_v8 = vpop.f32.mrf.mxu1  ;;  %6333 = vmatpush3.bf16.msra.mxu0 %v6734_v1  ;;  %v6741_v60 = vld [vmem:[%s8651_s3 + $0x560] sm:$0xff]   ;;  %v3652_v1 = vpack.c.bf16 %v3625_v31, %v3622_v27  ;;  %v6744_v36 = vld [vmem:[%s8651_s3 + $0x510] sm:$0xff]   ;;  %v6746_v27 = vld [vmem:[%s8651_s3 + $0x508] sm:$0xff]   ;;  %v3626_v31 = vrot.slane %v3268_v51, 4 }
 0x155   : > { %6357 = vmatpush3.bf16.msra.mxu1 %v6735_v24  ;;  %v1478_v20 = vpop.f32.mrf.mxu0  ;;  %6334 = vmatprep.subr.bf16.mxu0 %v6738_v25  ;;  %v3636_v51 = vrot.slane %v3275_v6, 4  ;;  %v3642_v6 = vrot.slane %v3279_v46, 4 }
 0x156   : > { %v8031_v54 = vadd.f32 %v6037_v8, %v1509_v21  ;;  %v1507_v55 = vadd.f32 %v1478_v20, %v7855_v29  ;;  %v1629_v19 = vpop.f32.mrf.mxu1  ;;  %6358 = vmatprep.subr.bf16.mxu1 %v6739_v7  ;;  %v3629_v21 = vrot.slane %v3270_v5, 4  ;;  %v3627_v8 = vrot.slane %v3269_v57, 4 }
 0x157   : > { %v6016_v4 = vpop.f32.mrf.mxu0  ;;  %6303 = vmatmul.mubr.bf16.gmra.mxu0 %v8018_v28  ;;  %v3630_v20 = vrot.slane %v3271_v58, 4  ;;  %v6750_v58 = vld [vmem:[%s8651_s3 + $0x5b8] sm:$0xff]   ;;  %v3637_v3 = vsel %vm763_vm1, %v3635_v44, %v3636_v51  ;;  %v3643_v40 = vsel %vm763_vm1, %v3641_v12, %v3642_v6  ;;  %v6761_v44 = vld [vmem:[%s8651_s3 + $0x590] sm:$0xff]  }
 0x158   : > { %v8038_v24 = vadd.f32 %v1629_v19, %v1507_v55  ;;  %v1512_v9 = vadd.f32 %v6016_v4, %v7862_v45  ;;  %6335 = vmatpush3.bf16.msra.mxu0 %v6738_v25  ;;  %v6040_v10 = vpop.f32.mrf.mxu1  ;;  %6327 = vmatmul.mubr.bf16.gmra.mxu1 %v8026_v43  ;;  %v6743_v45 = vld [vmem:[%s8651_s3 + $0x558] sm:$0xff]   ;;  %v3628_v5 = vsel %vm763_vm1, %v3626_v31, %v3627_v8  ;;  %v6752_v55 = vld [vmem:[%s8651_s3 + $0x5b0] sm:$0xff]   ;;  %v6754_v19 = vld [vmem:[%s8651_s3 + $0x5a8] sm:$0xff]  }
 0x159   : > { %6359 = vmatpush3.bf16.msra.mxu1 %v6739_v7  ;;  %v1491_v29 = vpop.f32.mrf.mxu0  ;;  %6336 = vmatprep.subr.bf16.mxu0 %v6740_v15  ;;  %v3631_v57 = vsel %vm763_vm1, %v3629_v21, %v3630_v20  ;;  %v8120_v62 = vpack.c.bf16 %v3637_v3, %v3634_v16  ;;  %v6766_v16 = vld [vmem:[%s8651_s3 + $0x5c0] sm:$0xff]   ;;  %v6767_v6 = vld [vmem:[%s8651_s3 + $0x638] sm:$0xff]  }
 0x15a   : > { %v1510_v23 = vadd.f32 %v1491_v29, %v7871_v42  ;;  %v8046_v50 = vadd.f32 %v6040_v10, %v1512_v9  ;;  %v1642_v22 = vpop.f32.mrf.mxu1  ;;  %6360 = vmatprep.subr.bf16.mxu1 %v6741_v60  ;;  %6346 = vmatprep.mubr.bf16.mxu0 %v3652_v1  ;;  %v8102_v2 = vpack.c.bf16 %v3631_v57, %v3628_v5  ;;  %v8134_v1 = vld [vmem:[%s7779_s20 + $0x48] sm:$0xf] }
 0x15b   : > { %v6017_v48 = vpop.f32.mrf.mxu0  ;;  %6370 = vmatprep.mubr.bf16.mxu1 %v7967_v37  ;;  %v6755_v10 = vld [vmem:[%s8651_s3 + $0x5e8] sm:$0xff]   ;;  %v3282_v11 = vunpack.c.l.bf16 %v8134_v1 }
 0x15c   : > { %v1513_v25 = vadd.f32 %v6017_v48, %v7886_v53  ;;  %v8053_v56 = vadd.f32 %v1642_v22, %v1510_v23  ;;  %6337 = vmatpush3.bf16.msra.mxu0 %v6740_v15  ;;  %v6041_v32 = vpop.f32.mrf.mxu1  ;;  %v6745_v53 = vld [vmem:[%s8651_s3 + $0x550] sm:$0xff]   ;;  %v6748_v15 = vld [vmem:[%s8651_s3 + $0x500] sm:$0xff]   ;;  %v6763_v57 = vld [vmem:[%s8651_s3 + $0x588] sm:$0xff]  }
 0x15d   : > { %6361 = vmatpush3.bf16.msra.mxu1 %v6741_v60  ;;  %v1494_v42 = vpop.f32.mrf.mxu0  ;;  %6338 = vmatprep.subr.bf16.mxu0 %v6742_v47  ;;  %v8131_v60 = vld [vmem:[%s7779_s20 + $0x40] sm:$0xf] }
 0x15e   : > { %v1511_v30 = vadd.f32 %v1494_v42, %v7895_v59  ;;  %v8059_v7 = vadd.f32 %v6041_v32, %v1513_v25  ;;  %v1645_v61 = vpop.f32.mrf.mxu1  ;;  %6362 = vmatprep.subr.bf16.mxu1 %v6743_v45  ;;  %v6747_v59 = vld [vmem:[%s8651_s3 + $0x548] sm:$0xff]   ;;  %v6757_v25 = vld [vmem:[%s8651_s3 + $0x5a0] sm:$0xff]   ;;  %v3280_v3 = vunpack.c.l.bf16 %v8131_v60 }
 0x160   : > { %v8064_v37 = vadd.f32 %v1645_v61, %v1511_v30  ;;  %6339 = vmatpush3.bf16.msra.mxu0 %v6742_v47  ;;  %v8143_v47 = vpack.c.bf16 %v3643_v40, %v3640_v39  ;;  %v4084_v39 = vrot.slane %v3280_v3, 4  ;;  %v4087_v40 = vrot.slane %v3282_v11, 4 }
 0x161   : > { %6363 = vmatpush3.bf16.msra.mxu1 %v6743_v45  ;;  %6340 = vmatprep.subr.bf16.mxu0 %v6744_v36 }
 0x162   : > { %6364 = vmatprep.subr.bf16.mxu1 %v6745_v53 }
 0x164   : > { %6341 = vmatpush3.bf16.msra.mxu0 %v6744_v36 }
 0x165   : > { %6365 = vmatpush3.bf16.msra.mxu1 %v6745_v53  ;;  %6342 = vmatprep.subr.bf16.mxu0 %v6746_v27 }
 0x166   : > { %6366 = vmatprep.subr.bf16.mxu1 %v6747_v59 }
 0x168   : > { %6343 = vmatpush3.bf16.msra.mxu0 %v6746_v27 }
 0x169   : > { %6367 = vmatpush3.bf16.msra.mxu1 %v6747_v59  ;;  %6344 = vmatprep.subr.bf16.mxu0 %v6748_v15 }
 0x16a   : > { %6368 = vmatprep.subr.bf16.mxu1 %v6749_v38 }
 0x16c   : > { %6345 = vmatpush3.bf16.msra.mxu0 %v6748_v15 }
 0x16d   : > { %6369 = vmatpush3.bf16.msra.mxu1 %v6749_v38  ;;  %6378 = vmatprep.subr.bf16.mxu0 %v6750_v58 }
 0x16e   : > { %6402 = vmatprep.subr.bf16.mxu1 %v6751_v0 }
 0x16f   : > { %v6060_v18 = vpop.f32.mrf.mxu0  ;;  %6347 = vmatmul.mubr.bf16.vlgmr.msra.gmra.mxu0 %v8102_v2 }
 0x170   : > { %v1806_v33 = vadd.f32 %v6060_v18, %v8009_v26  ;;  %v6084_v63 = vpop.f32.mrf.mxu1  ;;  %6371 = vmatmul.mubr.bf16.vlgmr.msra.gmra.mxu1 %v7991_v17  ;;  %6379 = vmatpush3.bf16.msra.mxu0 %v6750_v58  ;;  %v6765_v58 = vld [vmem:[%s8651_s3 + $0x580] sm:$0xff]   ;;  %v3940_v18 = vrot.slane %v3282_v11, 2  ;;  %v6777_v11 = vld [vmem:[%s8651_s3 + $0x610] sm:$0xff]  }
 0x171   : > { %6403 = vmatpush3.bf16.msra.mxu1 %v6751_v0  ;;  %v1773_v46 = vpop.f32.mrf.mxu0  ;;  %6380 = vmatprep.subr.bf16.mxu0 %v6752_v55  ;;  %v3257_v0 = vld [vmem:[%s7779_s20 + $0x44] sm:$0x3] }
 0x172   : > { %v8136_v26 = vadd.f32 %v6084_v63, %v1806_v33  ;;  %v1804_v4 = vadd.f32 %v1773_v46, %v8023_v14  ;;  %v1963_v9 = vpop.f32.mrf.mxu1  ;;  %6404 = vmatprep.subr.bf16.mxu1 %v6753_v34  ;;  %6350 = vmatprep.mubr.bf16.mxu0 %v8120_v62  ;;  %v8151_v14 = vcombine.low %v8131_v60, %v8134_v1  ;;  %v3281_v12 = vunpack.c.l.bf16 %v3257_v0  ;;  %v6769_v46 = vld [vmem:[%s8651_s3 + $0x630] sm:$0xff]  }
 0x173   : > { %v6061_v29 = vpop.f32.mrf.mxu0  ;;  %6374 = vmatprep.mubr.bf16.mxu1 %v8018_v28  ;;  %v6770_v1 = vld [vmem:[%s8651_s3 + $0x670] sm:$0xff]  }
 0x174   : > { %v8146_v23 = vadd.f32 %v1963_v9, %v1804_v4  ;;  %v1807_v22 = vadd.f32 %v6061_v29, %v8031_v54  ;;  %v6085_v45 = vpop.f32.mrf.mxu1  ;;  %6381 = vmatpush3.bf16.msra.mxu0 %v6752_v55  ;;  %v6758_v54 = vld [vmem:[%s8651_s3 + $0x5e0] sm:$0xff]   ;;  %v6768_v55 = vld [vmem:[%s8651_s3 + $0x678] sm:$0xff]   ;;  %v3938_v33 = vrot.slane %v3281_v12, 2 }
 0x175   : > { %6405 = vmatpush3.bf16.msra.mxu1 %v6753_v34  ;;  %v1776_v48 = vpop.f32.mrf.mxu0  ;;  %6382 = vmatprep.subr.bf16.mxu0 %v6754_v19  ;;  %v3937_v34 = vrot.slane %v3280_v3, 2 }
 0x176   : > { %v8156_v32 = vadd.f32 %v6085_v45, %v1807_v22  ;;  %v1805_v42 = vadd.f32 %v1776_v48, %v8038_v24  ;;  %v1966_v36 = vpop.f32.mrf.mxu1  ;;  %6406 = vmatprep.subr.bf16.mxu1 %v6755_v10  ;;  %v6759_v24 = vld [vmem:[%s8651_s3 + $0x598] sm:$0xff]   ;;  %v6771_v48 = vld [vmem:[%s8651_s3 + $0x628] sm:$0xff]  }
 0x177   : > { %v6064_v30 = vpop.f32.mrf.mxu0  ;;  %6351 = vmatmul.mubr.bf16.gmra.mxu0 %v8143_v47  ;;  %v3939_v29 = vsel %vm483_vm0, %v3937_v34, %v3938_v33  ;;  %v6782_v34 = vld [vmem:[%s8651_s3 + $0x640] sm:$0xff]   ;;  %v8300_v33 = vld [vmem:[%s7779_s20 + $0x58] sm:$0xf] }
 0x178   : > { %v8163_v61 = vadd.f32 %v1966_v36, %v1805_v42  ;;  %v1810_v53 = vadd.f32 %v6064_v30, %v8046_v50  ;;  %6383 = vmatpush3.bf16.msra.mxu0 %v6754_v19  ;;  %v6088_v27 = vpop.f32.mrf.mxu1  ;;  %6375 = vmatmul.mubr.bf16.gmra.mxu1 %v8151_v14  ;;  %v6760_v50 = vld [vmem:[%s8651_s3 + $0x5d8] sm:$0xff]   ;;  %v4085_v19 = vrot.slane %v3281_v12, 4  ;;  %v6772_v30 = vld [vmem:[%s8651_s3 + $0x668] sm:$0xff]  }
 0x179   : > { %6407 = vmatpush3.bf16.msra.mxu1 %v6755_v10  ;;  %v1789_v59 = vpop.f32.mrf.mxu0  ;;  %6384 = vmatprep.subr.bf16.mxu0 %v6757_v25 }
 0x17a   : > { %v1808_v31 = vadd.f32 %v1789_v59, %v8053_v56  ;;  %v8171_v21 = vadd.f32 %v6088_v27, %v1810_v53  ;;  %v1979_v8 = vpop.f32.mrf.mxu1  ;;  %6408 = vmatprep.subr.bf16.mxu1 %v6758_v54  ;;  %6394 = vmatprep.mubr.bf16.mxu0 %v7969_v41 }
 0x17b   : > { %v6065_v20 = vpop.f32.mrf.mxu0  ;;  %6418 = vmatprep.mubr.bf16.mxu1 %v8102_v2  ;;  %v3259_v2 = vld [vmem:[%s7779_s20 + $0x4c] sm:$0x3] }
 0x17c   : > { %v1811_v15 = vadd.f32 %v6065_v20, %v8059_v7  ;;  %v8179_v38 = vadd.f32 %v1979_v8, %v1808_v31  ;;  %6385 = vmatpush3.bf16.msra.mxu0 %v6757_v25  ;;  %v6089_v52 = vpop.f32.mrf.mxu1  ;;  %v6762_v7 = vld [vmem:[%s8651_s3 + $0x5d0] sm:$0xff]   ;;  %v3283_v13 = vunpack.c.l.bf16 %v3259_v2  ;;  %v4086_v25 = vsel %vm763_vm1, %v4084_v39, %v4085_v19  ;;  %v8306_v39 = vld [vmem:[%s7779_s20 + $0x5c] sm:$0x3] }
 0x17d   : > { %6409 = vmatpush3.bf16.msra.mxu1 %v6758_v54  ;;  %v1792_v56 = vpop.f32.mrf.mxu0  ;;  %6386 = vmatprep.subr.bf16.mxu0 %v6759_v24  ;;  %v3286_v19 = vunpack.c.l.bf16 %v8300_v33 }
 0x17e   : > { %v1809_v49 = vadd.f32 %v1792_v56, %v8064_v37  ;;  %v8185_v41 = vadd.f32 %v6089_v52, %v1811_v15  ;;  %v1982_v51 = vpop.f32.mrf.mxu1  ;;  %6410 = vmatprep.subr.bf16.mxu1 %v6760_v50  ;;  %v6764_v37 = vld [vmem:[%s8651_s3 + $0x5c8] sm:$0xff]   ;;  %v3941_v63 = vrot.slane %v3283_v13, 2  ;;  %v4088_v60 = vrot.slane %v3283_v13, 4 }
 0x180   : > { %v8190_v5 = vadd.f32 %v1982_v51, %v1809_v49  ;;  %6387 = vmatpush3.bf16.msra.mxu0 %v6759_v24  ;;  %v3942_v22 = vsel %vm483_vm0, %v3940_v18, %v3941_v63  ;;  %v4089_v42 = vsel %vm763_vm1, %v4087_v40, %v4088_v60  ;;  %v8297_v18 = vld [vmem:[%s7779_s20 + $0x50] sm:$0xf]  ;;  %v8303_v63 = vld [vmem:[%s7779_s20 + $0x54] sm:$0x3]  ;;  %v6783_v40 = vld [vmem:[%s8651_s3 + $0x6b8] sm:$0xff]  }
 0x181   : > { %6411 = vmatpush3.bf16.msra.mxu1 %v6760_v50  ;;  %6388 = vmatprep.subr.bf16.mxu0 %v6761_v44  ;;  %v8237_v27 = vpack.c.bf16 %v3942_v22, %v3939_v29  ;;  %v6773_v50 = vld [vmem:[%s8651_s3 + $0x620] sm:$0xff]   ;;  %v3285_v60 = vunpack.c.l.bf16 %v8303_v63 }
 0x182   : > { %6412 = vmatprep.subr.bf16.mxu1 %v6762_v7 }
 0x183   : > { %v4375_v29 = vrot.slane %v3285_v60, 2 }
 0x184   : > { %6389 = vmatpush3.bf16.msra.mxu0 %v6761_v44 }
 0x185   : > { %6413 = vmatpush3.bf16.msra.mxu1 %v6762_v7  ;;  %6390 = vmatprep.subr.bf16.mxu0 %v6763_v57 }
 0x186   : > { %6414 = vmatprep.subr.bf16.mxu1 %v6764_v37 }
 0x188   : > { %6391 = vmatpush3.bf16.msra.mxu0 %v6763_v57 }
 0x189   : > { %6415 = vmatpush3.bf16.msra.mxu1 %v6764_v37  ;;  %6392 = vmatprep.subr.bf16.mxu0 %v6765_v58 }
 0x18a   : > { %6416 = vmatprep.subr.bf16.mxu1 %v6766_v16 }
 0x18c   : > { %6393 = vmatpush3.bf16.msra.mxu0 %v6765_v58 }
 0x18d   : > { %6417 = vmatpush3.bf16.msra.mxu1 %v6766_v16  ;;  %6426 = vmatprep.subr.bf16.mxu0 %v6767_v6 }
 0x18e   : > { %6450 = vmatprep.subr.bf16.mxu1 %v6768_v55 }
 0x18f   : > { %v6108_v4 = vpop.f32.mrf.mxu0  ;;  %6395 = vmatmul.mubr.bf16.vlgmr.msra.gmra.mxu0 %v7996_v35 }
 0x190   : > { %v2186_v9 = vadd.f32 %v6108_v4, %v8136_v26  ;;  %v6132_v10 = vpop.f32.mrf.mxu1  ;;  %6419 = vmatmul.mubr.bf16.vlgmr.msra.gmra.mxu1 %v8120_v62  ;;  %6427 = vmatpush3.bf16.msra.mxu0 %v6767_v6  ;;  %v6780_v6 = vld [vmem:[%s8651_s3 + $0x648] sm:$0xff]   ;;  %v6784_v4 = vld [vmem:[%s8651_s3 + $0x6b0] sm:$0xff]  }
 0x191   : > { %6451 = vmatpush3.bf16.msra.mxu1 %v6768_v55  ;;  %v2153_v45 = vpop.f32.mrf.mxu0  ;;  %6428 = vmatprep.subr.bf16.mxu0 %v6769_v46  ;;  %v6781_v55 = vld [vmem:[%s8651_s3 + $0x600] sm:$0xff]  }
 0x192   : > { %v8230_v26 = vadd.f32 %v6132_v10, %v2186_v9  ;;  %v2184_v36 = vadd.f32 %v2153_v45, %v8146_v23  ;;  %v2327_v54 = vpop.f32.mrf.mxu1  ;;  %6452 = vmatprep.subr.bf16.mxu1 %v6770_v1  ;;  %6398 = vmatprep.mubr.bf16.mxu0 %v8026_v43  ;;  %v8243_v23 = vpack.c.bf16 %v4089_v42, %v4086_v25  ;;  %v4377_v10 = vrot.slane %v3286_v19, 2 }
 0x193   : > { %v6109_v53 = vpop.f32.mrf.mxu0  ;;  %6422 = vmatprep.mubr.bf16.mxu1 %v8143_v47 }
 0x194   : > { %v8240_v59 = vadd.f32 %v2327_v54, %v2184_v36  ;;  %v2187_v24 = vadd.f32 %v6109_v53, %v8156_v32  ;;  %v6133_v31 = vpop.f32.mrf.mxu1  ;;  %6429 = vmatpush3.bf16.msra.mxu0 %v6769_v46  ;;  %v6774_v32 = vld [vmem:[%s8651_s3 + $0x660] sm:$0xff]   ;;  %v3284_v46 = vunpack.c.l.bf16 %v8297_v18  ;;  %v6786_v36 = vld [vmem:[%s8651_s3 + $0x6a8] sm:$0xff]  }
 0x195   : > { %6453 = vmatpush3.bf16.msra.mxu1 %v6770_v1  ;;  %v2156_v8 = vpop.f32.mrf.mxu0  ;;  %6430 = vmatprep.subr.bf16.mxu0 %v6771_v48  ;;  %v3287_v1 = vunpack.c.l.bf16 %v8306_v39 }
 0x196   : > { %v8248_v20 = vadd.f32 %v6133_v31, %v2187_v24  ;;  %v2185_v15 = vadd.f32 %v2156_v8, %v8163_v61  ;;  %v2330_v52 = vpop.f32.mrf.mxu1  ;;  %6454 = vmatprep.subr.bf16.mxu1 %v6772_v30  ;;  %v6775_v61 = vld [vmem:[%s8651_s3 + $0x618] sm:$0xff]   ;;  %v4374_v9 = vrot.slane %v3284_v46, 2  ;;  %v5449_v24 = vcombine.low %v8297_v18, %v8300_v33 }
 0x197   : > { %v6112_v56 = vpop.f32.mrf.mxu0  ;;  %6399 = vmatmul.mubr.bf16.gmra.mxu0 %v8237_v27  ;;  %v4378_v22 = vrot.slane %v3287_v1, 2 }
 0x198   : > { %v8255_v44 = vadd.f32 %v2330_v52, %v2185_v15  ;;  %v2190_v49 = vadd.f32 %v6112_v56, %v8171_v21  ;;  %6431 = vmatpush3.bf16.msra.mxu0 %v6771_v48  ;;  %v6136_v51 = vpop.f32.mrf.mxu1  ;;  %6423 = vmatmul.mubr.bf16.gmra.mxu1 %v8243_v23  ;;  %v6776_v21 = vld [vmem:[%s8651_s3 + $0x658] sm:$0xff]   ;;  %v4376_v54 = vsel %vm483_vm0, %v4374_v9, %v4375_v29 }
 0x199   : > { %6455 = vmatpush3.bf16.msra.mxu1 %v6772_v30  ;;  %v2169_v7 = vpop.f32.mrf.mxu0  ;;  %6432 = vmatprep.subr.bf16.mxu0 %v6773_v50  ;;  %v4379_v30 = vsel %vm483_vm0, %v4377_v10, %v4378_v22 }
 0x19a   : > { %v2188_v57 = vadd.f32 %v2169_v7, %v8179_v38  ;;  %v8263_v37 = vadd.f32 %v6136_v51, %v2190_v49  ;;  %v2343_v58 = vpop.f32.mrf.mxu1  ;;  %6456 = vmatprep.subr.bf16.mxu1 %v6774_v32  ;;  %6442 = vmatprep.mubr.bf16.mxu0 %v7991_v17  ;;  %v4382_v15 = vpack.c.bf16 %v4379_v30, %v4376_v54 }
 0x19b   : > { %v6113_v0 = vpop.f32.mrf.mxu0  ;;  %6466 = vmatprep.mubr.bf16.mxu1 %v7996_v35  ;;  %v6778_v35 = vld [vmem:[%s8651_s3 + $0x650] sm:$0xff]  }
 0x19c   : > { %v2191_v2 = vadd.f32 %v6113_v0, %v8185_v41  ;;  %v8271_v16 = vadd.f32 %v2343_v58, %v2188_v57  ;;  %6433 = vmatpush3.bf16.msra.mxu0 %v6773_v50  ;;  %v6137_v3 = vpop.f32.mrf.mxu1 }
 0x19d   : > { %6457 = vmatpush3.bf16.msra.mxu1 %v6774_v32  ;;  %v2172_v38 = vpop.f32.mrf.mxu0  ;;  %6434 = vmatprep.subr.bf16.mxu0 %v6775_v61 }
 0x19e   : > { %v2189_v12 = vadd.f32 %v2172_v38, %v8190_v5  ;;  %v8277_v13 = vadd.f32 %v6137_v3, %v2191_v2  ;;  %v2346_v17 = vpop.f32.mrf.mxu1  ;;  %6458 = vmatprep.subr.bf16.mxu1 %v6776_v21  ;;  %v6779_v5 = vld [vmem:[%s8651_s3 + $0x608] sm:$0xff]  }
 0x1a0   : > { %v8282_v41 = vadd.f32 %v2346_v17, %v2189_v12  ;;  %6435 = vmatpush3.bf16.msra.mxu0 %v6775_v61  ;;  %v6788_v61 = vld [vmem:[%s8651_s3 + $0x698] sm:$0xff]   ;;  %v4524_v17 = vrot.slane %v3286_v19, 4 }
 0x1a1   : > { %6459 = vmatpush3.bf16.msra.mxu1 %v6776_v21  ;;  %6436 = vmatprep.subr.bf16.mxu0 %v6777_v11 }
 0x1a2   : > { %6460 = vmatprep.subr.bf16.mxu1 %v6778_v35 }
 0x1a4   : > { %6437 = vmatpush3.bf16.msra.mxu0 %v6777_v11 }
 0x1a5   : > { %6461 = vmatpush3.bf16.msra.mxu1 %v6778_v35  ;;  %6438 = vmatprep.subr.bf16.mxu0 %v6779_v5  ;;  %v4522_v35 = vrot.slane %v3285_v60, 4 }
 0x1a6   : > { %6462 = vmatprep.subr.bf16.mxu1 %v6780_v6 }
 0x1a8   : > { %6439 = vmatpush3.bf16.msra.mxu0 %v6779_v5  ;;  %v6791_v5 = vld [vmem:[%s8651_s3 + $0x680] sm:$0xff]  }
 0x1a9   : > { %6463 = vmatpush3.bf16.msra.mxu1 %v6780_v6  ;;  %6440 = vmatprep.subr.bf16.mxu0 %v6781_v55 }
 0x1aa   : > { %6464 = vmatprep.subr.bf16.mxu1 %v6782_v34 }
 0x1ac   : > { %6441 = vmatpush3.bf16.msra.mxu0 %v6781_v55 }
 0x1ad   : > { %6465 = vmatpush3.bf16.msra.mxu1 %v6782_v34  ;;  %6474 = vmatprep.subr.bf16.mxu0 %v6783_v40 }
 0x1ae   : > { %6498 = vmatprep.subr.bf16.mxu1 %v6783_v40 }
 0x1af   : > { %v6156_v45 = vpop.f32.mrf.mxu0  ;;  %6443 = vmatmul.mubr.bf16.vlgmr.msra.gmra.mxu0 %v8018_v28 }
 0x1b0   : > { %v2499_v48 = vadd.f32 %v6156_v45, %v8230_v26  ;;  %v6180_v25 = vpop.f32.mrf.mxu1  ;;  %6467 = vmatmul.mubr.bf16.vlgmr.msra.gmra.mxu1 %v8026_v43  ;;  %6475 = vmatpush3.bf16.msra.mxu0 %v6783_v40 }
 0x1b1   : > { %6506 = vmatpush3.bf16.msra.mxu1 %v6783_v40  ;;  %v2466_v42 = vpop.f32.mrf.mxu0  ;;  %6476 = vmatprep.subr.bf16.mxu0 %v6784_v4 }
 0x1b2   : > { %v8334_v53 = vadd.f32 %v6180_v25, %v2499_v48  ;;  %v2497_v28 = vadd.f32 %v2466_v42, %v8240_v59  ;;  %v2617_v26 = vpop.f32.mrf.mxu1  ;;  %6499 = vmatprep.subr.bf16.mxu1 %v6784_v4  ;;  %6446 = vmatprep.mubr.bf16.mxu0 %v8151_v14  ;;  %v6787_v14 = vld [vmem:[%s8651_s3 + $0x6a0] sm:$0xff]  }
 0x1b3   : > { %v6157_v43 = vpop.f32.mrf.mxu0  ;;  %6470 = vmatprep.mubr.bf16.mxu1 %v8237_v27 }
 0x1b4   : > { %v8341_v31 = vadd.f32 %v2617_v26, %v2497_v28  ;;  %v2500_v8 = vadd.f32 %v6157_v43, %v8248_v20  ;;  %v6181_v50 = vpop.f32.mrf.mxu1  ;;  %6477 = vmatpush3.bf16.msra.mxu0 %v6784_v4 }
 0x1b5   : > { %6507 = vmatpush3.bf16.msra.mxu1 %v6784_v4  ;;  %v2469_v52 = vpop.f32.mrf.mxu0  ;;  %6478 = vmatprep.subr.bf16.mxu0 %v6786_v36 }
 0x1b6   : > { %v8347_v59 = vadd.f32 %v6181_v50, %v2500_v8  ;;  %v2498_v32 = vadd.f32 %v2469_v52, %v8255_v44  ;;  %v2620_v56 = vpop.f32.mrf.mxu1  ;;  %6500 = vmatprep.subr.bf16.mxu1 %v6786_v36 }
 0x1b7   : > { %v6160_v27 = vpop.f32.mrf.mxu0  ;;  %6447 = vmatmul.mubr.bf16.gmra.mxu0 %v5449_v24 }
 0x1b8   : > { %v8350_v49 = vadd.f32 %v2620_v56, %v2498_v32  ;;  %v2503_v20 = vadd.f32 %v6160_v27, %v8263_v37  ;;  %6479 = vmatpush3.bf16.msra.mxu0 %v6786_v36  ;;  %v6184_v51 = vpop.f32.mrf.mxu1  ;;  %6471 = vmatmul.mubr.bf16.gmra.mxu1 %v4382_v15 }
 0x1b9   : > { %6508 = vmatpush3.bf16.msra.mxu1 %v6786_v36  ;;  %v2482_v7 = vpop.f32.mrf.mxu0  ;;  %6480 = vmatprep.subr.bf16.mxu0 %v6787_v14 }
 0x1ba   : > { %v2501_v44 = vadd.f32 %v2482_v7, %v8271_v16  ;;  %v2654_v57 = vadd.f32 %v6184_v51, %v2503_v20  ;;  %v2633_v58 = vpop.f32.mrf.mxu1  ;;  %6501 = vmatprep.subr.bf16.mxu1 %v6787_v14  ;;  %6490 = vmatprep.mubr.bf16.mxu0 %v8120_v62  ;;  %v6789_v16 = vld [vmem:[%s8651_s3 + $0x690] sm:$0xff]  }
 0x1bb   : > { %v6161_v21 = vpop.f32.mrf.mxu0  ;;  %6494 = vmatprep.mubr.bf16.mxu1 %v8243_v23  ;;  %v6790_v23 = vld [vmem:[%s8651_s3 + $0x688] sm:$0xff]  }
 0x1bc   : > { %v2504_v37 = vadd.f32 %v6161_v21, %v8277_v13  ;;  %v2652_v0 = vadd.f32 %v2633_v58, %v2501_v44  ;;  %6481 = vmatpush3.bf16.msra.mxu0 %v6787_v14  ;;  %v6185_v2 = vpop.f32.mrf.mxu1  ;;  %v4521_v13 = vrot.slane %v3284_v46, 4 }
 0x1bd   : > { %6509 = vmatpush3.bf16.msra.mxu1 %v6787_v14  ;;  %v2485_v3 = vpop.f32.mrf.mxu0  ;;  %6482 = vmatprep.subr.bf16.mxu0 %v6788_v61 }
 0x1be   : > { %v2502_v38 = vadd.f32 %v2485_v3, %v8282_v41  ;;  %v2655_v11 = vadd.f32 %v6185_v2, %v2504_v37  ;;  %v2636_v12 = vpop.f32.mrf.mxu1  ;;  %6502 = vmatprep.subr.bf16.mxu1 %v6788_v61  ;;  %v4525_v41 = vrot.slane %v3287_v1, 4  ;;  %v4523_v6 = vsel %vm763_vm1, %v4521_v13, %v4522_v35 }
 0x1c0   : > { %v2653_v62 = vadd.f32 %v2636_v12, %v2502_v38  ;;  %6483 = vmatpush3.bf16.msra.mxu0 %v6788_v61  ;;  %v4526_v55 = vsel %vm763_vm1, %v4524_v17, %v4525_v41 }
 0x1c1   : > { %6510 = vmatpush3.bf16.msra.mxu1 %v6788_v61  ;;  %6484 = vmatprep.subr.bf16.mxu0 %v6789_v16  ;;  %v4529_v34 = vpack.c.bf16 %v4526_v55, %v4523_v6 }
 0x1c2   : > { %6503 = vmatprep.subr.bf16.mxu1 %v6789_v16 }
 0x1c4   : > { %6485 = vmatpush3.bf16.msra.mxu0 %v6789_v16 }
 0x1c5   : > { %6511 = vmatpush3.bf16.msra.mxu1 %v6789_v16  ;;  %6486 = vmatprep.subr.bf16.mxu0 %v6790_v23 }
 0x1c6   : > { %6504 = vmatprep.subr.bf16.mxu1 %v6790_v23 }
 0x1c8   : > { %6487 = vmatpush3.bf16.msra.mxu0 %v6790_v23 }
 0x1c9   : > { %6512 = vmatpush3.bf16.msra.mxu1 %v6790_v23  ;;  %6488 = vmatprep.subr.bf16.mxu0 %v6791_v5 }
 0x1ca   : > { %6505 = vmatprep.subr.bf16.mxu1 %v6791_v5 }
 0x1cc   : > { %6489 = vmatpush3.bf16.msra.mxu0 %v6791_v5 }
 0x1cd   : > { %6513 = vmatpush3.bf16.msra.mxu1 %v6791_v5 }
 0x1cf   : > { %v6204_v18 = vpop.f32.mrf.mxu0  ;;  %6491 = vmatmul.mubr.bf16.vlgmr.msra.gmra.mxu0 %v8143_v47 }
 0x1d0   : > { %v2797_v33 = vadd.f32 %v6204_v18, %v8334_v53  ;;  %v6228_v63 = vpop.f32.mrf.mxu1  ;;  %6495 = vmatmul.mubr.bf16.vlgmr.msra.gmra.mxu1 %v4529_v34 }
 0x1d1   : > { %v2764_v39 = vpop.f32.mrf.mxu0 }
 0x1d2   : > { %v8382_v40 = vadd.f32 %v6228_v63, %v2797_v33  ;;  %v2795_v46 = vadd.f32 %v2764_v39, %v8341_v31  ;;  %v2903_v19 = vpop.f32.mrf.mxu1 }
 0x1d3   : > { %v6205_v60 = vpop.f32.mrf.mxu0 }
 0x1d4   : > { %v8385_v1 = vadd.f32 %v2903_v19, %v2795_v46  ;;  %v2798_v4 = vadd.f32 %v6205_v60, %v8347_v59  ;;  %v6229_v9 = vpop.f32.mrf.mxu1 }
 0x1d5   : > { %v2767_v10 = vpop.f32.mrf.mxu0 }
 0x1d6   : > { %v8388_v29 = vadd.f32 %v6229_v9, %v2798_v4  ;;  %v2796_v47 = vadd.f32 %v2767_v10, %v8350_v49  ;;  %v2906_v22 = vpop.f32.mrf.mxu1 }
 0x1d7   : > { %v6208_v45 = vpop.f32.mrf.mxu0 }
 0x1d8   : > { %v8391_v48 = vadd.f32 %v2906_v22, %v2796_v47  ;;  %v2801_v25 = vadd.f32 %v6208_v45, %v2654_v57  ;;  %v6232_v42 = vpop.f32.mrf.mxu1 }
 0x1d9   : > { %v2780_v36 = vpop.f32.mrf.mxu0 }
 0x1da   : > { %v2799_v54 = vadd.f32 %v2780_v36, %v2652_v0  ;;  %v8393_v30 = vadd.f32 %v6232_v42, %v2801_v25  ;;  %v2919_v53 = vpop.f32.mrf.mxu1 }
 0x1db   : > { %v6209_v28 = vpop.f32.mrf.mxu0 }
 0x1dc   : > { %v2802_v26 = vadd.f32 %v6209_v28, %v2655_v11  ;;  %v8395_v43 = vadd.f32 %v2919_v53, %v2799_v54  ;;  %v6233_v24 = vpop.f32.mrf.mxu1 }
 0x1dd   : > { %v2783_v31 = vpop.f32.mrf.mxu0 }
 0x1de   : > { %v2800_v8 = vadd.f32 %v2783_v31, %v2653_v62  ;;  %v8397_v50 = vadd.f32 %v6233_v24, %v2802_v26  ;;  %v2922_v15 = vpop.f32.mrf.mxu1 }
 0x1e0   : > { %v8399_v52 = vadd.f32 %v2922_v15, %v2800_v8 }
 0x1ef   : > { %v8401_v14 = vpop.f32.mrf.mxu0 }
 0x1f0   : > { %v8407_v56 = vpop.f32.mrf.mxu1 }
 0x1f1   : > { %v8403_v59 = vpop.f32.mrf.mxu0 }
 0x1f2   : > { %v8411_v49 = vpop.f32.mrf.mxu1 }
 0x1f3   : > { %v8405_v32 = vpop.f32.mrf.mxu0 }
 0x1f4   : > { %v8413_v51 = vpop.f32.mrf.mxu1 }
 0x1f5   : > { %v8409_v27 = vpop.f32.mrf.mxu0 }
 0x1f6   : > { %v8415_v61 = vpop.f32.mrf.mxu1 }
 0x1f7   : > { %v6256_v20 = vpop.f32.mrf.mxu0 }
 0x1f8   : > { %v6280_v57 = vpop.f32.mrf.mxu1 }
 0x1f9   : > { %v3070_v7 = vpop.f32.mrf.mxu0 }
 0x1fa   : > { %v8421_v21 = vpop.f32.mrf.mxu1 }
 0x1fb   : > { %v8417_v44 = vpop.f32.mrf.mxu0 }
 0x1fc   : > { %v8425_v0 = vpop.f32.mrf.mxu1 }
 0x1fd   : > { %v8419_v58 = vpop.f32.mrf.mxu0 }
 0x1fe   : > { %v8429_v3 = vpop.f32.mrf.mxu1 }
 0x20f   : > { %v8423_v37 = vpop.f32.mrf.mxu0 }
 0x210   : > { %v8433_v38 = vpop.f32.mrf.mxu1 }
 0x211   : > { %v8427_v2 = vpop.f32.mrf.mxu0 }
 0x212   : > { %v8437_v12 = vpop.f32.mrf.mxu1 }
 0x213   : > { %v8431_v16 = vpop.f32.mrf.mxu0 }
 0x214   : > { %v8439_v23 = vpop.f32.mrf.mxu1 }
 0x215   : > { %v8435_v11 = vpop.f32.mrf.mxu0 }
 0x216   : > { %v8441_v17 = vpop.f32.mrf.mxu1 }
 0x217   : > { %v6304_v62 = vpop.f32.mrf.mxu0 }
 0x218   : > { %v8443_v35 = vpop.f32.mrf.mxu1 }
 0x219   : > { %v3407_v13 = vpop.f32.mrf.mxu0 }
 0x21a   : > { %v8447_v5 = vpop.f32.mrf.mxu1 }
 0x21b   : > { %v8445_v41 = vpop.f32.mrf.mxu0 }
 0x21c   : > { %v8453_v34 = vpop.f32.mrf.mxu1 }
 0x21d   : > { %v8449_v6 = vpop.f32.mrf.mxu0 }
 0x21e   : > { %v8457_v33 = vpop.f32.mrf.mxu1 }
 0x22f   : > { %v8451_v55 = vpop.f32.mrf.mxu0 }
 0x230   : > { %v8459_v63 = vpop.f32.mrf.mxu1 }
 0x231   : > { %v8455_v18 = vpop.f32.mrf.mxu0 }
 0x232   : > { %v8463_v46 = vpop.f32.mrf.mxu1 }
 0x233   : > { %v8461_v39 = vpop.f32.mrf.mxu0 }
 0x234   : > { %v8467_v60 = vpop.f32.mrf.mxu1 }
 0x235   : > { %v8465_v19 = vpop.f32.mrf.mxu0  ;;  %8656 = vst [vmem:[#allocation2_spill] sm:$0xff] %v8467_v60 }
 0x236   : > { %v8469_v9 = vpop.f32.mrf.mxu1 }
 0x237   : > { %v6352_v4 = vpop.f32.mrf.mxu0  ;;  %8657 = vst [vmem:[#allocation3_spill] sm:$0xff] %v8469_v9 }
 0x238   : > { %v8473_v47 = vpop.f32.mrf.mxu1 }
 0x239   : > { %v8471_v10 = vpop.f32.mrf.mxu0 }
 0x23a   : > { %v8477_v45 = vpop.f32.mrf.mxu1 }
 0x23b   : > { %v8475_v22 = vpop.f32.mrf.mxu0 }
 0x23c   : > { %v8481_v42 = vpop.f32.mrf.mxu1 }
 0x23d   : > { %v8479_v25 = vpop.f32.mrf.mxu0  ;;  %8658 = vst [vmem:[#allocation4_spill] sm:$0xff] %v8481_v42 }
 0x23e   : > { %v8485_v54 = vpop.f32.mrf.mxu1 }
 0x23f   : > { %8659 = vst [vmem:[#allocation5_spill] sm:$0xff] %v8485_v54 }
 0x24f   : > { %v8483_v36 = vpop.f32.mrf.mxu0 }
 0x250   : > { %v8489_v28 = vpop.f32.mrf.mxu1 }
 0x251   : > { %v8487_v53 = vpop.f32.mrf.mxu0  ;;  %8661 = vst [vmem:[#allocation7_spill] sm:$0xff] %v8489_v28 }
 0x252   : > { %8660 = vst [vmem:[#allocation6_spill] sm:$0xff] %v8487_v53  ;;  %v8493_v24 = vpop.f32.mrf.mxu1 }
 0x253   : > { %v8491_v26 = vpop.f32.mrf.mxu0  ;;  %8663 = vst [vmem:[#allocation9_spill] sm:$0xff] %v8493_v24 }
 0x254   : > { %8662 = vst [vmem:[#allocation8_spill] sm:$0xff] %v8491_v26  ;;  %v8497_v8 = vpop.f32.mrf.mxu1 }
 0x255   : > { %v8495_v31 = vpop.f32.mrf.mxu0  ;;  %8665 = vst [vmem:[#allocation11_spill] sm:$0xff] %v8497_v8  ;;  %v3087_v8 = vadd.f32 %v8401_v14, %v8382_v40  ;;  %v3092_v40 = vadd.f32 %v8417_v44, %v8397_v50 }
 0x256   : > { %8664 = vst [vmem:[#allocation10_spill] sm:$0xff] %v8495_v31  ;;  %v8501_v9 = vpop.f32.mrf.mxu1 }
 0x257   : > { %v8499_v15 = vpop.f32.mrf.mxu0  ;;  %8666 = vst [vmem:[#allocation12_spill] sm:$0xff] %v8501_v9  ;;  %v3091_v9 = vadd.f32 %v6256_v20, %v8393_v30 }
 0x258   : > { %v8503_v42 = vpop.f32.mrf.mxu1 }
 0x259   : > { %8667 = vst [vmem:[#allocation13_spill] sm:$0xff] %v8503_v42  ;;  %v8505_v60 = vpop.f32.mrf.mxu0  ;;  %v3085_v42 = vadd.f32 %v8403_v59, %v8385_v1  ;;  %v3086_v1 = vadd.f32 %v8409_v27, %v8391_v48 }
 0x25a   : > { %8668 = vst [vmem:[#allocation14_spill] sm:$0xff] %v8505_v60  ;;  %v8507_v54 = vpop.f32.mrf.mxu1 }
 0x25b   : > { %8669 = vst [vmem:[#allocation15_spill] sm:$0xff] %v8507_v54  ;;  %v8509_v53 = vpop.f32.mrf.mxu0  ;;  %v3089_v54 = vadd.f32 %v3070_v7, %v8395_v43  ;;  %v3232_v30 = vadd.f32 %v8411_v49, %v3085_v42  ;;  %v3239_v49 = vadd.f32 %v8425_v0, %v3092_v40  ;;  %v3233_v48 = vadd.f32 %v8415_v61, %v3086_v1 }
 0x25c   : > { %8670 = vst [vmem:[#allocation16_spill] sm:$0xff] %v8509_v53  ;;  %v8511_v28 = vpop.f32.mrf.mxu1 }
 0x25d   : > { %8671 = vst [vmem:[#allocation17_spill] sm:$0xff] %v8511_v28  ;;  %v8513_v26 = vpop.f32.mrf.mxu0  ;;  %v3234_v28 = vadd.f32 %v8407_v56, %v3087_v8  ;;  %v3236_v43 = vadd.f32 %v8421_v21, %v3089_v54  ;;  %v3090_v56 = vadd.f32 %v8419_v58, %v8399_v52  ;;  %v3422_v50 = vadd.f32 %v8427_v2, %v3232_v30  ;;  %v8674_v54 = vld [vmem:[#allocation2_spill] sm:$0xff] }
 0x25e   : > { %8672 = vst [vmem:[#allocation18_spill] sm:$0xff] %v8513_v26  ;;  %v8519_v31 = vpop.f32.mrf.mxu1  ;;  %v3088_v26 = vadd.f32 %v8405_v32, %v8388_v29  ;;  %v3429_v21 = vadd.f32 %v8445_v41, %v3239_v49  ;;  %v3423_v0 = vadd.f32 %v8435_v11, %v3233_v48 }
 0x25f   : > { %v3424_v14 = vadd.f32 %v8423_v37, %v3234_v28  ;;  %v3426_v7 = vadd.f32 %v3407_v13, %v3236_v43  ;;  %v3237_v52 = vadd.f32 %v8429_v3, %v3090_v56  ;;  %v3612_v37 = vadd.f32 %v8437_v12, %v3422_v50  ;;  %v8684_v50 = vld [vmem:[#allocation9_spill] sm:$0xff] }
 0x260   : > { %v3235_v32 = vadd.f32 %v8413_v51, %v3088_v26  ;;  %v3613_v11 = vadd.f32 %v8441_v17, %v3423_v0 }
 0x261   : > { %v3614_v27 = vadd.f32 %v8433_v38, %v3424_v14  ;;  %v3616_v2 = vadd.f32 %v8447_v5, %v3426_v7  ;;  %v8682_v14 = vld [vmem:[#allocation13_spill] sm:$0xff]  ;;  %v8685_v7 = vld [vmem:[#allocation10_spill] sm:$0xff] }
 0x262   : > { %v3425_v44 = vadd.f32 %v8431_v16, %v3235_v32  ;;  %v3427_v16 = vadd.f32 %v8449_v6, %v3237_v52 }
 0x263   : > { %v3788_v61 = vadd.f32 %v8451_v55, %v3614_v27  ;;  %v3790_v12 = vadd.f32 %v8471_v10, %v3616_v2  ;;  %v8683_v56 = vld [vmem:[#allocation16_spill] sm:$0xff]  ;;  %v8689_v2 = vld [vmem:[#allocation11_spill] sm:$0xff] }
 0x264   : > { %v3615_v3 = vadd.f32 %v8439_v23, %v3425_v44  ;;  %v3617_v23 = vadd.f32 %v8457_v33, %v3427_v16  ;;  %v8675_v33 = vld [vmem:[#allocation6_spill] sm:$0xff] }
 0x265   : > { %v3927_v55 = vadd.f32 %v8459_v63, %v3788_v61  ;;  %v3929_v63 = vadd.f32 %v8477_v45, %v3790_v12  ;;  %v8679_v45 = vld [vmem:[#allocation7_spill] sm:$0xff] }
 0x266   : > { %v3789_v5 = vadd.f32 %v8461_v39, %v3615_v3  ;;  %v3791_v39 = vadd.f32 %v8479_v25, %v3617_v23  ;;  %v8680_v25 = vld [vmem:[#allocation8_spill] sm:$0xff]  ;;  %v8690_v3 = vld [vmem:[#allocation17_spill] sm:$0xff] }
 0x267   : > { %v4078_v17 = vadd.f32 %v8483_v36, %v3927_v55  ;;  %v8678_v36 = vld [vmem:[#allocation3_spill] sm:$0xff] }
 0x268   : > { %v3928_v28 = vadd.f32 %v8674_v54, %v3789_v5 }
 0x269   : > { %v4225_v40 = vadd.f32 %v8679_v45, %v4078_v17 }
 0x26a   : > { %v4079_v30 = vadd.f32 %v8680_v25, %v3928_v28 }
 0x26c   : > { %v4226_v16 = vadd.f32 %v8689_v2, %v4079_v30 }
 0x26f   : > { %v8515_v24 = vpop.f32.mrf.mxu0 }
 0x270   : > { %8673 = vst [vmem:[#allocation19_spill] sm:$0xff] %v8515_v24  ;;  %v8524_v60 = vpop.f32.mrf.mxu1  ;;  %v3238_v24 = vadd.f32 %v6280_v57, %v3091_v9  ;;  %v3787_v9 = vadd.f32 %v8465_v19, %v3613_v11  ;;  %v8677_v19 = vld [vmem:[#allocation14_spill] sm:$0xff]  ;;  %v8691_v11 = vld [vmem:[#allocation12_spill] sm:$0xff] }
 0x271   : > { %v8527_v53 = vpop.f32.mrf.mxu0 }
 0x272   : > { %v8538_v59 = vpop.f32.mrf.mxu1  ;;  %v3428_v20 = vadd.f32 %v6304_v62, %v3238_v24  ;;  %v3786_v62 = vadd.f32 %v8455_v18, %v3612_v37  ;;  %v4080_v24 = vadd.f32 %v8677_v19, %v3929_v63  ;;  %v3926_v8 = vadd.f32 %v8678_v36, %v3787_v9  ;;  %v8688_v37 = vld [vmem:[#allocation18_spill] sm:$0xff] }
 0x273   : > { %v8543_v29 = vpop.f32.mrf.mxu0  ;;  %v5522_v9 = vld [vmem:[%s385_s8] ss:$0 sm:$0xff] }
 0x274   : > { %v8551_v57 = vpop.f32.mrf.mxu1  ;;  %v3618_v58 = vadd.f32 %v8443_v35, %v3428_v20  ;;  %v3619_v35 = vadd.f32 %v8453_v34, %v3429_v21  ;;  %v3925_v34 = vadd.f32 %v8463_v46, %v3786_v62  ;;  %v8676_v46 = vld [vmem:[#allocation4_spill] sm:$0xff]  ;;  %v4077_v48 = vadd.f32 %v8685_v7, %v3926_v8 }
 0x275   : > { %v8556_v51 = vpop.f32.mrf.mxu0  ;;  %v4365_v23 = vadd.f32 %v8543_v29, %v4226_v16 }
 0x276   : > { %v3792_v38 = vadd.f32 %v6352_v4, %v3618_v58  ;;  %v8565_v13 = vpop.f32.mrf.mxu1  ;;  %v3793_v4 = vadd.f32 %v8475_v22, %v3619_v35  ;;  %v4076_v26 = vadd.f32 %v8675_v33, %v3925_v34  ;;  %v8687_v58 = vld [vmem:[#allocation15_spill] sm:$0xff]  ;;  %v4224_v55 = vadd.f32 %v8691_v11, %v4077_v48 }
 0x277   : > { %v6448_v41 = vpop.f32.mrf.mxu0  ;;  %v8686_v27 = vld [vmem:[#allocation19_spill] sm:$0xff]  ;;  %v4227_v21 = vadd.f32 %v8687_v58, %v4080_v24  ;;  %v4516_v33 = vadd.f32 %v8551_v57, %v4365_v23 }
 0x278   : > { %v6472_v6 = vpop.f32.mrf.mxu1  ;;  %v3931_v18 = vadd.f32 %v8473_v47, %v3792_v38  ;;  %v3932_v22 = vadd.f32 %v8676_v46, %v3793_v4  ;;  %v4223_v49 = vadd.f32 %v8684_v50, %v4076_v26  ;;  %v4364_v44 = vadd.f32 %v8686_v27, %v4225_v40 }
 0x279   : > { %v4347_v42 = vpop.f32.mrf.mxu0  ;;  %v4363_v63 = vadd.f32 %v8556_v51, %v4224_v55 }
 0x27a   : > { %v4082_v10 = vadd.f32 %v8499_v15, %v3931_v18  ;;  %v4498_v47 = vpop.f32.mrf.mxu1  ;;  %v8681_v15 = vld [vmem:[#allocation5_spill] sm:$0xff]  ;;  %v4083_v20 = vadd.f32 %v8683_v56, %v3932_v22  ;;  %v4362_v38 = vadd.f32 %v8527_v53, %v4223_v49  ;;  %v4366_v35 = vadd.f32 %v4347_v42, %v4227_v21  ;;  %v5523_v42 = vld [vmem:[%s388_s13] ss:$0 sm:$0xff] }
 0x27b   : > { %v3930_v1 = vadd.f32 %v8681_v15, %v3791_v39  ;;  %v6449_v32 = vpop.f32.mrf.mxu0  ;;  %v4515_v5 = vadd.f32 %v8524_v60, %v4364_v44 }
 0x27c   : > { %v4229_v43 = vadd.f32 %v8682_v14, %v4082_v10  ;;  %v6473_v52 = vpop.f32.mrf.mxu1  ;;  %v4230_v62 = vadd.f32 %v8690_v3, %v4083_v20  ;;  %v4513_v17 = vadd.f32 %v8538_v59, %v4362_v38  ;;  %v4517_v10 = vadd.f32 %v4498_v47, %v4366_v35 }
 0x27d   : > { %v4081_v0 = vadd.f32 %v8688_v37, %v3930_v1  ;;  %v4350_v12 = vpop.f32.mrf.mxu0  ;;  %v4514_v47 = vadd.f32 %v8565_v13, %v4363_v63 }
 0x27e   : > { %v4368_v61 = vadd.f32 %v6448_v41, %v4229_v43  ;;  %v4501_v41 = vpop.f32.mrf.mxu1  ;;  %v4369_v4 = vadd.f32 %v6449_v32, %v4230_v62 }
 0x27f   : > { %v4228_v53 = vadd.f32 %v8519_v31, %v4081_v0 }
 0x280   : > { %v4519_v18 = vadd.f32 %v6472_v6, %v4368_v61  ;;  %v4520_v46 = vadd.f32 %v6473_v52, %v4369_v4 }
 0x281   : > { %v4367_v29 = vadd.f32 %v4350_v12, %v4228_v53 }
 0x283   : > { %v4518_v8 = vadd.f32 %v4501_v41, %v4367_v29 }
 0x28f   : > { %v6492_v34 = vpop.f32.mrf.mxu0 }
 0x290   : > { %v4662_v39 = vadd.f32 %v6492_v34, %v4515_v5  ;;  %v6496_v60 = vpop.f32.mrf.mxu1 }
 0x291   : > { %v4666_v54 = vadd.f32 %v6496_v60, %v4519_v18  ;;  %v4629_v28 = vpop.f32.mrf.mxu0 }
 0x292   : > { %v4677_v26 = vmul.f32 %v5522_v9, %v4662_v39  ;;  %v4660_v31 = vadd.f32 %v4629_v28, %v4513_v17  ;;  %v4645_v6 = vpop.f32.mrf.mxu1 }
 0x293   : > { %v4681_v59 = vmul.f32 %v5522_v9, %v4666_v54  ;;  %v4664_v51 = vadd.f32 %v4645_v6, %v4517_v10  ;;  %v6493_v22 = vpop.f32.mrf.mxu0 }
 0x294   : > { %v4692_v19 = vadd.f32 %v5523_v42, %v4677_v26  ;;  %v4675_v24 = vmul.f32 %v5522_v9, %v4660_v31  ;;  %v4663_v36 = vadd.f32 %v6493_v22, %v4516_v33  ;;  %v6497_v57 = vpop.f32.mrf.mxu1 }
 0x295   : > { %v4696_v45 = vadd.f32 %v5523_v42, %v4681_v59  ;;  %v4679_v40 = vmul.f32 %v5522_v9, %v4664_v51  ;;  %v4667_v25 = vadd.f32 %v6497_v57, %v4520_v46  ;;  %v4632_v30 = vpop.f32.mrf.mxu0 }
 0x296   : > { %4700 = vst [vmem:[%s8622_s19 + $0x10] sm:$0xff] %v4692_v19  ;;  %v4690_v15 = vadd.f32 %v5523_v42, %v4675_v24  ;;  %v4678_v1 = vmul.f32 %v5522_v9, %v4663_v36  ;;  %v4661_v14 = vadd.f32 %v4632_v30, %v4514_v47  ;;  %v4648_v43 = vpop.f32.mrf.mxu1 }
 0x297   : > { %4704 = vst [vmem:[%s8622_s19 + $0x30] sm:$0xff] %v4696_v45  ;;  %v4694_v13 = vadd.f32 %v5523_v42, %v4679_v40  ;;  %v4682_v56 = vmul.f32 %v5522_v9, %v4667_v25  ;;  %v4665_v20 = vadd.f32 %v4648_v43, %v4518_v8 }
 0x298   : > { %4698 = vst [vmem:[%s8622_s19] sm:$0xff] %v4690_v15  ;;  %v4693_v32 = vadd.f32 %v5523_v42, %v4678_v1  ;;  %v4676_v50 = vmul.f32 %v5522_v9, %v4661_v14 }
 0x299   : > { %4702 = vst [vmem:[%s8622_s19 + $0x20] sm:$0xff] %v4694_v13  ;;  %v4697_v49 = vadd.f32 %v5523_v42, %v4682_v56  ;;  %v4680_v7 = vmul.f32 %v5522_v9, %v4665_v20 }
 0x29a   : > { %4701 = vst [vmem:[%s8622_s19 + $0x18] sm:$0xff] %v4693_v32  ;;  %v4691_v48 = vadd.f32 %v5523_v42, %v4676_v50 }
 0x29b   : > { %4705 = vst [vmem:[%s8622_s19 + $0x38] sm:$0xff] %v4697_v49  ;;  %v4695_v27 = vadd.f32 %v5523_v42, %v4680_v7 }
 0x29c   : > { %4699 = vst [vmem:[%s8622_s19 + $0x8] sm:$0xff] %v4691_v48 }
 0x29d   : > { %4703 = vst [vmem:[%s8622_s19 + $0x28] sm:$0xff] %v4695_v27 }
 0x29e PF: > { %s16_s25 = sadd.s32 1, %s6830_s25   ;;  %s8692_s21 = smov %s6822_s23 }
 0x29f   : > { %p13_p10 = scmp.ge.s32.totalorder %s16_s25, 10   ;;  %s8693_s22 = smov %s6826_s24 }
 0x2a0   : > { %s8694_s23 = smov %s8697_s26  ;;  %s8695_s24 = smov %s8701_s27 }
 0x2a1   :  { %15 = sbr.rel (!%p13_p10) target bundleno = 3 (0x3), region = 112 }

</bundles_post_ra>
